<compile_context>
chip_gen: v6e
topology: v6e:2x2x1
jax: 0.10.0
libtpu: 0.0.40
codegen_flags: <defaults>
</compile_context>

<pallas_src>
import jax
import jax.numpy as jnp
import numpy as np
from jax import lax
from jax.experimental import pallas as pl
from jax.experimental.pallas import tpu as pltpu

BN_EPS = 1e-5
STABILITY_COEFF = 1.0          # stable=False -> coeff forced to 1 in the module
LANE = 128                     # TPU lane width; channels padded to a multiple


def _round_up(x, m):
    return ((x + m - 1) // m) * m


def _vmem_limit_bytes():
    """Per-generation VMEM budget: <= ~3/4 of physical, capped at 100 MiB."""
    cap = 64 * 1024 * 1024
    try:
        info_fn = getattr(pltpu, "get_tpu_info", None)
        if info_fn is not None:
            cap = int(getattr(info_fn(), "vmem_capacity_bytes", cap))
    except Exception:
        pass
    return int(min(cap * 3 // 4, 100 * 1024 * 1024))


# -----------------------------------------------------------------------------
# Kernel A: 3x3 conv (stride 1) over the flat padded-row layout.
#   - optional fused input BN (scale/shift) + ReLU (used for conv2)
#   - 9 accumulated MXU matmuls over contiguous row-slab taps
#   - compensated per-sample partial BN statistics
#   - output written directly in the same padded flat layout (chains to next conv)
# Grid: (N,) -- one sample per step, "parallel" (megacore splits samples).
# -----------------------------------------------------------------------------
def _make_conv_kernel(*, apply_input_bn, H, W, Wp2, R, HWR):
    OUT_OFF = Wp2 + 1                     # acc row 0 -> padded-flat output row Wp2+1
    HEAD = OUT_OFF
    TAIL = R - (OUT_OFF + HWR)
    inv_cnt = 1.0 / float(H * W)

    def kernel(x_ref, w_ref, scale_ref, shift_ref, mask_ref,
               y_ref, stats_ref, acc_ref, *maybe_xt):
        # x_ref    : (1, R, Cp)   bf16   padded flat activation
        # w_ref    : (9, Cp, Cp)  bf16   HWIO weight taps (kh*3+kw), VMEM-resident
        # scale/shift: (1, Cp)    f32    input BN coeffs (only used if fused)
        # mask_ref : (R, 1)       f32    1.0 at valid data rows/cols, else 0.0
        # y_ref    : (1, R, Cp)          raw conv output in padded flat layout
        # stats_ref: (1, 2, Cp)   f32    [sum, centered sum-of-squares]
        # acc_ref  : (HWR, Cp)    f32    VMEM accumulator
        cp = x_ref.shape[-1]

        if apply_input_bn:
            # Fused bn1 + ReLU + bf16 cast on the incoming raw conv1 output.
            xt_ref = maybe_xt[0]
            xin = x_ref[0].astype(jnp.float32)
            t = jnp.maximum(xin * scale_ref[...] + shift_ref[...], 0.0)
            xt_ref[...] = (t * mask_ref[...]).astype(xt_ref.dtype)  # pads stay 0

            def tap(base):
                return xt_ref[pl.ds(base, HWR), :]
        else:
            def tap(base):
                return x_ref[0, pl.ds(base, HWR), :]

        # 9 taps accumulated in place (no chain of full-size temporaries).
        first = True
        for kh in range(3):
            for kw in range(3):
                contrib = jnp.dot(tap(kh * Wp2 + kw), w_ref[kh * 3 + kw],
                                  preferred_element_type=jnp.float32)
                if first:
                    acc_ref[...] = contrib
                    first = False
                else:
                    acc_ref[...] += contrib

        # Mask the 2 wrap columns per output row (they land on pad positions of
        # the padded output layout, so zeroing them is also the correct store).
        amask = mask_ref[pl.ds(OUT_OFF, HWR), :]       # (HWR, 1)
        acc = acc_ref[...] * amask

        # Compensated per-sample partial statistics (combined globally outside).
        s1 = jnp.sum(acc, axis=0, keepdims=True)       # (1, Cp)
        mloc = s1 * inv_cnt
        d = (acc - mloc) * amask
        stats_ref[0, 0:1, :] = s1
        stats_ref[0, 1:2, :] = jnp.sum(d * d, axis=0, keepdims=True)

        # Store in padded flat layout: interior + zeroed head/tail borders.
        y_ref[0, pl.ds(OUT_OFF, HWR), :] = acc.astype(y_ref.dtype)
        y_ref[0, 0:HEAD, :] = jnp.zeros((HEAD, cp), y_ref.dtype)
        y_ref[0, OUT_OFF + HWR:R, :] = jnp.zeros((TAIL, cp), y_ref.dtype)

    return kernel


def _conv3x3_bn_stats(x_flat, w9, scale_in, shift_in, mask, *,
                      apply_input_bn, out_dtype, H, W, vmem_limit):
    n, R, cp = x_flat.shape
    Wp2 = W + 2
    HWR = H * Wp2
    kernel = _make_conv_kernel(apply_input_bn=apply_input_bn, H=H, W=W,
                               Wp2=Wp2, R=R, HWR=HWR)
    scratch = [pltpu.VMEM((HWR, cp), jnp.float32)]
    if apply_input_bn:
        scratch.append(pltpu.VMEM((R, cp), jnp.bfloat16))
    return pl.pallas_call(
        kernel,
        grid=(n,),
        in_specs=[
            pl.BlockSpec((1, R, cp), lambda i: (i, 0, 0)),
            pl.BlockSpec((9, cp, cp), lambda i: (0, 0, 0)),   # resident weight
            pl.BlockSpec((1, cp), lambda i: (0, 0)),          # resident scale
            pl.BlockSpec((1, cp), lambda i: (0, 0)),          # resident shift
            pl.BlockSpec((R, 1), lambda i: (0, 0)),           # resident mask
        ],
        out_specs=(
            pl.BlockSpec((1, R, cp), lambda i: (i, 0, 0)),
            pl.BlockSpec((1, 2, cp), lambda i: (i, 0, 0)),
        ),
        out_shape=(
            jax.ShapeDtypeStruct((n, R, cp), out_dtype),
            jax.ShapeDtypeStruct((n, 2, cp), jnp.float32),
        ),
        scratch_shapes=tuple(scratch),
        compiler_params=pltpu.CompilerParams(
            dimension_semantics=("parallel",),
            vmem_limit_bytes=vmem_limit),
    )(x_flat, w9, scale_in, shift_in, mask)


# -----------------------------------------------------------------------------
# Kernel B: bn2 finalize + residual subtract + ReLU (mem-bound elementwise pass).
# -----------------------------------------------------------------------------
def _bn_residual_relu_kernel(y_ref, res_ref, scale_ref, shift_ref, out_ref):
    y = y_ref[...] * scale_ref[...] + shift_ref[...]
    res = res_ref[...].astype(jnp.float32)
    out_ref[...] = jnp.maximum(res - STABILITY_COEFF * y, 0.0).astype(out_ref.dtype)


def _pick_row_tile(m, cp, vmem_limit):
    """Budget-driven row tile: largest multiple-of-8 divisor of m within budget."""
    bytes_per_row = cp * (4 + 2 + 4) * 2      # f32 y + bf16 residual + f32 out, x2 buf
    cap = max(vmem_limit // 2 // bytes_per_row, 8)
    cap = min(cap, 4096, m)
    best = 8
    cand = 8
    while cand <= cap:
        if m % cand == 0:
            best = cand
        cand += 8
    return best


def _bn_residual_relu(y2_flat, res_flat, scale, shift, *, vmem_limit):
    m, cp = y2_flat.shape
    tm = _pick_row_tile(m, cp, vmem_limit)
    row = pl.BlockSpec((tm, cp), lambda i: (i, 0))
    vec = pl.BlockSpec((1, cp), lambda i: (0, 0))
    return pl.pallas_call(
        _bn_residual_relu_kernel,
        grid=(m // tm,),
        in_specs=[row, row, vec, vec],
        out_specs=row,
        out_shape=jax.ShapeDtypeStruct((m, cp), jnp.float32),
        compiler_params=pltpu.CompilerParams(
            dimension_semantics=("parallel",),
            vmem_limit_bytes=vmem_limit),
    )(y2_flat, res_flat, scale, shift)


# -----------------------------------------------------------------------------
# Host-side glue
# -----------------------------------------------------------------------------
def _prep_weight(w_oihw, cp):
    cout, cin = w_oihw.shape[0], w_oihw.shape[1]
    w = jnp.transpose(w_oihw, (2, 3, 1, 0))                       # (3,3,Cin,Cout)
    w = jnp.pad(w, ((0, 0), (0, 0), (0, cp - cin), (0, cp - cout)))
    return w.reshape(9, cp, cp).astype(jnp.bfloat16)


def _bn_scale_shift(stats, cnt_per_sample, total, gamma, beta, cp):
    """Combine compensated per-sample partials into global BN scale/shift."""
    c = gamma.shape[0]
    s1 = stats[:, 0, :]                                           # (N, Cp) sums
    s2 = stats[:, 1, :]                                           # centered sumsq
    m_i = s1 / cnt_per_sample
    mean = jnp.sum(s1, axis=0) / total
    var = (jnp.sum(s2, axis=0)
           + cnt_per_sample * jnp.sum((m_i - mean) ** 2, axis=0)) / total
    var = jnp.maximum(var, 0.0)
    g = jnp.pad(gamma.astype(jnp.float32), (0, cp - c))
    b = jnp.pad(beta.astype(jnp.float32), (0, cp - c))
    scale = g * lax.rsqrt(var + BN_EPS)
    shift = b - mean * scale
    return scale.reshape(1, cp), shift.reshape(1, cp)


@jax.jit
def basic_block_forward(x_nchw, w1, w2, gamma1, beta1, gamma2, beta2):
    n, c, h, w = x_nchw.shape
    assert c == w1.shape[0], "this instantiation has in_channels == out_channels"
    cp = _round_up(c, LANE)
    hp2, wp2 = h + 2, w + 2
    # flat padded-row layout: (H+2)*(W+2) rows (+2 for tap overrun), rounded to 128
    r = _round_up(hp2 * wp2 + 2, LANE)
    vmem_limit = _vmem_limit_bytes()

    # x: NCHW -> NHWC, channel-pad to Cp, 1-px spatial pad, flatten, bf16.
    x_nhwc = jnp.transpose(x_nchw, (0, 2, 3, 1)).astype(jnp.float32)
    xpad = jnp.pad(x_nhwc, ((0, 0), (1, 1), (1, 1), (0, cp - c)))
    x_flat = jnp.pad(xpad.reshape(n, hp2 * wp2, cp),
                     ((0, 0), (0, r - hp2 * wp2), (0, 0))).astype(jnp.bfloat16)

    # Static 0/1 validity mask over the padded-flat row index (tiny, resident).
    m2 = np.zeros((hp2, wp2), np.float32)
    m2[1:h + 1, 1:w + 1] = 1.0
    mask_np = np.zeros((r, 1), np.float32)
    mask_np[:hp2 * wp2, 0] = m2.reshape(-1)
    mask = jnp.asarray(mask_np)

    w1p = _prep_weight(w1, cp)
    w2p = _prep_weight(w2, cp)
    ones = jnp.ones((1, cp), jnp.float32)
    zeros = jnp.zeros((1, cp), jnp.float32)

    total = n * h * w
    cnt = h * w

    # conv1 + partial BN stats (raw output kept as bf16, stats from f32 acc).
    y1_raw, st1 = _conv3x3_bn_stats(
        x_flat, w1p, ones, zeros, mask,
        apply_input_bn=False, out_dtype=jnp.bfloat16, H=h, W=w,
        vmem_limit=vmem_limit)
    scale1, shift1 = _bn_scale_shift(st1, cnt, total, gamma1, beta1, cp)

    # conv2 with bn1 + ReLU fused into its input stage, + partial stats.
    y2_raw, st2 = _conv3x3_bn_stats(
        y1_raw, w2p, scale1, shift1, mask,
        apply_input_bn=True, out_dtype=jnp.float32, H=h, W=w,
        vmem_limit=vmem_limit)
    scale2, shift2 = _bn_scale_shift(st2, cnt, total, gamma2, beta2, cp)

    # bn2 + residual subtract + ReLU (residual streamed from the bf16 x_flat).
    out_flat = _bn_residual_relu(y2_raw.reshape(n * r, cp),
                                 x_flat.reshape(n * r, cp),
                                 scale2, shift2, vmem_limit=vmem_limit)

    out = out_flat.reshape(n, r, cp)[:, :hp2 * wp2, :]
    out = out.reshape(n, hp2, wp2, cp)[:, 1:h + 1, 1:w + 1, :c]
    return jnp.transpose(out, (0, 3, 1, 2))                       # back to NCHW


# -----------------------------------------------------------------------------
# References
# -----------------------------------------------------------------------------
def _reference_f32(x, w1, w2, g1, b1, g2, b2):
    """Pure-f32 PyTorch-semantics reference."""
    def conv(t, wgt):
        return lax.conv_general_dilated(
            t, wgt, (1, 1), ((1, 1), (1, 1)),
            dimension_numbers=("NCHW", "OIHW", "NCHW"))

    def bn(t, g, b):
        mean = jnp.mean(t, axis=(0, 2, 3), keepdims=True)
        var = jnp.mean((t - mean) ** 2, axis=(0, 2, 3), keepdims=True)
        return (t - mean) * lax.rsqrt(var + BN_EPS) * g.reshape(1, -1, 1, 1) \
            + b.reshape(1, -1, 1, 1)

    out = jnp.maximum(bn(conv(x, w1), g1, b1), 0.0)
    out = bn(conv(out, w2), g2, b2)
    return jnp.maximum(x - STABILITY_COEFF * out, 0.0)


def _reference_matched(x, w1, w2, g1, b1, g2, b2):
    """Same numerics as the kernels: bf16 MXU operands, f32 accumulation/stats,
    bf16 storage of the raw conv1 output, bf16 conv2 input, bf16 residual."""
    def conv(t_bf16, wgt):
        return lax.conv_general_dilated(
            t_bf16, wgt.astype(jnp.bfloat16), (1, 1), ((1, 1), (1, 1)),
            dimension_numbers=("NCHW", "OIHW", "NCHW"),
            preferred_element_type=jnp.float32)

    def bn_coeffs(t, g, b):
        mean = jnp.mean(t, axis=(0, 2, 3))
        var = jnp.mean((t - mean.reshape(1, -1, 1, 1)) ** 2, axis=(0, 2, 3))
        scale = g * lax.rsqrt(var + BN_EPS)
        shift = b - mean * scale
        return scale.reshape(1, -1, 1, 1), shift.reshape(1, -1, 1, 1)

    xb = x.astype(jnp.bfloat16)
    y1 = conv(xb, w1)
    s1, sh1 = bn_coeffs(y1, g1, b1)
    y1b = y1.astype(jnp.bfloat16).astype(jnp.float32)     # raw y1 stored as bf16
    hact = jnp.maximum(y1b * s1 + sh1, 0.0).astype(jnp.bfloat16)
    y2 = conv(hact, w2)
    s2, sh2 = bn_coeffs(y2, g2, b2)
    res = xb.astype(jnp.float32)                          # residual read as bf16
    return jnp.maximum(res - STABILITY_COEFF * (y2 * s2 + sh2), 0.0)


if __name__ == "__main__":
    # Small deterministic example consistent with the module.
    N, C, H, W = 2, 8, 16, 16            # in_channels == out_channels == 8
    key = jax.random.PRNGKey(0)
    k_x, k_w1, k_w2 = jax.random.split(key, 3)

    x = jax.random.normal(k_x, (N, C, H, W), dtype=jnp.float32)

    # conv2d_weight_parameter: kaiming_normal_(mode='fan_out', relu)
    fan_out = C * 3 * 3
    std = float(np.sqrt(2.0 / fan_out))
    w1 = std * jax.random.normal(k_w1, (C, C, 3, 3), dtype=jnp.float32)
    w2 = std * jax.random.normal(k_w2, (C, C, 3, 3), dtype=jnp.float32)

    # BatchNorm2d default affine params.
    gamma1 = jnp.ones((C,), jnp.float32)
    beta1 = jnp.zeros((C,), jnp.float32)
    gamma2 = jnp.ones((C,), jnp.float32)
    beta2 = jnp.zeros((C,), jnp.float32)

    out = jax.block_until_ready(
        basic_block_forward(x, w1, w2, gamma1, beta1, gamma2, beta2))

    # 1) Check against a reference with matched numerics.
    ref_matched = _reference_matched(x, w1, w2, gamma1, beta1, gamma2, beta2)
    np.testing.assert_allclose(np.asarray(out), np.asarray(ref_matched),
                               rtol=1e-2, atol=1e-2)

    # 2) Fidelity check vs. the full-f32 PyTorch-semantics reference (loose
    #    tolerance accounts for bf16 rounding of the MXU operands).
    ref_f32 = _reference_f32(x, w1, w2, gamma1, beta1, gamma2, beta2)
    np.testing.assert_allclose(np.asarray(out), np.asarray(ref_f32),
                               rtol=5e-2, atol=5e-2)

    print("KERNEL_OK")
</pallas_src>

<mosaic_0001>
module attributes {stable_mosaic.version = 11 : i64} {
  func.func @kernel(%arg0: i32, %arg1: memref<1x384x128xbf16, #tpu.memory_space<vmem>>, %arg2: memref<9x128x128xbf16, #tpu.memory_space<vmem>>, %arg3: memref<1x128xf32, #tpu.memory_space<vmem>>, %arg4: memref<1x128xf32, #tpu.memory_space<vmem>>, %arg5: memref<384x1xf32, #tpu.memory_space<vmem>>, %arg6: memref<1x384x128xbf16, #tpu.memory_space<vmem>>, %arg7: memref<1x2x128xf32, #tpu.memory_space<vmem>>, %arg8: memref<288x128xf32, #tpu.memory_space<vmem>>) attributes {dimension_semantics = [#tpu.dimension_semantics<parallel>], iteration_bounds = array<i64: 2>, scalar_prefetch = 0 : i64, scratch_operands = 1 : i64, tpu.core_type = #tpu.core_type<tc>, window_params = [{transform_indices = @transform_0, window_bounds = array<i64: 1, 384, 128>}, {pipeline_mode = #tpu.pipeline_mode<synchronous>, transform_indices = @transform_1, window_bounds = array<i64: 9, 128, 128>}, {pipeline_mode = #tpu.pipeline_mode<synchronous>, transform_indices = @transform_2, window_bounds = array<i64: 1, 128>}, {pipeline_mode = #tpu.pipeline_mode<synchronous>, transform_indices = @transform_3, window_bounds = array<i64: 1, 128>}, {pipeline_mode = #tpu.pipeline_mode<synchronous>, transform_indices = @transform_4, window_bounds = array<i64: 384, 1>}, {transform_indices = @transform_5, window_bounds = array<i64: 1, 384, 128>}, {transform_indices = @transform_6, window_bounds = array<i64: 1, 2, 128>}]} {
    %c0 = arith.constant 0 : index
    %c0_0 = arith.constant 0 : index
    %c0_1 = arith.constant 0 : index
    %0 = vector.load %arg1[%c0, %c0_0, %c0_1] : memref<1x384x128xbf16, #tpu.memory_space<vmem>>, vector<1x288x128xbf16>
    %1 = vector.shape_cast %0 : vector<1x288x128xbf16> to vector<288x128xbf16>
    %c0_2 = arith.constant 0 : index
    %c0_3 = arith.constant 0 : index
    %c0_4 = arith.constant 0 : index
    %2 = vector.load %arg2[%c0_2, %c0_3, %c0_4] : memref<9x128x128xbf16, #tpu.memory_space<vmem>>, vector<1x128x128xbf16>
    %3 = vector.shape_cast %2 : vector<1x128x128xbf16> to vector<128x128xbf16>
    %cst = arith.constant dense<0.000000e+00> : vector<288x128xf32>
    %4 = tpu.matmul %1, %3, %cst {dimension_numbers = #tpu.dot_dimension_numbers<[1], [0], [0], [1], [0, 0, 1, 1], [], []>} : vector<288x128xbf16>, vector<128x128xbf16>, vector<288x128xf32> -> vector<288x128xf32>
    %c0_5 = arith.constant 0 : index
    %c0_6 = arith.constant 0 : index
    %5 = vector.load %arg8[%c0_5, %c0_6] : memref<288x128xf32, #tpu.memory_space<vmem>>, vector<288x128xf32>
    tpu.vector_store %arg8[%c0_5, %c0_6], %4 {strides = array<i32>} : memref<288x128xf32, #tpu.memory_space<vmem>>, vector<288x128xf32>,
    %c0_7 = arith.constant 0 : index
    %c1 = arith.constant 1 : index
    %c0_8 = arith.constant 0 : index
    %6 = vector.load %arg1[%c0_7, %c1, %c0_8] : memref<1x384x128xbf16, #tpu.memory_space<vmem>>, vector<1x288x128xbf16>
    %7 = vector.shape_cast %6 : vector<1x288x128xbf16> to vector<288x128xbf16>
    %c1_9 = arith.constant 1 : index
    %c0_10 = arith.constant 0 : index
    %c0_11 = arith.constant 0 : index
    %8 = vector.load %arg2[%c1_9, %c0_10, %c0_11] : memref<9x128x128xbf16, #tpu.memory_space<vmem>>, vector<1x128x128xbf16>
    %9 = vector.shape_cast %8 : vector<1x128x128xbf16> to vector<128x128xbf16>
    %cst_12 = arith.constant dense<0.000000e+00> : vector<288x128xf32>
    %10 = tpu.matmul %7, %9, %cst_12 {dimension_numbers = #tpu.dot_dimension_numbers<[1], [0], [0], [1], [0, 0, 1, 1], [], []>} : vector<288x128xbf16>, vector<128x128xbf16>, vector<288x128xf32> -> vector<288x128xf32>
    %c0_13 = arith.constant 0 : index
    %c0_14 = arith.constant 0 : index
    %11 = vector.load %arg8[%c0_13, %c0_14] : memref<288x128xf32, #tpu.memory_space<vmem>>, vector<288x128xf32>
    %12 = arith.addf %11, %10 : vector<288x128xf32>
    %c0_15 = arith.constant 0 : index
    %c0_16 = arith.constant 0 : index
    %13 = vector.load %arg8[%c0_15, %c0_16] : memref<288x128xf32, #tpu.memory_space<vmem>>, vector<288x128xf32>
    tpu.vector_store %arg8[%c0_15, %c0_16], %12 {strides = array<i32>} : memref<288x128xf32, #tpu.memory_space<vmem>>, vector<288x128xf32>,
    %c0_17 = arith.constant 0 : index
    %c2 = arith.constant 2 : index
    %c0_18 = arith.constant 0 : index
    %14 = vector.load %arg1[%c0_17, %c2, %c0_18] : memref<1x384x128xbf16, #tpu.memory_space<vmem>>, vector<1x288x128xbf16>
    %15 = vector.shape_cast %14 : vector<1x288x128xbf16> to vector<288x128xbf16>
    %c2_19 = arith.constant 2 : index
    %c0_20 = arith.constant 0 : index
    %c0_21 = arith.constant 0 : index
    %16 = vector.load %arg2[%c2_19, %c0_20, %c0_21] : memref<9x128x128xbf16, #tpu.memory_space<vmem>>, vector<1x128x128xbf16>
    %17 = vector.shape_cast %16 : vector<1x128x128xbf16> to vector<128x128xbf16>
    %cst_22 = arith.constant dense<0.000000e+00> : vector<288x128xf32>
    %18 = tpu.matmul %15, %17, %cst_22 {dimension_numbers = #tpu.dot_dimension_numbers<[1], [0], [0], [1], [0, 0, 1, 1], [], []>} : vector<288x128xbf16>, vector<128x128xbf16>, vector<288x128xf32> -> vector<288x128xf32>
    %c0_23 = arith.constant 0 : index
    %c0_24 = arith.constant 0 : index
    %19 = vector.load %arg8[%c0_23, %c0_24] : memref<288x128xf32, #tpu.memory_space<vmem>>, vector<288x128xf32>
    %20 = arith.addf %19, %18 : vector<288x128xf32>
    %c0_25 = arith.constant 0 : index
    %c0_26 = arith.constant 0 : index
    %21 = vector.load %arg8[%c0_25, %c0_26] : memref<288x128xf32, #tpu.memory_space<vmem>>, vector<288x128xf32>
    tpu.vector_store %arg8[%c0_25, %c0_26], %20 {strides = array<i32>} : memref<288x128xf32, #tpu.memory_space<vmem>>, vector<288x128xf32>,
    %c0_27 = arith.constant 0 : index
    %c18 = arith.constant 18 : index
    %c0_28 = arith.constant 0 : index
    %22 = vector.load %arg1[%c0_27, %c18, %c0_28] : memref<1x384x128xbf16, #tpu.memory_space<vmem>>, vector<1x288x128xbf16>
    %23 = vector.shape_cast %22 : vector<1x288x128xbf16> to vector<288x128xbf16>
    %c3 = arith.constant 3 : index
    %c0_29 = arith.constant 0 : index
    %c0_30 = arith.constant 0 : index
    %24 = vector.load %arg2[%c3, %c0_29, %c0_30] : memref<9x128x128xbf16, #tpu.memory_space<vmem>>, vector<1x128x128xbf16>
    %25 = vector.shape_cast %24 : vector<1x128x128xbf16> to vector<128x128xbf16>
    %cst_31 = arith.constant dense<0.000000e+00> : vector<288x128xf32>
    %26 = tpu.matmul %23, %25, %cst_31 {dimension_numbers = #tpu.dot_dimension_numbers<[1], [0], [0], [1], [0, 0, 1, 1], [], []>} : vector<288x128xbf16>, vector<128x128xbf16>, vector<288x128xf32> -> vector<288x128xf32>
    %c0_32 = arith.constant 0 : index
    %c0_33 = arith.constant 0 : index
    %27 = vector.load %arg8[%c0_32, %c0_33] : memref<288x128xf32, #tpu.memory_space<vmem>>, vector<288x128xf32>
    %28 = arith.addf %27, %26 : vector<288x128xf32>
    %c0_34 = arith.constant 0 : index
    %c0_35 = arith.constant 0 : index
    %29 = vector.load %arg8[%c0_34, %c0_35] : memref<288x128xf32, #tpu.memory_space<vmem>>, vector<288x128xf32>
    tpu.vector_store %arg8[%c0_34, %c0_35], %28 {strides = array<i32>} : memref<288x128xf32, #tpu.memory_space<vmem>>, vector<288x128xf32>,
    %c0_36 = arith.constant 0 : index
    %c19 = arith.constant 19 : index
    %c0_37 = arith.constant 0 : index
    %30 = vector.load %arg1[%c0_36, %c19, %c0_37] : memref<1x384x128xbf16, #tpu.memory_space<vmem>>, vector<1x288x128xbf16>
    %31 = vector.shape_cast %30 : vector<1x288x128xbf16> to vector<288x128xbf16>
    %c4 = arith.constant 4 : index
    %c0_38 = arith.constant 0 : index
    %c0_39 = arith.constant 0 : index
    %32 = vector.load %arg2[%c4, %c0_38, %c0_39] : memref<9x128x128xbf16, #tpu.memory_space<vmem>>, vector<1x128x128xbf16>
    %33 = vector.shape_cast %32 : vector<1x128x128xbf16> to vector<128x128xbf16>
    %cst_40 = arith.constant dense<0.000000e+00> : vector<288x128xf32>
    %34 = tpu.matmul %31, %33, %cst_40 {dimension_numbers = #tpu.dot_dimension_numbers<[1], [0], [0], [1], [0, 0, 1, 1], [], []>} : vector<288x128xbf16>, vector<128x128xbf16>, vector<288x128xf32> -> vector<288x128xf32>
    %c0_41 = arith.constant 0 : index
    %c0_42 = arith.constant 0 : index
    %35 = vector.load %arg8[%c0_41, %c0_42] : memref<288x128xf32, #tpu.memory_space<vmem>>, vector<288x128xf32>
    %36 = arith.addf %35, %34 : vector<288x128xf32>
    %c0_43 = arith.constant 0 : index
    %c0_44 = arith.constant 0 : index
    %37 = vector.load %arg8[%c0_43, %c0_44] : memref<288x128xf32, #tpu.memory_space<vmem>>, vector<288x128xf32>
    tpu.vector_store %arg8[%c0_43, %c0_44], %36 {strides = array<i32>} : memref<288x128xf32, #tpu.memory_space<vmem>>, vector<288x128xf32>,
    %c0_45 = arith.constant 0 : index
    %c20 = arith.constant 20 : index
    %c0_46 = arith.constant 0 : index
    %38 = vector.load %arg1[%c0_45, %c20, %c0_46] : memref<1x384x128xbf16, #tpu.memory_space<vmem>>, vector<1x288x128xbf16>
    %39 = vector.shape_cast %38 : vector<1x288x128xbf16> to vector<288x128xbf16>
    %c5 = arith.constant 5 : index
    %c0_47 = arith.constant 0 : index
    %c0_48 = arith.constant 0 : index
    %40 = vector.load %arg2[%c5, %c0_47, %c0_48] : memref<9x128x128xbf16, #tpu.memory_space<vmem>>, vector<1x128x128xbf16>
    %41 = vector.shape_cast %40 : vector<1x128x128xbf16> to vector<128x128xbf16>
    %cst_49 = arith.constant dense<0.000000e+00> : vector<288x128xf32>
    %42 = tpu.matmul %39, %41, %cst_49 {dimension_numbers = #tpu.dot_dimension_numbers<[1], [0], [0], [1], [0, 0, 1, 1], [], []>} : vector<288x128xbf16>, vector<128x128xbf16>, vector<288x128xf32> -> vector<288x128xf32>
    %c0_50 = arith.constant 0 : index
    %c0_51 = arith.constant 0 : index
    %43 = vector.load %arg8[%c0_50, %c0_51] : memref<288x128xf32, #tpu.memory_space<vmem>>, vector<288x128xf32>
    %44 = arith.addf %43, %42 : vector<288x128xf32>
    %c0_52 = arith.constant 0 : index
    %c0_53 = arith.constant 0 : index
    %45 = vector.load %arg8[%c0_52, %c0_53] : memref<288x128xf32, #tpu.memory_space<vmem>>, vector<288x128xf32>
    tpu.vector_store %arg8[%c0_52, %c0_53], %44 {strides = array<i32>} : memref<288x128xf32, #tpu.memory_space<vmem>>, vector<288x128xf32>,
    %c0_54 = arith.constant 0 : index
    %c36 = arith.constant 36 : index
    %c0_55 = arith.constant 0 : index
    %46 = vector.load %arg1[%c0_54, %c36, %c0_55] : memref<1x384x128xbf16, #tpu.memory_space<vmem>>, vector<1x288x128xbf16>
    %47 = vector.shape_cast %46 : vector<1x288x128xbf16> to vector<288x128xbf16>
    %c6 = arith.constant 6 : index
    %c0_56 = arith.constant 0 : index
    %c0_57 = arith.constant 0 : index
    %48 = vector.load %arg2[%c6, %c0_56, %c0_57] : memref<9x128x128xbf16, #tpu.memory_space<vmem>>, vector<1x128x128xbf16>
    %49 = vector.shape_cast %48 : vector<1x128x128xbf16> to vector<128x128xbf16>
    %cst_58 = arith.constant dense<0.000000e+00> : vector<288x128xf32>
    %50 = tpu.matmul %47, %49, %cst_58 {dimension_numbers = #tpu.dot_dimension_numbers<[1], [0], [0], [1], [0, 0, 1, 1], [], []>} : vector<288x128xbf16>, vector<128x128xbf16>, vector<288x128xf32> -> vector<288x128xf32>
    %c0_59 = arith.constant 0 : index
    %c0_60 = arith.constant 0 : index
    %51 = vector.load %arg8[%c0_59, %c0_60] : memref<288x128xf32, #tpu.memory_space<vmem>>, vector<288x128xf32>
    %52 = arith.addf %51, %50 : vector<288x128xf32>
    %c0_61 = arith.constant 0 : index
    %c0_62 = arith.constant 0 : index
    %53 = vector.load %arg8[%c0_61, %c0_62] : memref<288x128xf32, #tpu.memory_space<vmem>>, vector<288x128xf32>
    tpu.vector_store %arg8[%c0_61, %c0_62], %52 {strides = array<i32>} : memref<288x128xf32, #tpu.memory_space<vmem>>, vector<288x128xf32>,
    %c0_63 = arith.constant 0 : index
    %c37 = arith.constant 37 : index
    %c0_64 = arith.constant 0 : index
    %54 = vector.load %arg1[%c0_63, %c37, %c0_64] : memref<1x384x128xbf16, #tpu.memory_space<vmem>>, vector<1x288x128xbf16>
    %55 = vector.shape_cast %54 : vector<1x288x128xbf16> to vector<288x128xbf16>
    %c7 = arith.constant 7 : index
    %c0_65 = arith.constant 0 : index
    %c0_66 = arith.constant 0 : index
    %56 = vector.load %arg2[%c7, %c0_65, %c0_66] : memref<9x128x128xbf16, #tpu.memory_space<vmem>>, vector<1x128x128xbf16>
    %57 = vector.shape_cast %56 : vector<1x128x128xbf16> to vector<128x128xbf16>
    %cst_67 = arith.constant dense<0.000000e+00> : vector<288x128xf32>
    %58 = tpu.matmul %55, %57, %cst_67 {dimension_numbers = #tpu.dot_dimension_numbers<[1], [0], [0], [1], [0, 0, 1, 1], [], []>} : vector<288x128xbf16>, vector<128x128xbf16>, vector<288x128xf32> -> vector<288x128xf32>
    %c0_68 = arith.constant 0 : index
    %c0_69 = arith.constant 0 : index
    %59 = vector.load %arg8[%c0_68, %c0_69] : memref<288x128xf32, #tpu.memory_space<vmem>>, vector<288x128xf32>
    %60 = arith.addf %59, %58 : vector<288x128xf32>
    %c0_70 = arith.constant 0 : index
    %c0_71 = arith.constant 0 : index
    %61 = vector.load %arg8[%c0_70, %c0_71] : memref<288x128xf32, #tpu.memory_space<vmem>>, vector<288x128xf32>
    tpu.vector_store %arg8[%c0_70, %c0_71], %60 {strides = array<i32>} : memref<288x128xf32, #tpu.memory_space<vmem>>, vector<288x128xf32>,
    %c0_72 = arith.constant 0 : index
    %c38 = arith.constant 38 : index
    %c0_73 = arith.constant 0 : index
    %62 = vector.load %arg1[%c0_72, %c38, %c0_73] : memref<1x384x128xbf16, #tpu.memory_space<vmem>>, vector<1x288x128xbf16>
    %63 = vector.shape_cast %62 : vector<1x288x128xbf16> to vector<288x128xbf16>
    %c8 = arith.constant 8 : index
    %c0_74 = arith.constant 0 : index
    %c0_75 = arith.constant 0 : index
    %64 = vector.load %arg2[%c8, %c0_74, %c0_75] : memref<9x128x128xbf16, #tpu.memory_space<vmem>>, vector<1x128x128xbf16>
    %65 = vector.shape_cast %64 : vector<1x128x128xbf16> to vector<128x128xbf16>
    %cst_76 = arith.constant dense<0.000000e+00> : vector<288x128xf32>
    %66 = tpu.matmul %63, %65, %cst_76 {dimension_numbers = #tpu.dot_dimension_numbers<[1], [0], [0], [1], [0, 0, 1, 1], [], []>} : vector<288x128xbf16>, vector<128x128xbf16>, vector<288x128xf32> -> vector<288x128xf32>
    %c0_77 = arith.constant 0 : index
    %c0_78 = arith.constant 0 : index
    %67 = vector.load %arg8[%c0_77, %c0_78] : memref<288x128xf32, #tpu.memory_space<vmem>>, vector<288x128xf32>
    %68 = arith.addf %67, %66 : vector<288x128xf32>
    %c0_79 = arith.constant 0 : index
    %c0_80 = arith.constant 0 : index
    %69 = vector.load %arg8[%c0_79, %c0_80] : memref<288x128xf32, #tpu.memory_space<vmem>>, vector<288x128xf32>
    tpu.vector_store %arg8[%c0_79, %c0_80], %68 {strides = array<i32>} : memref<288x128xf32, #tpu.memory_space<vmem>>, vector<288x128xf32>,
    %c19_81 = arith.constant 19 : index
    %c0_82 = arith.constant 0 : index
    %70 = vector.load %arg5[%c19_81, %c0_82] : memref<384x1xf32, #tpu.memory_space<vmem>>, vector<288x1xf32>
    %c0_83 = arith.constant 0 : index
    %c0_84 = arith.constant 0 : index
    %71 = vector.load %arg8[%c0_83, %c0_84] : memref<288x128xf32, #tpu.memory_space<vmem>>, vector<288x128xf32>
    %72 = vector.broadcast %70 : vector<288x1xf32> to vector<288x128xf32>
    %73 = arith.mulf %71, %72 : vector<288x128xf32>
    %cst_85 = arith.constant dense<0.000000e+00> : vector<128xf32>
    %74 = vector.multi_reduction <add>, %73, %cst_85 [0] : vector<288x128xf32> to vector<128xf32>
    %75 = vector.shape_cast %74 : vector<128xf32> to vector<1x128xf32>
    %cst_86 = arith.constant 3.906250e-03 : f32
    %76 = vector.broadcast %cst_86 : f32 to vector<1x128xf32>
    %77 = arith.mulf %75, %76 : vector<1x128xf32>
    %78 = vector.broadcast %77 : vector<1x128xf32> to vector<288x128xf32>
    %79 = arith.subf %73, %78 : vector<288x128xf32>
    %80 = vector.broadcast %70 : vector<288x1xf32> to vector<288x128xf32>
    %81 = arith.mulf %79, %80 : vector<288x128xf32>
    %c0_87 = arith.constant 0 : index
    %c0_88 = arith.constant 0 : index
    %c0_89 = arith.constant 0 : index
    %82 = vector.load %arg7[%c0_87, %c0_88, %c0_89] : memref<1x2x128xf32, #tpu.memory_space<vmem>>, vector<1x1x128xf32>
    %83 = vector.shape_cast %82 : vector<1x1x128xf32> to vector<1x128xf32>
    %84 = vector.shape_cast %75 : vector<1x128xf32> to vector<1x1x128xf32>
    tpu.vector_store %arg7[%c0_87, %c0_88, %c0_89], %84 {strides = array<i32>} : memref<1x2x128xf32, #tpu.memory_space<vmem>>, vector<1x1x128xf32>,
    %85 = arith.mulf %81, %81 : vector<288x128xf32>
    %cst_90 = arith.constant dense<0.000000e+00> : vector<128xf32>
    %86 = vector.multi_reduction <add>, %85, %cst_90 [0] : vector<288x128xf32> to vector<128xf32>
    %87 = vector.shape_cast %86 : vector<128xf32> to vector<1x128xf32>
    %c0_91 = arith.constant 0 : index
    %c1_92 = arith.constant 1 : index
    %c0_93 = arith.constant 0 : index
    %88 = vector.load %arg7[%c0_91, %c1_92, %c0_93] : memref<1x2x128xf32, #tpu.memory_space<vmem>>, vector<1x1x128xf32>
    %89 = vector.shape_cast %88 : vector<1x1x128xf32> to vector<1x128xf32>
    %90 = vector.shape_cast %87 : vector<1x128xf32> to vector<1x1x128xf32>
    tpu.vector_store %arg7[%c0_91, %c1_92, %c0_93], %90 {strides = array<i32>} : memref<1x2x128xf32, #tpu.memory_space<vmem>>, vector<1x1x128xf32>,
    %91 = arith.truncf %73 : vector<288x128xf32> to vector<288x128xbf16>
    %c0_94 = arith.constant 0 : index
    %c19_95 = arith.constant 19 : index
    %c0_96 = arith.constant 0 : index
    %92 = vector.load %arg6[%c0_94, %c19_95, %c0_96] : memref<1x384x128xbf16, #tpu.memory_space<vmem>>, vector<1x288x128xbf16>
    %93 = vector.shape_cast %92 : vector<1x288x128xbf16> to vector<288x128xbf16>
    %94 = vector.shape_cast %91 : vector<288x128xbf16> to vector<1x288x128xbf16>
    tpu.vector_store %arg6[%c0_94, %c19_95, %c0_96], %94 {strides = array<i32>} : memref<1x384x128xbf16, #tpu.memory_space<vmem>>, vector<1x288x128xbf16>,
    %cst_97 = arith.constant 0.000000e+00 : bf16
    %95 = vector.broadcast %cst_97 : bf16 to vector<19x128xbf16>
    %c0_98 = arith.constant 0 : index
    %c0_99 = arith.constant 0 : index
    %c0_100 = arith.constant 0 : index
    %96 = vector.load %arg6[%c0_98, %c0_99, %c0_100] : memref<1x384x128xbf16, #tpu.memory_space<vmem>>, vector<1x19x128xbf16>
    %97 = vector.shape_cast %96 : vector<1x19x128xbf16> to vector<19x128xbf16>
    %98 = vector.shape_cast %95 : vector<19x128xbf16> to vector<1x19x128xbf16>
    tpu.vector_store %arg6[%c0_98, %c0_99, %c0_100], %98 {strides = array<i32>} : memref<1x384x128xbf16, #tpu.memory_space<vmem>>, vector<1x19x128xbf16>,
    %cst_101 = arith.constant 0.000000e+00 : bf16
    %99 = vector.broadcast %cst_101 : bf16 to vector<77x128xbf16>
    %c0_102 = arith.constant 0 : index
    %c307 = arith.constant 307 : index
    %c0_103 = arith.constant 0 : index
    %100 = vector.load %arg6[%c0_102, %c307, %c0_103] : memref<1x384x128xbf16, #tpu.memory_space<vmem>>, vector<1x77x128xbf16>
    %101 = vector.shape_cast %100 : vector<1x77x128xbf16> to vector<77x128xbf16>
    %102 = vector.shape_cast %99 : vector<77x128xbf16> to vector<1x77x128xbf16>
    tpu.vector_store %arg6[%c0_102, %c307, %c0_103], %102 {strides = array<i32>} : memref<1x384x128xbf16, #tpu.memory_space<vmem>>, vector<1x77x128xbf16>,
    return
  }
  func.func @transform_0(%arg0: i32) -> (i32, i32, i32) {
    %c0_i32 = arith.constant 0 : i32
    %c0_i32_0 = arith.constant 0 : i32
    %c0_i32_1 = arith.constant 0 : i32
    return %arg0, %c0_i32, %c0_i32_0 : i32, i32, i32
  }
  func.func @transform_1(%arg0: i32) -> (i32, i32, i32) {
    %c0_i32 = arith.constant 0 : i32
    %c0_i32_0 = arith.constant 0 : i32
    %c0_i32_1 = arith.constant 0 : i32
    %c0_i32_2 = arith.constant 0 : i32
    return %c0_i32, %c0_i32_0, %c0_i32_1 : i32, i32, i32
  }
  func.func @transform_2(%arg0: i32) -> (i32, i32) {
    %c0_i32 = arith.constant 0 : i32
    %c0_i32_0 = arith.constant 0 : i32
    %c0_i32_1 = arith.constant 0 : i32
    return %c0_i32, %c0_i32_0 : i32, i32
  }
  func.func @transform_3(%arg0: i32) -> (i32, i32) {
    %c0_i32 = arith.constant 0 : i32
    %c0_i32_0 = arith.constant 0 : i32
    %c0_i32_1 = arith.constant 0 : i32
    return %c0_i32, %c0_i32_0 : i32, i32
  }
  func.func @transform_4(%arg0: i32) -> (i32, i32) {
    %c0_i32 = arith.constant 0 : i32
    %c0_i32_0 = arith.constant 0 : i32
    %c0_i32_1 = arith.constant 0 : i32
    return %c0_i32, %c0_i32_0 : i32, i32
  }
  func.func @transform_5(%arg0: i32) -> (i32, i32, i32) {
    %c0_i32 = arith.constant 0 : i32
    %c0_i32_0 = arith.constant 0 : i32
    %c0_i32_1 = arith.constant 0 : i32
    return %arg0, %c0_i32, %c0_i32_0 : i32, i32, i32
  }
  func.func @transform_6(%arg0: i32) -> (i32, i32, i32) {
    %c0_i32 = arith.constant 0 : i32
    %c0_i32_0 = arith.constant 0 : i32
    %c0_i32_1 = arith.constant 0 : i32
    return %arg0, %c0_i32, %c0_i32_0 : i32, i32, i32
  }
}

module attributes {stable_mosaic.version = 11 : i64} {
  func.func @_bn_residual_relu_kernel(%arg0: i32, %arg1: memref<768x128xf32, #tpu.memory_space<vmem>>, %arg2: memref<768x128xbf16, #tpu.memory_space<vmem>>, %arg3: memref<1x128xf32, #tpu.memory_space<vmem>>, %arg4: memref<1x128xf32, #tpu.memory_space<vmem>>, %arg5: memref<768x128xf32, #tpu.memory_space<vmem>>) attributes {dimension_semantics = [#tpu.dimension_semantics<parallel>], iteration_bounds = array<i64: 1>, scalar_prefetch = 0 : i64, scratch_operands = 0 : i64, tpu.core_type = #tpu.core_type<tc>, window_params = [{transform_indices = @transform_0, window_bounds = array<i64: 768, 128>}, {transform_indices = @transform_1, window_bounds = array<i64: 768, 128>}, {pipeline_mode = #tpu.pipeline_mode<synchronous>, transform_indices = @transform_2, window_bounds = array<i64: 1, 128>}, {pipeline_mode = #tpu.pipeline_mode<synchronous>, transform_indices = @transform_3, window_bounds = array<i64: 1, 128>}, {transform_indices = @transform_4, window_bounds = array<i64: 768, 128>}]} {
    %c0 = arith.constant 0 : index
    %c0_0 = arith.constant 0 : index
    %0 = vector.load %arg1[%c0, %c0_0] : memref<768x128xf32, #tpu.memory_space<vmem>>, vector<768x128xf32>
    %c0_1 = arith.constant 0 : index
    %c0_2 = arith.constant 0 : index
    %1 = vector.load %arg3[%c0_1, %c0_2] : memref<1x128xf32, #tpu.memory_space<vmem>>, vector<1x128xf32>
    %2 = vector.broadcast %1 : vector<1x128xf32> to vector<768x128xf32>
    %3 = arith.mulf %0, %2 : vector<768x128xf32>
    %c0_3 = arith.constant 0 : index
    %c0_4 = arith.constant 0 : index
    %4 = vector.load %arg4[%c0_3, %c0_4] : memref<1x128xf32, #tpu.memory_space<vmem>>, vector<1x128xf32>
    %5 = vector.broadcast %4 : vector<1x128xf32> to vector<768x128xf32>
    %6 = arith.addf %3, %5 : vector<768x128xf32>
    %c0_5 = arith.constant 0 : index
    %c0_6 = arith.constant 0 : index
    %7 = vector.load %arg2[%c0_5, %c0_6] : memref<768x128xbf16, #tpu.memory_space<vmem>>, vector<768x128xbf16>
    %8 = arith.extf %7 : vector<768x128xbf16> to vector<768x128xf32>
    %cst = arith.constant 1.000000e+00 : f32
    %9 = vector.broadcast %cst : f32 to vector<768x128xf32>
    %10 = arith.mulf %9, %6 : vector<768x128xf32>
    %11 = arith.subf %8, %10 : vector<768x128xf32>
    %cst_7 = arith.constant 0.000000e+00 : f32
    %12 = vector.broadcast %cst_7 : f32 to vector<768x128xf32>
    %13 = arith.maximumf %11, %12 : vector<768x128xf32>
    %c0_8 = arith.constant 0 : index
    %c0_9 = arith.constant 0 : index
    %14 = vector.load %arg5[%c0_8, %c0_9] : memref<768x128xf32, #tpu.memory_space<vmem>>, vector<768x128xf32>
    tpu.vector_store %arg5[%c0_8, %c0_9], %13 {strides = array<i32>} : memref<768x128xf32, #tpu.memory_space<vmem>>, vector<768x128xf32>,
    return
  }
  func.func @transform_0(%arg0: i32) -> (i32, i32) {
    %c0_i32 = arith.constant 0 : i32
    %c0_i32_0 = arith.constant 0 : i32
    return %arg0, %c0_i32 : i32, i32
  }
  func.func @transform_1(%arg0: i32) -> (i32, i32) {
    %c0_i32 = arith.constant 0 : i32
    %c0_i32_0 = arith.constant 0 : i32
    return %arg0, %c0_i32 : i32, i32
  }
  func.func @transform_2(%arg0: i32) -> (i32, i32) {
    %c0_i32 = arith.constant 0 : i32
    %c0_i32_0 = arith.constant 0 : i32
    %c0_i32_1 = arith.constant 0 : i32
    return %c0_i32, %c0_i32_0 : i32, i32
  }
  func.func @transform_3(%arg0: i32) -> (i32, i32) {
    %c0_i32 = arith.constant 0 : i32
    %c0_i32_0 = arith.constant 0 : i32
    %c0_i32_1 = arith.constant 0 : i32
    return %c0_i32, %c0_i32_0 : i32, i32
  }
  func.func @transform_4(%arg0: i32) -> (i32, i32) {
    %c0_i32 = arith.constant 0 : i32
    %c0_i32_0 = arith.constant 0 : i32
    return %arg0, %c0_i32 : i32, i32
  }
}

module attributes {stable_mosaic.version = 11 : i64} {
  func.func @kernel(%arg0: i32, %arg1: memref<1x384x128xbf16, #tpu.memory_space<vmem>>, %arg2: memref<9x128x128xbf16, #tpu.memory_space<vmem>>, %arg3: memref<1x128xf32, #tpu.memory_space<vmem>>, %arg4: memref<1x128xf32, #tpu.memory_space<vmem>>, %arg5: memref<384x1xf32, #tpu.memory_space<vmem>>, %arg6: memref<1x384x128xf32, #tpu.memory_space<vmem>>, %arg7: memref<1x2x128xf32, #tpu.memory_space<vmem>>, %arg8: memref<288x128xf32, #tpu.memory_space<vmem>>, %arg9: memref<384x128xbf16, #tpu.memory_space<vmem>>) attributes {dimension_semantics = [#tpu.dimension_semantics<parallel>], iteration_bounds = array<i64: 2>, scalar_prefetch = 0 : i64, scratch_operands = 2 : i64, tpu.core_type = #tpu.core_type<tc>, window_params = [{transform_indices = @transform_0, window_bounds = array<i64: 1, 384, 128>}, {pipeline_mode = #tpu.pipeline_mode<synchronous>, transform_indices = @transform_1, window_bounds = array<i64: 9, 128, 128>}, {pipeline_mode = #tpu.pipeline_mode<synchronous>, transform_indices = @transform_2, window_bounds = array<i64: 1, 128>}, {pipeline_mode = #tpu.pipeline_mode<synchronous>, transform_indices = @transform_3, window_bounds = array<i64: 1, 128>}, {pipeline_mode = #tpu.pipeline_mode<synchronous>, transform_indices = @transform_4, window_bounds = array<i64: 384, 1>}, {transform_indices = @transform_5, window_bounds = array<i64: 1, 384, 128>}, {transform_indices = @transform_6, window_bounds = array<i64: 1, 2, 128>}]} {
    %c0 = arith.constant 0 : index
    %c0_0 = arith.constant 0 : index
    %c0_1 = arith.constant 0 : index
    %0 = vector.load %arg1[%c0, %c0_0, %c0_1] : memref<1x384x128xbf16, #tpu.memory_space<vmem>>, vector<1x384x128xbf16>
    %1 = vector.shape_cast %0 : vector<1x384x128xbf16> to vector<384x128xbf16>
    %2 = arith.extf %1 : vector<384x128xbf16> to vector<384x128xf32>
    %c0_2 = arith.constant 0 : index
    %c0_3 = arith.constant 0 : index
    %3 = vector.load %arg3[%c0_2, %c0_3] : memref<1x128xf32, #tpu.memory_space<vmem>>, vector<1x128xf32>
    %4 = vector.broadcast %3 : vector<1x128xf32> to vector<384x128xf32>
    %5 = arith.mulf %2, %4 : vector<384x128xf32>
    %c0_4 = arith.constant 0 : index
    %c0_5 = arith.constant 0 : index
    %6 = vector.load %arg4[%c0_4, %c0_5] : memref<1x128xf32, #tpu.memory_space<vmem>>, vector<1x128xf32>
    %7 = vector.broadcast %6 : vector<1x128xf32> to vector<384x128xf32>
    %8 = arith.addf %5, %7 : vector<384x128xf32>
    %cst = arith.constant 0.000000e+00 : f32
    %9 = vector.broadcast %cst : f32 to vector<384x128xf32>
    %10 = arith.maximumf %8, %9 : vector<384x128xf32>
    %c0_6 = arith.constant 0 : index
    %c0_7 = arith.constant 0 : index
    %11 = vector.load %arg5[%c0_6, %c0_7] : memref<384x1xf32, #tpu.memory_space<vmem>>, vector<384x1xf32>
    %12 = vector.broadcast %11 : vector<384x1xf32> to vector<384x128xf32>
    %13 = arith.mulf %10, %12 : vector<384x128xf32>
    %14 = arith.truncf %13 : vector<384x128xf32> to vector<384x128xbf16>
    %c0_8 = arith.constant 0 : index
    %c0_9 = arith.constant 0 : index
    %15 = vector.load %arg9[%c0_8, %c0_9] : memref<384x128xbf16, #tpu.memory_space<vmem>>, vector<384x128xbf16>
    tpu.vector_store %arg9[%c0_8, %c0_9], %14 {strides = array<i32>} : memref<384x128xbf16, #tpu.memory_space<vmem>>, vector<384x128xbf16>,
    %c0_10 = arith.constant 0 : index
    %c0_11 = arith.constant 0 : index
    %16 = vector.load %arg9[%c0_10, %c0_11] : memref<384x128xbf16, #tpu.memory_space<vmem>>, vector<288x128xbf16>
    %c0_12 = arith.constant 0 : index
    %c0_13 = arith.constant 0 : index
    %c0_14 = arith.constant 0 : index
    %17 = vector.load %arg2[%c0_12, %c0_13, %c0_14] : memref<9x128x128xbf16, #tpu.memory_space<vmem>>, vector<1x128x128xbf16>
    %18 = vector.shape_cast %17 : vector<1x128x128xbf16> to vector<128x128xbf16>
    %cst_15 = arith.constant dense<0.000000e+00> : vector<288x128xf32>
    %19 = tpu.matmul %16, %18, %cst_15 {dimension_numbers = #tpu.dot_dimension_numbers<[1], [0], [0], [1], [0, 0, 1, 1], [], []>} : vector<288x128xbf16>, vector<128x128xbf16>, vector<288x128xf32> -> vector<288x128xf32>
    %c0_16 = arith.constant 0 : index
    %c0_17 = arith.constant 0 : index
    %20 = vector.load %arg8[%c0_16, %c0_17] : memref<288x128xf32, #tpu.memory_space<vmem>>, vector<288x128xf32>
    tpu.vector_store %arg8[%c0_16, %c0_17], %19 {strides = array<i32>} : memref<288x128xf32, #tpu.memory_space<vmem>>, vector<288x128xf32>,
    %c1 = arith.constant 1 : index
    %c0_18 = arith.constant 0 : index
    %21 = vector.load %arg9[%c1, %c0_18] : memref<384x128xbf16, #tpu.memory_space<vmem>>, vector<288x128xbf16>
    %c1_19 = arith.constant 1 : index
    %c0_20 = arith.constant 0 : index
    %c0_21 = arith.constant 0 : index
    %22 = vector.load %arg2[%c1_19, %c0_20, %c0_21] : memref<9x128x128xbf16, #tpu.memory_space<vmem>>, vector<1x128x128xbf16>
    %23 = vector.shape_cast %22 : vector<1x128x128xbf16> to vector<128x128xbf16>
    %cst_22 = arith.constant dense<0.000000e+00> : vector<288x128xf32>
    %24 = tpu.matmul %21, %23, %cst_22 {dimension_numbers = #tpu.dot_dimension_numbers<[1], [0], [0], [1], [0, 0, 1, 1], [], []>} : vector<288x128xbf16>, vector<128x128xbf16>, vector<288x128xf32> -> vector<288x128xf32>
    %c0_23 = arith.constant 0 : index
    %c0_24 = arith.constant 0 : index
    %25 = vector.load %arg8[%c0_23, %c0_24] : memref<288x128xf32, #tpu.memory_space<vmem>>, vector<288x128xf32>
    %26 = arith.addf %25, %24 : vector<288x128xf32>
    %c0_25 = arith.constant 0 : index
    %c0_26 = arith.constant 0 : index
    %27 = vector.load %arg8[%c0_25, %c0_26] : memref<288x128xf32, #tpu.memory_space<vmem>>, vector<288x128xf32>
    tpu.vector_store %arg8[%c0_25, %c0_26], %26 {strides = array<i32>} : memref<288x128xf32, #tpu.memory_space<vmem>>, vector<288x128xf32>,
    %c2 = arith.constant 2 : index
    %c0_27 = arith.constant 0 : index
    %28 = vector.load %arg9[%c2, %c0_27] : memref<384x128xbf16, #tpu.memory_space<vmem>>, vector<288x128xbf16>
    %c2_28 = arith.constant 2 : index
    %c0_29 = arith.constant 0 : index
    %c0_30 = arith.constant 0 : index
    %29 = vector.load %arg2[%c2_28, %c0_29, %c0_30] : memref<9x128x128xbf16, #tpu.memory_space<vmem>>, vector<1x128x128xbf16>
    %30 = vector.shape_cast %29 : vector<1x128x128xbf16> to vector<128x128xbf16>
    %cst_31 = arith.constant dense<0.000000e+00> : vector<288x128xf32>
    %31 = tpu.matmul %28, %30, %cst_31 {dimension_numbers = #tpu.dot_dimension_numbers<[1], [0], [0], [1], [0, 0, 1, 1], [], []>} : vector<288x128xbf16>, vector<128x128xbf16>, vector<288x128xf32> -> vector<288x128xf32>
    %c0_32 = arith.constant 0 : index
    %c0_33 = arith.constant 0 : index
    %32 = vector.load %arg8[%c0_32, %c0_33] : memref<288x128xf32, #tpu.memory_space<vmem>>, vector<288x128xf32>
    %33 = arith.addf %32, %31 : vector<288x128xf32>
    %c0_34 = arith.constant 0 : index
    %c0_35 = arith.constant 0 : index
    %34 = vector.load %arg8[%c0_34, %c0_35] : memref<288x128xf32, #tpu.memory_space<vmem>>, vector<288x128xf32>
    tpu.vector_store %arg8[%c0_34, %c0_35], %33 {strides = array<i32>} : memref<288x128xf32, #tpu.memory_space<vmem>>, vector<288x128xf32>,
    %c18 = arith.constant 18 : index
    %c0_36 = arith.constant 0 : index
    %35 = vector.load %arg9[%c18, %c0_36] : memref<384x128xbf16, #tpu.memory_space<vmem>>, vector<288x128xbf16>
    %c3 = arith.constant 3 : index
    %c0_37 = arith.constant 0 : index
    %c0_38 = arith.constant 0 : index
    %36 = vector.load %arg2[%c3, %c0_37, %c0_38] : memref<9x128x128xbf16, #tpu.memory_space<vmem>>, vector<1x128x128xbf16>
    %37 = vector.shape_cast %36 : vector<1x128x128xbf16> to vector<128x128xbf16>
    %cst_39 = arith.constant dense<0.000000e+00> : vector<288x128xf32>
    %38 = tpu.matmul %35, %37, %cst_39 {dimension_numbers = #tpu.dot_dimension_numbers<[1], [0], [0], [1], [0, 0, 1, 1], [], []>} : vector<288x128xbf16>, vector<128x128xbf16>, vector<288x128xf32> -> vector<288x128xf32>
    %c0_40 = arith.constant 0 : index
    %c0_41 = arith.constant 0 : index
    %39 = vector.load %arg8[%c0_40, %c0_41] : memref<288x128xf32, #tpu.memory_space<vmem>>, vector<288x128xf32>
    %40 = arith.addf %39, %38 : vector<288x128xf32>
    %c0_42 = arith.constant 0 : index
    %c0_43 = arith.constant 0 : index
    %41 = vector.load %arg8[%c0_42, %c0_43] : memref<288x128xf32, #tpu.memory_space<vmem>>, vector<288x128xf32>
    tpu.vector_store %arg8[%c0_42, %c0_43], %40 {strides = array<i32>} : memref<288x128xf32, #tpu.memory_space<vmem>>, vector<288x128xf32>,
    %c19 = arith.constant 19 : index
    %c0_44 = arith.constant 0 : index
    %42 = vector.load %arg9[%c19, %c0_44] : memref<384x128xbf16, #tpu.memory_space<vmem>>, vector<288x128xbf16>
    %c4 = arith.constant 4 : index
    %c0_45 = arith.constant 0 : index
    %c0_46 = arith.constant 0 : index
    %43 = vector.load %arg2[%c4, %c0_45, %c0_46] : memref<9x128x128xbf16, #tpu.memory_space<vmem>>, vector<1x128x128xbf16>
    %44 = vector.shape_cast %43 : vector<1x128x128xbf16> to vector<128x128xbf16>
    %cst_47 = arith.constant dense<0.000000e+00> : vector<288x128xf32>
    %45 = tpu.matmul %42, %44, %cst_47 {dimension_numbers = #tpu.dot_dimension_numbers<[1], [0], [0], [1], [0, 0, 1, 1], [], []>} : vector<288x128xbf16>, vector<128x128xbf16>, vector<288x128xf32> -> vector<288x128xf32>
    %c0_48 = arith.constant 0 : index
    %c0_49 = arith.constant 0 : index
    %46 = vector.load %arg8[%c0_48, %c0_49] : memref<288x128xf32, #tpu.memory_space<vmem>>, vector<288x128xf32>
    %47 = arith.addf %46, %45 : vector<288x128xf32>
    %c0_50 = arith.constant 0 : index
    %c0_51 = arith.constant 0 : index
    %48 = vector.load %arg8[%c0_50, %c0_51] : memref<288x128xf32, #tpu.memory_space<vmem>>, vector<288x128xf32>
    tpu.vector_store %arg8[%c0_50, %c0_51], %47 {strides = array<i32>} : memref<288x128xf32, #tpu.memory_space<vmem>>, vector<288x128xf32>,
    %c20 = arith.constant 20 : index
    %c0_52 = arith.constant 0 : index
    %49 = vector.load %arg9[%c20, %c0_52] : memref<384x128xbf16, #tpu.memory_space<vmem>>, vector<288x128xbf16>
    %c5 = arith.constant 5 : index
    %c0_53 = arith.constant 0 : index
    %c0_54 = arith.constant 0 : index
    %50 = vector.load %arg2[%c5, %c0_53, %c0_54] : memref<9x128x128xbf16, #tpu.memory_space<vmem>>, vector<1x128x128xbf16>
    %51 = vector.shape_cast %50 : vector<1x128x128xbf16> to vector<128x128xbf16>
    %cst_55 = arith.constant dense<0.000000e+00> : vector<288x128xf32>
    %52 = tpu.matmul %49, %51, %cst_55 {dimension_numbers = #tpu.dot_dimension_numbers<[1], [0], [0], [1], [0, 0, 1, 1], [], []>} : vector<288x128xbf16>, vector<128x128xbf16>, vector<288x128xf32> -> vector<288x128xf32>
    %c0_56 = arith.constant 0 : index
    %c0_57 = arith.constant 0 : index
    %53 = vector.load %arg8[%c0_56, %c0_57] : memref<288x128xf32, #tpu.memory_space<vmem>>, vector<288x128xf32>
    %54 = arith.addf %53, %52 : vector<288x128xf32>
    %c0_58 = arith.constant 0 : index
    %c0_59 = arith.constant 0 : index
    %55 = vector.load %arg8[%c0_58, %c0_59] : memref<288x128xf32, #tpu.memory_space<vmem>>, vector<288x128xf32>
    tpu.vector_store %arg8[%c0_58, %c0_59], %54 {strides = array<i32>} : memref<288x128xf32, #tpu.memory_space<vmem>>, vector<288x128xf32>,
    %c36 = arith.constant 36 : index
    %c0_60 = arith.constant 0 : index
    %56 = vector.load %arg9[%c36, %c0_60] : memref<384x128xbf16, #tpu.memory_space<vmem>>, vector<288x128xbf16>
    %c6 = arith.constant 6 : index
    %c0_61 = arith.constant 0 : index
    %c0_62 = arith.constant 0 : index
    %57 = vector.load %arg2[%c6, %c0_61, %c0_62] : memref<9x128x128xbf16, #tpu.memory_space<vmem>>, vector<1x128x128xbf16>
    %58 = vector.shape_cast %57 : vector<1x128x128xbf16> to vector<128x128xbf16>
    %cst_63 = arith.constant dense<0.000000e+00> : vector<288x128xf32>
    %59 = tpu.matmul %56, %58, %cst_63 {dimension_numbers = #tpu.dot_dimension_numbers<[1], [0], [0], [1], [0, 0, 1, 1], [], []>} : vector<288x128xbf16>, vector<128x128xbf16>, vector<288x128xf32> -> vector<288x128xf32>
    %c0_64 = arith.constant 0 : index
    %c0_65 = arith.constant 0 : index
    %60 = vector.load %arg8[%c0_64, %c0_65] : memref<288x128xf32, #tpu.memory_space<vmem>>, vector<288x128xf32>
    %61 = arith.addf %60, %59 : vector<288x128xf32>
    %c0_66 = arith.constant 0 : index
    %c0_67 = arith.constant 0 : index
    %62 = vector.load %arg8[%c0_66, %c0_67] : memref<288x128xf32, #tpu.memory_space<vmem>>, vector<288x128xf32>
    tpu.vector_store %arg8[%c0_66, %c0_67], %61 {strides = array<i32>} : memref<288x128xf32, #tpu.memory_space<vmem>>, vector<288x128xf32>,
    %c37 = arith.constant 37 : index
    %c0_68 = arith.constant 0 : index
    %63 = vector.load %arg9[%c37, %c0_68] : memref<384x128xbf16, #tpu.memory_space<vmem>>, vector<288x128xbf16>
    %c7 = arith.constant 7 : index
    %c0_69 = arith.constant 0 : index
    %c0_70 = arith.constant 0 : index
    %64 = vector.load %arg2[%c7, %c0_69, %c0_70] : memref<9x128x128xbf16, #tpu.memory_space<vmem>>, vector<1x128x128xbf16>
    %65 = vector.shape_cast %64 : vector<1x128x128xbf16> to vector<128x128xbf16>
    %cst_71 = arith.constant dense<0.000000e+00> : vector<288x128xf32>
    %66 = tpu.matmul %63, %65, %cst_71 {dimension_numbers = #tpu.dot_dimension_numbers<[1], [0], [0], [1], [0, 0, 1, 1], [], []>} : vector<288x128xbf16>, vector<128x128xbf16>, vector<288x128xf32> -> vector<288x128xf32>
    %c0_72 = arith.constant 0 : index
    %c0_73 = arith.constant 0 : index
    %67 = vector.load %arg8[%c0_72, %c0_73] : memref<288x128xf32, #tpu.memory_space<vmem>>, vector<288x128xf32>
    %68 = arith.addf %67, %66 : vector<288x128xf32>
    %c0_74 = arith.constant 0 : index
    %c0_75 = arith.constant 0 : index
    %69 = vector.load %arg8[%c0_74, %c0_75] : memref<288x128xf32, #tpu.memory_space<vmem>>, vector<288x128xf32>
    tpu.vector_store %arg8[%c0_74, %c0_75], %68 {strides = array<i32>} : memref<288x128xf32, #tpu.memory_space<vmem>>, vector<288x128xf32>,
    %c38 = arith.constant 38 : index
    %c0_76 = arith.constant 0 : index
    %70 = vector.load %arg9[%c38, %c0_76] : memref<384x128xbf16, #tpu.memory_space<vmem>>, vector<288x128xbf16>
    %c8 = arith.constant 8 : index
    %c0_77 = arith.constant 0 : index
    %c0_78 = arith.constant 0 : index
    %71 = vector.load %arg2[%c8, %c0_77, %c0_78] : memref<9x128x128xbf16, #tpu.memory_space<vmem>>, vector<1x128x128xbf16>
    %72 = vector.shape_cast %71 : vector<1x128x128xbf16> to vector<128x128xbf16>
    %cst_79 = arith.constant dense<0.000000e+00> : vector<288x128xf32>
    %73 = tpu.matmul %70, %72, %cst_79 {dimension_numbers = #tpu.dot_dimension_numbers<[1], [0], [0], [1], [0, 0, 1, 1], [], []>} : vector<288x128xbf16>, vector<128x128xbf16>, vector<288x128xf32> -> vector<288x128xf32>
    %c0_80 = arith.constant 0 : index
    %c0_81 = arith.constant 0 : index
    %74 = vector.load %arg8[%c0_80, %c0_81] : memref<288x128xf32, #tpu.memory_space<vmem>>, vector<288x128xf32>
    %75 = arith.addf %74, %73 : vector<288x128xf32>
    %c0_82 = arith.constant 0 : index
    %c0_83 = arith.constant 0 : index
    %76 = vector.load %arg8[%c0_82, %c0_83] : memref<288x128xf32, #tpu.memory_space<vmem>>, vector<288x128xf32>
    tpu.vector_store %arg8[%c0_82, %c0_83], %75 {strides = array<i32>} : memref<288x128xf32, #tpu.memory_space<vmem>>, vector<288x128xf32>,
    %c19_84 = arith.constant 19 : index
    %c0_85 = arith.constant 0 : index
    %77 = vector.load %arg5[%c19_84, %c0_85] : memref<384x1xf32, #tpu.memory_space<vmem>>, vector<288x1xf32>
    %c0_86 = arith.constant 0 : index
    %c0_87 = arith.constant 0 : index
    %78 = vector.load %arg8[%c0_86, %c0_87] : memref<288x128xf32, #tpu.memory_space<vmem>>, vector<288x128xf32>
    %79 = vector.broadcast %77 : vector<288x1xf32> to vector<288x128xf32>
    %80 = arith.mulf %78, %79 : vector<288x128xf32>
    %cst_88 = arith.constant dense<0.000000e+00> : vector<128xf32>
    %81 = vector.multi_reduction <add>, %80, %cst_88 [0] : vector<288x128xf32> to vector<128xf32>
    %82 = vector.shape_cast %81 : vector<128xf32> to vector<1x128xf32>
    %cst_89 = arith.constant 3.906250e-03 : f32
    %83 = vector.broadcast %cst_89 : f32 to vector<1x128xf32>
    %84 = arith.mulf %82, %83 : vector<1x128xf32>
    %85 = vector.broadcast %84 : vector<1x128xf32> to vector<288x128xf32>
    %86 = arith.subf %80, %85 : vector<288x128xf32>
    %87 = vector.broadcast %77 : vector<288x1xf32> to vector<288x128xf32>
    %88 = arith.mulf %86, %87 : vector<288x128xf32>
    %c0_90 = arith.constant 0 : index
    %c0_91 = arith.constant 0 : index
    %c0_92 = arith.constant 0 : index
    %89 = vector.load %arg7[%c0_90, %c0_91, %c0_92] : memref<1x2x128xf32, #tpu.memory_space<vmem>>, vector<1x1x128xf32>
    %90 = vector.shape_cast %89 : vector<1x1x128xf32> to vector<1x128xf32>
    %91 = vector.shape_cast %82 : vector<1x128xf32> to vector<1x1x128xf32>
    tpu.vector_store %arg7[%c0_90, %c0_91, %c0_92], %91 {strides = array<i32>} : memref<1x2x128xf32, #tpu.memory_space<vmem>>, vector<1x1x128xf32>,
    %92 = arith.mulf %88, %88 : vector<288x128xf32>
    %cst_93 = arith.constant dense<0.000000e+00> : vector<128xf32>
    %93 = vector.multi_reduction <add>, %92, %cst_93 [0] : vector<288x128xf32> to vector<128xf32>
    %94 = vector.shape_cast %93 : vector<128xf32> to vector<1x128xf32>
    %c0_94 = arith.constant 0 : index
    %c1_95 = arith.constant 1 : index
    %c0_96 = arith.constant 0 : index
    %95 = vector.load %arg7[%c0_94, %c1_95, %c0_96] : memref<1x2x128xf32, #tpu.memory_space<vmem>>, vector<1x1x128xf32>
    %96 = vector.shape_cast %95 : vector<1x1x128xf32> to vector<1x128xf32>
    %97 = vector.shape_cast %94 : vector<1x128xf32> to vector<1x1x128xf32>
    tpu.vector_store %arg7[%c0_94, %c1_95, %c0_96], %97 {strides = array<i32>} : memref<1x2x128xf32, #tpu.memory_space<vmem>>, vector<1x1x128xf32>,
    %c0_97 = arith.constant 0 : index
    %c19_98 = arith.constant 19 : index
    %c0_99 = arith.constant 0 : index
    %98 = vector.load %arg6[%c0_97, %c19_98, %c0_99] : memref<1x384x128xf32, #tpu.memory_space<vmem>>, vector<1x288x128xf32>
    %99 = vector.shape_cast %98 : vector<1x288x128xf32> to vector<288x128xf32>
    %100 = vector.shape_cast %80 : vector<288x128xf32> to vector<1x288x128xf32>
    tpu.vector_store %arg6[%c0_97, %c19_98, %c0_99], %100 {strides = array<i32>} : memref<1x384x128xf32, #tpu.memory_space<vmem>>, vector<1x288x128xf32>,
    %cst_100 = arith.constant 0.000000e+00 : f32
    %101 = vector.broadcast %cst_100 : f32 to vector<19x128xf32>
    %c0_101 = arith.constant 0 : index
    %c0_102 = arith.constant 0 : index
    %c0_103 = arith.constant 0 : index
    %102 = vector.load %arg6[%c0_101, %c0_102, %c0_103] : memref<1x384x128xf32, #tpu.memory_space<vmem>>, vector<1x19x128xf32>
    %103 = vector.shape_cast %102 : vector<1x19x128xf32> to vector<19x128xf32>
    %104 = vector.shape_cast %101 : vector<19x128xf32> to vector<1x19x128xf32>
    tpu.vector_store %arg6[%c0_101, %c0_102, %c0_103], %104 {strides = array<i32>} : memref<1x384x128xf32, #tpu.memory_space<vmem>>, vector<1x19x128xf32>,
    %cst_104 = arith.constant 0.000000e+00 : f32
    %105 = vector.broadcast %cst_104 : f32 to vector<77x128xf32>
    %c0_105 = arith.constant 0 : index
    %c307 = arith.constant 307 : index
    %c0_106 = arith.constant 0 : index
    %106 = vector.load %arg6[%c0_105, %c307, %c0_106] : memref<1x384x128xf32, #tpu.memory_space<vmem>>, vector<1x77x128xf32>
    %107 = vector.shape_cast %106 : vector<1x77x128xf32> to vector<77x128xf32>
    %108 = vector.shape_cast %105 : vector<77x128xf32> to vector<1x77x128xf32>
    tpu.vector_store %arg6[%c0_105, %c307, %c0_106], %108 {strides = array<i32>} : memref<1x384x128xf32, #tpu.memory_space<vmem>>, vector<1x77x128xf32>,
    return
  }
  func.func @transform_0(%arg0: i32) -> (i32, i32, i32) {
    %c0_i32 = arith.constant 0 : i32
    %c0_i32_0 = arith.constant 0 : i32
    %c0_i32_1 = arith.constant 0 : i32
    return %arg0, %c0_i32, %c0_i32_0 : i32, i32, i32
  }
  func.func @transform_1(%arg0: i32) -> (i32, i32, i32) {
    %c0_i32 = arith.constant 0 : i32
    %c0_i32_0 = arith.constant 0 : i32
    %c0_i32_1 = arith.constant 0 : i32
    %c0_i32_2 = arith.constant 0 : i32
    return %c0_i32, %c0_i32_0, %c0_i32_1 : i32, i32, i32
  }
  func.func @transform_2(%arg0: i32) -> (i32, i32) {
    %c0_i32 = arith.constant 0 : i32
    %c0_i32_0 = arith.constant 0 : i32
    %c0_i32_1 = arith.constant 0 : i32
    return %c0_i32, %c0_i32_0 : i32, i32
  }
  func.func @transform_3(%arg0: i32) -> (i32, i32) {
    %c0_i32 = arith.constant 0 : i32
    %c0_i32_0 = arith.constant 0 : i32
    %c0_i32_1 = arith.constant 0 : i32
    return %c0_i32, %c0_i32_0 : i32, i32
  }
  func.func @transform_4(%arg0: i32) -> (i32, i32) {
    %c0_i32 = arith.constant 0 : i32
    %c0_i32_0 = arith.constant 0 : i32
    %c0_i32_1 = arith.constant 0 : i32
    return %c0_i32, %c0_i32_0 : i32, i32
  }
  func.func @transform_5(%arg0: i32) -> (i32, i32, i32) {
    %c0_i32 = arith.constant 0 : i32
    %c0_i32_0 = arith.constant 0 : i32
    %c0_i32_1 = arith.constant 0 : i32
    return %arg0, %c0_i32, %c0_i32_0 : i32, i32, i32
  }
  func.func @transform_6(%arg0: i32) -> (i32, i32, i32) {
    %c0_i32 = arith.constant 0 : i32
    %c0_i32_0 = arith.constant 0 : i32
    %c0_i32_1 = arith.constant 0 : i32
    return %arg0, %c0_i32, %c0_i32_0 : i32, i32, i32
  }
}

</mosaic_0001>

<bundles_post_ra>
// kernel: basic_block_forward.5
= control target key start
LH: loop header
LB: loop body
LE: loop exit
PB: predicated region body
PF: predicated region fallthrough
CT: control target
= control target key end

     0   :  { %s2003_s0 = inlined_call_operand.vmem [shape: f32[768,128], index: 0, kind: input, shape index: {}]   ;;  %s2004_s1 = inlined_call_operand.vmem [shape: bf16[768,128], index: 1, kind: input, shape index: {}]   ;;  %s2005_s2 = inlined_call_operand.vmem [shape: f32[1,128], index: 2, kind: input, shape index: {}]   ;;  %s2006_s3 = inlined_call_operand.vmem [shape: f32[1,128], index: 3, kind: input, shape index: {}]   ;;  %s2007_s4 = inlined_call_operand.vmem [shape: f32[768,128], index: 4, kind: output, shape index: {}]  }
   0x1   :  { %v17_v0 = vld [vmem:[%s2003_s0] sm:$0xff]  ;;  %v18_v5 = vld [vmem:[%s2003_s0 + $0x8] sm:$0xff]  ;;  %v19_v6 = vld [vmem:[%s2003_s0 + $0x10] sm:$0xff] }
   0x2   :  { %v1077_v1 = vld [vmem:[%s2005_s2] ss:$0 sm:$0xff]  ;;  %v997_v11 = vld [vmem:[%s2004_s1 + $0x8] sm:$0xff]   ;;  %v20_v12 = vld [vmem:[%s2003_s0 + $0x18] sm:$0xff] }
   0x3   :  { %v1082_v2 = vld [vmem:[%s2006_s3] ss:$0 sm:$0xff]  ;;  %v120_v3 = vmul.f32 %v1077_v1, %v17_v0  ;;  %v121_v8 = vmul.f32 %v1077_v1, %v18_v5  ;;  %v122_v10 = vmul.f32 %v1077_v1, %v19_v6  ;;  %v811_v15 = vunpack.c.l.bf16 %v997_v11  ;;  %v998_v18 = vld [vmem:[%s2004_s1 + $0x10] sm:$0xff]   ;;  %v22_v19 = vld [vmem:[%s2003_s0 + $0x28] sm:$0xff] }
   0x4   :  { %v806_v4 = vld [vmem:[%s2004_s1] sm:$0xff]   ;;  %v123_v16 = vmul.f32 %v1077_v1, %v20_v12  ;;  %v812_v17 = vunpack.c.h.bf16 %v997_v11  ;;  %v23_v20 = vld [vmem:[%s2003_s0 + $0x30] sm:$0xff]  ;;  %v815_v24 = vunpack.c.l.bf16 %v998_v18  ;;  %v999_v25 = vld [vmem:[%s2004_s1 + $0x18] sm:$0xff]   ;;  %v125_v28 = vmul.f32 %v1077_v1, %v22_v19 }
   0x5   :  { %v807_v7 = vunpack.c.l.bf16 %v806_v4  ;;  %v808_v9 = vunpack.c.h.bf16 %v806_v4  ;;  %v21_v13 = vld [vmem:[%s2003_s0 + $0x20] sm:$0xff]  ;;  %v223_v14 = vadd.f32 %v1082_v2, %v120_v3  ;;  %v224_v21 = vadd.f32 %v1082_v2, %v121_v8  ;;  %v24_v34 = vld [vmem:[%s2003_s0 + $0x38] sm:$0xff]  ;;  %v26_v45 = vld [vmem:[%s2003_s0 + $0x48] sm:$0xff] }
   0x6   :  { %v225_v22 = vadd.f32 %v1082_v2, %v122_v10  ;;  %v124_v23 = vmul.f32 %v1077_v1, %v21_v13  ;;  %v226_v27 = vadd.f32 %v1082_v2, %v123_v16  ;;  %v816_v29 = vunpack.c.h.bf16 %v998_v18  ;;  %v25_v39 = vld [vmem:[%s2003_s0 + $0x40] sm:$0xff]  ;;  %v27_v50 = vld [vmem:[%s2003_s0 + $0x50] sm:$0xff]  ;;  %v1001_v51 = vld [vmem:[%s2004_s1 + $0x28] sm:$0xff]  }
   0x7   :  { %v511_v26 = vsub.f32 %v807_v7, %v223_v14  ;;  %v512_v30 = vsub.f32 %v808_v9, %v224_v21  ;;  %v126_v33 = vmul.f32 %v1077_v1, %v23_v20  ;;  %v228_v37 = vadd.f32 %v1082_v2, %v125_v28  ;;  %v1000_v40 = vld [vmem:[%s2004_s1 + $0x20] sm:$0xff]   ;;  %v28_v56 = vld [vmem:[%s2003_s0 + $0x58] sm:$0xff]  ;;  %v1002_v62 = vld [vmem:[%s2004_s1 + $0x30] sm:$0xff]  }
   0x8   :  { %v513_v31 = vsub.f32 %v811_v15, %v225_v22  ;;  %v227_v32 = vadd.f32 %v1082_v2, %v124_v23  ;;  %v514_v36 = vsub.f32 %v812_v17, %v226_v27  ;;  %v819_v38 = vunpack.c.l.bf16 %v999_v25  ;;  %v29_v61 = vld [vmem:[%s2003_s0 + $0x60] sm:$0xff]  ;;  %v30_v5 = vld [vmem:[%s2003_s0 + $0x68] sm:$0xff]  ;;  %v31_v14 = vld [vmem:[%s2003_s0 + $0x70] sm:$0xff] }
   0x9   :  { %v607_v35 = vmax.f32 %v511_v26, 0.0  ;;  %v608_v41 = vmax.f32 %v512_v30, 0.0  ;;  %v229_v44 = vadd.f32 %v1082_v2, %v126_v33  ;;  %v516_v47 = vsub.f32 %v816_v29, %v228_v37  ;;  %v1003_v19 = vld [vmem:[%s2004_s1 + $0x38] sm:$0xff]   ;;  %v33_v29 = vld [vmem:[%s2003_s0 + $0x80] sm:$0xff] }
   0xa   :  { %v609_v42 = vmax.f32 %v513_v31, 0.0  ;;  %v515_v43 = vsub.f32 %v815_v24, %v227_v32  ;;  %v610_v46 = vmax.f32 %v514_v36, 0.0  ;;  %v127_v48 = vmul.f32 %v1077_v1, %v24_v34  ;;  %v32_v20 = vld [vmem:[%s2003_s0 + $0x78] sm:$0xff]  ;;  %v1004_v30 = vld [vmem:[%s2004_s1 + $0x40] sm:$0xff]  }
   0xb   :  { %703 = vst [vmem:[%s2007_s4] sm:$0xff] %v607_v35  ;;  %v820_v49 = vunpack.c.h.bf16 %v999_v25  ;;  %704 = vst [vmem:[%s2007_s4 + $0x8] sm:$0xff] %v608_v41  ;;  %v517_v53 = vsub.f32 %v819_v38, %v229_v44  ;;  %v128_v54 = vmul.f32 %v1077_v1, %v25_v39  ;;  %v823_v55 = vunpack.c.l.bf16 %v1000_v40  ;;  %v34_v35 = vld [vmem:[%s2003_s0 + $0x88] sm:$0xff] }
   0xc   :  { %705 = vst [vmem:[%s2007_s4 + $0x10] sm:$0xff] %v609_v42  ;;  %v611_v52 = vmax.f32 %v515_v43, 0.0  ;;  %706 = vst [vmem:[%s2007_s4 + $0x18] sm:$0xff] %v610_v46  ;;  %v612_v57 = vmax.f32 %v516_v47, 0.0  ;;  %v230_v58 = vadd.f32 %v1082_v2, %v127_v48  ;;  %v129_v59 = vmul.f32 %v1077_v1, %v26_v45  ;;  %v1005_v41 = vld [vmem:[%s2004_s1 + $0x48] sm:$0xff]   ;;  %v36_v46 = vld [vmem:[%s2003_s0 + $0x98] sm:$0xff] }
   0xd   :  { %v824_v60 = vunpack.c.h.bf16 %v1000_v40  ;;  %v613_v63 = vmax.f32 %v517_v53, 0.0  ;;  %v231_v0 = vadd.f32 %v1082_v2, %v128_v54  ;;  %v130_v3 = vmul.f32 %v1077_v1, %v27_v50  ;;  %v35_v40 = vld [vmem:[%s2003_s0 + $0x90] sm:$0xff] }
   0xe   :  { %707 = vst [vmem:[%s2007_s4 + $0x20] sm:$0xff] %v611_v52  ;;  %v827_v4 = vunpack.c.l.bf16 %v1001_v51  ;;  %708 = vst [vmem:[%s2007_s4 + $0x28] sm:$0xff] %v612_v57  ;;  %v518_v6 = vsub.f32 %v820_v49, %v230_v58  ;;  %v232_v7 = vadd.f32 %v1082_v2, %v129_v59  ;;  %v131_v8 = vmul.f32 %v1077_v1, %v28_v56  ;;  %v1006_v56 = vld [vmem:[%s2004_s1 + $0x50] sm:$0xff]   ;;  %v38_v57 = vld [vmem:[%s2003_s0 + $0xa8] sm:$0xff] }
   0xf   :  { %v828_v9 = vunpack.c.h.bf16 %v1001_v51  ;;  %709 = vst [vmem:[%s2007_s4 + $0x30] sm:$0xff] %v613_v63  ;;  %v519_v10 = vsub.f32 %v823_v55, %v231_v0  ;;  %v233_v11 = vadd.f32 %v1082_v2, %v130_v3  ;;  %v132_v12 = vmul.f32 %v1077_v1, %v29_v61  ;;  %v37_v51 = vld [vmem:[%s2003_s0 + $0xa0] sm:$0xff] }
  0x10   :  { %v831_v13 = vunpack.c.l.bf16 %v1002_v62  ;;  %v614_v15 = vmax.f32 %v518_v6, 0.0  ;;  %v520_v16 = vsub.f32 %v824_v60, %v232_v7  ;;  %v234_v17 = vadd.f32 %v1082_v2, %v131_v8 }
  0x11   :  { %v133_v18 = vmul.f32 %v1077_v1, %v30_v5  ;;  %v615_v21 = vmax.f32 %v519_v10, 0.0  ;;  %v521_v22 = vsub.f32 %v827_v4, %v233_v11  ;;  %v235_v23 = vadd.f32 %v1082_v2, %v132_v12  ;;  %v39_v4 = vld [vmem:[%s2003_s0 + $0xb0] sm:$0xff]  ;;  %v40_v10 = vld [vmem:[%s2003_s0 + $0xb8] sm:$0xff] }
  0x12   :  { %v832_v24 = vunpack.c.h.bf16 %v1002_v62  ;;  %710 = vst [vmem:[%s2007_s4 + $0x38] sm:$0xff] %v614_v15  ;;  %v616_v25 = vmax.f32 %v520_v16, 0.0  ;;  %v522_v26 = vsub.f32 %v828_v9, %v234_v17  ;;  %v134_v28 = vmul.f32 %v1077_v1, %v31_v14  ;;  %v1007_v9 = vld [vmem:[%s2004_s1 + $0x58] sm:$0xff]  }
  0x13   :  { %v236_v27 = vadd.f32 %v1082_v2, %v133_v18  ;;  %711 = vst [vmem:[%s2007_s4 + $0x40] sm:$0xff] %v615_v21  ;;  %v617_v31 = vmax.f32 %v521_v22, 0.0  ;;  %v523_v32 = vsub.f32 %v831_v13, %v235_v23  ;;  %v835_v33 = vunpack.c.l.bf16 %v1003_v19 }
  0x14   :  { %v135_v34 = vmul.f32 %v1077_v1, %v32_v20  ;;  %712 = vst [vmem:[%s2007_s4 + $0x48] sm:$0xff] %v616_v25  ;;  %v618_v36 = vmax.f32 %v522_v26, 0.0  ;;  %v237_v38 = vadd.f32 %v1082_v2, %v134_v28  ;;  %v836_v39 = vunpack.c.h.bf16 %v1003_v19  ;;  %v41_v19 = vld [vmem:[%s2003_s0 + $0xc0] sm:$0xff]  ;;  %v42_v25 = vld [vmem:[%s2003_s0 + $0xc8] sm:$0xff] }
  0x15   :  { %v524_v37 = vsub.f32 %v832_v24, %v236_v27  ;;  %713 = vst [vmem:[%s2007_s4 + $0x50] sm:$0xff] %v617_v31  ;;  %v619_v42 = vmax.f32 %v523_v32, 0.0  ;;  %v136_v44 = vmul.f32 %v1077_v1, %v33_v29  ;;  %v839_v45 = vunpack.c.l.bf16 %v1004_v30  ;;  %v1008_v20 = vld [vmem:[%s2004_s1 + $0x60] sm:$0xff]   ;;  %v1009_v31 = vld [vmem:[%s2004_s1 + $0x68] sm:$0xff]  }
  0x16   :  { %v238_v43 = vadd.f32 %v1082_v2, %v135_v34  ;;  %714 = vst [vmem:[%s2007_s4 + $0x58] sm:$0xff] %v618_v36  ;;  %v525_v48 = vsub.f32 %v835_v33, %v237_v38  ;;  %v137_v49 = vmul.f32 %v1077_v1, %v34_v35  ;;  %v840_v50 = vunpack.c.h.bf16 %v1004_v30  ;;  %v43_v30 = vld [vmem:[%s2003_s0 + $0xd0] sm:$0xff]  ;;  %v44_v36 = vld [vmem:[%s2003_s0 + $0xd8] sm:$0xff] }
  0x17   :  { %v620_v47 = vmax.f32 %v524_v37, 0.0  ;;  %715 = vst [vmem:[%s2007_s4 + $0x60] sm:$0xff] %v619_v42  ;;  %v239_v53 = vadd.f32 %v1082_v2, %v136_v44  ;;  %v138_v54 = vmul.f32 %v1077_v1, %v35_v40  ;;  %v843_v55 = vunpack.c.l.bf16 %v1005_v41 }
  0x18   :  { %v526_v52 = vsub.f32 %v836_v39, %v238_v43  ;;  %v621_v58 = vmax.f32 %v525_v48, 0.0  ;;  %v240_v59 = vadd.f32 %v1082_v2, %v137_v49  ;;  %v139_v60 = vmul.f32 %v1077_v1, %v36_v46  ;;  %v1010_v46 = vld [vmem:[%s2004_s1 + $0x70] sm:$0xff]  }
  0x19   :  { %716 = vst [vmem:[%s2007_s4 + $0x68] sm:$0xff] %v620_v47  ;;  %v844_v61 = vunpack.c.h.bf16 %v1005_v41  ;;  %v527_v63 = vsub.f32 %v839_v45, %v239_v53  ;;  %v241_v0 = vadd.f32 %v1082_v2, %v138_v54  ;;  %v140_v3 = vmul.f32 %v1077_v1, %v37_v51  ;;  %v45_v41 = vld [vmem:[%s2003_s0 + $0xe0] sm:$0xff]  ;;  %v46_v47 = vld [vmem:[%s2003_s0 + $0xe8] sm:$0xff] }
  0x1a   :  { %v622_v62 = vmax.f32 %v526_v52, 0.0  ;;  %717 = vst [vmem:[%s2007_s4 + $0x70] sm:$0xff] %v621_v58  ;;  %v528_v5 = vsub.f32 %v840_v50, %v240_v59  ;;  %v242_v6 = vadd.f32 %v1082_v2, %v139_v60  ;;  %v847_v7 = vunpack.c.l.bf16 %v1006_v56 }
  0x1b   :  { %v141_v8 = vmul.f32 %v1077_v1, %v38_v57  ;;  %v623_v11 = vmax.f32 %v527_v63, 0.0  ;;  %v529_v12 = vsub.f32 %v843_v55, %v241_v0  ;;  %v243_v13 = vadd.f32 %v1082_v2, %v140_v3 }
  0x1c   :  { %718 = vst [vmem:[%s2007_s4 + $0x78] sm:$0xff] %v622_v62  ;;  %v848_v14 = vunpack.c.h.bf16 %v1006_v56  ;;  %v624_v15 = vmax.f32 %v528_v5, 0.0  ;;  %v530_v16 = vsub.f32 %v844_v61, %v242_v6  ;;  %v142_v18 = vmul.f32 %v1077_v1, %v39_v4  ;;  %v47_v56 = vld [vmem:[%s2003_s0 + $0xf0] sm:$0xff]  ;;  %v1011_v61 = vld [vmem:[%s2004_s1 + $0x78] sm:$0xff]  }
  0x1d   :  { %v244_v17 = vadd.f32 %v1082_v2, %v141_v8  ;;  %719 = vst [vmem:[%s2007_s4 + $0x80] sm:$0xff] %v623_v11  ;;  %v625_v21 = vmax.f32 %v529_v12, 0.0  ;;  %v531_v22 = vsub.f32 %v847_v7, %v243_v13  ;;  %v851_v23 = vunpack.c.l.bf16 %v1007_v9  ;;  %v48_v62 = vld [vmem:[%s2003_s0 + $0xf8] sm:$0xff] }
  0x1e   :  { %v143_v24 = vmul.f32 %v1077_v1, %v40_v10  ;;  %720 = vst [vmem:[%s2007_s4 + $0x88] sm:$0xff] %v624_v15  ;;  %v626_v26 = vmax.f32 %v530_v16, 0.0  ;;  %v245_v28 = vadd.f32 %v1082_v2, %v142_v18  ;;  %v852_v29 = vunpack.c.h.bf16 %v1007_v9  ;;  %v49_v9 = vld [vmem:[%s2003_s0 + $0x100] sm:$0xff]  ;;  %v50_v15 = vld [vmem:[%s2003_s0 + $0x108] sm:$0xff] }
  0x1f   :  { %v532_v27 = vsub.f32 %v848_v14, %v244_v17  ;;  %721 = vst [vmem:[%s2007_s4 + $0x90] sm:$0xff] %v625_v21  ;;  %v627_v32 = vmax.f32 %v531_v22, 0.0  ;;  %v144_v34 = vmul.f32 %v1077_v1, %v41_v19  ;;  %v855_v35 = vunpack.c.l.bf16 %v1008_v20  ;;  %v1012_v10 = vld [vmem:[%s2004_s1 + $0x80] sm:$0xff]   ;;  %v1013_v21 = vld [vmem:[%s2004_s1 + $0x88] sm:$0xff]  }
  0x20   :  { %v246_v33 = vadd.f32 %v1082_v2, %v143_v24  ;;  %722 = vst [vmem:[%s2007_s4 + $0x98] sm:$0xff] %v626_v26  ;;  %v533_v38 = vsub.f32 %v851_v23, %v245_v28  ;;  %v145_v39 = vmul.f32 %v1077_v1, %v42_v25  ;;  %v856_v40 = vunpack.c.h.bf16 %v1008_v20  ;;  %v51_v20 = vld [vmem:[%s2003_s0 + $0x110] sm:$0xff]  ;;  %v52_v26 = vld [vmem:[%s2003_s0 + $0x118] sm:$0xff] }
  0x21   :  { %v628_v37 = vmax.f32 %v532_v27, 0.0  ;;  %723 = vst [vmem:[%s2007_s4 + $0xa0] sm:$0xff] %v627_v32  ;;  %v247_v43 = vadd.f32 %v1082_v2, %v144_v34  ;;  %v146_v44 = vmul.f32 %v1077_v1, %v43_v30  ;;  %v859_v45 = vunpack.c.l.bf16 %v1009_v31 }
  0x22   :  { %v534_v42 = vsub.f32 %v852_v29, %v246_v33  ;;  %v629_v48 = vmax.f32 %v533_v38, 0.0  ;;  %v248_v49 = vadd.f32 %v1082_v2, %v145_v39  ;;  %v147_v50 = vmul.f32 %v1077_v1, %v44_v36  ;;  %v1014_v36 = vld [vmem:[%s2004_s1 + $0x90] sm:$0xff]  }
  0x23   :  { %724 = vst [vmem:[%s2007_s4 + $0xa8] sm:$0xff] %v628_v37  ;;  %v860_v51 = vunpack.c.h.bf16 %v1009_v31  ;;  %v535_v53 = vsub.f32 %v855_v35, %v247_v43  ;;  %v249_v54 = vadd.f32 %v1082_v2, %v146_v44  ;;  %v148_v55 = vmul.f32 %v1077_v1, %v45_v41  ;;  %v53_v31 = vld [vmem:[%s2003_s0 + $0x120] sm:$0xff]  ;;  %v54_v37 = vld [vmem:[%s2003_s0 + $0x128] sm:$0xff] }
  0x24   :  { %v630_v52 = vmax.f32 %v534_v42, 0.0  ;;  %725 = vst [vmem:[%s2007_s4 + $0xb0] sm:$0xff] %v629_v48  ;;  %v536_v57 = vsub.f32 %v856_v40, %v248_v49  ;;  %v250_v58 = vadd.f32 %v1082_v2, %v147_v50  ;;  %v863_v59 = vunpack.c.l.bf16 %v1010_v46 }
  0x25   :  { %v149_v60 = vmul.f32 %v1077_v1, %v46_v47  ;;  %v631_v63 = vmax.f32 %v535_v53, 0.0  ;;  %v537_v0 = vsub.f32 %v859_v45, %v249_v54  ;;  %v251_v3 = vadd.f32 %v1082_v2, %v148_v55 }
  0x26   :  { %726 = vst [vmem:[%s2007_s4 + $0xb8] sm:$0xff] %v630_v52  ;;  %v864_v4 = vunpack.c.h.bf16 %v1010_v46  ;;  %v632_v5 = vmax.f32 %v536_v57, 0.0  ;;  %v538_v6 = vsub.f32 %v860_v51, %v250_v58  ;;  %v150_v8 = vmul.f32 %v1077_v1, %v47_v56  ;;  %v55_v46 = vld [vmem:[%s2003_s0 + $0x130] sm:$0xff]  ;;  %v1015_v51 = vld [vmem:[%s2004_s1 + $0x98] sm:$0xff]  }
  0x27   :  { %v252_v7 = vadd.f32 %v1082_v2, %v149_v60  ;;  %727 = vst [vmem:[%s2007_s4 + $0xc0] sm:$0xff] %v631_v63  ;;  %v633_v11 = vmax.f32 %v537_v0, 0.0  ;;  %v539_v12 = vsub.f32 %v863_v59, %v251_v3  ;;  %v867_v13 = vunpack.c.l.bf16 %v1011_v61  ;;  %v56_v52 = vld [vmem:[%s2003_s0 + $0x138] sm:$0xff] }
  0x28   :  { %v151_v14 = vmul.f32 %v1077_v1, %v48_v62  ;;  %728 = vst [vmem:[%s2007_s4 + $0xc8] sm:$0xff] %v632_v5  ;;  %v634_v16 = vmax.f32 %v538_v6, 0.0  ;;  %v253_v18 = vadd.f32 %v1082_v2, %v150_v8  ;;  %v868_v19 = vunpack.c.h.bf16 %v1011_v61  ;;  %v57_v61 = vld [vmem:[%s2003_s0 + $0x140] sm:$0xff]  ;;  %v58_v5 = vld [vmem:[%s2003_s0 + $0x148] sm:$0xff] }
  0x29   :  { %v540_v17 = vsub.f32 %v864_v4, %v252_v7  ;;  %729 = vst [vmem:[%s2007_s4 + $0xd0] sm:$0xff] %v633_v11  ;;  %v635_v22 = vmax.f32 %v539_v12, 0.0  ;;  %v152_v24 = vmul.f32 %v1077_v1, %v49_v9  ;;  %v871_v25 = vunpack.c.l.bf16 %v1012_v10  ;;  %v1016_v62 = vld [vmem:[%s2004_s1 + $0xa0] sm:$0xff]   ;;  %v1017_v11 = vld [vmem:[%s2004_s1 + $0xa8] sm:$0xff]  }
  0x2a   :  { %v254_v23 = vadd.f32 %v1082_v2, %v151_v14  ;;  %730 = vst [vmem:[%s2007_s4 + $0xd8] sm:$0xff] %v634_v16  ;;  %v541_v28 = vsub.f32 %v867_v13, %v253_v18  ;;  %v153_v29 = vmul.f32 %v1077_v1, %v50_v15  ;;  %v872_v30 = vunpack.c.h.bf16 %v1012_v10  ;;  %v59_v10 = vld [vmem:[%s2003_s0 + $0x150] sm:$0xff]  ;;  %v60_v16 = vld [vmem:[%s2003_s0 + $0x158] sm:$0xff] }
  0x2b   :  { %v636_v27 = vmax.f32 %v540_v17, 0.0  ;;  %731 = vst [vmem:[%s2007_s4 + $0xe0] sm:$0xff] %v635_v22  ;;  %v255_v33 = vadd.f32 %v1082_v2, %v152_v24  ;;  %v154_v34 = vmul.f32 %v1077_v1, %v51_v20  ;;  %v875_v35 = vunpack.c.l.bf16 %v1013_v21 }
  0x2c   :  { %v542_v32 = vsub.f32 %v868_v19, %v254_v23  ;;  %v637_v38 = vmax.f32 %v541_v28, 0.0  ;;  %v256_v39 = vadd.f32 %v1082_v2, %v153_v29  ;;  %v155_v40 = vmul.f32 %v1077_v1, %v52_v26  ;;  %v1018_v26 = vld [vmem:[%s2004_s1 + $0xb0] sm:$0xff]  }
  0x2d   :  { %732 = vst [vmem:[%s2007_s4 + $0xe8] sm:$0xff] %v636_v27  ;;  %v876_v41 = vunpack.c.h.bf16 %v1013_v21  ;;  %v543_v43 = vsub.f32 %v871_v25, %v255_v33  ;;  %v257_v44 = vadd.f32 %v1082_v2, %v154_v34  ;;  %v156_v45 = vmul.f32 %v1077_v1, %v53_v31  ;;  %v61_v21 = vld [vmem:[%s2003_s0 + $0x160] sm:$0xff]  ;;  %v62_v27 = vld [vmem:[%s2003_s0 + $0x168] sm:$0xff] }
  0x2e   :  { %v638_v42 = vmax.f32 %v542_v32, 0.0  ;;  %733 = vst [vmem:[%s2007_s4 + $0xf0] sm:$0xff] %v637_v38  ;;  %v544_v47 = vsub.f32 %v872_v30, %v256_v39  ;;  %v258_v48 = vadd.f32 %v1082_v2, %v155_v40  ;;  %v879_v49 = vunpack.c.l.bf16 %v1014_v36 }
  0x2f   :  { %v157_v50 = vmul.f32 %v1077_v1, %v54_v37  ;;  %v639_v53 = vmax.f32 %v543_v43, 0.0  ;;  %v545_v54 = vsub.f32 %v875_v35, %v257_v44  ;;  %v259_v55 = vadd.f32 %v1082_v2, %v156_v45 }
  0x30   :  { %734 = vst [vmem:[%s2007_s4 + $0xf8] sm:$0xff] %v638_v42  ;;  %v880_v56 = vunpack.c.h.bf16 %v1014_v36  ;;  %v640_v57 = vmax.f32 %v544_v47, 0.0  ;;  %v546_v58 = vsub.f32 %v876_v41, %v258_v48  ;;  %v158_v60 = vmul.f32 %v1077_v1, %v55_v46  ;;  %v63_v36 = vld [vmem:[%s2003_s0 + $0x170] sm:$0xff]  ;;  %v1019_v41 = vld [vmem:[%s2004_s1 + $0xb8] sm:$0xff]  }
  0x31   :  { %v260_v59 = vadd.f32 %v1082_v2, %v157_v50  ;;  %735 = vst [vmem:[%s2007_s4 + $0x100] sm:$0xff] %v639_v53  ;;  %v641_v63 = vmax.f32 %v545_v54, 0.0  ;;  %v547_v0 = vsub.f32 %v879_v49, %v259_v55  ;;  %v883_v3 = vunpack.c.l.bf16 %v1015_v51  ;;  %v64_v42 = vld [vmem:[%s2003_s0 + $0x178] sm:$0xff] }
  0x32   :  { %v159_v4 = vmul.f32 %v1077_v1, %v56_v52  ;;  %736 = vst [vmem:[%s2007_s4 + $0x108] sm:$0xff] %v640_v57  ;;  %v642_v6 = vmax.f32 %v546_v58, 0.0  ;;  %v261_v8 = vadd.f32 %v1082_v2, %v158_v60  ;;  %v884_v9 = vunpack.c.h.bf16 %v1015_v51  ;;  %v65_v51 = vld [vmem:[%s2003_s0 + $0x180] sm:$0xff]  ;;  %v66_v57 = vld [vmem:[%s2003_s0 + $0x188] sm:$0xff] }
  0x33   :  { %v548_v7 = vsub.f32 %v880_v56, %v260_v59  ;;  %737 = vst [vmem:[%s2007_s4 + $0x110] sm:$0xff] %v641_v63  ;;  %v643_v12 = vmax.f32 %v547_v0, 0.0  ;;  %v160_v14 = vmul.f32 %v1077_v1, %v57_v61  ;;  %v887_v15 = vunpack.c.l.bf16 %v1016_v62  ;;  %v1020_v52 = vld [vmem:[%s2004_s1 + $0xc0] sm:$0xff]   ;;  %v1021_v63 = vld [vmem:[%s2004_s1 + $0xc8] sm:$0xff]  }
  0x34   :  { %v262_v13 = vadd.f32 %v1082_v2, %v159_v4  ;;  %738 = vst [vmem:[%s2007_s4 + $0x118] sm:$0xff] %v642_v6  ;;  %v549_v18 = vsub.f32 %v883_v3, %v261_v8  ;;  %v161_v19 = vmul.f32 %v1077_v1, %v58_v5  ;;  %v888_v20 = vunpack.c.h.bf16 %v1016_v62  ;;  %v67_v62 = vld [vmem:[%s2003_s0 + $0x190] sm:$0xff]  ;;  %v68_v6 = vld [vmem:[%s2003_s0 + $0x198] sm:$0xff] }
  0x35   :  { %v644_v17 = vmax.f32 %v548_v7, 0.0  ;;  %739 = vst [vmem:[%s2007_s4 + $0x120] sm:$0xff] %v643_v12  ;;  %v263_v23 = vadd.f32 %v1082_v2, %v160_v14  ;;  %v162_v24 = vmul.f32 %v1077_v1, %v59_v10  ;;  %v891_v25 = vunpack.c.l.bf16 %v1017_v11 }
  0x36   :  { %v550_v22 = vsub.f32 %v884_v9, %v262_v13  ;;  %v645_v28 = vmax.f32 %v549_v18, 0.0  ;;  %v264_v29 = vadd.f32 %v1082_v2, %v161_v19  ;;  %v163_v30 = vmul.f32 %v1077_v1, %v60_v16  ;;  %v1022_v16 = vld [vmem:[%s2004_s1 + $0xd0] sm:$0xff]  }
  0x37   :  { %740 = vst [vmem:[%s2007_s4 + $0x128] sm:$0xff] %v644_v17  ;;  %v892_v31 = vunpack.c.h.bf16 %v1017_v11  ;;  %v551_v33 = vsub.f32 %v887_v15, %v263_v23  ;;  %v265_v34 = vadd.f32 %v1082_v2, %v162_v24  ;;  %v164_v35 = vmul.f32 %v1077_v1, %v61_v21  ;;  %v69_v11 = vld [vmem:[%s2003_s0 + $0x1a0] sm:$0xff]  ;;  %v70_v17 = vld [vmem:[%s2003_s0 + $0x1a8] sm:$0xff] }
  0x38   :  { %v646_v32 = vmax.f32 %v550_v22, 0.0  ;;  %741 = vst [vmem:[%s2007_s4 + $0x130] sm:$0xff] %v645_v28  ;;  %v552_v37 = vsub.f32 %v888_v20, %v264_v29  ;;  %v266_v38 = vadd.f32 %v1082_v2, %v163_v30  ;;  %v895_v39 = vunpack.c.l.bf16 %v1018_v26 }
  0x39   :  { %v165_v40 = vmul.f32 %v1077_v1, %v62_v27  ;;  %v647_v43 = vmax.f32 %v551_v33, 0.0  ;;  %v553_v44 = vsub.f32 %v891_v25, %v265_v34  ;;  %v267_v45 = vadd.f32 %v1082_v2, %v164_v35 }
  0x3a   :  { %742 = vst [vmem:[%s2007_s4 + $0x138] sm:$0xff] %v646_v32  ;;  %v896_v46 = vunpack.c.h.bf16 %v1018_v26  ;;  %v648_v47 = vmax.f32 %v552_v37, 0.0  ;;  %v554_v48 = vsub.f32 %v892_v31, %v266_v38  ;;  %v166_v50 = vmul.f32 %v1077_v1, %v63_v36  ;;  %v71_v26 = vld [vmem:[%s2003_s0 + $0x1b0] sm:$0xff]  ;;  %v1023_v31 = vld [vmem:[%s2004_s1 + $0xd8] sm:$0xff]  }
  0x3b   :  { %v268_v49 = vadd.f32 %v1082_v2, %v165_v40  ;;  %743 = vst [vmem:[%s2007_s4 + $0x140] sm:$0xff] %v647_v43  ;;  %v649_v53 = vmax.f32 %v553_v44, 0.0  ;;  %v555_v54 = vsub.f32 %v895_v39, %v267_v45  ;;  %v899_v55 = vunpack.c.l.bf16 %v1019_v41  ;;  %v72_v32 = vld [vmem:[%s2003_s0 + $0x1b8] sm:$0xff] }
  0x3c   :  { %v167_v56 = vmul.f32 %v1077_v1, %v64_v42  ;;  %744 = vst [vmem:[%s2007_s4 + $0x148] sm:$0xff] %v648_v47  ;;  %v650_v58 = vmax.f32 %v554_v48, 0.0  ;;  %v269_v60 = vadd.f32 %v1082_v2, %v166_v50  ;;  %v900_v61 = vunpack.c.h.bf16 %v1019_v41  ;;  %v73_v41 = vld [vmem:[%s2003_s0 + $0x1c0] sm:$0xff]  ;;  %v74_v47 = vld [vmem:[%s2003_s0 + $0x1c8] sm:$0xff] }
  0x3d   :  { %v556_v59 = vsub.f32 %v896_v46, %v268_v49  ;;  %745 = vst [vmem:[%s2007_s4 + $0x150] sm:$0xff] %v649_v53  ;;  %v651_v0 = vmax.f32 %v555_v54, 0.0  ;;  %v168_v4 = vmul.f32 %v1077_v1, %v65_v51  ;;  %v903_v5 = vunpack.c.l.bf16 %v1020_v52  ;;  %v1024_v42 = vld [vmem:[%s2004_s1 + $0xe0] sm:$0xff]   ;;  %v1025_v53 = vld [vmem:[%s2004_s1 + $0xe8] sm:$0xff]  }
  0x3e   :  { %v270_v3 = vadd.f32 %v1082_v2, %v167_v56  ;;  %746 = vst [vmem:[%s2007_s4 + $0x158] sm:$0xff] %v650_v58  ;;  %v557_v8 = vsub.f32 %v899_v55, %v269_v60  ;;  %v169_v9 = vmul.f32 %v1077_v1, %v66_v57  ;;  %v904_v10 = vunpack.c.h.bf16 %v1020_v52  ;;  %v75_v52 = vld [vmem:[%s2003_s0 + $0x1d0] sm:$0xff]  ;;  %v76_v58 = vld [vmem:[%s2003_s0 + $0x1d8] sm:$0xff] }
  0x3f   :  { %v652_v7 = vmax.f32 %v556_v59, 0.0  ;;  %747 = vst [vmem:[%s2007_s4 + $0x160] sm:$0xff] %v651_v0  ;;  %v271_v13 = vadd.f32 %v1082_v2, %v168_v4  ;;  %v170_v14 = vmul.f32 %v1077_v1, %v67_v62  ;;  %v907_v15 = vunpack.c.l.bf16 %v1021_v63 }
  0x40   :  { %v558_v12 = vsub.f32 %v900_v61, %v270_v3  ;;  %v653_v18 = vmax.f32 %v557_v8, 0.0  ;;  %v272_v19 = vadd.f32 %v1082_v2, %v169_v9  ;;  %v171_v20 = vmul.f32 %v1077_v1, %v68_v6  ;;  %v1026_v6 = vld [vmem:[%s2004_s1 + $0xf0] sm:$0xff]  }
  0x41   :  { %748 = vst [vmem:[%s2007_s4 + $0x168] sm:$0xff] %v652_v7  ;;  %v908_v21 = vunpack.c.h.bf16 %v1021_v63  ;;  %v559_v23 = vsub.f32 %v903_v5, %v271_v13  ;;  %v273_v24 = vadd.f32 %v1082_v2, %v170_v14  ;;  %v172_v25 = vmul.f32 %v1077_v1, %v69_v11  ;;  %v77_v63 = vld [vmem:[%s2003_s0 + $0x1e0] sm:$0xff]  ;;  %v78_v7 = vld [vmem:[%s2003_s0 + $0x1e8] sm:$0xff] }
  0x42   :  { %v654_v22 = vmax.f32 %v558_v12, 0.0  ;;  %749 = vst [vmem:[%s2007_s4 + $0x170] sm:$0xff] %v653_v18  ;;  %v560_v27 = vsub.f32 %v904_v10, %v272_v19  ;;  %v274_v28 = vadd.f32 %v1082_v2, %v171_v20  ;;  %v911_v29 = vunpack.c.l.bf16 %v1022_v16 }
  0x43   :  { %v173_v30 = vmul.f32 %v1077_v1, %v70_v17  ;;  %v655_v33 = vmax.f32 %v559_v23, 0.0  ;;  %v561_v34 = vsub.f32 %v907_v15, %v273_v24  ;;  %v275_v35 = vadd.f32 %v1082_v2, %v172_v25 }
  0x44   :  { %750 = vst [vmem:[%s2007_s4 + $0x178] sm:$0xff] %v654_v22  ;;  %v912_v36 = vunpack.c.h.bf16 %v1022_v16  ;;  %v656_v37 = vmax.f32 %v560_v27, 0.0  ;;  %v562_v38 = vsub.f32 %v908_v21, %v274_v28  ;;  %v174_v40 = vmul.f32 %v1077_v1, %v71_v26  ;;  %v79_v16 = vld [vmem:[%s2003_s0 + $0x1f0] sm:$0xff]  ;;  %v1027_v21 = vld [vmem:[%s2004_s1 + $0xf8] sm:$0xff]  }
  0x45   :  { %v276_v39 = vadd.f32 %v1082_v2, %v173_v30  ;;  %751 = vst [vmem:[%s2007_s4 + $0x180] sm:$0xff] %v655_v33  ;;  %v657_v43 = vmax.f32 %v561_v34, 0.0  ;;  %v563_v44 = vsub.f32 %v911_v29, %v275_v35  ;;  %v915_v45 = vunpack.c.l.bf16 %v1023_v31  ;;  %v80_v22 = vld [vmem:[%s2003_s0 + $0x1f8] sm:$0xff] }
  0x46   :  { %v175_v46 = vmul.f32 %v1077_v1, %v72_v32  ;;  %752 = vst [vmem:[%s2007_s4 + $0x188] sm:$0xff] %v656_v37  ;;  %v658_v48 = vmax.f32 %v562_v38, 0.0  ;;  %v277_v50 = vadd.f32 %v1082_v2, %v174_v40  ;;  %v916_v51 = vunpack.c.h.bf16 %v1023_v31  ;;  %v81_v31 = vld [vmem:[%s2003_s0 + $0x200] sm:$0xff]  ;;  %v82_v37 = vld [vmem:[%s2003_s0 + $0x208] sm:$0xff] }
  0x47   :  { %v564_v49 = vsub.f32 %v912_v36, %v276_v39  ;;  %753 = vst [vmem:[%s2007_s4 + $0x190] sm:$0xff] %v657_v43  ;;  %v659_v54 = vmax.f32 %v563_v44, 0.0  ;;  %v176_v56 = vmul.f32 %v1077_v1, %v73_v41  ;;  %v919_v57 = vunpack.c.l.bf16 %v1024_v42  ;;  %v1028_v32 = vld [vmem:[%s2004_s1 + $0x100] sm:$0xff]   ;;  %v1029_v43 = vld [vmem:[%s2004_s1 + $0x108] sm:$0xff]  }
  0x48   :  { %v278_v55 = vadd.f32 %v1082_v2, %v175_v46  ;;  %754 = vst [vmem:[%s2007_s4 + $0x198] sm:$0xff] %v658_v48  ;;  %v565_v60 = vsub.f32 %v915_v45, %v277_v50  ;;  %v177_v61 = vmul.f32 %v1077_v1, %v74_v47  ;;  %v920_v62 = vunpack.c.h.bf16 %v1024_v42  ;;  %v83_v42 = vld [vmem:[%s2003_s0 + $0x210] sm:$0xff]  ;;  %v84_v48 = vld [vmem:[%s2003_s0 + $0x218] sm:$0xff] }
  0x49   :  { %v660_v59 = vmax.f32 %v564_v49, 0.0  ;;  %755 = vst [vmem:[%s2007_s4 + $0x1a0] sm:$0xff] %v659_v54  ;;  %v279_v3 = vadd.f32 %v1082_v2, %v176_v56  ;;  %v178_v4 = vmul.f32 %v1077_v1, %v75_v52  ;;  %v923_v5 = vunpack.c.l.bf16 %v1025_v53 }
  0x4a   :  { %v566_v0 = vsub.f32 %v916_v51, %v278_v55  ;;  %v661_v8 = vmax.f32 %v565_v60, 0.0  ;;  %v280_v9 = vadd.f32 %v1082_v2, %v177_v61  ;;  %v179_v10 = vmul.f32 %v1077_v1, %v76_v58  ;;  %v1030_v58 = vld [vmem:[%s2004_s1 + $0x110] sm:$0xff]  }
  0x4b   :  { %756 = vst [vmem:[%s2007_s4 + $0x1a8] sm:$0xff] %v660_v59  ;;  %v924_v11 = vunpack.c.h.bf16 %v1025_v53  ;;  %v567_v13 = vsub.f32 %v919_v57, %v279_v3  ;;  %v281_v14 = vadd.f32 %v1082_v2, %v178_v4  ;;  %v180_v15 = vmul.f32 %v1077_v1, %v77_v63  ;;  %v85_v53 = vld [vmem:[%s2003_s0 + $0x220] sm:$0xff]  ;;  %v86_v59 = vld [vmem:[%s2003_s0 + $0x228] sm:$0xff] }
  0x4c   :  { %v662_v12 = vmax.f32 %v566_v0, 0.0  ;;  %757 = vst [vmem:[%s2007_s4 + $0x1b0] sm:$0xff] %v661_v8  ;;  %v568_v17 = vsub.f32 %v920_v62, %v280_v9  ;;  %v282_v18 = vadd.f32 %v1082_v2, %v179_v10  ;;  %v927_v19 = vunpack.c.l.bf16 %v1026_v6 }
  0x4d   :  { %v181_v20 = vmul.f32 %v1077_v1, %v78_v7  ;;  %v663_v23 = vmax.f32 %v567_v13, 0.0  ;;  %v569_v24 = vsub.f32 %v923_v5, %v281_v14  ;;  %v283_v25 = vadd.f32 %v1082_v2, %v180_v15 }
  0x4e   :  { %758 = vst [vmem:[%s2007_s4 + $0x1b8] sm:$0xff] %v662_v12  ;;  %v928_v26 = vunpack.c.h.bf16 %v1026_v6  ;;  %v664_v27 = vmax.f32 %v568_v17, 0.0  ;;  %v570_v28 = vsub.f32 %v924_v11, %v282_v18  ;;  %v182_v30 = vmul.f32 %v1077_v1, %v79_v16  ;;  %v87_v6 = vld [vmem:[%s2003_s0 + $0x230] sm:$0xff]  ;;  %v1031_v11 = vld [vmem:[%s2004_s1 + $0x118] sm:$0xff]  }
  0x4f   :  { %v284_v29 = vadd.f32 %v1082_v2, %v181_v20  ;;  %759 = vst [vmem:[%s2007_s4 + $0x1c0] sm:$0xff] %v663_v23  ;;  %v665_v33 = vmax.f32 %v569_v24, 0.0  ;;  %v571_v34 = vsub.f32 %v927_v19, %v283_v25  ;;  %v931_v35 = vunpack.c.l.bf16 %v1027_v21  ;;  %v88_v12 = vld [vmem:[%s2003_s0 + $0x238] sm:$0xff]  ;;  %v1745_v19 = vld [vmem:[%s2005_s2] ss:$0 sm:$0xff] }
  0x50   :  { %v183_v36 = vmul.f32 %v1077_v1, %v80_v22  ;;  %760 = vst [vmem:[%s2007_s4 + $0x1c8] sm:$0xff] %v664_v27  ;;  %v666_v38 = vmax.f32 %v570_v28, 0.0  ;;  %v285_v40 = vadd.f32 %v1082_v2, %v182_v30  ;;  %v932_v41 = vunpack.c.h.bf16 %v1027_v21  ;;  %v89_v21 = vld [vmem:[%s2003_s0 + $0x240] sm:$0xff]  ;;  %v90_v27 = vld [vmem:[%s2003_s0 + $0x248] sm:$0xff] }
  0x51   :  { %v572_v39 = vsub.f32 %v928_v26, %v284_v29  ;;  %761 = vst [vmem:[%s2007_s4 + $0x1d0] sm:$0xff] %v665_v33  ;;  %v667_v44 = vmax.f32 %v571_v34, 0.0  ;;  %v184_v46 = vmul.f32 %v1077_v1, %v81_v31  ;;  %v935_v47 = vunpack.c.l.bf16 %v1028_v32  ;;  %v1032_v22 = vld [vmem:[%s2004_s1 + $0x120] sm:$0xff]   ;;  %v1033_v33 = vld [vmem:[%s2004_s1 + $0x128] sm:$0xff]  }
  0x52   :  { %v286_v45 = vadd.f32 %v1082_v2, %v183_v36  ;;  %762 = vst [vmem:[%s2007_s4 + $0x1d8] sm:$0xff] %v666_v38  ;;  %v573_v50 = vsub.f32 %v931_v35, %v285_v40  ;;  %v185_v51 = vmul.f32 %v1077_v1, %v82_v37  ;;  %v936_v52 = vunpack.c.h.bf16 %v1028_v32  ;;  %v91_v32 = vld [vmem:[%s2003_s0 + $0x250] sm:$0xff]  ;;  %v92_v38 = vld [vmem:[%s2003_s0 + $0x258] sm:$0xff] }
  0x53   :  { %v668_v49 = vmax.f32 %v572_v39, 0.0  ;;  %763 = vst [vmem:[%s2007_s4 + $0x1e0] sm:$0xff] %v667_v44  ;;  %v287_v55 = vadd.f32 %v1082_v2, %v184_v46  ;;  %v186_v56 = vmul.f32 %v1077_v1, %v83_v42  ;;  %v939_v57 = vunpack.c.l.bf16 %v1029_v43 }
  0x54   :  { %v574_v54 = vsub.f32 %v932_v41, %v286_v45  ;;  %v669_v60 = vmax.f32 %v573_v50, 0.0  ;;  %v288_v61 = vadd.f32 %v1082_v2, %v185_v51  ;;  %v187_v62 = vmul.f32 %v1077_v1, %v84_v48  ;;  %v1034_v48 = vld [vmem:[%s2004_s1 + $0x130] sm:$0xff]  }
  0x55   :  { %764 = vst [vmem:[%s2007_s4 + $0x1e8] sm:$0xff] %v668_v49  ;;  %v940_v63 = vunpack.c.h.bf16 %v1029_v43  ;;  %v575_v3 = vsub.f32 %v935_v47, %v287_v55  ;;  %v289_v4 = vadd.f32 %v1082_v2, %v186_v56  ;;  %v188_v5 = vmul.f32 %v1077_v1, %v85_v53  ;;  %v93_v43 = vld [vmem:[%s2003_s0 + $0x260] sm:$0xff]  ;;  %v94_v49 = vld [vmem:[%s2003_s0 + $0x268] sm:$0xff] }
  0x56   :  { %v670_v0 = vmax.f32 %v574_v54, 0.0  ;;  %765 = vst [vmem:[%s2007_s4 + $0x1f0] sm:$0xff] %v669_v60  ;;  %v576_v7 = vsub.f32 %v936_v52, %v288_v61  ;;  %v290_v8 = vadd.f32 %v1082_v2, %v187_v62  ;;  %v943_v9 = vunpack.c.l.bf16 %v1030_v58  ;;  %v1738_v2 = vld [vmem:[%s2006_s3] ss:$0 sm:$0xff] }
  0x57   :  { %v189_v10 = vmul.f32 %v1077_v1, %v86_v59  ;;  %v671_v13 = vmax.f32 %v575_v3, 0.0  ;;  %v577_v14 = vsub.f32 %v939_v57, %v289_v4  ;;  %v291_v1 = vadd.f32 %v1738_v2, %v188_v5 }
  0x58   :  { %766 = vst [vmem:[%s2007_s4 + $0x1f8] sm:$0xff] %v670_v0  ;;  %v944_v15 = vunpack.c.h.bf16 %v1030_v58  ;;  %v672_v16 = vmax.f32 %v576_v7, 0.0  ;;  %v578_v17 = vsub.f32 %v940_v63, %v290_v8  ;;  %v190_v20 = vmul.f32 %v1745_v19, %v87_v6  ;;  %v95_v58 = vld [vmem:[%s2003_s0 + $0x270] sm:$0xff]  ;;  %v1035_v63 = vld [vmem:[%s2004_s1 + $0x138] sm:$0xff]  }
  0x59   :  { %v292_v18 = vadd.f32 %v1738_v2, %v189_v10  ;;  %767 = vst [vmem:[%s2007_s4 + $0x200] sm:$0xff] %v671_v13  ;;  %v673_v23 = vmax.f32 %v577_v14, 0.0  ;;  %v579_v24 = vsub.f32 %v943_v9, %v291_v1  ;;  %v947_v25 = vunpack.c.l.bf16 %v1031_v11  ;;  %v96_v0 = vld [vmem:[%s2003_s0 + $0x278] sm:$0xff] }
  0x5a   :  { %v191_v26 = vmul.f32 %v1745_v19, %v88_v12  ;;  %768 = vst [vmem:[%s2007_s4 + $0x208] sm:$0xff] %v672_v16  ;;  %v674_v28 = vmax.f32 %v578_v17, 0.0  ;;  %v293_v30 = vadd.f32 %v1738_v2, %v190_v20  ;;  %v948_v31 = vunpack.c.h.bf16 %v1031_v11  ;;  %v97_v11 = vld [vmem:[%s2003_s0 + $0x280] sm:$0xff]  ;;  %v98_v16 = vld [vmem:[%s2003_s0 + $0x288] sm:$0xff] }
  0x5b   :  { %v580_v29 = vsub.f32 %v944_v15, %v292_v18  ;;  %769 = vst [vmem:[%s2007_s4 + $0x210] sm:$0xff] %v673_v23  ;;  %v675_v34 = vmax.f32 %v579_v24, 0.0  ;;  %v192_v36 = vmul.f32 %v1745_v19, %v89_v21  ;;  %v951_v37 = vunpack.c.l.bf16 %v1032_v22  ;;  %v1036_v12 = vld [vmem:[%s2004_s1 + $0x140] sm:$0xff]   ;;  %v1037_v23 = vld [vmem:[%s2004_s1 + $0x148] sm:$0xff]  }
  0x5c   :  { %v294_v35 = vadd.f32 %v1738_v2, %v191_v26  ;;  %770 = vst [vmem:[%s2007_s4 + $0x218] sm:$0xff] %v674_v28  ;;  %v581_v40 = vsub.f32 %v947_v25, %v293_v30  ;;  %v193_v41 = vmul.f32 %v1745_v19, %v90_v27  ;;  %v952_v42 = vunpack.c.h.bf16 %v1032_v22  ;;  %v99_v22 = vld [vmem:[%s2003_s0 + $0x290] sm:$0xff]  ;;  %v100_v28 = vld [vmem:[%s2003_s0 + $0x298] sm:$0xff] }
  0x5d   :  { %v676_v39 = vmax.f32 %v580_v29, 0.0  ;;  %771 = vst [vmem:[%s2007_s4 + $0x220] sm:$0xff] %v675_v34  ;;  %v295_v45 = vadd.f32 %v1738_v2, %v192_v36  ;;  %v194_v46 = vmul.f32 %v1745_v19, %v91_v32  ;;  %v955_v47 = vunpack.c.l.bf16 %v1033_v33 }
  0x5e   :  { %v582_v44 = vsub.f32 %v948_v31, %v294_v35  ;;  %v677_v50 = vmax.f32 %v581_v40, 0.0  ;;  %v296_v51 = vadd.f32 %v1738_v2, %v193_v41  ;;  %v195_v52 = vmul.f32 %v1745_v19, %v92_v38  ;;  %v1038_v38 = vld [vmem:[%s2004_s1 + $0x150] sm:$0xff]  }
  0x5f   :  { %772 = vst [vmem:[%s2007_s4 + $0x228] sm:$0xff] %v676_v39  ;;  %v956_v53 = vunpack.c.h.bf16 %v1033_v33  ;;  %v583_v55 = vsub.f32 %v951_v37, %v295_v45  ;;  %v297_v56 = vadd.f32 %v1738_v2, %v194_v46  ;;  %v196_v57 = vmul.f32 %v1745_v19, %v93_v43  ;;  %v101_v33 = vld [vmem:[%s2003_s0 + $0x2a0] sm:$0xff]  ;;  %v102_v39 = vld [vmem:[%s2003_s0 + $0x2a8] sm:$0xff] }
  0x60   :  { %v678_v54 = vmax.f32 %v582_v44, 0.0  ;;  %773 = vst [vmem:[%s2007_s4 + $0x230] sm:$0xff] %v677_v50  ;;  %v584_v59 = vsub.f32 %v952_v42, %v296_v51  ;;  %v298_v60 = vadd.f32 %v1738_v2, %v195_v52  ;;  %v959_v61 = vunpack.c.l.bf16 %v1034_v48 }
  0x61   :  { %v197_v62 = vmul.f32 %v1745_v19, %v94_v49  ;;  %v679_v3 = vmax.f32 %v583_v55, 0.0  ;;  %v585_v4 = vsub.f32 %v955_v47, %v297_v56  ;;  %v299_v5 = vadd.f32 %v1738_v2, %v196_v57 }
  0x62   :  { %774 = vst [vmem:[%s2007_s4 + $0x238] sm:$0xff] %v678_v54  ;;  %v960_v6 = vunpack.c.h.bf16 %v1034_v48  ;;  %v680_v7 = vmax.f32 %v584_v59, 0.0  ;;  %v586_v8 = vsub.f32 %v956_v53, %v298_v60  ;;  %v198_v10 = vmul.f32 %v1745_v19, %v95_v58  ;;  %v103_v48 = vld [vmem:[%s2003_s0 + $0x2b0] sm:$0xff]  ;;  %v1039_v53 = vld [vmem:[%s2004_s1 + $0x158] sm:$0xff]  }
  0x63   :  { %v300_v9 = vadd.f32 %v1738_v2, %v197_v62  ;;  %775 = vst [vmem:[%s2007_s4 + $0x240] sm:$0xff] %v679_v3  ;;  %v681_v13 = vmax.f32 %v585_v4, 0.0  ;;  %v587_v14 = vsub.f32 %v959_v61, %v299_v5  ;;  %v963_v1 = vunpack.c.l.bf16 %v1035_v63  ;;  %v104_v54 = vld [vmem:[%s2003_s0 + $0x2b8] sm:$0xff] }
  0x64   :  { %v199_v15 = vmul.f32 %v1745_v19, %v96_v0  ;;  %776 = vst [vmem:[%s2007_s4 + $0x248] sm:$0xff] %v680_v7  ;;  %v682_v17 = vmax.f32 %v586_v8, 0.0  ;;  %v301_v20 = vadd.f32 %v1738_v2, %v198_v10  ;;  %v964_v21 = vunpack.c.h.bf16 %v1035_v63  ;;  %v105_v63 = vld [vmem:[%s2003_s0 + $0x2c0] sm:$0xff]  ;;  %v106_v7 = vld [vmem:[%s2003_s0 + $0x2c8] sm:$0xff] }
  0x65   :  { %v588_v18 = vsub.f32 %v960_v6, %v300_v9  ;;  %777 = vst [vmem:[%s2007_s4 + $0x250] sm:$0xff] %v681_v13  ;;  %v683_v24 = vmax.f32 %v587_v14, 0.0  ;;  %v200_v26 = vmul.f32 %v1745_v19, %v97_v11  ;;  %v967_v27 = vunpack.c.l.bf16 %v1036_v12  ;;  %v1040_v0 = vld [vmem:[%s2004_s1 + $0x160] sm:$0xff]   ;;  %v1041_v13 = vld [vmem:[%s2004_s1 + $0x168] sm:$0xff]  }
  0x66   :  { %v302_v25 = vadd.f32 %v1738_v2, %v199_v15  ;;  %778 = vst [vmem:[%s2007_s4 + $0x258] sm:$0xff] %v682_v17  ;;  %v589_v30 = vsub.f32 %v963_v1, %v301_v20  ;;  %v201_v31 = vmul.f32 %v1745_v19, %v98_v16  ;;  %v968_v32 = vunpack.c.h.bf16 %v1036_v12  ;;  %v107_v12 = vld [vmem:[%s2003_s0 + $0x2d0] sm:$0xff]  ;;  %v108_v17 = vld [vmem:[%s2003_s0 + $0x2d8] sm:$0xff] }
  0x67   :  { %v684_v29 = vmax.f32 %v588_v18, 0.0  ;;  %779 = vst [vmem:[%s2007_s4 + $0x260] sm:$0xff] %v683_v24  ;;  %v303_v35 = vadd.f32 %v1738_v2, %v200_v26  ;;  %v202_v36 = vmul.f32 %v1745_v19, %v99_v22  ;;  %v971_v37 = vunpack.c.l.bf16 %v1037_v23 }
  0x68   :  { %v590_v34 = vsub.f32 %v964_v21, %v302_v25  ;;  %v685_v40 = vmax.f32 %v589_v30, 0.0  ;;  %v304_v41 = vadd.f32 %v1738_v2, %v201_v31  ;;  %v203_v42 = vmul.f32 %v1745_v19, %v100_v28  ;;  %v1042_v28 = vld [vmem:[%s2004_s1 + $0x170] sm:$0xff]  }
  0x69   :  { %780 = vst [vmem:[%s2007_s4 + $0x268] sm:$0xff] %v684_v29  ;;  %v972_v43 = vunpack.c.h.bf16 %v1037_v23  ;;  %v591_v45 = vsub.f32 %v967_v27, %v303_v35  ;;  %v305_v46 = vadd.f32 %v1738_v2, %v202_v36  ;;  %v204_v47 = vmul.f32 %v1745_v19, %v101_v33  ;;  %v109_v23 = vld [vmem:[%s2003_s0 + $0x2e0] sm:$0xff]  ;;  %v110_v29 = vld [vmem:[%s2003_s0 + $0x2e8] sm:$0xff] }
  0x6a   :  { %v686_v44 = vmax.f32 %v590_v34, 0.0  ;;  %781 = vst [vmem:[%s2007_s4 + $0x270] sm:$0xff] %v685_v40  ;;  %v592_v49 = vsub.f32 %v968_v32, %v304_v41  ;;  %v306_v50 = vadd.f32 %v1738_v2, %v203_v42  ;;  %v975_v51 = vunpack.c.l.bf16 %v1038_v38 }
  0x6b   :  { %v205_v52 = vmul.f32 %v1745_v19, %v102_v39  ;;  %v687_v55 = vmax.f32 %v591_v45, 0.0  ;;  %v593_v56 = vsub.f32 %v971_v37, %v305_v46  ;;  %v307_v57 = vadd.f32 %v1738_v2, %v204_v47 }
  0x6c   :  { %782 = vst [vmem:[%s2007_s4 + $0x278] sm:$0xff] %v686_v44  ;;  %v976_v58 = vunpack.c.h.bf16 %v1038_v38  ;;  %v688_v59 = vmax.f32 %v592_v49, 0.0  ;;  %v594_v60 = vsub.f32 %v972_v43, %v306_v50  ;;  %v206_v62 = vmul.f32 %v1745_v19, %v103_v48  ;;  %v111_v38 = vld [vmem:[%s2003_s0 + $0x2f0] sm:$0xff]  ;;  %v1043_v43 = vld [vmem:[%s2004_s1 + $0x178] sm:$0xff]  }
  0x6d   :  { %v308_v61 = vadd.f32 %v1738_v2, %v205_v52  ;;  %783 = vst [vmem:[%s2007_s4 + $0x280] sm:$0xff] %v687_v55  ;;  %v689_v3 = vmax.f32 %v593_v56, 0.0  ;;  %v595_v4 = vsub.f32 %v975_v51, %v307_v57  ;;  %v979_v5 = vunpack.c.l.bf16 %v1039_v53  ;;  %v112_v44 = vld [vmem:[%s2003_s0 + $0x2f8] sm:$0xff] }
  0x6e   :  { %v207_v6 = vmul.f32 %v1745_v19, %v104_v54  ;;  %784 = vst [vmem:[%s2007_s4 + $0x288] sm:$0xff] %v688_v59  ;;  %v690_v8 = vmax.f32 %v594_v60, 0.0  ;;  %v309_v10 = vadd.f32 %v1738_v2, %v206_v62  ;;  %v980_v11 = vunpack.c.h.bf16 %v1039_v53 }
  0x6f   :  { %v596_v9 = vsub.f32 %v976_v58, %v308_v61  ;;  %785 = vst [vmem:[%s2007_s4 + $0x290] sm:$0xff] %v689_v3  ;;  %v691_v14 = vmax.f32 %v595_v4, 0.0  ;;  %v208_v15 = vmul.f32 %v1745_v19, %v105_v63  ;;  %v983_v16 = vunpack.c.l.bf16 %v1040_v0 }
  0x70   :  { %v310_v1 = vadd.f32 %v1738_v2, %v207_v6  ;;  %786 = vst [vmem:[%s2007_s4 + $0x298] sm:$0xff] %v690_v8  ;;  %v597_v20 = vsub.f32 %v979_v5, %v309_v10  ;;  %v209_v21 = vmul.f32 %v1745_v19, %v106_v7  ;;  %v984_v22 = vunpack.c.h.bf16 %v1040_v0 }
  0x71   :  { %v692_v18 = vmax.f32 %v596_v9, 0.0  ;;  %787 = vst [vmem:[%s2007_s4 + $0x2a0] sm:$0xff] %v691_v14  ;;  %v311_v25 = vadd.f32 %v1738_v2, %v208_v15  ;;  %v210_v26 = vmul.f32 %v1745_v19, %v107_v12  ;;  %v987_v27 = vunpack.c.l.bf16 %v1041_v13 }
  0x72   :  { %v598_v24 = vsub.f32 %v980_v11, %v310_v1  ;;  %v693_v30 = vmax.f32 %v597_v20, 0.0  ;;  %v312_v31 = vadd.f32 %v1738_v2, %v209_v21  ;;  %v211_v32 = vmul.f32 %v1745_v19, %v108_v17 }
  0x73   :  { %788 = vst [vmem:[%s2007_s4 + $0x2a8] sm:$0xff] %v692_v18  ;;  %v988_v33 = vunpack.c.h.bf16 %v1041_v13  ;;  %v599_v35 = vsub.f32 %v983_v16, %v311_v25  ;;  %v313_v36 = vadd.f32 %v1738_v2, %v210_v26  ;;  %v212_v37 = vmul.f32 %v1745_v19, %v109_v23 }
  0x74   :  { %v694_v34 = vmax.f32 %v598_v24, 0.0  ;;  %789 = vst [vmem:[%s2007_s4 + $0x2b0] sm:$0xff] %v693_v30  ;;  %v600_v39 = vsub.f32 %v984_v22, %v312_v31  ;;  %v314_v40 = vadd.f32 %v1738_v2, %v211_v32  ;;  %v991_v41 = vunpack.c.l.bf16 %v1042_v28 }
  0x75   :  { %v213_v42 = vmul.f32 %v1745_v19, %v110_v29  ;;  %v695_v45 = vmax.f32 %v599_v35, 0.0  ;;  %v601_v46 = vsub.f32 %v987_v27, %v313_v36  ;;  %v315_v47 = vadd.f32 %v1738_v2, %v212_v37 }
  0x76   :  { %790 = vst [vmem:[%s2007_s4 + $0x2b8] sm:$0xff] %v694_v34  ;;  %v992_v48 = vunpack.c.h.bf16 %v1042_v28  ;;  %v696_v49 = vmax.f32 %v600_v39, 0.0  ;;  %v602_v50 = vsub.f32 %v988_v33, %v314_v40  ;;  %v214_v52 = vmul.f32 %v1745_v19, %v111_v38 }
  0x77   :  { %v316_v51 = vadd.f32 %v1738_v2, %v213_v42  ;;  %791 = vst [vmem:[%s2007_s4 + $0x2c0] sm:$0xff] %v695_v45  ;;  %v697_v53 = vmax.f32 %v601_v46, 0.0  ;;  %v603_v54 = vsub.f32 %v991_v41, %v315_v47  ;;  %v995_v55 = vunpack.c.l.bf16 %v1043_v43 }
  0x78   :  { %v215_v56 = vmul.f32 %v1745_v19, %v112_v44  ;;  %792 = vst [vmem:[%s2007_s4 + $0x2c8] sm:$0xff] %v696_v49  ;;  %v698_v57 = vmax.f32 %v602_v50, 0.0  ;;  %v317_v59 = vadd.f32 %v1738_v2, %v214_v52  ;;  %v996_v60 = vunpack.c.h.bf16 %v1043_v43 }
  0x79   :  { %v604_v58 = vsub.f32 %v992_v48, %v316_v51  ;;  %793 = vst [vmem:[%s2007_s4 + $0x2d0] sm:$0xff] %v697_v53  ;;  %v699_v61 = vmax.f32 %v603_v54, 0.0 }
  0x7a   :  { %v318_v62 = vadd.f32 %v1738_v2, %v215_v56  ;;  %794 = vst [vmem:[%s2007_s4 + $0x2d8] sm:$0xff] %v698_v57  ;;  %v605_v63 = vsub.f32 %v995_v55, %v317_v59 }
  0x7b   :  { %v700_v19 = vmax.f32 %v604_v58, 0.0  ;;  %795 = vst [vmem:[%s2007_s4 + $0x2e0] sm:$0xff] %v699_v61 }
  0x7c   :  { %v606_v0 = vsub.f32 %v996_v60, %v318_v62  ;;  %v701_v3 = vmax.f32 %v605_v63, 0.0 }
  0x7d   :  { %796 = vst [vmem:[%s2007_s4 + $0x2e8] sm:$0xff] %v700_v19 }
  0x7e   :  { %v702_v4 = vmax.f32 %v606_v0, 0.0  ;;  %797 = vst [vmem:[%s2007_s4 + $0x2f0] sm:$0xff] %v701_v3 }
  0x80   :  { %798 = vst [vmem:[%s2007_s4 + $0x2f8] sm:$0xff] %v702_v4 }

// kernel: basic_block_forward.3
= control target key start
LH: loop header
LB: loop body
LE: loop exit
PB: predicated region body
PF: predicated region fallthrough
CT: control target
= control target key end

     0   :  { %s7953_s21 = smov 0   ;;  %s9970_s0 = inlined_call_operand.vmem [shape: bf16[2,384,128], index: 0, kind: input, shape index: {}]   ;;  %s9971_s1 = inlined_call_operand.vmem [shape: bf16[9,128,128], index: 1, kind: input, shape index: {}]   ;;  %s9972_s2 = inlined_call_operand.vmem [shape: f32[1,128], index: 2, kind: input, shape index: {}]   ;;  %s9973_s3 = inlined_call_operand.vmem [shape: f32[1,128], index: 3, kind: input, shape index: {}]   ;;  %s9974_s4 = inlined_call_operand.vmem [shape: f32[384,1], index: 4, kind: input, shape index: {}]   ;;  %s9975_s5 = inlined_call_operand.vmem [shape: bf16[2,384,128], index: 5, kind: output, shape index: {0}]   ;;  %s9976_s6 = inlined_call_operand.vmem [shape: f32[2,2,128], index: 6, kind: output, shape index: {1}]  }
   0x1 LB: > { %s6485_s2 = sadd.s32 4294967295, %s7915_s21   ;;  %p6489_p0 = scmp.ge.s32.totalorder %s7915_s21, 1  ;;  %s7915_s21 = sphi %s7953_s21, %s17_s21  }
   0x2   : > { %p215_p1 = scmp.lt.s32.totalorder %s7915_s21, 3 }
   0x4   : > { %p216_p2 = pnand %p6489_p0, %p215_p1 }
   0x6   : > { %219 = sbr.rel (%p216_p2) target bundleno = 712 (0x2c8), region = 40 }
   0xb   : > { %v7667_v0 = vld [vmem:[%s9971_s1 + $0x38] sm:$0xff]   ;;  %p249_p3 = scmp.lt.s32.totalorder %s6485_s2, 1  ;;  %v7668_v1 = vld [vmem:[%s9971_s1 + $0x30] sm:$0xff]   ;;  %v7669_v2 = vld [vmem:[%s9971_s1 + $0x28] sm:$0xff]   ;;  %vm1479_vm0 = vcmask 1046528   ;;  %vm3219_vm3 = vcmask 1045504  }
   0xc   : > { %7639 = vmatprep.subr.bf16.mxu1 %v7667_v0  ;;  %7171 = vmatprep.subr.bf16.mxu0 %v7667_v0  ;;  %v7670_v3 = vld [vmem:[%s9971_s1 + $0x20] sm:$0xff]   ;;  %v7671_v6 = vld [vmem:[%s9971_s1 + $0x18] sm:$0xff]   ;;  %v7672_v7 = vld [vmem:[%s9971_s1 + $0x10] sm:$0xff]   ;;  %vm832_vm1 = vsmask.f32 7424  ;;  %vm4959_vm4 = vcmask 1044480  }
   0xd   : > { %s10126_s2 = smov (!%p249_p3, %s6485_s2), 1  ;;  %7647 = vmatpush3.bf16.msra.mxu1 %v7667_v0  ;;  %7172 = vmatpush3.bf16.msra.mxu0 %v7667_v0  ;;  %v7673_v8 = vld [vmem:[%s9971_s1 + $0x8] sm:$0xff]   ;;  %v7674_v9 = vld [vmem:[%s9971_s1] sm:$0xff]   ;;  %v7677_v10 = vld [vmem:[%s9971_s1 + $0x78] sm:$0xff]   ;;  %vm2550_vm2 = vsmask.f32 6400 }
   0xe   : > { %7640 = vmatprep.subr.bf16.mxu1 %v7668_v1  ;;  %7173 = vmatprep.subr.bf16.mxu0 %v7668_v1  ;;  %s7655_s27 = smul.u32 192, %s10126_s2  ;;  %v7681_v12 = vld [vmem:[%s9971_s1 + $0xb8] sm:$0xff]   ;;  %v7680_v14 = vld [vmem:[%s9971_s1 + $0x70] sm:$0xff]   ;;  %v7685_v18 = vld [vmem:[%s9971_s1 + $0x68] sm:$0xff]   ;;  %vm4290_vm5 = vsmask.f32 5376 }
   0xf   : > { %v7684_v16 = vld [vmem:[%s9971_s1 + $0xb0] sm:$0xff]   ;;  %v7688_v20 = vld [vmem:[%s9971_s1 + $0xa8] sm:$0xff]   ;;  %v7690_v23 = vld [vmem:[%s9971_s1 + $0x60] sm:$0xff]   ;;  %vm6336_vm6 = vcmask 1043457   ;;  %vm6337_vm7 = vsmask.f32 7942 }
  0x10   : > { %s7978_s30 = scalar_lea.vmem %s9970_s0, %s7655_s27  ;;  %v7692_v24 = vld [vmem:[%s9971_s1 + $0xa0] sm:$0xff]   ;;  %v7694_v26 = vld [vmem:[%s9971_s1 + $0x58] sm:$0xff]   ;;  %v7699_v31 = vld [vmem:[%s9971_s1 + $0x50] sm:$0xff]   ;;  %s8324_s7 = scalar_lea.vmem %s9975_s5, %s7655_s27  ;;  %vm5937_vm8 = vsmask.f32 1280  ;;  %vm6377_vm12 = vcmask 1041408  }
  0x11   : > { %7648 = vmatpush3.bf16.msra.mxu1 %v7668_v1  ;;  %7174 = vmatpush3.bf16.msra.mxu0 %v7668_v1  ;;  %v7675_v4 = vld [vmem:[%s7978_s30 + $0x40] sm:$0xff]   ;;  %v7676_v11 = vld [vmem:[%s7978_s30 + $0x48] sm:$0xff]   ;;  %v7682_v15 = vld [vmem:[%s7978_s30 + $0x50] sm:$0xff]   ;;  %vm5938_vm9 = vsmask.f32 5392 }
  0x12   : > { %7641 = vmatprep.subr.bf16.mxu1 %v7669_v2  ;;  %7175 = vmatprep.subr.bf16.mxu0 %v7669_v2  ;;  %v7678_v5 = vld [vmem:[%s7978_s30] sm:$0xff]   ;;  %v7679_v13 = vld [vmem:[%s7978_s30 + $0x8] sm:$0xff]   ;;  %v7686_v17 = vld [vmem:[%s7978_s30 + $0x10] sm:$0xff]  }
  0x13   : > { %7203 = vmatprep.mubr.bf16.mxu1 %v7675_v4  ;;  %7187 = vmatprep.mubr.bf16.mxu0 %v7678_v5  ;;  %v7683_v19 = vld [vmem:[%s7978_s30 + $0x58] sm:$0xff]   ;;  %v7689_v22 = vld [vmem:[%s7978_s30 + $0x60] sm:$0xff]   ;;  %v7691_v27 = vld [vmem:[%s7978_s30 + $0x68] sm:$0xff]  }
  0x14   : > { %v7687_v21 = vld [vmem:[%s7978_s30 + $0x18] sm:$0xff]   ;;  %v7693_v25 = vld [vmem:[%s7978_s30 + $0x20] sm:$0xff]   ;;  %v7695_v29 = vld [vmem:[%s7978_s30 + $0x28] sm:$0xff]  }
  0x15   : > { %7649 = vmatpush3.bf16.msra.mxu1 %v7669_v2  ;;  %7176 = vmatpush3.bf16.msra.mxu0 %v7669_v2  ;;  %v7696_v28 = vld [vmem:[%s9971_s1 + $0x98] sm:$0xff]   ;;  %v7697_v30 = vld [vmem:[%s7978_s30 + $0x70] sm:$0xff]   ;;  %v7712_v33 = vld [vmem:[%s7978_s30] sm:$0xff]  }
  0x16   : > { %7642 = vmatprep.subr.bf16.mxu1 %v7670_v3  ;;  %7177 = vmatprep.subr.bf16.mxu0 %v7670_v3  ;;  %v7700_v32 = vld [vmem:[%s9971_s1 + $0x90] sm:$0xff]   ;;  %v7709_v35 = vld [vmem:[%s7978_s30] sm:$0xfe]   ;;  %v7703_v36 = vld [vmem:[%s9971_s1 + $0x88] sm:$0xff]   ;;  %v836_v42 = vshll.u32 %v7712_v33, 16  ;;  %v834_v49 = vshrl.u32 %v7712_v33, 16 }
  0x17   : > { %v7701_v34 = vld [vmem:[%s7978_s30 + $0x30] sm:$0xff]   ;;  %v7710_v37 = vld [vmem:[%s7978_s30 + $0x8] sm:$0xff]   ;;  %v7698_v39 = vld [vmem:[%s7978_s30 + $0x78] sm:$0xff]   ;;  %v1480_v45 = vrot.slane %v7709_v35, 1 }
  0x18   : > { %v7704_v38 = vld [vmem:[%s9971_s1 + $0x48] sm:$0xff]   ;;  %v7702_v40 = vld [vmem:[%s7978_s30 + $0x38] sm:$0xff]   ;;  %v7705_v43 = vld [vmem:[%s7978_s30 + $0x80] sm:$0xff]   ;;  %v1481_v46 = vrot.slane %v7710_v37, 1  ;;  %v838_v50 = vrot.slane %v836_v42, 1 }
  0x19   : > { %7650 = vmatpush3.bf16.msra.mxu1 %v7670_v3  ;;  %7178 = vmatpush3.bf16.msra.mxu0 %v7670_v3  ;;  %v7713_v41 = vld [vmem:[%s7978_s30 + $0x8] sm:$0xff]   ;;  %v7707_v44 = vld [vmem:[%s9971_s1 + $0x80] sm:$0xff]   ;;  %v7711_v48 = vld [vmem:[%s7978_s30 + $0x10] sm:$0xff]  }
  0x1a   : > { %7643 = vmatprep.subr.bf16.mxu1 %v7671_v6  ;;  %7179 = vmatprep.subr.bf16.mxu0 %v7671_v6  ;;  %v7708_v47 = vld [vmem:[%s9971_s1 + $0x40] sm:$0xff]   ;;  %v841_v51 = vshll.u32 %v7713_v41, 16  ;;  %v7717_v52 = vld [vmem:[%s7978_s30 + $0x18] sm:$0xff]   ;;  %v1482_v53 = vsel %vm1479_vm0, %v1480_v45, %v1481_v46  ;;  %v7714_v54 = vld [vmem:[%s7978_s30 + $0x10] sm:$0xff]   ;;  %v1483_v55 = vrot.slane %v7711_v48, 1  ;;  %v839_v57 = vor.u32 %v838_v50, %v834_v49 }
  0x1b   : > { %v7715_v56 = vld [vmem:[%s9971_s1 + $0xf8] sm:$0xff]   ;;  %v1485_v60 = vrot.slane %v7717_v52, 1  ;;  %v7706_v62 = vld [vmem:[%s7978_s30 + $0x88] sm:$0xff]   ;;  %v849_v63 = vshll.u32 %v7714_v54, 16  ;;  %v845_v1 = vshrl.u32 %v7713_v41, 16  ;;  %v7718_v2 = vld [vmem:[%s7978_s30 + $0x20] sm:$0xff]  }
  0x1c   : > { %v843_v58 = vrot.slane %v841_v51, 1  ;;  %v7716_v59 = vld [vmem:[%s9971_s1 + $0x138] sm:$0xff]   ;;  %v1484_v0 = vsel %vm1479_vm0, %v1481_v46, %v1483_v55  ;;  %v853_v3 = vshrl.u32 %v7714_v54, 16  ;;  %v7720_v4 = vld [vmem:[%s7978_s30 + $0x20] sm:$0xff]   ;;  %v7727_v37 = vld [vmem:[%s9971_s1 + $0xe8] sm:$0xff]  }
  0x1d   : > { %7651 = vmatpush3.bf16.msra.mxu1 %v7671_v6  ;;  %7180 = vmatpush3.bf16.msra.mxu0 %v7671_v6  ;;  %v7719_v61 = vld [vmem:[%s7978_s30 + $0x18] sm:$0xff]   ;;  %v7730_v41 = vld [vmem:[%s7978_s30 + $0x40] sm:$0xff]   ;;  %v7734_v48 = vld [vmem:[%s7978_s30 + $0x48] sm:$0xff]  }
  0x1e   : > { %7644 = vmatprep.subr.bf16.mxu1 %v7672_v7  ;;  %7181 = vmatprep.subr.bf16.mxu0 %v7672_v7  ;;  %v844_v5 = vsel %vm832_vm1, %v839_v57, %v843_v58  ;;  %v857_v6 = vshll.u32 %v7719_v61, 16  ;;  %v7733_v45 = vld [vmem:[%s9971_s1 + $0xe0] sm:$0xff]   ;;  %v7742_v51 = vld [vmem:[%s9971_s1 + $0x118] sm:$0xff]   ;;  %v1495_v52 = vrot.slane %v7730_v41, 1  ;;  %vm9269_vm10 = vmand %vm6336_vm6, %vm6337_vm7 }
  0x1f   : > { %vm9295_vm11 = vmor %vm5937_vm8, %vm5938_vm9 }
  0x20   : > { %vm9727_vm13 = vmand %vm6377_vm12, %vm5937_vm8 }
  0x21   : > { %7652 = vmatpush3.bf16.msra.mxu1 %v7672_v7  ;;  %7182 = vmatpush3.bf16.msra.mxu0 %v7672_v7  ;;  %v7722_v7 = vld [vmem:[%s9971_s1 + $0x130] sm:$0xff]  }
  0x22   : > { %7645 = vmatprep.subr.bf16.mxu1 %v7673_v8  ;;  %7183 = vmatprep.subr.bf16.mxu0 %v7673_v8 }
  0x25   : > { %7653 = vmatpush3.bf16.msra.mxu1 %v7673_v8  ;;  %7184 = vmatpush3.bf16.msra.mxu0 %v7673_v8  ;;  %v1486_v8 = vsel %vm1479_vm0, %v1483_v55, %v1485_v60 }
  0x26   : > { %7646 = vmatprep.subr.bf16.mxu1 %v7674_v9  ;;  %7185 = vmatprep.subr.bf16.mxu0 %v7674_v9 }
  0x29   : > { %7654 = vmatpush3.bf16.msra.mxu1 %v7674_v9  ;;  %7186 = vmatpush3.bf16.msra.mxu0 %v7674_v9  ;;  %v7723_v9 = vld [vmem:[%s7978_s30 + $0x28] sm:$0xff]  }
  0x2a   : > { %7223 = vmatprep.subr.bf16.mxu1 %v7677_v10  ;;  %7275 = vmatprep.subr.bf16.mxu0 %v7681_v12 }
  0x2c   : > { %7204 = vmatmul.mubr.bf16.vlgmr.msra.gmra.mxu1 %v7676_v11  ;;  %7188 = vmatmul.mubr.bf16.vlgmr.msra.gmra.mxu0 %v7679_v13  ;;  %v847_v11 = vor.u32 %v845_v1, %v843_v58  ;;  %v7725_v13 = vld [vmem:[%s7978_s30 + $0x28] sm:$0xff]   ;;  %v1497_v58 = vrot.slane %v7734_v48, 1  ;;  %v7735_v1 = vld [vmem:[%s7978_s30 + $0x50] sm:$0xff]  }
  0x2d   : > { %7224 = vmatpush3.bf16.msra.mxu1 %v7677_v10  ;;  %7276 = vmatpush3.bf16.msra.mxu0 %v7681_v12  ;;  %v851_v10 = vrot.slane %v849_v63, 1  ;;  %v1487_v12 = vrot.slane %v7718_v2, 1  ;;  %v7750_v48 = vld [vmem:[%s7978_s30 + $0x70] sm:$0xff]  }
  0x2e   : > { %7225 = vmatprep.subr.bf16.mxu1 %v7680_v14  ;;  %7207 = vmatprep.mubr.bf16.mxu1 %v7682_v15  ;;  %v859_v15 = vrot.slane %v857_v6, 1  ;;  %v1498_v6 = vsel %vm1479_vm0, %v1495_v52, %v1497_v58 }
  0x2f   : > { %7277 = vmatprep.subr.bf16.mxu0 %v7684_v16  ;;  %7191 = vmatprep.mubr.bf16.mxu0 %v7686_v17  ;;  %v865_v17 = vshll.u32 %v7720_v4, 16 }
  0x31   : > { %7226 = vmatpush3.bf16.msra.mxu1 %v7680_v14  ;;  %7278 = vmatpush3.bf16.msra.mxu0 %v7684_v16  ;;  %v855_v14 = vor.u32 %v853_v3, %v851_v10  ;;  %v7729_v16 = vld [vmem:[%s9971_s1 + $0x128] sm:$0xff]  }
  0x32   : > { %7227 = vmatprep.subr.bf16.mxu1 %v7685_v18  ;;  %7279 = vmatprep.subr.bf16.mxu0 %v7688_v20 }
  0x34   : > { %7208 = vmatmul.mubr.bf16.gmra.mxu1 %v7683_v19  ;;  %7192 = vmatmul.mubr.bf16.gmra.mxu0 %v7687_v21  ;;  %v861_v19 = vshrl.u32 %v7719_v61, 16  ;;  %v852_v21 = vsel %vm832_vm1, %v847_v11, %v851_v10  ;;  %v1499_v11 = vrot.slane %v7735_v1, 1 }
  0x35   : > { %7228 = vmatpush3.bf16.msra.mxu1 %v7685_v18  ;;  %7280 = vmatpush3.bf16.msra.mxu0 %v7688_v20  ;;  %v1489_v18 = vrot.slane %v7723_v9, 1  ;;  %v7721_v20 = vld [vmem:[%s9971_s1 + $0xf0] sm:$0xff]  }
  0x36   : > { %7211 = vmatprep.mubr.bf16.mxu1 %v7689_v22  ;;  %7229 = vmatprep.subr.bf16.mxu1 %v7690_v23  ;;  %v1488_v22 = vsel %vm1479_vm0, %v1485_v60, %v1487_v12  ;;  %v7738_v9 = vld [vmem:[%s7978_s30 + $0x50] sm:$0xff]  }
  0x37   : > { %7281 = vmatprep.subr.bf16.mxu0 %v7692_v24  ;;  %7195 = vmatprep.mubr.bf16.mxu0 %v7693_v25  ;;  %v860_v25 = vsel %vm832_vm1, %v855_v14, %v859_v15 }
  0x39   : > { %7230 = vmatpush3.bf16.msra.mxu1 %v7690_v23  ;;  %7282 = vmatpush3.bf16.msra.mxu0 %v7692_v24  ;;  %v7724_v23 = vld [vmem:[%s7978_s30 + $0x30] sm:$0xff]   ;;  %v869_v24 = vshrl.u32 %v7720_v4, 16  ;;  %v7739_v4 = vld [vmem:[%s7978_s30 + $0x58] sm:$0xff]  }
  0x3a   : > { %7231 = vmatprep.subr.bf16.mxu1 %v7694_v26  ;;  %7283 = vmatprep.subr.bf16.mxu0 %v7696_v28  ;;  %v1491_v33 = vrot.slane %v7724_v23, 1  ;;  %v1501_v14 = vrot.slane %v7739_v4, 1 }
  0x3c   : > { %7212 = vmatmul.mubr.bf16.gmra.mxu1 %v7691_v27  ;;  %7196 = vmatmul.mubr.bf16.gmra.mxu0 %v7695_v29  ;;  %v7726_v27 = vld [vmem:[%s7978_s30 + $0x30] sm:$0xff]   ;;  %v1490_v29 = vsel %vm1479_vm0, %v1487_v12, %v1489_v18 }
  0x3d   : > { %7232 = vmatpush3.bf16.msra.mxu1 %v7694_v26  ;;  %7284 = vmatpush3.bf16.msra.mxu0 %v7696_v28  ;;  %v873_v26 = vshll.u32 %v7725_v13, 16  ;;  %v867_v28 = vrot.slane %v865_v17, 1  ;;  %v7756_v17 = vld [vmem:[%s9971_s1 + $0x108] sm:$0xff]  }
  0x3e   : > { %7215 = vmatprep.mubr.bf16.mxu1 %v7697_v30  ;;  %7233 = vmatprep.subr.bf16.mxu1 %v7699_v31  ;;  %v7728_v30 = vld [vmem:[%s7978_s30 + $0x38] sm:$0xff]  }
  0x3f   : > { %7285 = vmatprep.subr.bf16.mxu0 %v7700_v32  ;;  %7199 = vmatprep.mubr.bf16.mxu0 %v7701_v34  ;;  %v7731_v34 = vld [vmem:[%s7978_s30 + $0x38] sm:$0xff]   ;;  %v871_v35 = vor.u32 %v869_v24, %v867_v28  ;;  %v1502_v24 = vsel %vm1479_vm0, %v1499_v11, %v1501_v14 }
  0x40   : > { %v893_v60 = vshrl.u32 %v7731_v34, 16 }
  0x41   : > { %7234 = vmatpush3.bf16.msra.mxu1 %v7699_v31  ;;  %7286 = vmatpush3.bf16.msra.mxu0 %v7700_v32  ;;  %v7736_v31 = vld [vmem:[%s9971_s1 + $0x120] sm:$0xff]   ;;  %v863_v32 = vor.u32 %v861_v19, %v859_v15  ;;  %v7743_v15 = vld [vmem:[%s7978_s30 + $0x58] sm:$0xff]  }
  0x42   : > { %7287 = vmatprep.subr.bf16.mxu0 %v7703_v36  ;;  %7235 = vmatprep.subr.bf16.mxu1 %v7704_v38 }
  0x43   : > { %v868_v42 = vsel %vm832_vm1, %v863_v32, %v867_v28  ;;  %v7760_v28 = vld [vmem:[%s9971_s1 + $0xc0] sm:$0xff]  }
  0x44   : > { %7216 = vmatmul.mubr.bf16.gmra.mxu1 %v7698_v39  ;;  %7200 = vmatmul.mubr.bf16.gmra.mxu0 %v7702_v40  ;;  %v1493_v39 = vrot.slane %v7728_v30, 1  ;;  %v877_v40 = vshrl.u32 %v7725_v13, 16  ;;  %v7744_v30 = vld [vmem:[%s7978_s30 + $0x60] sm:$0xff]  }
  0x45   : > { %7288 = vmatpush3.bf16.msra.mxu0 %v7703_v36  ;;  %7219 = vmatprep.mubr.bf16.mxu1 %v7705_v43  ;;  %v875_v36 = vrot.slane %v873_v26, 1  ;;  %v1492_v43 = vsel %vm1479_vm0, %v1489_v18, %v1491_v33  ;;  %v913_v18 = vshll.u32 %v7738_v9, 16  ;;  %v921_v26 = vshll.u32 %v7743_v15, 16 }
  0x46   : > { %7236 = vmatpush3.bf16.msra.mxu1 %v7704_v38  ;;  %7289 = vmatprep.subr.bf16.mxu0 %v7707_v44  ;;  %v881_v38 = vshll.u32 %v7726_v27, 16  ;;  %v1494_v50 = vsel %vm1479_vm0, %v1491_v33, %v1493_v39 }
  0x47   : > { %7237 = vmatprep.subr.bf16.mxu1 %v7708_v47  ;;  %7291 = vmatprep.mubr.bf16.mxu0 %v1482_v53  ;;  %v876_v46 = vsel %vm832_vm1, %v871_v35, %v875_v36  ;;  %v7732_v53 = vld [vmem:[%s7978_s30 + $0x40] sm:$0xff]   ;;  %v879_v54 = vor.u32 %v877_v40, %v875_v36  ;;  %v923_v36 = vrot.slane %v921_v26, 1 }
  0x48   : > { %v883_v49 = vrot.slane %v881_v38, 1  ;;  %v897_v61 = vshll.u32 %v7732_v53, 16  ;;  %v901_v2 = vshrl.u32 %v7732_v53, 16  ;;  %v929_v38 = vshll.u32 %v7744_v30, 16 }
  0x49   : > { %7290 = vmatpush3.bf16.msra.mxu0 %v7707_v44  ;;  %v889_v44 = vshll.u32 %v7731_v34, 16  ;;  %v7748_v34 = vld [vmem:[%s7978_s30 + $0x68] sm:$0xff]  }
  0x4a   : > { %7238 = vmatpush3.bf16.msra.mxu1 %v7708_v47  ;;  %7379 = vmatprep.subr.bf16.mxu0 %v7716_v59  ;;  %v885_v47 = vshrl.u32 %v7726_v27, 16  ;;  %v884_v63 = vsel %vm832_vm1, %v879_v54, %v883_v49  ;;  %v7745_v27 = vld [vmem:[%s7978_s30 + $0x68] sm:$0xff]   ;;  %v7754_v54 = vld [vmem:[%s7978_s30 + $0x78] sm:$0xff]  }
  0x4b   : > { %7327 = vmatprep.subr.bf16.mxu1 %v7715_v56  ;;  %v891_v55 = vrot.slane %v889_v44, 1  ;;  %v953_v1 = vshll.u32 %v7754_v54, 16 }
  0x4c   : > { %7220 = vmatmul.mubr.bf16.gmra.mxu1 %v7706_v62  ;;  %7292 = vmatmul.mubr.bf16.vlgmr.msra.gmra.mxu0 %v1484_v0  ;;  %v887_v57 = vor.u32 %v885_v47, %v883_v49  ;;  %v7749_v62 = vld [vmem:[%s9971_s1 + $0x110] sm:$0xff]   ;;  %v1496_v0 = vsel %vm1479_vm0, %v1493_v39, %v1495_v52  ;;  %v7751_v47 = vld [vmem:[%s7978_s30 + $0x78] sm:$0xff]   ;;  %v931_v49 = vrot.slane %v929_v38, 1 }
  0x4d   : > { %7239 = vmatprep.mubr.bf16.mxu1 %v844_v5  ;;  %7380 = vmatpush3.bf16.msra.mxu0 %v7716_v59  ;;  %v7740_v59 = vld [vmem:[%s9971_s1 + $0xd8] sm:$0xff]   ;;  %v895_v10 = vor.u32 %v893_v60, %v891_v55  ;;  %v7746_v39 = vld [vmem:[%s7978_s30 + $0x70] sm:$0xff]  }
  0x4e   : > { %7295 = vmatprep.mubr.bf16.mxu0 %v1486_v8  ;;  %7381 = vmatprep.subr.bf16.mxu0 %v7722_v7  ;;  %v892_v5 = vsel %vm832_vm1, %v887_v57, %v891_v55  ;;  %v899_v8 = vrot.slane %v897_v61, 1  ;;  %v7752_v57 = vld [vmem:[%s7978_s30 + $0x80] sm:$0xff]   ;;  %v8172_v60 = vld [vmem:[%s9971_s1 + $0x178] sm:$0xff]   ;;  %v949_v61 = vshrl.u32 %v7750_v48, 16 }
  0x50   : > { %v903_v13 = vor.u32 %v901_v2, %v899_v8  ;;  %v900_v19 = vsel %vm832_vm1, %v895_v10, %v899_v8  ;;  %v7764_v2 = vld [vmem:[%s7978_s30 + $0x10] sm:$0xff]   ;;  %v8189_v10 = vld [vmem:[%s7978_s30 + $0x88] sm:$0xff]  }
  0x51   : > { %7382 = vmatpush3.bf16.msra.mxu0 %v7722_v7  ;;  %v7747_v7 = vld [vmem:[%s9971_s1 + $0xd0] sm:$0xff]  }
  0x52   : > { %7383 = vmatprep.subr.bf16.mxu0 %v7729_v16 }
  0x54   : > { %7240 = vmatmul.mubr.bf16.vlgmr.msra.gmra.mxu1 %v852_v21  ;;  %7296 = vmatmul.mubr.bf16.gmra.mxu0 %v1488_v22  ;;  %v7741_v22 = vld [vmem:[%s7978_s30 + $0x60] sm:$0xff]  }
  0x55   : > { %7328 = vmatpush3.bf16.msra.mxu1 %v7715_v56  ;;  %7243 = vmatprep.mubr.bf16.mxu1 %v860_v25  ;;  %v7737_v56 = vld [vmem:[%s7978_s30 + $0x48] sm:$0xff]   ;;  %v917_v25 = vshrl.u32 %v7738_v9, 16  ;;  %v1503_v33 = vrot.slane %v7741_v22, 1  ;;  %v1511_v9 = vrot.slane %v7752_v57, 1  ;;  %v969_v22 = vshll.u32 %v8189_v10, 16 }
  0x56   : > { %7329 = vmatprep.subr.bf16.mxu1 %v7721_v20  ;;  %7299 = vmatprep.mubr.bf16.mxu0 %v1490_v29  ;;  %v905_v3 = vshll.u32 %v7737_v56, 16  ;;  %v909_v21 = vshrl.u32 %v7737_v56, 16  ;;  %v915_v29 = vrot.slane %v913_v18, 1  ;;  %v1509_v56 = vrot.slane %v7751_v47, 1  ;;  %v7772_v47 = vld [vmem:[%s7978_s30 + $0x28] sm:$0xff]  }
  0x57   : > { %7384 = vmatpush3.bf16.msra.mxu0 %v7729_v16  ;;  %v7753_v16 = vld [vmem:[%s9971_s1 + $0xc8] sm:$0xff]   ;;  %v1504_v41 = vsel %vm1479_vm0, %v1501_v14, %v1503_v33  ;;  %v2560_v18 = vshrl.u32 %v7764_v2, 16 }
  0x58   : > { %7385 = vmatprep.subr.bf16.mxu0 %v7736_v31  ;;  %v907_v12 = vrot.slane %v905_v3, 1  ;;  %v919_v35 = vor.u32 %v917_v25, %v915_v29 }
  0x59   : > { %7330 = vmatpush3.bf16.msra.mxu1 %v7721_v20  ;;  %v1500_v20 = vsel %vm1479_vm0, %v1497_v58, %v1499_v11  ;;  %v945_v58 = vshll.u32 %v7750_v48, 16  ;;  %v7767_v48 = vld [vmem:[%s7978_s30 + $0x10] sm:$0xff]  }
  0x5a   : > { %7331 = vmatprep.subr.bf16.mxu1 %v7727_v37  ;;  %v908_v23 = vsel %vm832_vm1, %v903_v13, %v907_v12  ;;  %v911_v32 = vor.u32 %v909_v21, %v907_v12  ;;  %v924_v44 = vsel %vm832_vm1, %v919_v35, %v923_v36  ;;  %v955_v12 = vrot.slane %v953_v1, 1 }
  0x5b   : > { %7386 = vmatpush3.bf16.msra.mxu0 %v7736_v31  ;;  %v7762_v31 = vld [vmem:[%s9971_s1 + $0x100] sm:$0xff]   ;;  %v957_v13 = vshrl.u32 %v7754_v54, 16 }
  0x5c   : > { %7244 = vmatmul.mubr.bf16.gmra.mxu1 %v868_v42  ;;  %7300 = vmatmul.mubr.bf16.gmra.mxu0 %v1492_v43  ;;  %v916_v40 = vsel %vm832_vm1, %v911_v32, %v915_v29  ;;  %v925_v42 = vshrl.u32 %v7743_v15, 16  ;;  %v937_v43 = vshll.u32 %v7748_v34, 16  ;;  %v7758_v15 = vld [vmem:[%s7978_s30 + $0x90] ss:$0 sps:$4 sm:$0x11]  }
  0x5d   : > { %7247 = vmatprep.mubr.bf16.mxu1 %v876_v46  ;;  %7332 = vmatpush3.bf16.msra.mxu1 %v7727_v37  ;;  %v1505_v37 = vrot.slane %v7745_v27, 1  ;;  %v933_v46 = vshrl.u32 %v7744_v30, 16  ;;  %v7761_v27 = vld [vmem:[%s7978_s30 + $0x90] ss:$0 sps:$4 sm:$0x11]   ;;  %v1515_v35 = vrot.slane %v7758_v15, 1  ;;  %v959_v38 = vor.u32 %v957_v13, %v955_v12 }
  0x5e   : > { %7303 = vmatprep.mubr.bf16.mxu0 %v1494_v50  ;;  %7333 = vmatprep.subr.bf16.mxu1 %v7733_v45  ;;  %v1507_v50 = vrot.slane %v7746_v39, 1  ;;  %v927_v52 = vor.u32 %v925_v42, %v923_v36  ;;  %v939_v53 = vrot.slane %v937_v43, 1  ;;  %v971_v36 = vrot.slane %v969_v22, 1  ;;  %v7778_v13 = vld [vmem:[%s7978_s30 + $0x38] sm:$0xff]   ;;  %v7776_v15 = vld [vmem:[%s9971_s1 + $0x1b0] sm:$0xff]  }
  0x5f   : > { %7387 = vmatprep.subr.bf16.mxu0 %v7742_v51  ;;  %v935_v55 = vor.u32 %v933_v46, %v931_v49  ;;  %v2605_v22 = vshrl.u32 %v7778_v13, 16 }
  0x60   : > { %7388 = vmatpush3.bf16.msra.mxu0 %v7742_v51  ;;  %v941_v51 = vshrl.u32 %v7748_v34, 16  ;;  %v1510_v4 = vsel %vm1479_vm0, %v1507_v50, %v1509_v56 }
  0x61   : > { %7334 = vmatpush3.bf16.msra.mxu1 %v7733_v45  ;;  %7389 = vmatprep.subr.bf16.mxu0 %v7749_v62  ;;  %v1506_v45 = vsel %vm1479_vm0, %v1503_v33, %v1505_v37  ;;  %v940_v3 = vsel %vm832_vm1, %v935_v55, %v939_v53  ;;  %v7771_v33 = vld [vmem:[%s7978_s30 + $0x20] sm:$0xff]  }
  0x62   : > { %7335 = vmatprep.subr.bf16.mxu1 %v7740_v59  ;;  %v943_v8 = vor.u32 %v941_v51, %v939_v53  ;;  %v2581_v46 = vshll.u32 %v7771_v33, 16  ;;  %v7766_v53 = vld [vmem:[%s7978_s30 + $0x8] sm:$0xfe]  }
  0x64   : > { %7248 = vmatmul.mubr.bf16.gmra.mxu1 %v884_v63  ;;  %7304 = vmatmul.mubr.bf16.gmra.mxu0 %v1496_v0  ;;  %v932_v63 = vsel %vm832_vm1, %v927_v52, %v931_v49  ;;  %v1508_v0 = vsel %vm1479_vm0, %v1505_v37, %v1507_v50  ;;  %v973_v37 = vshrl.u32 %v8189_v10, 16 }
  0x65   : > { %7251 = vmatprep.mubr.bf16.mxu1 %v892_v5  ;;  %7307 = vmatprep.mubr.bf16.mxu0 %v1498_v6  ;;  %v7763_v5 = vld [vmem:[%s7978_s30 + $0x8] sm:$0xfe]   ;;  %v947_v6 = vrot.slane %v945_v58, 1  ;;  %v2583_v58 = vrot.slane %v2581_v46, 2  ;;  %v7780_v46 = vld [vmem:[%s7978_s30 + $0x38] sm:$0xff]  }
  0x66   : > { %7336 = vmatpush3.bf16.msra.mxu1 %v7740_v59  ;;  %7390 = vmatpush3.bf16.msra.mxu0 %v7749_v62  ;;  %v8167_v59 = vld [vmem:[%s7978_s30 + $0x88] sm:$0xff]   ;;  %v8177_v62 = vld [vmem:[%s9971_s1 + $0x1b8] sm:$0xff]  }
  0x67   : > { %7337 = vmatprep.subr.bf16.mxu1 %v7747_v7  ;;  %7391 = vmatprep.subr.bf16.mxu0 %v7756_v17  ;;  %v951_v11 = vor.u32 %v949_v61, %v947_v6  ;;  %v1513_v14 = vrot.slane %v8167_v59, 1  ;;  %v2587_v61 = vshrl.u32 %v7772_v47, 16 }
  0x69   : > { %v1514_v25 = vsel %vm1479_vm0, %v1511_v9, %v1513_v14  ;;  %v1516_v50 = vsel %vm1479_vm0, %v1513_v14, %v1515_v35  ;;  %v7788_v35 = vld [vmem:[%s7978_s30 + $0x50] sm:$0xff]  }
  0x6a   : > { %7338 = vmatpush3.bf16.msra.mxu1 %v7747_v7  ;;  %7392 = vmatpush3.bf16.msra.mxu0 %v7756_v17  ;;  %v7755_v7 = vld [vmem:[%s7978_s30 + $0x80] sm:$0xff]   ;;  %v2555_v17 = vshll.u32 %v7763_v5, 16 }
  0x6b   : > { %7339 = vmatprep.subr.bf16.mxu1 %v7753_v16  ;;  %7393 = vmatprep.subr.bf16.mxu0 %v7762_v31  ;;  %v961_v21 = vshll.u32 %v7755_v7, 16  ;;  %v965_v26 = vshrl.u32 %v7755_v7, 16  ;;  %v7768_v7 = vld [vmem:[%s7978_s30 + $0x18] sm:$0xff]  }
  0x6c   : > { %7252 = vmatmul.mubr.bf16.gmra.mxu1 %v900_v19  ;;  %7308 = vmatmul.mubr.bf16.gmra.mxu0 %v1500_v20  ;;  %v2563_v19 = vshll.u32 %v7764_v2, 16  ;;  %v948_v20 = vsel %vm832_vm1, %v943_v8, %v947_v6  ;;  %v2557_v30 = vrot.slane %v2555_v17, 2  ;;  %v2015_v2 = vrot.slane %v7766_v53, 1 }
  0x6d   : > { %7255 = vmatprep.mubr.bf16.mxu1 %v908_v23  ;;  %7311 = vmatprep.mubr.bf16.mxu0 %v1502_v24  ;;  %v1512_v23 = vsel %vm1479_vm0, %v1509_v56, %v1511_v9  ;;  %v956_v24 = vsel %vm832_vm1, %v951_v11, %v955_v12  ;;  %v963_v34 = vrot.slane %v961_v21, 1  ;;  %v7777_v56 = vld [vmem:[%s7978_s30 + $0x30] sm:$0xff]   ;;  %v2589_v8 = vrot.slane %v2587_v61, 1  ;;  %v8212_v9 = vld [vmem:[%s7978_s30 + $0x20] sm:$0xff]  }
  0x6e   : > { %7340 = vmatpush3.bf16.msra.mxu1 %v7753_v16  ;;  %7394 = vmatpush3.bf16.msra.mxu0 %v7762_v31  ;;  %v2552_v16 = vshrl.u32 %v7763_v5, 16  ;;  %v2562_v31 = vrot.slane %v2560_v18, 1  ;;  %v2565_v32 = vrot.slane %v2563_v19, 2  ;;  %v2599_v5 = vshll.u32 %v7777_v56, 16  ;;  %v7782_v18 = vld [vmem:[%s7978_s30 + $0x40] sm:$0xff]  }
  0x6f   : > { %7341 = vmatprep.subr.bf16.mxu1 %v7760_v28  ;;  %7483 = vmatprep.subr.bf16.mxu0 %v8177_v62  ;;  %v964_v49 = vsel %vm832_vm1, %v959_v38, %v963_v34  ;;  %v8239_v38 = vld [vmem:[%s7978_s30 + $0x30] sm:$0xff]   ;;  %v7793_v61 = vld [vmem:[%s7978_s30 + $0x60] sm:$0xff]  }
  0x70   : > { %v2554_v29 = vrot.slane %v2552_v16, 1  ;;  %v2566_v43 = vor.u32 %v2565_v32, %v2562_v31  ;;  %v2601_v17 = vrot.slane %v2599_v5, 2  ;;  %v7775_v32 = vld [vmem:[%s9971_s1 + $0x170] sm:$0xff]  }
  0x72   : > { %7342 = vmatpush3.bf16.msra.mxu1 %v7760_v28  ;;  %v7765_v28 = vld [vmem:[%s7978_s30 + $0x18] sm:$0xff]   ;;  %v2558_v42 = vor.u32 %v2557_v30, %v2554_v29  ;;  %v7784_v29 = vld [vmem:[%s7978_s30 + $0x48] sm:$0xff]  }
  0x73   : > { %7431 = vmatprep.subr.bf16.mxu1 %v8172_v60  ;;  %v2569_v39 = vshrl.u32 %v7765_v28, 16  ;;  %v7774_v30 = vld [vmem:[%s7978_s30 + $0x28] sm:$0xff]  }
  0x74   : > { %7256 = vmatmul.mubr.bf16.gmra.mxu1 %v916_v40  ;;  %7312 = vmatmul.mubr.bf16.gmra.mxu0 %v1504_v41  ;;  %v2572_v40 = vshll.u32 %v7765_v28, 16  ;;  %v967_v41 = vor.u32 %v965_v26, %v963_v34  ;;  %v2567_v55 = vsel %vm2550_vm2, %v2558_v42, %v2566_v43  ;;  %v2614_v26 = vshrl.u32 %v7782_v18, 16 }
  0x75   : > { %7259 = vmatprep.mubr.bf16.mxu1 %v924_v44  ;;  %7315 = vmatprep.mubr.bf16.mxu0 %v1506_v45  ;;  %v977_v44 = vshll.u32 %v7761_v27, 16  ;;  %v2578_v45 = vshrl.u32 %v7771_v33, 16  ;;  %v2571_v51 = vrot.slane %v2569_v39, 1  ;;  %v7783_v27 = vld [vmem:[%s9971_s1 + $0x1a8] sm:$0xff]   ;;  %v2617_v28 = vshll.u32 %v7782_v18, 16 }
  0x76   : > { %v2574_v52 = vrot.slane %v2572_v40, 2  ;;  %v972_v54 = vsel %vm832_vm1, %v967_v41, %v971_v36  ;;  %v2607_v33 = vrot.slane %v2605_v22, 1  ;;  %v2616_v39 = vrot.slane %v2614_v26, 1  ;;  %v7810_v26 = vld [vmem:[%s9971_s1 + $0x188] sm:$0xff]  }
  0x77   : > { %v2580_v57 = vrot.slane %v2578_v45, 1  ;;  %v979_v59 = vrot.slane %v977_v44, 1  ;;  %v2619_v40 = vrot.slane %v2617_v28, 2  ;;  %v2623_v41 = vshrl.u32 %v7784_v29, 16  ;;  %v7790_v44 = vld [vmem:[%s9971_s1 + $0x1a0] sm:$0xff]   ;;  %v8290_v28 = vld [vmem:[%s7978_s30 + $0x58] sm:$0xff]  }
  0x78   : > { %v2575_v1 = vor.u32 %v2574_v52, %v2571_v51  ;;  %v2626_v42 = vshll.u32 %v7784_v29, 16  ;;  %v8251_v51 = vld [vmem:[%s7978_s30 + $0x40] sm:$0xff]  }
  0x79   : > { %v2584_v6 = vor.u32 %v2583_v58, %v2580_v57  ;;  %v2620_v52 = vor.u32 %v2619_v40, %v2616_v39  ;;  %v2625_v53 = vrot.slane %v2623_v41, 1  ;;  %v2034_v39 = vrot.slane %v8290_v28, 1  ;;  %v7805_v40 = vld [vmem:[%s7978_s30 + $0x80] sm:$0xff]  }
  0x7a   : > { %v2576_v11 = vsel %vm2550_vm2, %v2566_v43, %v2575_v1  ;;  %v2022_v43 = vrot.slane %v7774_v30, 1 }
  0x7b   : > { %v2585_v19 = vsel %vm2550_vm2, %v2575_v1, %v2584_v6 }
  0x7c   : > { %7260 = vmatmul.mubr.bf16.gmra.mxu1 %v932_v63  ;;  %7316 = vmatmul.mubr.bf16.gmra.mxu0 %v1508_v0  ;;  %v2590_v63 = vshll.u32 %v7772_v47, 16  ;;  %v975_v0 = vor.u32 %v973_v37, %v971_v36  ;;  %v7781_v47 = vld [vmem:[%s9971_s1 + $0x168] sm:$0xff]  }
  0x7d   : > { %7263 = vmatprep.mubr.bf16.mxu1 %v940_v3  ;;  %7319 = vmatprep.mubr.bf16.mxu0 %v1510_v4  ;;  %v2016_v3 = vrot.slane %v7767_v48, 1  ;;  %v2596_v4 = vshrl.u32 %v7777_v56, 16  ;;  %v2632_v48 = vshrl.u32 %v7788_v35, 16 }
  0x7e   : > { %v980_v10 = vsel %vm832_vm1, %v975_v0, %v979_v59  ;;  %v2592_v12 = vrot.slane %v2590_v63, 2  ;;  %v7789_v59 = vld [vmem:[%s7978_s30 + $0x58] sm:$0xff]   ;;  %v2026_v0 = vrot.slane %v7780_v46, 1 }
  0x7f   : > { %v2017_v14 = vsel %vm1479_vm0, %v2015_v2, %v2016_v3  ;;  %v2598_v16 = vrot.slane %v2596_v4, 1  ;;  %v2634_v57 = vrot.slane %v2632_v48, 1  ;;  %v7796_v2 = vld [vmem:[%s9971_s1 + $0x198] sm:$0xff]   ;;  %v7786_v4 = vld [vmem:[%s7978_s30 + $0x48] sm:$0xff]  }
  0x80   : > { %v2593_v21 = vor.u32 %v2592_v12, %v2589_v8  ;;  %v7794_v8 = vld [vmem:[%s9971_s1 + $0x158] sm:$0xff]   ;;  %v2653_v12 = vshll.u32 %v7793_v61, 16 }
  0x82   : > { %v2594_v31 = vsel %vm2550_vm2, %v2584_v6, %v2593_v21  ;;  %v2641_v6 = vshrl.u32 %v7789_v59, 16 }
  0x84   : > { %7264 = vmatmul.mubr.bf16.gmra.mxu1 %v948_v20  ;;  %7320 = vmatmul.mubr.bf16.gmra.mxu0 %v1512_v23  ;;  %v2018_v20 = vrot.slane %v7768_v7, 1  ;;  %v2608_v23 = vshll.u32 %v7778_v13, 16  ;;  %v2644_v7 = vshll.u32 %v7789_v59, 16  ;;  %v2030_v13 = vrot.slane %v7786_v4, 1  ;;  %v8344_v59 = vld [vmem:[%s9971_s1 + $0x1f8] sm:$0xff]  }
  0x85   : > { %7267 = vmatprep.mubr.bf16.mxu1 %v956_v24  ;;  %7323 = vmatprep.mubr.bf16.mxu0 %v1514_v25  ;;  %v2020_v24 = vrot.slane %v8212_v9, 1  ;;  %v2602_v25 = vor.u32 %v2601_v17, %v2598_v16  ;;  %v7803_v9 = vld [vmem:[%s9971_s1 + $0x190] sm:$0xff]  }
  0x86   : > { %v2610_v34 = vrot.slane %v2608_v23, 2  ;;  %v7799_v16 = vld [vmem:[%s7978_s30 + $0x70] sm:$0xff]  }
  0x87   : > { %v2021_v36 = vsel %vm1479_vm0, %v2018_v20, %v2020_v24  ;;  %v2603_v37 = vsel %vm2550_vm2, %v2593_v21, %v2602_v25 }
  0x88   : > { %v2611_v45 = vor.u32 %v2610_v34, %v2607_v33  ;;  %v7800_v33 = vld [vmem:[%s7978_s30 + $0x78] sm:$0xff]  }
  0x8a   : > { %v2612_v56 = vsel %vm2550_vm2, %v2602_v25, %v2611_v45  ;;  %v2621_v1 = vsel %vm2550_vm2, %v2611_v45, %v2620_v52  ;;  %v7801_v25 = vld [vmem:[%s9971_s1 + $0x150] sm:$0xff]  }
  0x8c   : > { %7268 = vmatmul.mubr.bf16.gmra.mxu1 %v964_v49  ;;  %7324 = vmatmul.mubr.bf16.gmra.mxu0 %v1516_v50  ;;  %v2635_v49 = vshll.u32 %v7788_v35, 16  ;;  %v2024_v50 = vrot.slane %v8239_v38, 1  ;;  %v2671_v35 = vshll.u32 %v7799_v16, 16 }
  0x8d   : > { %7271 = vmatprep.mubr.bf16.mxu1 %v972_v54  ;;  %7395 = vmatprep.mubr.bf16.mxu0 %v2567_v55  ;;  %v7787_v54 = vld [vmem:[%s9971_s1 + $0x160] sm:$0xff]   ;;  %v2023_v55 = vsel %vm1479_vm0, %v2020_v24, %v2022_v43  ;;  %v2655_v24 = vrot.slane %v2653_v12, 2 }
  0x8e   : > { %v2637_v58 = vrot.slane %v2635_v49, 2  ;;  %v2025_v63 = vsel %vm1479_vm0, %v2022_v43, %v2024_v50  ;;  %v2027_v17 = vsel %vm1479_vm0, %v2024_v50, %v2026_v0  ;;  %v2673_v48 = vrot.slane %v2671_v35, 2  ;;  %v7814_v50 = vld [vmem:[%s9971_s1 + $0x140] sm:$0xff]  }
  0x8f   : > { %v2677_v49 = vshrl.u32 %v7800_v33, 16 }
  0x94   : > { %7272 = vmatmul.mubr.bf16.gmra.mxu1 %v980_v10  ;;  %7396 = vmatmul.mubr.bf16.vlgmr.msra.gmra.mxu0 %v2576_v11  ;;  %v2638_v10 = vor.u32 %v2637_v58, %v2634_v57  ;;  %v2650_v11 = vshrl.u32 %v7793_v61, 16  ;;  %v2689_v57 = vshll.u32 %v7805_v40, 16  ;;  %v7917_v58 = vmov 0  }
  0x95   : > { %7343 = vmatprep.mubr.bf16.mxu1 %v2017_v14  ;;  %7484 = vmatpush3.bf16.msra.mxu0 %v8177_v62  ;;  %v2019_v62 = vsel %vm1479_vm0, %v2016_v3, %v2018_v20  ;;  %v2028_v3 = vrot.slane %v8251_v51, 1  ;;  %v8274_v14 = vld [vmem:[%s7978_s30 + $0x50] sm:$0xff]   ;;  %v2646_v20 = vrot.slane %v2644_v7, 2  ;;  %v2680_v51 = vshll.u32 %v7800_v33, 16  ;;  %6382 = vst [vmem:[%s8324_s7] sm:$0xf] %v7917_v58 }
  0x96   : > { %7399 = vmatprep.mubr.bf16.mxu0 %v2585_v19  ;;  %7485 = vmatprep.subr.bf16.mxu0 %v7776_v15  ;;  %v2643_v19 = vrot.slane %v2641_v6, 1  ;;  %v2652_v23 = vrot.slane %v2650_v11, 1  ;;  %6383 = vst [vmem:[%s8324_s7 + $0x4] sm:$0xf] %v7917_v58  ;;  %6390 = vst [vmem:[%s8324_s7 + $0x9c] sm:$0xf] %v7917_v58 }
  0x97   : > { %v2029_v21 = vsel %vm1479_vm0, %v2026_v0, %v2028_v3  ;;  %v2031_v38 = vsel %vm1479_vm0, %v2028_v3, %v2030_v13  ;;  %6391 = vst [vmem:[%s8324_s7 + $0xa0] sm:$0xf] %v7917_v58  ;;  %6392 = vst [vmem:[%s8324_s7 + $0xa4] sm:$0xf] %v7917_v58  ;;  %v2679_v61 = vrot.slane %v2677_v49, 1  ;;  %7665 = vset.pattern.permute.xlu0 %v7917_v58  ;;  %7666 = vset.pattern.permute.xlu1 %v7917_v58  ;;  %v7806_v3 = vld [vmem:[%s7978_s30 + $0x88] sm:$0xff]  }
  0x98   : > { %v2656_v34 = vor.u32 %v2655_v24, %v2652_v23  ;;  %6393 = vst [vmem:[%s8324_s7 + $0xa8] sm:$0xf] %v7917_v58  ;;  %6394 = vst [vmem:[%s8324_s7 + $0xac] sm:$0xf] %v7917_v58  ;;  %v2691_v6 = vrot.slane %v2689_v57, 2  ;;  %v7811_v7 = vld [vmem:[%s7978_s30 + $0x90] sm:$0xff]  }
  0x99   : > { %7486 = vmatpush3.bf16.msra.mxu0 %v7776_v15  ;;  %v7795_v15 = vld [vmem:[%s7978_s30 + $0x68] sm:$0xff]   ;;  %6395 = vst [vmem:[%s8324_s7 + $0xb0] sm:$0xf] %v7917_v58  ;;  %6396 = vst [vmem:[%s8324_s7 + $0xb4] sm:$0xf] %v7917_v58  ;;  %v2695_v11 = vshrl.u32 %v7806_v3, 16 }
  0x9a   : > { %7487 = vmatprep.subr.bf16.mxu0 %v7783_v27  ;;  %v2659_v29 = vshrl.u32 %v7795_v15, 16  ;;  %v2662_v30 = vshll.u32 %v7795_v15, 16  ;;  %6397 = vst [vmem:[%s8324_s7 + $0xb8] sm:$0xf] %v7917_v58  ;;  %6398 = vst [vmem:[%s8324_s7 + $0xbc] sm:$0xf] %v7917_v58 }
  0x9b   : > { %v2698_v12 = vshll.u32 %v7806_v3, 16  ;;  %v2707_v15 = vshll.u32 %v7811_v7, 16 }
  0x9c   : > { %7344 = vmatmul.mubr.bf16.vlgmr.msra.gmra.mxu1 %v2019_v62  ;;  %7400 = vmatmul.mubr.bf16.gmra.mxu0 %v2594_v31  ;;  %v8293_v62 = vld [vmem:[%s7978_s30 + $0x60] sm:$0xff]   ;;  %v2668_v31 = vshrl.u32 %v7799_v16, 16  ;;  %v2661_v43 = vrot.slane %v2659_v29, 1  ;;  %v7812_v16 = vld [vmem:[%s7978_s30 + $0x98] ss:$0 sps:$4 sm:$0x33]  }
  0x9d   : > { %7432 = vmatpush3.bf16.msra.mxu1 %v8172_v60  ;;  %7347 = vmatprep.mubr.bf16.mxu1 %v2021_v36  ;;  %v2628_v60 = vrot.slane %v2626_v42, 2  ;;  %v7807_v36 = vld [vmem:[%s9971_s1 + $0x148] sm:$0xff]   ;;  %v2036_v46 = vrot.slane %v8293_v62, 1 }
  0x9e   : > { %7433 = vmatprep.subr.bf16.mxu1 %v7775_v32  ;;  %7403 = vmatprep.mubr.bf16.mxu0 %v2603_v37  ;;  %v7816_v37 = vld [vmem:[%s9971_s1 + $0x180] sm:$0xff]  }
  0x9f   : > { %7488 = vmatpush3.bf16.msra.mxu0 %v7783_v27  ;;  %v2629_v5 = vor.u32 %v2628_v60, %v2625_v53  ;;  %v2032_v27 = vrot.slane %v8274_v14, 1  ;;  %v8317_v60 = vld [vmem:[%s9971_s1 + $0x238] sm:$0xff]   ;;  %v2037_v4 = vsel %vm1479_vm0, %v2034_v39, %v2036_v46  ;;  %v2704_v14 = vshrl.u32 %v7811_v7, 16 }
  0xa0   : > { %7489 = vmatprep.subr.bf16.mxu0 %v7790_v44 }
  0xa1   : > { %7434 = vmatpush3.bf16.msra.mxu1 %v7775_v32  ;;  %v2630_v18 = vsel %vm2550_vm2, %v2620_v52, %v2629_v5  ;;  %v2639_v22 = vsel %vm2550_vm2, %v2629_v5, %v2638_v10  ;;  %v2647_v32 = vor.u32 %v2646_v20, %v2643_v19  ;;  %v2033_v42 = vsel %vm1479_vm0, %v2030_v13, %v2032_v27 }
  0xa2   : > { %7435 = vmatprep.subr.bf16.mxu1 %v7781_v47  ;;  %v2686_v52 = vshrl.u32 %v7805_v40, 16  ;;  %v2035_v0 = vsel %vm1479_vm0, %v2032_v27, %v2034_v39  ;;  %v2713_v27 = vshrl.u32 %v7812_v16, 16 }
  0xa3   : > { %7490 = vmatpush3.bf16.msra.mxu0 %v7790_v44  ;;  %v2648_v41 = vsel %vm2550_vm2, %v2638_v10, %v2647_v32  ;;  %v2664_v44 = vrot.slane %v2662_v30, 2  ;;  %v2657_v45 = vsel %vm2550_vm2, %v2647_v32, %v2656_v34  ;;  %v2716_v30 = vshll.u32 %v7812_v16, 16  ;;  %v7809_v32 = vld [vmem:[%s7978_s30 + $0x88] sm:$0xff]  }
  0xa4   : > { %7348 = vmatmul.mubr.bf16.gmra.mxu1 %v2023_v55  ;;  %7404 = vmatmul.mubr.bf16.gmra.mxu0 %v2612_v56  ;;  %v8328_v56 = vld [vmem:[%s7978_s30 + $0x70] sm:$0xff]   ;;  %v2715_v33 = vrot.slane %v2713_v27, 1 }
  0xa5   : > { %7351 = vmatprep.mubr.bf16.mxu1 %v2025_v63  ;;  %7436 = vmatpush3.bf16.msra.mxu1 %v7781_v47  ;;  %v2670_v47 = vrot.slane %v2668_v31, 1  ;;  %v2665_v53 = vor.u32 %v2664_v44, %v2661_v43  ;;  %v2682_v63 = vrot.slane %v2680_v51, 2  ;;  %v7821_v51 = vld [vmem:[%s7978_s30 + $0x10] sm:$0xff]  }
  0xa6   : > { %7407 = vmatprep.mubr.bf16.mxu0 %v2621_v1  ;;  %7437 = vmatprep.subr.bf16.mxu1 %v7787_v54 }
  0xa7   : > { %7491 = vmatprep.subr.bf16.mxu0 %v7796_v2  ;;  %v2674_v55 = vor.u32 %v2673_v48, %v2670_v47  ;;  %v2666_v1 = vsel %vm2550_vm2, %v2656_v34, %v2665_v53  ;;  %v2683_v10 = vor.u32 %v2682_v63, %v2679_v61  ;;  %v7813_v34 = vld [vmem:[%s7978_s30 + $0x90] sm:$0xff]   ;;  %v7815_v47 = vld [vmem:[%s7978_s30 + $0x98] ss:$0 sps:$4 sm:$0x11]   ;;  %v7819_v48 = vld [vmem:[%s7978_s30 + $0x20] sm:$0xff]   ;;  %v3221_v61 = vrot.slane %v7821_v51, 2 }
  0xa8   : > { %7492 = vmatpush3.bf16.msra.mxu0 %v7796_v2  ;;  %v2688_v2 = vrot.slane %v2686_v52, 1  ;;  %v2048_v44 = vrot.slane %v7813_v34, 1  ;;  %v3758_v57 = vrot.slane %v7819_v48, 2  ;;  %v7822_v63 = vld [vmem:[%s7978_s30 + $0x18] sm:$0xff]  }
  0xa9   : > { %7438 = vmatpush3.bf16.msra.mxu1 %v7787_v54  ;;  %7493 = vmatprep.subr.bf16.mxu0 %v7803_v9  ;;  %v7798_v54 = vld [vmem:[%s7978_s30 + $0x68] sm:$0xff]   ;;  %v2675_v5 = vsel %vm2550_vm2, %v2665_v53, %v2674_v55  ;;  %v2684_v20 = vsel %vm2550_vm2, %v2674_v55, %v2683_v10  ;;  %v5349_v51 = vld [vmem:[%s9974_s4 + $0x1b] sm:$0xff] }
  0xaa   : > { %7439 = vmatprep.subr.bf16.mxu1 %v7794_v8  ;;  %v2692_v13 = vor.u32 %v2691_v6, %v2688_v2  ;;  %v7825_v55 = vld [vmem:[%s7978_s30 + $0x28] sm:$0xff]   ;;  %v7830_v6 = vld [vmem:[%s9971_s1 + $0x230] sm:$0xff]  }
  0xac   : > { %7352 = vmatmul.mubr.bf16.gmra.mxu1 %v2027_v17  ;;  %7408 = vmatmul.mubr.bf16.gmra.mxu0 %v2630_v18  ;;  %v7804_v17 = vld [vmem:[%s7978_s30 + $0x78] sm:$0xff]   ;;  %v7808_v18 = vld [vmem:[%s7978_s30 + $0x80] sm:$0xff]   ;;  %v2693_v24 = vsel %vm2550_vm2, %v2683_v10, %v2692_v13 }
  0xad   : > { %7355 = vmatprep.mubr.bf16.mxu1 %v2029_v21  ;;  %7411 = vmatprep.mubr.bf16.mxu0 %v2639_v22  ;;  %v2697_v21 = vrot.slane %v2695_v11, 1  ;;  %v2700_v22 = vrot.slane %v2698_v12, 2  ;;  %v2042_v28 = vrot.slane %v7804_v17, 1  ;;  %v2044_v62 = vrot.slane %v7808_v18, 1  ;;  %v7837_v12 = vld [vmem:[%s9971_s1 + $0x228] sm:$0xff]  }
  0xae   : > { %7440 = vmatpush3.bf16.msra.mxu1 %v7794_v8  ;;  %7494 = vmatpush3.bf16.msra.mxu0 %v7803_v9  ;;  %v2038_v8 = vrot.slane %v7798_v54, 1  ;;  %v2040_v9 = vrot.slane %v8328_v56, 1  ;;  %v7820_v54 = vld [vmem:[%s7978_s30 + $0x8] sm:$0xfc]   ;;  %v2050_v56 = vrot.slane %v7815_v47, 1 }
  0xaf   : > { %7441 = vmatprep.subr.bf16.mxu1 %v7801_v25  ;;  %7495 = vmatprep.subr.bf16.mxu0 %v7810_v26  ;;  %v2701_v29 = vor.u32 %v2700_v22, %v2697_v21  ;;  %v2045_v39 = vsel %vm1479_vm0, %v2042_v28, %v2044_v62  ;;  %v3220_v58 = vrot.slane %v7820_v54, 2  ;;  %v7844_v22 = vld [vmem:[%s9971_s1 + $0x220] sm:$0xff]   ;;  %v7840_v47 = vld [vmem:[%s7978_s30 + $0x48] sm:$0xff]  }
  0xb0   : > { %v2039_v19 = vsel %vm1479_vm0, %v2036_v46, %v2038_v8  ;;  %v2041_v23 = vsel %vm1479_vm0, %v2038_v8, %v2040_v9  ;;  %v2043_v35 = vsel %vm1479_vm0, %v2040_v9, %v2042_v28  ;;  %v2051_v2 = vsel %vm1479_vm0, %v2048_v44, %v2050_v56  ;;  %v7831_v8 = vld [vmem:[%s7978_s30 + $0x38] sm:$0xff]   ;;  %v7843_v54 = vld [vmem:[%s7978_s30 + $0x60] sm:$0xff]  }
  0xb1   : > { %v3223_v9 = vrot.slane %v7822_v63, 2  ;;  %v7834_v28 = vld [vmem:[%s7978_s30 + $0x38] sm:$0xff]   ;;  %v8479_v63 = vld [vmem:[%s7978_s30 + $0x68] sm:$0xff]  }
  0xb2   : > { %7442 = vmatpush3.bf16.msra.mxu1 %v7801_v25  ;;  %7496 = vmatpush3.bf16.msra.mxu0 %v7810_v26  ;;  %v2706_v25 = vrot.slane %v2704_v14, 1  ;;  %v2709_v26 = vrot.slane %v2707_v15, 2  ;;  %v3764_v14 = vrot.slane %v7831_v8, 2  ;;  %v7829_v15 = vld [vmem:[%s9971_s1 + $0x1f0] sm:$0xff]  }
  0xb3   : > { %7443 = vmatprep.subr.bf16.mxu1 %v7807_v36  ;;  %7497 = vmatprep.subr.bf16.mxu0 %v7816_v37  ;;  %v3224_v16 = vsel %vm3219_vm3, %v3221_v61, %v3223_v9 }
  0xb4   : > { %7356 = vmatmul.mubr.bf16.gmra.mxu1 %v2031_v38  ;;  %7412 = vmatmul.mubr.bf16.gmra.mxu0 %v2648_v41  ;;  %v2710_v31 = vor.u32 %v2709_v26, %v2706_v25  ;;  %v7818_v38 = vld [vmem:[%s7978_s30 + $0x18] sm:$0xff]   ;;  %v7817_v41 = vld [vmem:[%s7978_s30 + $0x10] sm:$0xfc]   ;;  %v7835_v26 = vld [vmem:[%s9971_s1 + $0x1e8] sm:$0xff]  }
  0xb5   : > { %7359 = vmatprep.mubr.bf16.mxu1 %v2033_v42  ;;  %7415 = vmatprep.mubr.bf16.mxu0 %v2657_v45  ;;  %v2046_v42 = vrot.slane %v7809_v32, 1  ;;  %v3755_v45 = vrot.slane %v7817_v41, 2  ;;  %v3756_v46 = vrot.slane %v7818_v38, 2  ;;  %v7841_v32 = vld [vmem:[%s9971_s1 + $0x1e0] sm:$0xff]   ;;  %v3231_v38 = vrot.slane %v7834_v28, 2 }
  0xb6   : > { %7444 = vmatpush3.bf16.msra.mxu1 %v7807_v36  ;;  %7498 = vmatpush3.bf16.msra.mxu0 %v7816_v37  ;;  %v2702_v36 = vsel %vm2550_vm2, %v2692_v13, %v2701_v29  ;;  %v2718_v37 = vrot.slane %v2716_v30, 2  ;;  %v2711_v40 = vsel %vm2550_vm2, %v2701_v29, %v2710_v31  ;;  %v7828_v13 = vld [vmem:[%s7978_s30 + $0x28] sm:$0xff]   ;;  %v7838_v29 = vld [vmem:[%s7978_s30 + $0x50] sm:$0xff]  }
  0xb7   : > { %7445 = vmatprep.subr.bf16.mxu1 %v7814_v50  ;;  %7587 = vmatprep.subr.bf16.mxu0 %v8317_v60  ;;  %v2047_v49 = vsel %vm1479_vm0, %v2044_v62, %v2046_v42  ;;  %v2049_v52 = vsel %vm1479_vm0, %v2046_v42, %v2048_v44  ;;  %v3757_v53 = vsel %vm3219_vm3, %v3755_v45, %v3756_v46  ;;  %v8423_v62 = vld [vmem:[%s7978_s30 + $0x40] sm:$0xff]   ;;  %v7848_v45 = vld [vmem:[%s9971_s1 + $0x1d8] sm:$0xff]  }
  0xb8   : > { %v2719_v43 = vor.u32 %v2718_v37, %v2715_v33  ;;  %v3759_v3 = vsel %vm3219_vm3, %v3756_v46, %v3758_v57  ;;  %v8430_v33 = vld [vmem:[%s7978_s30 + $0x58] sm:$0xff]  }
  0xb9   : > { %v3772_v44 = vrot.slane %v8430_v33, 2  ;;  %v5348_v46 = vld [vmem:[%s9974_s4 + $0x13] sm:$0xff] }
  0xba   : > { %7446 = vmatpush3.bf16.msra.mxu1 %v7814_v50  ;;  %v2720_v50 = vsel %vm2550_vm2, %v2710_v31, %v2719_v43  ;;  %v3233_v43 = vrot.slane %v8423_v62, 2  ;;  %5422 = vperm.xlu0 %7665, %v5348_v46  }
  0xbb   : > { %7535 = vmatprep.subr.bf16.mxu1 %v8344_v59 }
  0xbc   : > { %7360 = vmatmul.mubr.bf16.gmra.mxu1 %v2035_v0  ;;  %7416 = vmatmul.mubr.bf16.gmra.mxu0 %v2666_v1  ;;  %v3760_v0 = vrot.slane %v7825_v55, 2  ;;  %v7826_v1 = vld [vmem:[%s7978_s30 + $0x30] sm:$0xff]  }
  0xbd   : > { %7363 = vmatprep.mubr.bf16.mxu1 %v2037_v4  ;;  %7419 = vmatprep.mubr.bf16.mxu0 %v2675_v5  ;;  %v7827_v4 = vld [vmem:[%s7978_s30 + $0x20] sm:$0xff]   ;;  %v3222_v5 = vsel %vm3219_vm3, %v3220_v58, %v3221_v61  ;;  %v3762_v10 = vrot.slane %v7826_v1, 2  ;;  %v8470_v55 = vld [vmem:[%s7978_s30 + $0x50] sm:$0xff]   ;;  %v3234_v58 = vsel %vm3219_vm3, %v3231_v38, %v3233_v43  ;;  %v7864_v1 = vld [vmem:[%s9971_s1 + $0x208] sm:$0xff]  }
  0xbe   : > { %v3761_v7 = vsel %vm3219_vm3, %v3758_v57, %v3760_v0  ;;  %v3225_v11 = vrot.slane %v7827_v4, 2  ;;  %5427 = vperm.xlu0 %7665, %v5349_v51   ;;  %v3235_v4 = vrot.slane %v7840_v47, 2  ;;  %v7856_v51 = vld [vmem:[%s7978_s30 + $0x70] sm:$0xff]  }
  0xbf   : > { %v3763_v17 = vsel %vm3219_vm3, %v3760_v0, %v3762_v10  ;;  %v3765_v21 = vsel %vm3219_vm3, %v3762_v10, %v3764_v14  ;;  %v7855_v0 = vld [vmem:[%s9971_s1 + $0x1d0] sm:$0xff]   ;;  %v3237_v10 = vrot.slane %v8470_v55, 2 }
  0xc0   : > { %v3226_v18 = vsel %vm3219_vm3, %v3223_v9, %v3225_v11 }
  0xc4   : > { %7364 = vmatmul.mubr.bf16.gmra.mxu1 %v2039_v19  ;;  %7420 = vmatmul.mubr.bf16.gmra.mxu0 %v2684_v20  ;;  %v7833_v19 = vld [vmem:[%s7978_s30 + $0x30] sm:$0xff]   ;;  %v7836_v20 = vld [vmem:[%s7978_s30 + $0x48] sm:$0xff]  }
  0xc5   : > { %7367 = vmatprep.mubr.bf16.mxu1 %v2041_v23  ;;  %7423 = vmatprep.mubr.bf16.mxu0 %v2693_v24  ;;  %v3227_v23 = vrot.slane %v7828_v13, 2  ;;  %v3229_v25 = vrot.slane %v7833_v19, 2  ;;  %v3768_v27 = vrot.slane %v7836_v20, 2  ;;  %v7870_v13 = vld [vmem:[%s9971_s1 + $0x200] sm:$0xff]  }
  0xc7   : > { %v3228_v30 = vsel %vm3219_vm3, %v3225_v11, %v3227_v23  ;;  %v3230_v31 = vsel %vm3219_vm3, %v3227_v23, %v3229_v25  ;;  %v3776_v11 = vrot.slane %v8479_v63, 2  ;;  %v8524_v23 = vld [vmem:[%s7978_s30 + $0x60] sm:$0xff]  }
  0xcc   : > { %7368 = vmatmul.mubr.bf16.gmra.mxu1 %v2043_v35  ;;  %7424 = vmatmul.mubr.bf16.gmra.mxu0 %v2702_v36  ;;  %v7850_v35 = vld [vmem:[%s9971_s1 + $0x218] sm:$0xff]  }
  0xcd   : > { %7371 = vmatprep.mubr.bf16.mxu1 %v2045_v39  ;;  %7427 = vmatprep.mubr.bf16.mxu0 %v2711_v40  ;;  %v3770_v39 = vrot.slane %v7838_v29, 2  ;;  %v7857_v40 = vld [vmem:[%s9971_s1 + $0x210] sm:$0xff]   ;;  %v5353_v29 = vld [vmem:[%s9974_s4 + $0x3b] sm:$0xff] }
  0xcf   : > { %v3773_v61 = vsel %vm3219_vm3, %v3770_v39, %v3772_v44 }
  0xd4   : > { %7372 = vmatmul.mubr.bf16.gmra.mxu1 %v2047_v49  ;;  %7428 = vmatmul.mubr.bf16.gmra.mxu0 %v2720_v50  ;;  %v5350_v50 = vld [vmem:[%s9974_s4 + $0x23] sm:$0xff] }
  0xd5   : > { %7375 = vmatprep.mubr.bf16.mxu1 %v2049_v52  ;;  %7499 = vmatprep.mubr.bf16.mxu0 %v3757_v53  ;;  %v3232_v52 = vsel %vm3219_vm3, %v3229_v25, %v3231_v38  ;;  %v3771_v53 = vsel %vm3219_vm3, %v3768_v27, %v3770_v39  ;;  %v7868_v25 = vld [vmem:[%s9971_s1 + $0x1c0] sm:$0xff]   ;;  %v7852_v38 = vld [vmem:[%s7978_s30 + $0x68] sm:$0xff]  }
  0xd6   : > { %5432 = vperm.xlu1 %7666, %v5350_v50   ;;  %v5355_v39 = vld [vmem:[%s9974_s4 + $0x4b] sm:$0xff] }
  0xdc   : > { %7376 = vmatmul.mubr.bf16.gmra.mxu1 %v2051_v2  ;;  %7500 = vmatmul.mubr.bf16.vlgmr.msra.gmra.mxu0 %v3759_v3 }
  0xdd   : > { %7447 = vmatprep.mubr.bf16.mxu1 %v3222_v5  ;;  %7588 = vmatpush3.bf16.msra.mxu0 %v8317_v60  ;;  %v7832_v60 = vld [vmem:[%s7978_s30 + $0x40] sm:$0xff]   ;;  %v5351_v5 = vld [vmem:[%s9974_s4 + $0x2b] sm:$0xff] }
  0xde   : > { %7503 = vmatprep.mubr.bf16.mxu0 %v3761_v7  ;;  %7589 = vmatprep.subr.bf16.mxu0 %v7830_v6  ;;  %v3766_v24 = vrot.slane %v7832_v60, 2  ;;  %v5352_v7 = vld [vmem:[%s9974_s4 + $0x33] sm:$0xff] }
  0xdf   : > { %5437 = vperm.xlu1 %7666, %v5351_v5   ;;  %5442 = vperm.xlu0 %7665, %v5352_v7  }
  0xe0   : > { %v3769_v34 = vsel %vm3219_vm3, %v3766_v24, %v3768_v27 }
  0xe1   : > { %7590 = vmatpush3.bf16.msra.mxu0 %v7830_v6  ;;  %v3774_v6 = vrot.slane %v7843_v54, 2 }
  0xe2   : > { %7591 = vmatprep.subr.bf16.mxu0 %v7837_v12 }
  0xe3   : > { %v3775_v60 = vsel %vm3219_vm3, %v3772_v44, %v3774_v6  ;;  %5447 = vperm.xlu1 %7666, %v5353_v29   ;;  %v7854_v44 = vld [vmem:[%s7978_s30 + $0x80] sm:$0xff]  }
  0xe4   : > { %7448 = vmatmul.mubr.bf16.vlgmr.msra.gmra.mxu1 %v3224_v16  ;;  %7504 = vmatmul.mubr.bf16.gmra.mxu0 %v3763_v17  ;;  %v7846_v16 = vld [vmem:[%s7978_s30 + $0x58] sm:$0xff]   ;;  %v3236_v17 = vsel %vm3219_vm3, %v3233_v43, %v3235_v4  ;;  %v3782_v63 = vrot.slane %v7854_v44, 2  ;;  %v7866_v44 = vld [vmem:[%s7978_s30 + $0xa0] ss:$0 sps:$4 sm:$0x33]  }
  0xe5   : > { %7536 = vmatpush3.bf16.msra.mxu1 %v8344_v59  ;;  %7451 = vmatprep.mubr.bf16.mxu1 %v3226_v18  ;;  %v3767_v59 = vsel %vm3219_vm3, %v3764_v14, %v3766_v24  ;;  %v7849_v18 = vld [vmem:[%s7978_s30 + $0x70] sm:$0xff]   ;;  %v8527_v24 = vld [vmem:[%s7978_s30 + $0x78] sm:$0xff]   ;;  %v3239_v28 = vrot.slane %v7846_v16, 2 }
  0xe6   : > { %7537 = vmatprep.subr.bf16.mxu1 %v7829_v15  ;;  %7507 = vmatprep.mubr.bf16.mxu0 %v3765_v21  ;;  %v3238_v21 = vsel %vm3219_vm3, %v3235_v4, %v3237_v10  ;;  %v3780_v33 = vrot.slane %v8527_v24, 2  ;;  %v3245_v4 = vrot.slane %v7856_v51, 2  ;;  %v8605_v24 = vld [vmem:[%s7978_s30 + $0x98] sm:$0xff]  }
  0xe7   : > { %7592 = vmatpush3.bf16.msra.mxu0 %v7837_v12  ;;  %v7861_v12 = vld [vmem:[%s9971_s1 + $0x1c8] sm:$0xff]   ;;  %5457 = vperm.xlu1 %7666, %v5355_v39  }
  0xe8   : > { %7593 = vmatprep.subr.bf16.mxu0 %v7844_v22  ;;  %v3783_v16 = vsel %vm3219_vm3, %v3780_v33, %v3782_v63 }
  0xe9   : > { %7538 = vmatpush3.bf16.msra.mxu1 %v7829_v15 }
  0xea   : > { %7539 = vmatprep.subr.bf16.mxu1 %v7835_v26 }
  0xeb   : > { %7594 = vmatpush3.bf16.msra.mxu0 %v7844_v22  ;;  %v3777_v22 = vsel %vm3219_vm3, %v3774_v6, %v3776_v11  ;;  %v5358_v6 = vld [vmem:[%s9974_s4 + $0x63] sm:$0xff] }
  0xec   : > { %v8436_v36 = vpop.f32.mrf.mxu1  ;;  %7452 = vmatmul.mubr.bf16.gmra.mxu1 %v3228_v30  ;;  %v8438_v37 = vpop.f32.mrf.mxu0  ;;  %7508 = vmatmul.mubr.bf16.gmra.mxu0 %v3767_v59  ;;  %v3778_v30 = vrot.slane %v7849_v18, 2  ;;  %v5354_v59 = vld [vmem:[%s9974_s4 + $0x43] sm:$0xff] }
  0xed   : > { %7455 = vmatprep.mubr.bf16.mxu1 %v3230_v31  ;;  %7540 = vmatpush3.bf16.msra.mxu1 %v7835_v26 }
  0xee   : > { %v8443_v41 = vpop.f32.mrf.mxu1  ;;  %v8445_v42 = vpop.f32.mrf.mxu0  ;;  %7511 = vmatprep.mubr.bf16.mxu0 %v3769_v34  ;;  %7541 = vmatprep.subr.bf16.mxu1 %v7841_v32  ;;  %v3779_v43 = vsel %vm3219_vm3, %v3776_v11, %v3778_v30  ;;  %v3781_v50 = vsel %vm3219_vm3, %v3778_v30, %v3780_v33  ;;  %v7858_v11 = vld [vmem:[%s7978_s30 + $0x78] sm:$0xff]  }
  0xef   : > { %7595 = vmatprep.subr.bf16.mxu0 %v7850_v35  ;;  %5452 = vperm.xlu0 %7665, %v5354_v59   ;;  %v5361_v30 = vld [vmem:[%s9974_s4 + $0x7b] sm:$0xff]  ;;  %v3247_v59 = vrot.slane %v7858_v11, 2 }
  0xf0   : > { %v8456_v48 = vpop.f32.mrf.mxu1  ;;  %v8458_v49 = vpop.f32.mrf.mxu0  ;;  %7596 = vmatpush3.bf16.msra.mxu0 %v7850_v35 }
  0xf1   : > { %7542 = vmatpush3.bf16.msra.mxu1 %v7841_v32  ;;  %7597 = vmatprep.subr.bf16.mxu0 %v7857_v40  ;;  %v3241_v32 = vrot.slane %v8524_v23, 2  ;;  %v8602_v23 = vld [vmem:[%s7978_s30 + $0x80] sm:$0xff]  }
  0xf2   : > { %v8472_v56 = vpop.f32.mrf.mxu1  ;;  %v8474_v57 = vpop.f32.mrf.mxu0  ;;  %7543 = vmatprep.subr.bf16.mxu1 %v7848_v45  ;;  %v3249_v39 = vrot.slane %v8602_v23, 2 }
  0xf3   : > { %v3242_v47 = vsel %vm3219_vm3, %v3239_v28, %v3241_v32 }
  0xf4   : > { %v8487_v2 = vpop.f32.mrf.mxu1  ;;  %7456 = vmatmul.mubr.bf16.gmra.mxu1 %v3232_v52  ;;  %v8489_v3 = vpop.f32.mrf.mxu0  ;;  %7512 = vmatmul.mubr.bf16.gmra.mxu0 %v3771_v53  ;;  %v7859_v52 = vld [vmem:[%s7978_s30 + $0x88] sm:$0xff]   ;;  %v5356_v53 = vld [vmem:[%s9974_s4 + $0x53] sm:$0xff] }
  0xf5   : > { %7459 = vmatprep.mubr.bf16.mxu1 %v3234_v58  ;;  %7515 = vmatprep.mubr.bf16.mxu0 %v3773_v61  ;;  %v5357_v58 = vld [vmem:[%s9974_s4 + $0x5b] sm:$0xff]  ;;  %v3243_v61 = vrot.slane %v7852_v38, 2  ;;  %v3784_v5 = vrot.slane %v7859_v52, 2 }
  0xf6   : > { %v8497_v8 = vpop.f32.mrf.mxu1  ;;  %v8499_v9 = vpop.f32.mrf.mxu0  ;;  %7544 = vmatpush3.bf16.msra.mxu1 %v7848_v45  ;;  %7598 = vmatpush3.bf16.msra.mxu0 %v7857_v40  ;;  %v3240_v40 = vsel %vm3219_vm3, %v3237_v10, %v3239_v28 }
  0xf7   : > { %7545 = vmatprep.subr.bf16.mxu1 %v7855_v0  ;;  %7599 = vmatprep.subr.bf16.mxu0 %v7864_v1 }
  0xf8   : > { %v8509_v14 = vpop.f32.mrf.mxu1  ;;  %v8511_v15 = vpop.f32.mrf.mxu0  ;;  %5462 = vperm.xlu0 %7665, %v5356_v53   ;;  %5467 = vperm.xlu1 %7666, %v5357_v58   ;;  %v8632_v53 = vld [vmem:[%s7978_s30 + $0x18] sm:$0xff]   ;;  %v5363_v58 = vld [vmem:[%s9974_s4 + $0x8b] sm:$0xff] }
  0xfa   : > { %v8517_v19 = vpop.f32.mrf.mxu1  ;;  %v8519_v20 = vpop.f32.mrf.mxu0  ;;  %7546 = vmatpush3.bf16.msra.mxu1 %v7855_v0  ;;  %7600 = vmatpush3.bf16.msra.mxu0 %v7864_v1 }
  0xfb   : > { %7547 = vmatprep.subr.bf16.mxu1 %v7861_v12  ;;  %7601 = vmatprep.subr.bf16.mxu0 %v7870_v13 }
  0xfc   : > { %v8532_v26 = vpop.f32.mrf.mxu1  ;;  %7460 = vmatmul.mubr.bf16.gmra.mxu1 %v3236_v17  ;;  %v8534_v27 = vpop.f32.mrf.mxu0  ;;  %7516 = vmatmul.mubr.bf16.gmra.mxu0 %v3775_v60  ;;  %v7860_v17 = vld [vmem:[%s7978_s30 + $0x90] sm:$0xff]  }
  0xfd   : > { %7463 = vmatprep.mubr.bf16.mxu1 %v3238_v21  ;;  %7519 = vmatprep.mubr.bf16.mxu0 %v3777_v22  ;;  %v3246_v21 = vsel %vm3219_vm3, %v3243_v61, %v3245_v4  ;;  %v3785_v22 = vsel %vm3219_vm3, %v3782_v63, %v3784_v5 }
  0xfe   : > { %v8542_v62 = vpop.f32.mrf.mxu1  ;;  %v8544_v31 = vpop.f32.mrf.mxu0  ;;  %7548 = vmatpush3.bf16.msra.mxu1 %v7861_v12  ;;  %7602 = vmatpush3.bf16.msra.mxu0 %v7870_v13  ;;  %v5359_v12 = vld [vmem:[%s9974_s4 + $0x6b] sm:$0xff]  ;;  %v3244_v13 = vsel %vm3219_vm3, %v3241_v32, %v3243_v61  ;;  %v3786_v32 = vrot.slane %v7860_v17, 2  ;;  %v3248_v61 = vsel %vm3219_vm3, %v3245_v4, %v3247_v59 }
  0xff   : > { %7549 = vmatprep.subr.bf16.mxu1 %v7868_v25  ;;  %5472 = vperm.xlu0 %7665, %v5358_v6   ;;  %v7871_v6 = vld [vmem:[%s7978_s30 + $0x10] sm:$0xf8]  }
 0x100   : > { %v8548_v34 = vpop.f32.mrf.mxu1  ;;  %v8550_v35 = vpop.f32.mrf.mxu0  ;;  %5477 = vperm.xlu1 %7666, %v5359_v12   ;;  %v3787_v63 = vsel %vm3219_vm3, %v3784_v5, %v3786_v32  ;;  %v7874_v17 = vld [vmem:[%s7978_s30 + $0x10] sm:$0xfc]  }
 0x102   : > { %v8559_v45 = vpop.f32.mrf.mxu1  ;;  %v8561_v46 = vpop.f32.mrf.mxu0  ;;  %7550 = vmatpush3.bf16.msra.mxu1 %v7868_v25  ;;  %v5360_v25 = vld [vmem:[%s9974_s4 + $0x73] sm:$0xff] }
 0x103   : > { %5482 = vperm.xlu0 %7665, %v5360_v25  }
 0x104   : > { %v8570_v54 = vpop.f32.mrf.mxu1  ;;  %7464 = vmatmul.mubr.bf16.gmra.mxu1 %v3240_v40  ;;  %v8572_v55 = vpop.f32.mrf.mxu0  ;;  %7520 = vmatmul.mubr.bf16.gmra.mxu0 %v3779_v43  ;;  %v7863_v40 = vld [vmem:[%s7978_s30 + $0x88] sm:$0xff]   ;;  %v3788_v43 = vrot.slane %v8605_v24, 2  ;;  %v3790_v24 = vrot.slane %v7866_v44, 2  ;;  %v4292_v44 = vshrl.u32 %v7874_v17, 16 }
 0x105   : > { %7467 = vmatprep.mubr.bf16.mxu1 %v3242_v47  ;;  %7523 = vmatprep.mubr.bf16.mxu0 %v3781_v50  ;;  %v8622_v47 = vld [vmem:[%s7978_s30 + $0x90] sm:$0xff]   ;;  %v5362_v50 = vld [vmem:[%s9974_s4 + $0x83] sm:$0xff]  ;;  %v3251_v23 = vrot.slane %v7863_v40, 2  ;;  %v8662_v40 = vld [vmem:[%s7978_s30 + $0x98] ss:$0 sps:$4 sm:$0x33]  }
 0x106   : > { %v8577_v0 = vpop.f32.mrf.mxu1  ;;  %v8579_v1 = vpop.f32.mrf.mxu0  ;;  %5487 = vperm.xlu1 %7666, %v5361_v30   ;;  %v5365_v30 = vld [vmem:[%s9974_s4 + $0x9b] sm:$0xff] }
 0x107   : > { %5492 = vperm.xlu0 %7665, %v5362_v50   ;;  %v4961_v50 = vrot.slane %v8632_v53, 3 }
 0x108   : > { %v8584_v7 = vpop.f32.mrf.mxu1  ;;  %v8586_v10 = vpop.f32.mrf.mxu0 }
 0x109   : > { %10010 = vst [vmem:[#allocation3_spill] sm:$0xff] %v8584_v7 }
 0x10a   : > { %v8595_v60 = vpop.f32.mrf.mxu1  ;;  %v8597_v18 = vpop.f32.mrf.mxu0  ;;  %5497 = vperm.xlu1 %7666, %v5363_v58  }
 0x10b   : > { %10011 = vst [vmem:[#allocation4_spill] sm:$0xff] %v8595_v60 }
 0x10c   : > { %v8610_v28 = vpop.f32.mrf.mxu1  ;;  %7468 = vmatmul.mubr.bf16.gmra.mxu1 %v3244_v13  ;;  %v7293_v29 = vpop.f32.mrf.mxu0  ;;  %7524 = vmatmul.mubr.bf16.gmra.mxu0 %v3783_v16  ;;  %v3250_v13 = vsel %vm3219_vm3, %v3247_v59, %v3249_v39  ;;  %v3789_v16 = vsel %vm3219_vm3, %v3786_v32, %v3788_v43  ;;  %v4960_v32 = vrot.slane %v7871_v6, 3  ;;  %v5366_v6 = vld [vmem:[%s9974_s4 + $0xa3] sm:$0xff] }
 0x10d   : > { %10012 = vst [vmem:[#allocation5_spill] sm:$0xff] %v8610_v28  ;;  %7471 = vmatprep.mubr.bf16.mxu1 %v3246_v21  ;;  %7527 = vmatprep.mubr.bf16.mxu0 %v3785_v22  ;;  %v7875_v21 = vld [vmem:[%s7978_s30 + $0x18] sm:$0xff]  }
 0x10e   : > { %v8615_v33 = vpop.f32.mrf.mxu1  ;;  %v1617_v38 = vpop.f32.mrf.mxu0  ;;  %v5364_v22 = vld [vmem:[%s9974_s4 + $0x93] sm:$0xff]  ;;  %v4300_v25 = vshrl.u32 %v7875_v21, 16  ;;  %5507 = vperm.xlu1 %7666, %v5365_v30   ;;  %v10017_v30 = vrot.slane %v8622_v47, 2 }
 0x10f   : > { %10013 = vst [vmem:[#allocation6_spill] sm:$0xff] %v8615_v33  ;;  %5502 = vperm.xlu0 %7665, %v5364_v22   ;;  %v8666_v33 = vld [vmem:[%s7978_s30 + $0x20] sm:$0xff]  }
 0x110   : > { %v8627_v51 = vpop.f32.mrf.mxu1  ;;  %v8629_v52 = vpop.f32.mrf.mxu0  ;;  %v4302_v60 = vrot.slane %v4300_v25, 2  ;;  %v3255_v25 = vrot.slane %v8662_v40, 2 }
 0x111   : > { %10014 = vst [vmem:[#allocation7_spill] sm:$0xff] %v8627_v51 }
 0x112   : > { %v8640_v11 = vpop.f32.mrf.mxu1  ;;  %v8642_v12 = vpop.f32.mrf.mxu0 }
 0x113   : > { %10015 = vst [vmem:[#allocation8_spill] sm:$0xff] %v8640_v11  ;;  %v4303_v11 = vshll.u32 %v7875_v21, 16  ;;  %v3791_v21 = vsel %vm3219_vm3, %v3788_v43, %v3790_v24  ;;  %v4294_v24 = vrot.slane %v4292_v44, 2  ;;  %5512 = vperm.xlu0 %7665, %v5366_v6  }
 0x114   : > { %v7241_v4 = vpop.f32.mrf.mxu1  ;;  %7472 = vmatmul.mubr.bf16.gmra.mxu1 %v3248_v61  ;;  %v8651_v5 = vpop.f32.mrf.mxu0  ;;  %7528 = vmatmul.mubr.bf16.gmra.mxu0 %v3787_v63  ;;  %v4295_v63 = vshll.u32 %v7874_v17, 16  ;;  %v3252_v17 = vsel %vm3219_vm3, %v3249_v39, %v3251_v23 }
 0x115   : > { %v1262_v59 = vadd.f32 %v7241_v4, %v8438_v37  ;;  %7475 = vmatprep.mubr.bf16.mxu1 %v3250_v13  ;;  %7531 = vmatprep.mubr.bf16.mxu0 %v3789_v16  ;;  %v7876_v37 = vld [vmem:[%s7978_s30 + $0x20] sm:$0xff]   ;;  %v4305_v7 = vrot.slane %v4303_v11, 3  ;;  %v4963_v11 = vrot.slane %v8666_v33, 3 }
 0x116   : > { %v1081_v58 = vpop.f32.mrf.mxu1  ;;  %v8659_v61 = vpop.f32.mrf.mxu0  ;;  %v4297_v28 = vrot.slane %v4295_v63, 3  ;;  %v4309_v44 = vshrl.u32 %v7876_v37, 16 }
 0x117   : > { %v1260_v51 = vadd.f32 %v1081_v58, %v8445_v42  ;;  %v8672_v13 = vadd.f32 %v7293_v29, %v1262_v59  ;;  %v5367_v42 = vld [vmem:[%s9974_s4 + $0xab] sm:$0xff]  ;;  %v3254_v58 = vsel %vm3219_vm3, %v3251_v23, %v10017_v30  ;;  %v4962_v29 = vsel %vm4959_vm4, %v4960_v32, %v4961_v50  ;;  %v5368_v23 = vld [vmem:[%s9974_s4 + $0xb3] sm:$0xff] }
 0x118   : > { %v7242_v16 = vpop.f32.mrf.mxu1  ;;  %v8675_v4 = vpop.f32.mrf.mxu0  ;;  %v8689_v59 = vld [vmem:[%s7978_s30 + $0x28] sm:$0xff]   ;;  %5517 = vperm.xlu1 %7666, %v5367_v42   ;;  %v4298_v33 = vor.u32 %v4297_v28, %v4294_v24  ;;  %5522 = vperm.xlu0 %7665, %v5368_v23   ;;  %v10018_v28 = vrot.slane %v8622_v47, 2  ;;  %v4311_v24 = vrot.slane %v4309_v44, 2  ;;  %v7878_v47 = vld [vmem:[%s7978_s30 + $0x30] sm:$0xff]  }
 0x119   : > { %10016 = vst [vmem:[#allocation9_spill] sm:$0xff] %v8672_v13  ;;  %v1263_v22 = vadd.f32 %v7242_v16, %v8458_v49  ;;  %v8691_v39 = vadd.f32 %v1617_v38, %v1260_v51  ;;  %v7879_v49 = vld [vmem:[%s7978_s30 + $0x28] sm:$0xff]   ;;  %v4965_v6 = vrot.slane %v8689_v59, 3 }
 0x11a   : > { %v1084_v13 = vpop.f32.mrf.mxu1  ;;  %v8693_v43 = vpop.f32.mrf.mxu0  ;;  %v4318_v42 = vshrl.u32 %v7879_v49, 16 }
 0x11b   : > { %v1261_v16 = vadd.f32 %v1084_v13, %v8474_v57  ;;  %v8701_v32 = vadd.f32 %v8629_v52, %v1263_v22  ;;  %v5369_v57 = vld [vmem:[%s9974_s4 + $0xbb] sm:$0xff]  ;;  %v4312_v52 = vshll.u32 %v7876_v37, 16  ;;  %v4321_v22 = vshll.u32 %v7879_v49, 16 }
 0x11c   : > { %v7245_v38 = vpop.f32.mrf.mxu1  ;;  %7476 = vmatmul.mubr.bf16.gmra.mxu1 %v3252_v17  ;;  %v8703_v51 = vpop.f32.mrf.mxu0  ;;  %7532 = vmatmul.mubr.bf16.gmra.mxu0 %v3791_v21  ;;  %v8717_v21 = vor.u32 %v4305_v7, %v4302_v60  ;;  %v3256_v7 = vsel %vm3219_vm3, %v10018_v28, %v3255_v25  ;;  %v4320_v25 = vrot.slane %v4318_v42, 2 }
 0x11d   : > { %v1266_v63 = vadd.f32 %v7245_v38, %v8489_v3  ;;  %7479 = vmatprep.mubr.bf16.mxu1 %v3254_v58  ;;  %7603 = vmatprep.mubr.bf16.mxu0 %v4962_v29  ;;  %v8713_v13 = vadd.f32 %v8642_v12, %v1261_v16  ;;  %v5370_v12 = vld [vmem:[%s9974_s4 + $0xc3] sm:$0xff]  ;;  %v7880_v58 = vld [vmem:[%s7978_s30 + $0x30] sm:$0xff]   ;;  %v4314_v49 = vrot.slane %v4312_v52, 3 }
 0x11e   : > { %v1097_v17 = vpop.f32.mrf.mxu1  ;;  %v8715_v40 = vpop.f32.mrf.mxu0  ;;  %5527 = vperm.xlu1 %7666, %v5369_v57   ;;  %v5371_v29 = vld [vmem:[%s9974_s4 + $0xcb] sm:$0xff]  ;;  %v4307_v53 = vsel %vm4290_vm5, %v4298_v33, %v8717_v21  ;;  %v4323_v57 = vrot.slane %v4321_v22, 3  ;;  %5532 = vperm.xlu0 %7665, %v5370_v12   ;;  %v4330_v42 = vshll.u32 %v7880_v58, 16  ;;  %v5373_v22 = vld [vmem:[%s9974_s4 + $0xdb] sm:$0xff]  ;;  %v4967_v12 = vrot.slane %v7878_v47, 3 }
 0x11f   : > { %v1264_v3 = vadd.f32 %v1097_v17, %v8499_v9  ;;  %v8724_v37 = vadd.f32 %v8651_v5, %v1266_v63  ;;  %v4964_v9 = vsel %vm4959_vm4, %v4961_v50, %v4963_v11  ;;  %v4966_v50 = vsel %vm4959_vm4, %v4963_v11, %v4965_v6  ;;  %v8751_v63 = vld [vmem:[%s7978_s30 + $0x38] sm:$0xff]  }
 0x120   : > { %v7246_v30 = vpop.f32.mrf.mxu1  ;;  %v8729_v60 = vpop.f32.mrf.mxu0  ;;  %v4327_v11 = vshrl.u32 %v7880_v58, 16 }
 0x121   : > { %v1267_v5 = vadd.f32 %v7246_v30, %v8511_v15  ;;  %v8741_v16 = vadd.f32 %v8659_v61, %v1264_v3  ;;  %v7883_v15 = vld [vmem:[%s7978_s30 + $0x38] sm:$0xff]   ;;  %v4315_v3 = vor.u32 %v4314_v49, %v4311_v24 }
 0x122   : > { %v1100_v23 = vpop.f32.mrf.mxu1  ;;  %v8743_v38 = vpop.f32.mrf.mxu0  ;;  %5537 = vperm.xlu1 %7666, %v5371_v29   ;;  %v5372_v61 = vld [vmem:[%s9974_s4 + $0xd3] sm:$0xff]  ;;  %v4336_v58 = vshrl.u32 %v7883_v15, 16  ;;  %v4339_v29 = vshll.u32 %v7883_v15, 16  ;;  %v4329_v47 = vrot.slane %v4327_v11, 2 }
 0x123   : > { %v1265_v44 = vadd.f32 %v1100_v23, %v8519_v20  ;;  %v8759_v52 = vadd.f32 %v8675_v4, %v1267_v5  ;;  %5542 = vperm.xlu0 %7665, %v5372_v61   ;;  %v5374_v5 = vld [vmem:[%s9974_s4 + $0xe3] sm:$0xff]  ;;  %v4332_v23 = vrot.slane %v4330_v42, 3 }
 0x124   : > { %v7249_v17 = vpop.f32.mrf.mxu1  ;;  %7480 = vmatmul.mubr.bf16.gmra.mxu1 %v3256_v7  ;;  %v8761_v33 = vpop.f32.mrf.mxu0  ;;  %7604 = vmatmul.mubr.bf16.vlgmr.msra.gmra.mxu0 %v4964_v9  ;;  %v4324_v7 = vor.u32 %v4323_v57, %v4320_v25  ;;  %v4969_v9 = vrot.slane %v8751_v63, 3  ;;  %v4316_v25 = vsel %vm4290_vm5, %v8717_v21, %v4315_v3  ;;  %v7884_v57 = vld [vmem:[%s7978_s30 + $0x40] sm:$0xff]   ;;  %v4338_v11 = vrot.slane %v4336_v58, 2  ;;  %v8801_v42 = vld [vmem:[%s7978_s30 + $0x48] sm:$0xff]  }
 0x125   : > { %v1270_v20 = vadd.f32 %v7249_v17, %v8534_v27  ;;  %7551 = vmatprep.mubr.bf16.mxu1 %v4307_v53  ;;  %7607 = vmatprep.mubr.bf16.mxu0 %v4966_v50  ;;  %v8768_v4 = vadd.f32 %v8693_v43, %v1265_v44  ;;  %v7882_v53 = vld [vmem:[%s7978_s30 + $0x40] sm:$0xff]   ;;  %v7887_v21 = vld [vmem:[%s7978_s30 + $0x48] sm:$0xff]   ;;  %v4345_v58 = vshrl.u32 %v7884_v57, 16 }
 0x126   : > { %v1113_v30 = vpop.f32.mrf.mxu1  ;;  %v8770_v28 = vpop.f32.mrf.mxu0  ;;  %5547 = vperm.xlu1 %7666, %v5373_v22   ;;  %v4325_v61 = vsel %vm4290_vm5, %v4315_v3, %v4324_v7  ;;  %v4970_v17 = vsel %vm4959_vm4, %v4967_v12, %v4969_v9  ;;  %v4333_v3 = vor.u32 %v4332_v23, %v4329_v47  ;;  %v4973_v47 = vrot.slane %v8801_v42, 3 }
 0x127   : > { %v1268_v27 = vadd.f32 %v1113_v30, %v8544_v31  ;;  %v8778_v43 = vadd.f32 %v8703_v51, %v1270_v20  ;;  %v5375_v31 = vld [vmem:[%s9974_s4 + $0xeb] sm:$0xff]  ;;  %v4968_v51 = vsel %vm4959_vm4, %v4965_v6, %v4967_v12  ;;  %5552 = vperm.xlu0 %7665, %v5374_v5   ;;  %v5376_v6 = vld [vmem:[%s9974_s4 + $0xf3] sm:$0xff]  ;;  %v4971_v12 = vrot.slane %v7882_v53, 3  ;;  %v5377_v30 = vld [vmem:[%s9974_s4 + $0xfb] sm:$0xff] }
 0x128   : > { %v7250_v24 = vpop.f32.mrf.mxu1  ;;  %v8780_v49 = vpop.f32.mrf.mxu0  ;;  %v4354_v23 = vshrl.u32 %v7887_v21, 16  ;;  %v4357_v53 = vshll.u32 %v7887_v21, 16 }
 0x129   : > { %v1271_v50 = vadd.f32 %v7250_v24, %v8550_v35  ;;  %v8794_v63 = vadd.f32 %v8715_v40, %v1268_v27  ;;  %v4341_v35 = vrot.slane %v4339_v29, 3  ;;  %v4348_v29 = vshll.u32 %v7884_v57, 16 }
 0x12a   : > { %v1116_v15 = vpop.f32.mrf.mxu1  ;;  %v8796_v44 = vpop.f32.mrf.mxu0  ;;  %5557 = vperm.xlu1 %7666, %v5375_v31   ;;  %v4972_v57 = vsel %vm4959_vm4, %v4969_v9, %v4971_v12  ;;  %v4974_v9 = vsel %vm4959_vm4, %v4971_v12, %v4973_v47 }
 0x12b   : > { %v1269_v59 = vadd.f32 %v1116_v15, %v8561_v46  ;;  %v8809_v40 = vadd.f32 %v8729_v60, %v1271_v50  ;;  %v8822_v24 = vor.u32 %v4341_v35, %v4338_v11  ;;  %5562 = vperm.xlu0 %7665, %v5376_v6   ;;  %v7888_v15 = vld [vmem:[%s7978_s30 + $0x50] sm:$0xff]   ;;  %v4350_v11 = vrot.slane %v4348_v29, 3 }
 0x12c   : > { %v7253_v22 = vpop.f32.mrf.mxu1  ;;  %7552 = vmatmul.mubr.bf16.vlgmr.msra.gmra.mxu1 %v4316_v25  ;;  %v8811_v20 = vpop.f32.mrf.mxu0  ;;  %7608 = vmatmul.mubr.bf16.gmra.mxu0 %v4968_v51  ;;  %v4334_v25 = vsel %vm4290_vm5, %v4324_v7, %v4333_v3  ;;  %v4356_v6 = vrot.slane %v4354_v23, 2  ;;  %v4363_v12 = vshrl.u32 %v7888_v15, 16  ;;  %v5381_v23 = vld [vmem:[%s9974_s4 + $0x11b] sm:$0xff] }
 0x12d   : > { %v1274_v46 = vadd.f32 %v7253_v22, %v8572_v55  ;;  %7555 = vmatprep.mubr.bf16.mxu1 %v4325_v61  ;;  %7611 = vmatprep.mubr.bf16.mxu0 %v4970_v17  ;;  %v8818_v60 = vadd.f32 %v8743_v38, %v1269_v59  ;;  %v5378_v38 = vld [vmem:[%s9974_s4 + $0x103] sm:$0xff]  ;;  %v4347_v17 = vrot.slane %v4345_v58, 2  ;;  %v4343_v59 = vsel %vm4290_vm5, %v4333_v3, %v8822_v24 }
 0x12e   : > { %v1129_v27 = vpop.f32.mrf.mxu1  ;;  %v8820_v5 = vpop.f32.mrf.mxu0  ;;  %5567 = vperm.xlu1 %7666, %v5377_v30   ;;  %v4359_v22 = vrot.slane %v4357_v53, 3  ;;  %v8853_v30 = vld [vmem:[%s7978_s30 + $0x58] sm:$0xff]  }
 0x12f   : > { %v1272_v55 = vadd.f32 %v1129_v27, %v8579_v1  ;;  %v8830_v31 = vadd.f32 %v8761_v33, %v1274_v46  ;;  %v5379_v1 = vld [vmem:[%s9974_s4 + $0x10b] sm:$0xff]  ;;  %5572 = vperm.xlu0 %7665, %v5378_v38   ;;  %v4366_v27 = vshll.u32 %v7888_v15, 16  ;;  %v4351_v53 = vor.u32 %v4350_v11, %v4347_v17 }
 0x130   : > { %v7254_v50 = vpop.f32.mrf.mxu1  ;;  %v8833_v51 = vpop.f32.mrf.mxu0  ;;  %v7886_v33 = vld [vmem:[%s7978_s30 + $0x50] sm:$0xff]  }
 0x131   : > { %v1275_v61 = vadd.f32 %v7254_v50, %v8586_v10  ;;  %v8843_v35 = vadd.f32 %v8770_v28, %v1272_v55  ;;  %v7891_v10 = vld [vmem:[%s7978_s30 + $0x58] sm:$0xff]   ;;  %v4975_v55 = vrot.slane %v7886_v33, 3  ;;  %v4365_v33 = vrot.slane %v4363_v12, 2 }
 0x132   : > { %v1132_v7 = vpop.f32.mrf.mxu1  ;;  %v8845_v21 = vpop.f32.mrf.mxu0  ;;  %5577 = vperm.xlu1 %7666, %v5379_v1   ;;  %v5380_v28 = vld [vmem:[%s9974_s4 + $0x113] sm:$0xff]  ;;  %v4372_v15 = vshrl.u32 %v7891_v10, 16  ;;  %v4375_v1 = vshll.u32 %v7891_v10, 16 }
 0x133   : > { %v1273_v46 = vadd.f32 %v1132_v7, %v8597_v18  ;;  %v8861_v58 = vadd.f32 %v8780_v49, %v1275_v61  ;;  %5582 = vperm.xlu0 %7665, %v5380_v28   ;;  %v4368_v7 = vrot.slane %v4366_v27, 3 }
 0x134   : > { %v7257_v3 = vpop.f32.mrf.mxu1  ;;  %7556 = vmatmul.mubr.bf16.gmra.mxu1 %v4334_v25  ;;  %v8863_v29 = vpop.f32.mrf.mxu0  ;;  %7612 = vmatmul.mubr.bf16.gmra.mxu0 %v4972_v57  ;;  %v4360_v25 = vor.u32 %v4359_v22, %v4356_v6  ;;  %v4977_v57 = vrot.slane %v8853_v30, 3  ;;  %v4352_v6 = vsel %vm4290_vm5, %v8822_v24, %v4351_v53  ;;  %v7892_v22 = vld [vmem:[%s7978_s30 + $0x60] sm:$0xff]   ;;  %v4374_v12 = vrot.slane %v4372_v15, 2 }
 0x135   : > { %v1278_v18 = vadd.f32 %v7257_v3, %v8436_v36  ;;  %7559 = vmatprep.mubr.bf16.mxu1 %v4343_v59  ;;  %7615 = vmatprep.mubr.bf16.mxu0 %v4974_v9  ;;  %v8870_v49 = vadd.f32 %v8796_v44, %v1273_v46  ;;  %v5382_v36 = vld [vmem:[%s9974_s4 + $0x123] sm:$0xff]  ;;  %v5383_v9 = vld [vmem:[%s9974_s4 + $0x12b] sm:$0xff]  ;;  %v4377_v27 = vrot.slane %v4375_v1, 3  ;;  %v4384_v15 = vshll.u32 %v7892_v22, 16 }
 0x136   : > { %v1145_v38 = vpop.f32.mrf.mxu1  ;;  %v1697_v50 = vpop.f32.mrf.mxu0  ;;  %5587 = vperm.xlu1 %7666, %v5381_v23   ;;  %v7890_v59 = vld [vmem:[%s7978_s30 + $0x60] sm:$0xff]   ;;  %v4361_v28 = vsel %vm4290_vm5, %v4351_v53, %v4360_v25  ;;  %v4978_v3 = vsel %vm4959_vm4, %v4975_v55, %v4977_v57  ;;  %v7895_v23 = vld [vmem:[%s7978_s30 + $0x68] sm:$0xff]  }
 0x137   : > { %v1276_v61 = vadd.f32 %v1145_v38, %v8443_v41  ;;  %v8878_v44 = vadd.f32 %v8811_v20, %v1278_v18  ;;  %v4976_v20 = vsel %vm4959_vm4, %v4973_v47, %v4975_v55  ;;  %5592 = vperm.xlu0 %7665, %v5382_v36   ;;  %v4369_v18 = vor.u32 %v4368_v7, %v4365_v33 }
 0x138   : > { %v7258_v17 = vpop.f32.mrf.mxu1  ;;  %v7314_v11 = vpop.f32.mrf.mxu0  ;;  %v4979_v53 = vrot.slane %v7890_v59, 3  ;;  %v4381_v38 = vshrl.u32 %v7892_v22, 16 }
 0x139   : > { %v1279_v41 = vadd.f32 %v7258_v17, %v8456_v48  ;;  %v8892_v30 = vadd.f32 %v8820_v5, %v1276_v61  ;;  %v8897_v48 = vld [vmem:[%s7978_s30 + $0x68] sm:$0xff]   ;;  %v4378_v61 = vor.u32 %v4377_v27, %v4374_v12  ;;  %v4390_v17 = vshrl.u32 %v7895_v23, 16 }
 0x13a   : > { %v1148_v10 = vpop.f32.mrf.mxu1  ;;  %v1700_v46 = vpop.f32.mrf.mxu0  ;;  %5597 = vperm.xlu1 %7666, %v5383_v9   ;;  %v4981_v36 = vrot.slane %v8897_v48, 3  ;;  %v4393_v9 = vshll.u32 %v7895_v23, 16  ;;  %v4370_v59 = vsel %vm4290_vm5, %v4360_v25, %v4369_v18  ;;  %v4383_v22 = vrot.slane %v4381_v38, 2  ;;  %v8923_v23 = vld [vmem:[%s7978_s30 + $0x78] sm:$0xff]  }
 0x13b   : > { %v1277_v42 = vadd.f32 %v1148_v10, %v8472_v56  ;;  %v8902_v24 = vadd.f32 %v8833_v51, %v1279_v41  ;;  %v4980_v41 = vsel %vm4959_vm4, %v4977_v57, %v4979_v53  ;;  %v4386_v10 = vrot.slane %v4384_v15, 3 }
 0x13c   : > { %v7261_v5 = vpop.f32.mrf.mxu1  ;;  %7560 = vmatmul.mubr.bf16.gmra.mxu1 %v4352_v6  ;;  %v7317_v47 = vpop.f32.mrf.mxu0  ;;  %7616 = vmatmul.mubr.bf16.gmra.mxu0 %v4976_v20  ;;  %v7896_v6 = vld [vmem:[%s7978_s30 + $0x70] sm:$0xff]   ;;  %v4982_v27 = vsel %vm4959_vm4, %v4979_v53, %v4981_v36  ;;  %v4392_v48 = vrot.slane %v4390_v17, 2  ;;  %v4395_v25 = vrot.slane %v4393_v9, 3  ;;  %v4985_v9 = vrot.slane %v8923_v23, 3 }
 0x13d   : > { %v1282_v55 = vadd.f32 %v7261_v5, %v8487_v2  ;;  %7563 = vmatprep.mubr.bf16.mxu1 %v4361_v28  ;;  %7619 = vmatprep.mubr.bf16.mxu0 %v4978_v3  ;;  %v8906_v1 = vadd.f32 %v8845_v21, %v1277_v42  ;;  %v7894_v28 = vld [vmem:[%s7978_s30 + $0x70] sm:$0xff]   ;;  %v7899_v42 = vld [vmem:[%s7978_s30 + $0x78] sm:$0xff]   ;;  %v4402_v38 = vshll.u32 %v7896_v6, 16 }
 0x13e   : > { %v1161_v56 = vpop.f32.mrf.mxu1  ;;  %v1713_v51 = vpop.f32.mrf.mxu0  ;;  %v4983_v53 = vrot.slane %v7894_v28, 3 }
 0x13f   : > { %v1280_v33 = vadd.f32 %v1161_v56, %v8497_v8  ;;  %v8911_v2 = vadd.f32 %v8863_v29, %v1282_v55  ;;  %v4379_v29 = vsel %vm4290_vm5, %v4369_v18, %v4378_v61  ;;  %v4387_v18 = vor.u32 %v4386_v10, %v4383_v22 }
 0x140   : > { %v7262_v7 = vpop.f32.mrf.mxu1  ;;  %v7318_v21 = vpop.f32.mrf.mxu0  ;;  %v4404_v22 = vrot.slane %v4402_v38, 3 }
 0x141   : > { %v1283_v20 = vadd.f32 %v7262_v7, %v8509_v14  ;;  %v8918_v3 = vadd.f32 %v1697_v50, %v1280_v33  ;;  %v4399_v50 = vshrl.u32 %v7896_v6, 16  ;;  %v4408_v33 = vshrl.u32 %v7899_v42, 16 }
 0x142   : > { %v1164_v8 = vpop.f32.mrf.mxu1  ;;  %v1716_v12 = vpop.f32.mrf.mxu0  ;;  %v4411_v7 = vshll.u32 %v7899_v42, 16  ;;  %v4388_v28 = vsel %vm4290_vm5, %v4378_v61, %v4387_v18 }
 0x143   : > { %v1281_v57 = vadd.f32 %v1164_v8, %v8517_v19  ;;  %v8927_v5 = vadd.f32 %v7314_v11, %v1283_v20  ;;  %v4396_v11 = vor.u32 %v4395_v25, %v4392_v48  ;;  %v4401_v20 = vrot.slane %v4399_v50, 2 }
 0x144   : > { %v7265_v14 = vpop.f32.mrf.mxu1  ;;  %7564 = vmatmul.mubr.bf16.gmra.mxu1 %v4370_v59  ;;  %v7321_v55 = vpop.f32.mrf.mxu0  ;;  %7620 = vmatmul.mubr.bf16.gmra.mxu0 %v4980_v41  ;;  %v4984_v8 = vsel %vm4959_vm4, %v4981_v36, %v4983_v53  ;;  %v4986_v25 = vsel %vm4959_vm4, %v4983_v53, %v4985_v9  ;;  %v4410_v23 = vrot.slane %v4408_v33, 2  ;;  %v4413_v42 = vrot.slane %v4411_v7, 3 }
 0x145   : > { %v1286_v15 = vadd.f32 %v7265_v14, %v8532_v26  ;;  %7567 = vmatprep.mubr.bf16.mxu1 %v4379_v29  ;;  %7623 = vmatprep.mubr.bf16.mxu0 %v4982_v27  ;;  %v8930_v56 = vadd.f32 %v1700_v46, %v1281_v57  ;;  %v7898_v46 = vld [vmem:[%s7978_s30 + $0x80] sm:$0xff]   ;;  %v8946_v57 = vld [vmem:[%s7978_s30 + $0x88] sm:$0xff]  }
 0x146   : > { %v1177_v17 = vpop.f32.mrf.mxu1  ;;  %v1729_v19 = vpop.f32.mrf.mxu0  ;;  %v7900_v29 = vld [vmem:[%s7978_s30 + $0x80] sm:$0xff]   ;;  %v7903_v14 = vld [vmem:[%s7978_s30 + $0x88] sm:$0xff]   ;;  %v4987_v38 = vrot.slane %v7898_v46, 3  ;;  %v4989_v7 = vrot.slane %v8946_v57, 3 }
 0x147   : > { %v1284_v59 = vadd.f32 %v1177_v17, %v8542_v62  ;;  %v8934_v41 = vadd.f32 %v7317_v47, %v1286_v15  ;;  %v4397_v47 = vsel %vm4290_vm5, %v4387_v18, %v4396_v11  ;;  %v4417_v18 = vshrl.u32 %v7900_v29, 16 }
 0x148   : > { %v7266_v26 = vpop.f32.mrf.mxu1  ;;  %v7322_v6 = vpop.f32.mrf.mxu0  ;;  %v4420_v53 = vshll.u32 %v7900_v29, 16  ;;  %v4990_v57 = vsel %vm4959_vm4, %v4987_v38, %v4989_v7 }
 0x149   : > { %v1287_v10 = vadd.f32 %v7266_v26, %v8548_v34  ;;  %v8941_v27 = vadd.f32 %v1713_v51, %v1284_v59  ;;  %v4405_v51 = vor.u32 %v4404_v22, %v4401_v20  ;;  %v4426_v59 = vshrl.u32 %v7903_v14, 16 }
 0x14a   : > { %v1180_v48 = vpop.f32.mrf.mxu1  ;;  %v1732_v62 = vpop.f32.mrf.mxu0  ;;  %v4429_v26 = vshll.u32 %v7903_v14, 16 }
 0x14b   : > { %v1285_v34 = vadd.f32 %v1180_v48, %v8559_v45  ;;  %v8950_v50 = vadd.f32 %v7318_v21, %v1287_v10  ;;  %v4414_v21 = vor.u32 %v4413_v42, %v4410_v23  ;;  %v4406_v46 = vsel %vm4290_vm5, %v4396_v11, %v4405_v51 }
 0x14c   : > { %v7269_v61 = vpop.f32.mrf.mxu1  ;;  %7568 = vmatmul.mubr.bf16.gmra.mxu1 %v4388_v28  ;;  %v7325_v36 = vpop.f32.mrf.mxu0  ;;  %7624 = vmatmul.mubr.bf16.gmra.mxu0 %v4984_v8  ;;  %v7904_v28 = vld [vmem:[%s7978_s30 + $0x90] sm:$0xff]   ;;  %v10019_v8 = vld [vmem:[#allocation3_spill] sm:$0xff]  ;;  %v4419_v48 = vrot.slane %v4417_v18, 2  ;;  %v4428_v14 = vrot.slane %v4426_v59, 2  ;;  %v4431_v11 = vrot.slane %v4429_v26, 3 }
 0x14d   : > { %v1290_v15 = vadd.f32 %v7269_v61, %v8570_v54  ;;  %7571 = vmatprep.mubr.bf16.mxu1 %v4397_v47  ;;  %7627 = vmatprep.mubr.bf16.mxu0 %v4986_v25  ;;  %v8953_v17 = vadd.f32 %v1716_v12, %v1285_v34  ;;  %v4988_v12 = vsel %vm4959_vm4, %v4985_v9, %v4987_v38  ;;  %v4422_v47 = vrot.slane %v4420_v53, 3  ;;  %v7902_v25 = vld [vmem:[%s7978_s30 + $0x90] sm:$0xff]   ;;  %v8969_v34 = vld [vmem:[%s7978_s30 + $0x98] sm:$0xff]   ;;  %v10020_v9 = vld [vmem:[#allocation4_spill] sm:$0xff] }
 0x14e   : > { %v1193_v33 = vpop.f32.mrf.mxu1  ;;  %v1745_v45 = vpop.f32.mrf.mxu0  ;;  %v7907_v61 = vld [vmem:[%s7978_s30 + $0x98] sm:$0xff]   ;;  %v4991_v38 = vrot.slane %v7902_v25, 3  ;;  %v10026_v25 = vld [vmem:[#allocation7_spill] sm:$0xff] }
 0x14f   : > { %v1288_v20 = vadd.f32 %v1193_v33, %v8577_v0  ;;  %v8957_v22 = vadd.f32 %v7321_v55, %v1290_v15  ;;  %v4415_v55 = vsel %vm4290_vm5, %v4405_v51, %v4414_v21  ;;  %v4423_v51 = vor.u32 %v4422_v47, %v4419_v48 }
 0x150   : > { %v7270_v54 = vpop.f32.mrf.mxu1  ;;  %v7326_v10 = vpop.f32.mrf.mxu0 }
 0x151   : > { %v1291_v29 = vadd.f32 %v7270_v54, %v10019_v8  ;;  %v8964_v23 = vadd.f32 %v1729_v19, %v1288_v20  ;;  %v4435_v19 = vshrl.u32 %v7904_v28, 16  ;;  %v4438_v20 = vshll.u32 %v7904_v28, 16  ;;  %v10022_v54 = vld [vmem:[#allocation5_spill] sm:$0xff] }
 0x152   : > { %v1196_v42 = vpop.f32.mrf.mxu1  ;;  %v1748_v0 = vpop.f32.mrf.mxu0 }
 0x153   : > { %v1289_v15 = vadd.f32 %v1196_v42, %v10020_v9  ;;  %v8973_v33 = vadd.f32 %v7322_v6, %v1291_v29  ;;  %v4432_v6 = vor.u32 %v4431_v11, %v4428_v14  ;;  %v4993_v29 = vrot.slane %v8969_v34, 3  ;;  %v7908_v14 = vld [vmem:[%s7978_s30 + $0xa0] ss:$0 sps:$4 sm:$0x77]  }
 0x154   : > { %v7273_v18 = vpop.f32.mrf.mxu1  ;;  %7572 = vmatmul.mubr.bf16.gmra.mxu1 %v4406_v46  ;;  %v7397_v53 = vpop.f32.mrf.mxu0  ;;  %7628 = vmatmul.mubr.bf16.gmra.mxu0 %v4988_v12  ;;  %v4444_v46 = vshrl.u32 %v7907_v61, 16  ;;  %v4447_v9 = vshll.u32 %v7907_v61, 16  ;;  %v10024_v12 = vld [vmem:[#allocation6_spill] sm:$0xff]  ;;  %v4437_v48 = vrot.slane %v4435_v19, 2  ;;  %v4440_v47 = vrot.slane %v4438_v20, 3  ;;  %v10028_v19 = vld [vmem:[#allocation8_spill] sm:$0xff] }
 0x155   : > { %10021 = vst [vmem:[#allocation3_spill] sm:$0xff] %v8973_v33  ;;  %v1294_v8 = vadd.f32 %v7273_v18, %v10022_v54  ;;  %7575 = vmatprep.mubr.bf16.mxu1 %v4415_v55  ;;  %7631 = vmatprep.mubr.bf16.mxu0 %v4990_v57  ;;  %v8976_v59 = vadd.f32 %v1732_v62, %v1289_v15  ;;  %v7906_v57 = vld [vmem:[%s7978_s30 + $0xa0] ss:$0 sps:$4 sm:$0x77]   ;;  %s6492_s30 = sshll.u32 %s10126_s2, 1 }
 0x156   : > { %v1209_v26 = vpop.f32.mrf.mxu1  ;;  %v2821_v42 = vpop.f32.mrf.mxu0  ;;  %v4424_v15 = vsel %vm4290_vm5, %v4414_v21, %v4423_v51  ;;  %v4992_v54 = vsel %vm4959_vm4, %v4989_v7, %v4991_v38  ;;  %v4441_v7 = vor.u32 %v4440_v47, %v4437_v48  ;;  %s9805_s23 = scalar_lea.vmem %s9976_s6, %s6492_s30 }
 0x157   : > { %10023 = vst [vmem:[#allocation4_spill] sm:$0xff] %v8976_v59  ;;  %v1292_v33 = vadd.f32 %v1209_v26, %v10024_v12  ;;  %v8980_v28 = vadd.f32 %v7325_v36, %v1294_v8  ;;  %v4433_v26 = vsel %vm4290_vm5, %v4423_v51, %v4432_v6  ;;  %v4994_v36 = vsel %vm4959_vm4, %v4991_v38, %v4993_v29 }
 0x158   : > { %v7274_v18 = vpop.f32.mrf.mxu1  ;;  %v7398_v55 = vpop.f32.mrf.mxu0  ;;  %v4446_v8 = vrot.slane %v4444_v46, 2  ;;  %v4449_v12 = vrot.slane %v4447_v9, 3  ;;  %v4456_v51 = vshll.u32 %v7908_v14, 16 }
 0x159   : > { %10025 = vst [vmem:[#allocation5_spill] sm:$0xff] %v8980_v28  ;;  %v1295_v62 = vadd.f32 %v7274_v18, %v10026_v25  ;;  %v8987_v11 = vadd.f32 %v1745_v45, %v1292_v33  ;;  %v4995_v25 = vrot.slane %v7906_v57, 3  ;;  %v10029_v45 = vld [vmem:[#allocation9_spill] sm:$0xff] }
 0x15a   : > { %v1212_v34 = vpop.f32.mrf.mxu1  ;;  %v2824_v61 = vpop.f32.mrf.mxu0  ;;  %v4450_v9 = vor.u32 %v4449_v12, %v4446_v8 }
 0x15b   : > { %10027 = vst [vmem:[#allocation6_spill] sm:$0xff] %v8987_v11  ;;  %v1293_v20 = vadd.f32 %v1212_v34, %v10028_v19  ;;  %v8992_v28 = vadd.f32 %v7326_v10, %v1295_v62  ;;  %v4453_v11 = vshrl.u32 %v7908_v14, 16  ;;  %v4996_v47 = vsel %vm4959_vm4, %v4993_v29, %v4995_v25 }
 0x15c   : > { %v7345_v18 = vpop.f32.mrf.mxu1  ;;  %7576 = vmatmul.mubr.bf16.gmra.mxu1 %v4424_v15  ;;  %v7401_v21 = vpop.f32.mrf.mxu0  ;;  %7632 = vmatmul.mubr.bf16.gmra.mxu0 %v4992_v54  ;;  %v4442_v54 = vsel %vm4290_vm5, %v4432_v6, %v4441_v7  ;;  %v4451_v8 = vsel %vm4290_vm5, %v4441_v7, %v4450_v9 }
 0x15d   : > { %v2333_v33 = vadd.f32 %v7345_v18, %v10029_v45  ;;  %7579 = vmatprep.mubr.bf16.mxu1 %v4433_v26  ;;  %7635 = vmatprep.mubr.bf16.mxu0 %v4994_v36  ;;  %v8995_v59 = vadd.f32 %v1748_v0, %v1293_v20  ;;  %v4455_v34 = vrot.slane %v4453_v11, 2  ;;  %v4458_v26 = vrot.slane %v4456_v51, 3 }
 0x15e   : > { %v2152_v38 = vpop.f32.mrf.mxu1  ;;  %v2837_v46 = vpop.f32.mrf.mxu0 }
 0x15f   : > { %v2331_v10 = vadd.f32 %v2152_v38, %v8691_v39  ;;  %v8998_v62 = vadd.f32 %v7397_v53, %v2333_v33 }
 0x160   : > { %v7346_v15 = vpop.f32.mrf.mxu1  ;;  %v7402_v48 = vpop.f32.mrf.mxu0 }
 0x161   : > { %v2334_v57 = vadd.f32 %v7346_v15, %v8701_v32  ;;  %v9003_v14 = vadd.f32 %v2821_v42, %v2331_v10  ;;  %v4459_v32 = vor.u32 %v4458_v26, %v4455_v34 }
 0x162   : > { %v2155_v0 = vpop.f32.mrf.mxu1  ;;  %v2840_v36 = vpop.f32.mrf.mxu0 }
 0x163   : > { %v2332_v39 = vadd.f32 %v2155_v0, %v8713_v13  ;;  %v9007_v53 = vadd.f32 %v7398_v55, %v2334_v57  ;;  %v4460_v25 = vsel %vm4290_vm5, %v4450_v9, %v4459_v32 }
 0x164   : > { %v7349_v12 = vpop.f32.mrf.mxu1  ;;  %7580 = vmatmul.mubr.bf16.gmra.mxu1 %v4442_v54  ;;  %v7405_v6 = vpop.f32.mrf.mxu0  ;;  %7636 = vmatmul.mubr.bf16.gmra.mxu0 %v4996_v47 }
 0x165   : > { %v2337_v29 = vadd.f32 %v7349_v12, %v8724_v37  ;;  %7583 = vmatprep.mubr.bf16.mxu1 %v4451_v8  ;;  %v9010_v11 = vadd.f32 %v2824_v61, %v2332_v39 }
 0x166   : > { %v2168_v42 = vpop.f32.mrf.mxu1  ;;  %v2853_v19 = vpop.f32.mrf.mxu0 }
 0x167   : > { %v2335_v20 = vadd.f32 %v2168_v42, %v8741_v16  ;;  %v9013_v18 = vadd.f32 %v7401_v21, %v2337_v29 }
 0x168   : > { %v7350_v7 = vpop.f32.mrf.mxu1  ;;  %v7406_v13 = vpop.f32.mrf.mxu0 }
 0x169   : > { %v2338_v55 = vadd.f32 %v7350_v7, %v8759_v52  ;;  %v9017_v45 = vadd.f32 %v2837_v46, %v2335_v20 }
 0x16a   : > { %v2171_v33 = vpop.f32.mrf.mxu1  ;;  %v2856_v37 = vpop.f32.mrf.mxu0 }
 0x16b   : > { %v2336_v51 = vadd.f32 %v2171_v33, %v8768_v4  ;;  %v9020_v61 = vadd.f32 %v7402_v48, %v2338_v55 }
 0x16c   : > { %v7353_v38 = vpop.f32.mrf.mxu1  ;;  %7584 = vmatmul.mubr.bf16.gmra.mxu1 %v4460_v25  ;;  %v7409_v10 = vpop.f32.mrf.mxu0 }
 0x16d   : > { %v2341_v16 = vadd.f32 %v7353_v38, %v8778_v43  ;;  %v9023_v21 = vadd.f32 %v2840_v36, %v2336_v51 }
 0x16e   : > { %v2184_v15 = vpop.f32.mrf.mxu1  ;;  %v2869_v54 = vpop.f32.mrf.mxu0 }
 0x16f   : > { %v2339_v52 = vadd.f32 %v2184_v15, %v8794_v63  ;;  %v9026_v9 = vadd.f32 %v7405_v6, %v2341_v16 }
 0x170   : > { %v7354_v46 = vpop.f32.mrf.mxu1  ;;  %v7410_v47 = vpop.f32.mrf.mxu0 }
 0x171   : > { %v2342_v57 = vadd.f32 %v7354_v46, %v8809_v40  ;;  %v9029_v4 = vadd.f32 %v2853_v19, %v2339_v52 }
 0x172   : > { %v2187_v48 = vpop.f32.mrf.mxu1  ;;  %v2872_v34 = vpop.f32.mrf.mxu0 }
 0x173   : > { %v2340_v26 = vadd.f32 %v2187_v48, %v8818_v60  ;;  %v9032_v0 = vadd.f32 %v7406_v13, %v2342_v57 }
 0x174   : > { %v7357_v43 = vpop.f32.mrf.mxu1  ;;  %v7413_v36 = vpop.f32.mrf.mxu0 }
 0x175   : > { %v2345_v8 = vadd.f32 %v7357_v43, %v8830_v31  ;;  %v9035_v39 = vadd.f32 %v2856_v37, %v2340_v26 }
 0x176   : > { %v2200_v63 = vpop.f32.mrf.mxu1  ;;  %v2885_v12 = vpop.f32.mrf.mxu0 }
 0x177   : > { %v2343_v6 = vadd.f32 %v2200_v63, %v8843_v35  ;;  %v9038_v29 = vadd.f32 %v7409_v10, %v2345_v8 }
 0x178   : > { %v7358_v40 = vpop.f32.mrf.mxu1  ;;  %v7414_v32 = vpop.f32.mrf.mxu0 }
 0x179   : > { %v2346_v42 = vadd.f32 %v7358_v40, %v8861_v58  ;;  %v9041_v19 = vadd.f32 %v2869_v54, %v2343_v6 }
 0x17a   : > { %v2203_v60 = vpop.f32.mrf.mxu1  ;;  %v2888_v20 = vpop.f32.mrf.mxu0 }
 0x17b   : > { %v2344_v7 = vadd.f32 %v2203_v60, %v8870_v49  ;;  %v9044_v13 = vadd.f32 %v7410_v47, %v2346_v42 }
 0x17c   : > { %v7361_v31 = vpop.f32.mrf.mxu1  ;;  %v7417_v55 = vpop.f32.mrf.mxu0 }
 0x17d   : > { %v2349_v25 = vadd.f32 %v7361_v31, %v8878_v44  ;;  %v9047_v33 = vadd.f32 %v2872_v34, %v2344_v7 }
 0x17e   : > { %v2216_v35 = vpop.f32.mrf.mxu1  ;;  %v2901_v37 = vpop.f32.mrf.mxu0 }
 0x17f   : > { %v2347_v51 = vadd.f32 %v2216_v35, %v8892_v30  ;;  %v9050_v38 = vadd.f32 %v7413_v36, %v2349_v25 }
 0x180   : > { %v7362_v58 = vpop.f32.mrf.mxu1  ;;  %v7418_v10 = vpop.f32.mrf.mxu0 }
 0x181   : > { %v2350_v16 = vadd.f32 %v7362_v58, %v8902_v24  ;;  %v9053_v15 = vadd.f32 %v2885_v12, %v2347_v51 }
 0x182   : > { %v2219_v49 = vpop.f32.mrf.mxu1  ;;  %v2904_v54 = vpop.f32.mrf.mxu0 }
 0x183   : > { %v2348_v52 = vadd.f32 %v2219_v49, %v8906_v1  ;;  %v9056_v46 = vadd.f32 %v7414_v32, %v2350_v16 }
 0x184   : > { %v7365_v44 = vpop.f32.mrf.mxu1  ;;  %v7421_v47 = vpop.f32.mrf.mxu0 }
 0x185   : > { %v2353_v57 = vadd.f32 %v7365_v44, %v8911_v2  ;;  %v9059_v48 = vadd.f32 %v2888_v20, %v2348_v52 }
 0x186   : > { %v2232_v30 = vpop.f32.mrf.mxu1  ;;  %v2917_v34 = vpop.f32.mrf.mxu0 }
 0x187   : > { %v2351_v26 = vadd.f32 %v2232_v30, %v8918_v3  ;;  %v9062_v43 = vadd.f32 %v7417_v55, %v2353_v57  ;;  %v10030_v57 = vld [vmem:[#allocation3_spill] sm:$0xff] }
 0x188   : > { %v7366_v24 = vpop.f32.mrf.mxu1  ;;  %v7422_v36 = vpop.f32.mrf.mxu0 }
 0x189   : > { %v2354_v8 = vadd.f32 %v7366_v24, %v8927_v5  ;;  %v9065_v63 = vadd.f32 %v2901_v37, %v2351_v26  ;;  %v10031_v24 = vld [vmem:[#allocation4_spill] sm:$0xff] }
 0x18a   : > { %v2235_v1 = vpop.f32.mrf.mxu1  ;;  %v2920_v12 = vpop.f32.mrf.mxu0 }
 0x18b   : > { %v2352_v6 = vadd.f32 %v2235_v1, %v8930_v56  ;;  %v9068_v40 = vadd.f32 %v7418_v10, %v2354_v8 }
 0x18c   : > { %v7369_v2 = vpop.f32.mrf.mxu1  ;;  %v7425_v32 = vpop.f32.mrf.mxu0 }
 0x18d   : > { %v2357_v42 = vadd.f32 %v7369_v2, %v8934_v41  ;;  %v9071_v60 = vadd.f32 %v2904_v54, %v2352_v6 }
 0x18e   : > { %v2248_v3 = vpop.f32.mrf.mxu1  ;;  %v2933_v20 = vpop.f32.mrf.mxu0 }
 0x18f   : > { %v2355_v7 = vadd.f32 %v2248_v3, %v8941_v27  ;;  %v9074_v31 = vadd.f32 %v7421_v47, %v2357_v42  ;;  %v10033_v42 = vld [vmem:[#allocation6_spill] sm:$0xff] }
 0x190   : > { %v7370_v5 = vpop.f32.mrf.mxu1  ;;  %v7426_v55 = vpop.f32.mrf.mxu0 }
 0x191   : > { %v2358_v25 = vadd.f32 %v7370_v5, %v8950_v50  ;;  %v9077_v35 = vadd.f32 %v2917_v34, %v2355_v7 }
 0x192   : > { %v2251_v56 = vpop.f32.mrf.mxu1  ;;  %v2936_v37 = vpop.f32.mrf.mxu0 }
 0x193   : > { %v2356_v51 = vadd.f32 %v2251_v56, %v8953_v17  ;;  %v9080_v58 = vadd.f32 %v7422_v36, %v2358_v25 }
 0x194   : > { %v7373_v41 = vpop.f32.mrf.mxu1  ;;  %v7429_v10 = vpop.f32.mrf.mxu0 }
 0x195   : > { %v2361_v16 = vadd.f32 %v7373_v41, %v8957_v22  ;;  %v9083_v49 = vadd.f32 %v2920_v12, %v2356_v51  ;;  %v10032_v12 = vld [vmem:[#allocation5_spill] sm:$0xff] }
 0x196   : > { %v2264_v27 = vpop.f32.mrf.mxu1  ;;  %v2949_v54 = vpop.f32.mrf.mxu0 }
 0x197   : > { %v2359_v52 = vadd.f32 %v2264_v27, %v8964_v23  ;;  %v9086_v44 = vadd.f32 %v7425_v32, %v2361_v16 }
 0x198   : > { %v7374_v50 = vpop.f32.mrf.mxu1  ;;  %v7430_v47 = vpop.f32.mrf.mxu0 }
 0x199   : > { %v2362_v30 = vadd.f32 %v7374_v50, %v10030_v57  ;;  %v9089_v34 = vadd.f32 %v2933_v20, %v2359_v52 }
 0x19a   : > { %v2267_v17 = vpop.f32.mrf.mxu1  ;;  %v2952_v26 = vpop.f32.mrf.mxu0 }
 0x19b   : > { %v2360_v36 = vadd.f32 %v2267_v17, %v10031_v24  ;;  %v9092_v8 = vadd.f32 %v7426_v55, %v2362_v30 }
 0x19c   : > { %v7377_v22 = vpop.f32.mrf.mxu1  ;;  %v7501_v1 = vpop.f32.mrf.mxu0 }
 0x19d   : > { %v2365_v6 = vadd.f32 %v7377_v22, %v10032_v12  ;;  %v9095_v2 = vadd.f32 %v2936_v37, %v2360_v36 }
 0x19e   : > { %v2280_v23 = vpop.f32.mrf.mxu1  ;;  %v3892_v32 = vpop.f32.mrf.mxu0 }
 0x19f   : > { %v2363_v3 = vadd.f32 %v2280_v23, %v10033_v42  ;;  %v9098_v7 = vadd.f32 %v7429_v10, %v2365_v6 }
 0x1a0   : > { %v7378_v20 = vpop.f32.mrf.mxu1  ;;  %v7502_v5 = vpop.f32.mrf.mxu0 }
 0x1a1   : > { %v2366_v25 = vadd.f32 %v7378_v20, %v8992_v28  ;;  %v9101_v56 = vadd.f32 %v2949_v54, %v2363_v3 }
 0x1a2   : > { %v2283_v55 = vpop.f32.mrf.mxu1  ;;  %v3895_v51 = vpop.f32.mrf.mxu0 }
 0x1a3   : > { %v2364_v41 = vadd.f32 %v2283_v55, %v8995_v59  ;;  %v9104_v16 = vadd.f32 %v7430_v47, %v2366_v25 }
 0x1a4   : > { %v7449_v37 = vpop.f32.mrf.mxu1  ;;  %v7505_v27 = vpop.f32.mrf.mxu0 }
 0x1a5   : > { %v3538_v52 = vadd.f32 %v7449_v37, %v8998_v62  ;;  %v9107_v50 = vadd.f32 %v2952_v26, %v2364_v41 }
 0x1a6   : > { %v3357_v10 = vpop.f32.mrf.mxu1  ;;  %v3908_v57 = vpop.f32.mrf.mxu0 }
 0x1a7   : > { %v3536_v30 = vadd.f32 %v3357_v10, %v9003_v14  ;;  %v9110_v17 = vadd.f32 %v7501_v1, %v3538_v52 }
 0x1a8   : > { %v7450_v28 = vpop.f32.mrf.mxu1  ;;  %v7506_v54 = vpop.f32.mrf.mxu0 }
 0x1a9   : > { %v3539_v24 = vadd.f32 %v7450_v28, %v9007_v53  ;;  %v9113_v36 = vadd.f32 %v3892_v32, %v3536_v30 }
 0x1aa   : > { %v3360_v59 = vpop.f32.mrf.mxu1  ;;  %v3911_v47 = vpop.f32.mrf.mxu0 }
 0x1ab   : > { %v3537_v22 = vadd.f32 %v3360_v59, %v9010_v11  ;;  %v9116_v12 = vadd.f32 %v7502_v5, %v3539_v24 }
 0x1ac   : > { %v7453_v62 = vpop.f32.mrf.mxu1  ;;  %v7509_v26 = vpop.f32.mrf.mxu0 }
 0x1ad   : > { %v3542_v6 = vadd.f32 %v7453_v62, %v9013_v18  ;;  %v9119_v23 = vadd.f32 %v3895_v51, %v3537_v22 }
 0x1ae   : > { %v3373_v14 = vpop.f32.mrf.mxu1  ;;  %v3924_v1 = vpop.f32.mrf.mxu0 }
 0x1af   : > { %v3540_v42 = vadd.f32 %v3373_v14, %v9017_v45  ;;  %v9122_v3 = vadd.f32 %v7505_v27, %v3542_v6 }
 0x1b0   : > { %v7454_v53 = vpop.f32.mrf.mxu1  ;;  %v7510_v32 = vpop.f32.mrf.mxu0 }
 0x1b1   : > { %v3543_v20 = vadd.f32 %v7454_v53, %v9020_v61  ;;  %v9125_v25 = vadd.f32 %v3908_v57, %v3540_v42 }
 0x1b2   : > { %v3376_v11 = vpop.f32.mrf.mxu1  ;;  %v3927_v5 = vpop.f32.mrf.mxu0 }
 0x1b3   : > { %v3541_v55 = vadd.f32 %v3376_v11, %v9023_v21  ;;  %v9128_v41 = vadd.f32 %v7506_v54, %v3543_v20 }
 0x1b4   : > { %v7457_v18 = vpop.f32.mrf.mxu1  ;;  %v7513_v51 = vpop.f32.mrf.mxu0 }
 0x1b5   : > { %v3546_v37 = vadd.f32 %v7457_v18, %v9026_v9  ;;  %v9131_v52 = vadd.f32 %v3911_v47, %v3541_v55 }
 0x1b6   : > { %v3389_v45 = vpop.f32.mrf.mxu1  ;;  %v3940_v27 = vpop.f32.mrf.mxu0 }
 0x1b7   : > { %v3544_v10 = vadd.f32 %v3389_v45, %v9029_v4  ;;  %v9134_v30 = vadd.f32 %v7509_v26, %v3546_v37 }
 0x1b8   : > { %v7458_v61 = vpop.f32.mrf.mxu1  ;;  %v7514_v57 = vpop.f32.mrf.mxu0 }
 0x1b9   : > { %v3547_v28 = vadd.f32 %v7458_v61, %v9032_v0  ;;  %v9137_v24 = vadd.f32 %v3924_v1, %v3544_v10 }
 0x1ba   : > { %v3392_v21 = vpop.f32.mrf.mxu1  ;;  %v3943_v54 = vpop.f32.mrf.mxu0 }
 0x1bb   : > { %v3545_v59 = vadd.f32 %v3392_v21, %v9035_v39  ;;  %v9140_v22 = vadd.f32 %v7510_v32, %v3547_v28 }
 0x1bc   : > { %v7461_v9 = vpop.f32.mrf.mxu1  ;;  %v7517_v47 = vpop.f32.mrf.mxu0 }
 0x1bd   : > { %v3550_v62 = vadd.f32 %v7461_v9, %v9038_v29  ;;  %v9143_v6 = vadd.f32 %v3927_v5, %v3545_v59 }
 0x1be   : > { %v3405_v4 = vpop.f32.mrf.mxu1  ;;  %v3956_v26 = vpop.f32.mrf.mxu0 }
 0x1bf   : > { %v3548_v14 = vadd.f32 %v3405_v4, %v9041_v19  ;;  %v9146_v42 = vadd.f32 %v7513_v51, %v3550_v62 }
 0x1c0   : > { %v7462_v0 = vpop.f32.mrf.mxu1  ;;  %v7518_v1 = vpop.f32.mrf.mxu0 }
 0x1c1   : > { %v3551_v53 = vadd.f32 %v7462_v0, %v9044_v13  ;;  %v9149_v20 = vadd.f32 %v3940_v27, %v3548_v14 }
 0x1c2   : > { %v3408_v39 = vpop.f32.mrf.mxu1  ;;  %v3959_v32 = vpop.f32.mrf.mxu0 }
 0x1c3   : > { %v3549_v11 = vadd.f32 %v3408_v39, %v9047_v33  ;;  %v9152_v55 = vadd.f32 %v7514_v57, %v3551_v53 }
 0x1c4   : > { %v7465_v29 = vpop.f32.mrf.mxu1  ;;  %v7521_v5 = vpop.f32.mrf.mxu0 }
 0x1c5   : > { %v3554_v18 = vadd.f32 %v7465_v29, %v9050_v38  ;;  %v9155_v37 = vadd.f32 %v3943_v54, %v3549_v11 }
 0x1c6   : > { %v3421_v19 = vpop.f32.mrf.mxu1  ;;  %v3972_v51 = vpop.f32.mrf.mxu0 }
 0x1c7   : > { %v3552_v45 = vadd.f32 %v3421_v19, %v9053_v15  ;;  %v9158_v10 = vadd.f32 %v7517_v47, %v3554_v18 }
 0x1c8   : > { %v7466_v13 = vpop.f32.mrf.mxu1  ;;  %v7522_v27 = vpop.f32.mrf.mxu0 }
 0x1c9   : > { %v3555_v61 = vadd.f32 %v7466_v13, %v9056_v46  ;;  %v9161_v28 = vadd.f32 %v3956_v26, %v3552_v45 }
 0x1ca   : > { %v3424_v33 = vpop.f32.mrf.mxu1  ;;  %v3975_v57 = vpop.f32.mrf.mxu0 }
 0x1cb   : > { %v3553_v21 = vadd.f32 %v3424_v33, %v9059_v48  ;;  %v9164_v59 = vadd.f32 %v7518_v1, %v3555_v61 }
 0x1cc   : > { %v7469_v38 = vpop.f32.mrf.mxu1  ;;  %v7525_v54 = vpop.f32.mrf.mxu0 }
 0x1cd   : > { %v3558_v9 = vadd.f32 %v7469_v38, %v9062_v43  ;;  %v9167_v62 = vadd.f32 %v3959_v32, %v3553_v21 }
 0x1ce   : > { %v3437_v15 = vpop.f32.mrf.mxu1  ;;  %v3988_v47 = vpop.f32.mrf.mxu0 }
 0x1cf   : > { %v3556_v4 = vadd.f32 %v3437_v15, %v9065_v63  ;;  %v9170_v14 = vadd.f32 %v7521_v5, %v3558_v9 }
 0x1d0   : > { %v7470_v46 = vpop.f32.mrf.mxu1  ;;  %v7526_v26 = vpop.f32.mrf.mxu0 }
 0x1d1   : > { %v3559_v0 = vadd.f32 %v7470_v46, %v9068_v40  ;;  %v9173_v53 = vadd.f32 %v3972_v51, %v3556_v4 }
 0x1d2   : > { %v3440_v48 = vpop.f32.mrf.mxu1  ;;  %v3991_v1 = vpop.f32.mrf.mxu0 }
 0x1d3   : > { %v3557_v39 = vadd.f32 %v3440_v48, %v9071_v60  ;;  %v9176_v11 = vadd.f32 %v7522_v27, %v3559_v0 }
 0x1d4   : > { %v7473_v43 = vpop.f32.mrf.mxu1  ;;  %v7529_v32 = vpop.f32.mrf.mxu0 }
 0x1d5   : > { %v3562_v29 = vadd.f32 %v7473_v43, %v9074_v31  ;;  %v9179_v18 = vadd.f32 %v3975_v57, %v3557_v39  ;;  %v9202_v43 = vpop.permute.xlu0 %5422 }
 0x1d6   : > { %v3453_v63 = vpop.f32.mrf.mxu1  ;;  %v4004_v5 = vpop.f32.mrf.mxu0  ;;  %10034 = vst [vmem:[#allocation7_spill] sm:$0xff] %v9202_v43 }
 0x1d7   : > { %v3560_v19 = vadd.f32 %v3453_v63, %v9077_v35  ;;  %v9182_v45 = vadd.f32 %v7525_v54, %v3562_v29 }
 0x1d8   : > { %v7474_v40 = vpop.f32.mrf.mxu1  ;;  %v7530_v51 = vpop.f32.mrf.mxu0 }
 0x1d9   : > { %v3563_v13 = vadd.f32 %v7474_v40, %v9080_v58  ;;  %v9185_v61 = vadd.f32 %v3988_v47, %v3560_v19 }
 0x1da   : > { %v3456_v60 = vpop.f32.mrf.mxu1  ;;  %v4007_v27 = vpop.f32.mrf.mxu0 }
 0x1db   : > { %v3561_v33 = vadd.f32 %v3456_v60, %v9083_v49  ;;  %v9188_v21 = vadd.f32 %v7526_v26, %v3563_v13 }
 0x1dc   : > { %v7477_v31 = vpop.f32.mrf.mxu1  ;;  %v7533_v57 = vpop.f32.mrf.mxu0 }
 0x1dd   : > { %v3566_v38 = vadd.f32 %v7477_v31, %v9086_v44  ;;  %v9191_v9 = vadd.f32 %v3991_v1, %v3561_v33  ;;  %v9213_v33 = vpop.permute.xlu1 %5432  ;;  %v9215_v31 = vpop.permute.xlu0 %5427 }
 0x1de   : > { %v3469_v35 = vpop.f32.mrf.mxu1  ;;  %v4020_v54 = vpop.f32.mrf.mxu0  ;;  %10037 = vst [vmem:[#allocation3_spill] sm:$0xff] %v9213_v33  ;;  %10038 = vst [vmem:[#allocation4_spill] sm:$0xff] %v9215_v31 }
 0x1df   : > { %v3564_v15 = vadd.f32 %v3469_v35, %v9089_v34  ;;  %v9194_v4 = vadd.f32 %v7529_v32, %v3566_v38 }
 0x1e0   : > { %v7478_v58 = vpop.f32.mrf.mxu1  ;;  %v7534_v47 = vpop.f32.mrf.mxu0 }
 0x1e1   : > { %v3567_v46 = vadd.f32 %v7478_v58, %v9092_v8  ;;  %v9197_v0 = vadd.f32 %v4004_v5, %v3564_v15 }
 0x1e2   : > { %v3472_v49 = vpop.f32.mrf.mxu1  ;;  %v4023_v26 = vpop.f32.mrf.mxu0 }
 0x1e3   : > { %v3565_v48 = vadd.f32 %v3472_v49, %v9095_v2  ;;  %v9200_v39 = vadd.f32 %v7530_v51, %v3567_v46 }
 0x1e4   : > { %v7481_v44 = vpop.f32.mrf.mxu1  ;;  %v7605_v1 = vpop.f32.mrf.mxu0 }
 0x1e5   : > { %v3570_v34 = vadd.f32 %v7481_v44, %v9098_v7  ;;  %v9205_v32 = vadd.f32 %v4007_v27, %v3565_v48  ;;  %v9226_v48 = vpop.permute.xlu1 %5437  ;;  %v9228_v44 = vpop.permute.xlu0 %5442 }
 0x1e6   : > { %v3485_v29 = vpop.f32.mrf.mxu1  ;;  %v5097_v63 = vpop.f32.mrf.mxu0  ;;  %10041 = vst [vmem:[#allocation10_spill] sm:$0xff] %v9226_v48  ;;  %10042 = vst [vmem:[#allocation11_spill] sm:$0xff] %v9228_v44 }
 0x1e7   : > { %v3568_v8 = vadd.f32 %v3485_v29, %v9101_v56  ;;  %v9208_v5 = vadd.f32 %v7533_v57, %v3570_v34 }
 0x1e8   : > { %v7482_v19 = vpop.f32.mrf.mxu1  ;;  %v7606_v40 = vpop.f32.mrf.mxu0 }
 0x1e9   : > { %10035 = vst [vmem:[#allocation8_spill] sm:$0xff] %v9208_v5  ;;  %v3571_v2 = vadd.f32 %v7482_v19, %v9104_v16  ;;  %v9211_v51 = vadd.f32 %v4020_v54, %v3568_v8 }
 0x1ea   : > { %v3488_v13 = vpop.f32.mrf.mxu1  ;;  %v5100_v60 = vpop.f32.mrf.mxu0 }
 0x1eb   : > { %10036 = vst [vmem:[#allocation9_spill] sm:$0xff] %v9211_v51  ;;  %v3569_v7 = vadd.f32 %v3488_v13, %v9107_v50  ;;  %v9218_v27 = vadd.f32 %v7534_v47, %v3571_v2 }
 0x1ec   : > { %v7553_v38 = vpop.f32.mrf.mxu1  ;;  %v7609_v56 = vpop.f32.mrf.mxu0 }
 0x1ed   : > { %10039 = vst [vmem:[#allocation5_spill] sm:$0xff] %v9218_v27  ;;  %v4742_v57 = vadd.f32 %v7553_v38, %v9110_v17  ;;  %v9221_v35 = vadd.f32 %v4023_v26, %v3569_v7 }
 0x1ee   : > { %v4561_v15 = vpop.f32.mrf.mxu1  ;;  %v5113_v16 = vpop.f32.mrf.mxu0 }
 0x1ef   : > { %10040 = vst [vmem:[#allocation6_spill] sm:$0xff] %v9221_v35  ;;  %v5278_v54 = vadd.f32 %v7605_v1, %v4742_v57  ;;  %v4740_v58 = vadd.f32 %v4561_v15, %v9113_v36  ;;  %v9252_v15 = vpop.permute.xlu1 %5447 }
 0x1f0   : > { %v7554_v46 = vpop.f32.mrf.mxu1  ;;  %v9224_v49 = vpop.f32.mrf.mxu0  ;;  %10046 = vst [vmem:[#allocation15_spill] sm:$0xff] %v9252_v15 }
 0x1f1   : > { %v9231_v50 = vmul.f32 %v9213_v33, %v5278_v54  ;;  %v5276_v47 = vadd.f32 %v5097_v63, %v4740_v58  ;;  %v4743_v17 = vadd.f32 %v7554_v46, %v9116_v12  ;;  %v9254_v54 = vpop.permute.xlu0 %5452 }
 0x1f2   : > { %v4564_v26 = vpop.f32.mrf.mxu1  ;;  %v9234_v34 = vpop.f32.mrf.mxu0  ;;  %10047 = vst [vmem:[#allocation16_spill] sm:$0xff] %v9254_v54 }
 0x1f3   : > { %10043 = vst [vmem:[#allocation12_spill] sm:$0xff] %v9231_v50  ;;  %v6903_v1 = vpack.c.bf16 %v9231_v50, %v9231_v50  ;;  %v9239_v36 = vmul.f32 %v9202_v43, %v5276_v47  ;;  %v5279_v29 = vadd.f32 %v7606_v40, %v4743_v17  ;;  %v4741_v8 = vadd.f32 %v4564_v26, %v9119_v23 }
 0x1f4   : > { %v7557_v19 = vpop.f32.mrf.mxu1  ;;  %v9242_v2 = vpop.f32.mrf.mxu0 }
 0x1f5   : > { %10044 = vst [vmem:[#allocation13_spill] sm:$0xff] %v9239_v36  ;;  %v5960_v63 = vshrl.u32 %v6903_v1, 16  ;;  %v5963_v13 = vshll.u32 %v6903_v1, 16  ;;  %v6901_v12 = vpack.c.bf16 %v9239_v36, %v9239_v36  ;;  %v9247_v7 = vmul.f32 %v9226_v48, %v5279_v29  ;;  %v9289_v27 = vpop.permute.xlu0 %5462 }
 0x1f6   : > { %v5277_v38 = vadd.f32 %v5100_v60, %v4741_v8  ;;  %v4746_v40 = vadd.f32 %v7557_v19, %v9122_v3  ;;  %v4577_v57 = vpop.f32.mrf.mxu1  ;;  %v9250_v23 = vpop.f32.mrf.mxu0  ;;  %10054 = vst [vmem:[#allocation21_spill] sm:$0xff] %v9289_v27 }
 0x1f7   : > { %10045 = vst [vmem:[#allocation14_spill] sm:$0xff] %v9247_v7  ;;  %v5962_v58 = vrot.slane %v5960_v63, 6  ;;  %v5965_v46 = vrot.slane %v5963_v13, 7  ;;  %v5941_v47 = vshrl.u32 %v6901_v12, 16  ;;  %v5944_v17 = vshll.u32 %v6901_v12, 16 }
 0x1f8   : > { %v6904_v26 = vpack.c.bf16 %v9247_v7, %v9247_v7  ;;  %v9259_v1 = vmul.f32 %v9215_v31, %v5277_v38  ;;  %v5282_v60 = vadd.f32 %v7609_v56, %v4746_v40  ;;  %v4744_v3 = vadd.f32 %v4577_v57, %v9125_v25  ;;  %v7558_v29 = vpop.f32.mrf.mxu1  ;;  %v9262_v8 = vpop.f32.mrf.mxu0  ;;  %v6339_v12 = vld [vmem:[%s8324_s7 + $0x8] sm:$0xe] }
 0x1f9   : > { %v9264_v19 = vor.u32 %v5965_v46, %v5962_v58  ;;  %v5943_v48 = vrot.slane %v5941_v47, 6  ;;  %v5946_v33 = vrot.slane %v5944_v17, 7  ;;  %v4747_v63 = vadd.f32 %v7558_v29, %v9128_v41 }
 0x1fa   : > { %10048 = vst [vmem:[#allocation17_spill] sm:$0xff] %v9259_v1  ;;  %v10049_v13 = vmov 0  ;;  %v5970_v38 = vshrl.u32 %v6904_v26, 16  ;;  %v5973_v56 = vshll.u32 %v6904_v26, 16  ;;  %v5636_v25 = vadd.f32 %v9259_v1, %v9239_v36  ;;  %v4580_v57 = vpop.f32.mrf.mxu1  ;;  %v9278_v58 = vpop.f32.mrf.mxu0 }
 0x1fb   : > { %v10050_v13 = vsel %vm9269_vm10, 4294967295, %v10049_v13  ;;  %v6902_v40 = vpack.c.bf16 %v9259_v1, %v9259_v1  ;;  %v5968_v41 = vrot.slane %v9264_v19, 4  ;;  %v5947_v46 = vor.u32 %v5946_v33, %v5943_v48  ;;  %v9287_v1 = vpop.permute.xlu1 %5457 }
 0x1fc   : > { %10051 = vst [vmem:[#allocation18_spill] sm:$0xff] %v10050_v13  ;;  %v9282_v47 = vmul.f32 %v9254_v54, %v5282_v60  ;;  %v5280_v17 = vadd.f32 %v5113_v16, %v4744_v3  ;;  %v5972_v29 = vrot.slane %v5970_v38, 6  ;;  %v5975_v31 = vrot.slane %v5973_v56, 7  ;;  %v7561_v36 = vpop.f32.mrf.mxu1  ;;  %v9285_v35 = vpop.f32.mrf.mxu0  ;;  %10053 = vst [vmem:[#allocation20_spill] sm:$0xff] %v9287_v1 }
 0x1fd   : > { %v5637_v26 = vadd.f32 %v5636_v25, %v9231_v50  ;;  %v5950_v43 = vshrl.u32 %v6902_v40, 16  ;;  %v5948_v51 = vrot.slane %v5947_v46, 4  ;;  %v6340_v33 = vsel %vm9269_vm10, %v5947_v46, %v6339_v12 }
 0x1fe   : > { %10052 = vst [vmem:[#allocation19_spill] sm:$0xff] %v9282_v47  ;;  %v5953_v48 = vshll.u32 %v6902_v40, 16  ;;  %v6907_v60 = vpack.c.bf16 %v9282_v47, %v9282_v47  ;;  %6341 = vst [vmem:[%s8324_s7 + $0x8] sm:$0xe] %v6340_v33  ;;  %v5976_v3 = vor.u32 %v5975_v31, %v5972_v29  ;;  %v9303_v56 = vmul.f32 %v9228_v44, %v5280_v17  ;;  %v4593_v12 = vpop.f32.mrf.mxu1  ;;  %v9306_v46 = vpop.f32.mrf.mxu0 }
 0x1ff   : > { %v5952_v38 = vrot.slane %v5950_v43, 6  ;;  %v5638_v25 = vadd.f32 %v5637_v26, %v9247_v7  ;;  %v5283_v40 = vadd.f32 %v9224_v49, %v4747_v63  ;;  %v9322_v7 = vpop.permute.xlu1 %5467 }
 0x200   : > { %10057 = vst [vmem:[#allocation22_spill] sm:$0xff] %v9303_v56  ;;  %v5955_v54 = vrot.slane %v5953_v48, 7  ;;  %v6000_v50 = vshrl.u32 %v6907_v60, 16  ;;  %v6003_v13 = vshll.u32 %v6907_v60, 16  ;;  %v5977_v5 = vsel %vm9295_vm11, %v5968_v41, %v5976_v3  ;;  %v7562_v17 = vpop.f32.mrf.mxu1  ;;  %v9314_v29 = vpop.f32.mrf.mxu0  ;;  %10059 = vst [vmem:[#allocation24_spill] sm:$0xff] %v9322_v7 }
 0x201   : > { %v5978_v33 = vrot.slane %v5976_v3, 4  ;;  %v5639_v31 = vadd.f32 %v5638_v25, %v9303_v56  ;;  %v6905_v43 = vpack.c.bf16 %v9303_v56, %v9303_v56  ;;  %6344 = vst [vmem:[%s8324_s7 + $0x14] sm:$0xf] %v5977_v5  ;;  %v9318_v60 = vmul.f32 %v9287_v1, %v5283_v40  ;;  %v9324_v56 = vpop.permute.xlu0 %5472 }
 0x202   : > { %v5956_v26 = vor.u32 %v5955_v54, %v5952_v38  ;;  %v6002_v48 = vrot.slane %v6000_v50, 6  ;;  %v6005_v44 = vrot.slane %v6003_v13, 7  ;;  %v4745_v41 = vadd.f32 %v4580_v57, %v9131_v52  ;;  %v4596_v25 = vpop.f32.mrf.mxu1  ;;  %10060 = vst [vmem:[#allocation25_spill] sm:$0xff] %v9324_v56  ;;  %v9335_v40 = vpop.f32.mrf.mxu0 }
 0x203   : > { %10058 = vst [vmem:[#allocation23_spill] sm:$0xff] %v9318_v60  ;;  %v5980_v49 = vshrl.u32 %v6905_v43, 16  ;;  %v5983_v63 = vshll.u32 %v6905_v43, 16  ;;  %v4750_v3 = vadd.f32 %v7561_v36, %v9134_v30  ;;  %v6908_v13 = vpack.c.bf16 %v9318_v60, %v9318_v60 }
 0x204   : > { %v5957_v5 = vsel %vm9295_vm11, %v5948_v51, %v5956_v26  ;;  %v5958_v50 = vrot.slane %v5956_v26, 4  ;;  %v9328_v54 = vor.u32 %v6005_v44, %v6002_v48  ;;  %v5281_v30 = vadd.f32 %v9234_v34, %v4745_v41  ;;  %v7565_v57 = vpop.f32.mrf.mxu1 }
 0x205   : > { %6342 = vst [vmem:[%s8324_s7 + $0xc] sm:$0xf] %v5957_v5  ;;  %v5982_v38 = vrot.slane %v5980_v49, 6  ;;  %v5985_v52 = vrot.slane %v5983_v63, 7  ;;  %v5286_v36 = vadd.f32 %v9242_v2, %v4750_v3  ;;  %v6010_v43 = vshrl.u32 %v6908_v13, 16 }
 0x206   : > { %v5967_v51 = vsel %vm9295_vm11, %v5958_v50, %v9264_v19  ;;  %v6008_v44 = vrot.slane %v9328_v54, 4  ;;  %v6013_v26 = vshll.u32 %v6908_v13, 16  ;;  %v9343_v49 = vmul.f32 %v9252_v15, %v5281_v30  ;;  %v4609_v63 = vpop.f32.mrf.mxu1 }
 0x207   : > { %6343 = vst [vmem:[%s8324_s7 + $0x10] sm:$0xf] %v5967_v51  ;;  %v5986_v48 = vor.u32 %v5985_v52, %v5982_v38  ;;  %v9346_v34 = vmul.f32 %v9324_v56, %v5286_v36  ;;  %v4748_v2 = vadd.f32 %v4593_v12, %v9137_v24  ;;  %v6012_v41 = vrot.slane %v6010_v43, 6  ;;  %v9358_v36 = vpop.f32.mrf.mxu0  ;;  %v9360_v24 = vpop.permute.xlu1 %5477 }
 0x208   : > { %v6015_v3 = vrot.slane %v6013_v26, 7  ;;  %v4751_v19 = vadd.f32 %v7562_v17, %v9140_v22  ;;  %v4749_v5 = vadd.f32 %v4596_v25, %v9143_v6  ;;  %v5640_v38 = vadd.f32 %v5639_v31, %v9343_v49  ;;  %v9356_v30 = vpop.f32.mrf.mxu1  ;;  %10061 = vst [vmem:[#allocation26_spill] sm:$0xff] %v9360_v24  ;;  %v9362_v12 = vpop.permute.xlu0 %5482 }
 0x209   : > { %v5987_v50 = vsel %vm9295_vm11, %v5978_v33, %v5986_v48  ;;  %v5988_v13 = vrot.slane %v5986_v48, 4  ;;  %v6906_v52 = vpack.c.bf16 %v9343_v49, %v9343_v49  ;;  %v6911_v6 = vpack.c.bf16 %v9346_v34, %v9346_v34 }
 0x20a   : > { %6345 = vst [vmem:[%s8324_s7 + $0x18] sm:$0xf] %v5987_v50  ;;  %v9365_v22 = vor.u32 %v6015_v3, %v6012_v41  ;;  %v5284_v33 = vadd.f32 %v9250_v23, %v4748_v2  ;;  %v5287_v31 = vadd.f32 %v9262_v8, %v4751_v19  ;;  %v5641_v17 = vadd.f32 %v5640_v38, %v9282_v47  ;;  %v9373_v26 = vpop.f32.mrf.mxu1  ;;  %v9384_v38 = vpop.f32.mrf.mxu0 }
 0x20b   : > { %v5990_v25 = vshrl.u32 %v6906_v52, 16  ;;  %v5993_v51 = vshll.u32 %v6906_v52, 16  ;;  %v5285_v43 = vadd.f32 %v9278_v58, %v4749_v5  ;;  %v6040_v3 = vshrl.u32 %v6911_v6, 16 }
 0x20c   : > { %v6017_v48 = vsel %vm9295_vm11, %v6008_v44, %v9365_v22  ;;  %v6018_v41 = vrot.slane %v9365_v22, 4  ;;  %v6043_v50 = vshll.u32 %v6911_v6, 16  ;;  %v9381_v8 = vmul.f32 %v9289_v27, %v5284_v33  ;;  %v9386_v58 = vpop.f32.mrf.mxu1 }
 0x20d   : > { %6348 = vst [vmem:[%s8324_s7 + $0x24] sm:$0xf] %v6017_v48  ;;  %v5992_v23 = vrot.slane %v5990_v25, 6  ;;  %v5995_v2 = vrot.slane %v5993_v51, 7  ;;  %v5642_v19 = vadd.f32 %v5641_v17, %v9318_v60  ;;  %v6042_v5 = vrot.slane %v6040_v3, 6  ;;  %v9400_v48 = vpop.permute.xlu1 %5487  ;;  %v9402_v3 = vpop.permute.xlu0 %5492 }
 0x20e   : > { %10062 = vst [vmem:[#allocation27_spill] sm:$0xff] %v9381_v8  ;;  %v6045_v52 = vrot.slane %v6043_v50, 7  ;;  %v9389_v44 = vmul.f32 %v9360_v24, %v5287_v31  ;;  %v9392_v22 = vmul.f32 %v9322_v7, %v5285_v43  ;;  %v6909_v33 = vpack.c.bf16 %v9381_v8, %v9381_v8  ;;  %v9398_v51 = vpop.f32.mrf.mxu1  ;;  %v9413_v24 = vpop.f32.mrf.mxu0 }
 0x20f   : > { %v5996_v6 = vor.u32 %v5995_v2, %v5992_v23  ;;  %v5643_v25 = vadd.f32 %v5642_v19, %v9381_v8  ;;  %v4754_v17 = vadd.f32 %v7565_v57, %v9146_v42  ;;  %v4752_v23 = vadd.f32 %v4609_v63, %v9149_v20 }
 0x210   : > { %10063 = vst [vmem:[#allocation28_spill] sm:$0xff] %v9392_v22  ;;  %v9404_v31 = vor.u32 %v6045_v52, %v6042_v5  ;;  %v6912_v43 = vpack.c.bf16 %v9389_v44, %v9389_v44  ;;  %v6910_v50 = vpack.c.bf16 %v9392_v22, %v9392_v22  ;;  %v6020_v57 = vshrl.u32 %v6909_v33, 16  ;;  %v9415_v56 = vpop.f32.mrf.mxu1  ;;  %v9429_v47 = vpop.f32.mrf.mxu0 }
 0x211   : > { %v5997_v2 = vsel %vm9295_vm11, %v5988_v13, %v5996_v6  ;;  %v5998_v42 = vrot.slane %v5996_v6, 4  ;;  %v6023_v19 = vshll.u32 %v6909_v33, 16  ;;  %v5644_v27 = vadd.f32 %v5643_v25, %v9392_v22 }
 0x212   : > { %6346 = vst [vmem:[%s8324_s7 + $0x1c] sm:$0xf] %v5997_v2  ;;  %v6048_v5 = vrot.slane %v9404_v31, 4  ;;  %v6050_v52 = vshrl.u32 %v6912_v43, 16  ;;  %v6053_v7 = vshll.u32 %v6912_v43, 16  ;;  %v6022_v63 = vrot.slane %v6020_v57, 6  ;;  %v9423_v1 = vpop.f32.mrf.mxu1  ;;  %v9435_v57 = vpop.permute.xlu0 %5502 }
 0x213   : > { %v6007_v20 = vsel %vm9295_vm11, %v5998_v42, %v9328_v54  ;;  %v6025_v13 = vrot.slane %v6023_v19, 7  ;;  %v6030_v6 = vshrl.u32 %v6910_v50, 16  ;;  %v5645_v2 = vadd.f32 %v5644_v27, %v9346_v34  ;;  %v9433_v42 = vpop.permute.xlu1 %5497 }
 0x214   : > { %6347 = vst [vmem:[%s8324_s7 + $0x20] sm:$0xf] %v6007_v20  ;;  %v6052_v33 = vrot.slane %v6050_v52, 6  ;;  %v6055_v8 = vrot.slane %v6053_v7, 7  ;;  %v6033_v15 = vshll.u32 %v6910_v50, 16  ;;  %v5290_v25 = vadd.f32 %v9285_v35, %v4754_v17  ;;  %v9431_v54 = vpop.f32.mrf.mxu1 }
 0x215   : > { %v6026_v60 = vor.u32 %v6025_v13, %v6022_v63  ;;  %v6032_v43 = vrot.slane %v6030_v6, 6  ;;  %v5288_v22 = vadd.f32 %v9306_v46, %v4752_v23  ;;  %v5646_v27 = vadd.f32 %v5645_v2, %v9389_v44 }
 0x216   : > { %v6056_v7 = vor.u32 %v6055_v8, %v6052_v33  ;;  %v6035_v19 = vrot.slane %v6033_v15, 7  ;;  %v4755_v50 = vadd.f32 %v9356_v30, %v9152_v55  ;;  %v9443_v17 = vmul.f32 %v9402_v3, %v5290_v25  ;;  %v9462_v63 = vpop.f32.mrf.mxu1  ;;  %v9474_v25 = vpop.permute.xlu0 %5512 }
 0x217   : > { %v6027_v35 = vsel %vm9295_vm11, %v6018_v41, %v6026_v60  ;;  %v6028_v46 = vrot.slane %v6026_v60, 4  ;;  %v9446_v23 = vmul.f32 %v9362_v12, %v5288_v22  ;;  %v4753_v41 = vadd.f32 %v9373_v26, %v9155_v37  ;;  %v9460_v22 = vpop.f32.mrf.mxu0  ;;  %v9472_v26 = vpop.permute.xlu1 %5507 }
 0x218   : > { %6349 = vst [vmem:[%s8324_s7 + $0x28] sm:$0xf] %v6027_v35  ;;  %v6057_v15 = vsel %vm9295_vm11, %v6048_v5, %v6056_v7  ;;  %v6058_v8 = vrot.slane %v6056_v7, 4  ;;  %v6036_v52 = vor.u32 %v6035_v19, %v6032_v43  ;;  %v5291_v20 = vadd.f32 %v9314_v29, %v4755_v50 }
 0x219   : > { %6352 = vst [vmem:[%s8324_s7 + $0x34] sm:$0xf] %v6057_v15  ;;  %v6915_v55 = vpack.c.bf16 %v9443_v17, %v9443_v17  ;;  %v5647_v60 = vadd.f32 %v5646_v27, %v9446_v23  ;;  %v6913_v30 = vpack.c.bf16 %v9446_v23, %v9446_v23  ;;  %v4758_v6 = vadd.f32 %v9386_v58, %v9158_v10  ;;  %v9484_v15 = vpop.f32.mrf.mxu0 }
 0x21a   : > { %v6037_v29 = vsel %vm9295_vm11, %v6028_v46, %v6036_v52  ;;  %v6038_v5 = vrot.slane %v6036_v52, 4  ;;  %v9467_v13 = vmul.f32 %v9433_v42, %v5291_v20  ;;  %v5289_v27 = vadd.f32 %v9335_v40, %v4753_v41  ;;  %v9486_v52 = vpop.f32.mrf.mxu1 }
 0x21b   : > { %6350 = vst [vmem:[%s8324_s7 + $0x2c] sm:$0xf] %v6037_v29  ;;  %v6080_v33 = vshrl.u32 %v6915_v55, 16  ;;  %v6083_v2 = vshll.u32 %v6915_v55, 16  ;;  %v6060_v43 = vshrl.u32 %v6913_v30, 16  ;;  %v6063_v37 = vshll.u32 %v6913_v30, 16 }
 0x21c   : > { %v6047_v7 = vsel %vm9295_vm11, %v6038_v5, %v9404_v31  ;;  %v6916_v19 = vpack.c.bf16 %v9467_v13, %v9467_v13  ;;  %v5294_v10 = vadd.f32 %v9358_v36, %v4758_v6  ;;  %v9489_v31 = vmul.f32 %v9400_v48, %v5289_v27  ;;  %v9505_v27 = vpop.f32.mrf.mxu0 }
 0x21d   : > { %6351 = vst [vmem:[%s8324_s7 + $0x30] sm:$0xf] %v6047_v7  ;;  %v6082_v58 = vrot.slane %v6080_v33, 6  ;;  %v6085_v50 = vrot.slane %v6083_v2, 7  ;;  %v6062_v35 = vrot.slane %v6060_v43, 6  ;;  %v6065_v46 = vrot.slane %v6063_v37, 7 }
 0x21e   : > { %v6090_v20 = vshrl.u32 %v6916_v19, 16  ;;  %v6093_v55 = vshll.u32 %v6916_v19, 16  ;;  %v9492_v30 = vmul.f32 %v9474_v25, %v5294_v10  ;;  %v4756_v41 = vadd.f32 %v9398_v51, %v9161_v28  ;;  %v9507_v28 = vpop.f32.mrf.mxu1 }
 0x21f   : > { %v6086_v40 = vor.u32 %v6085_v50, %v6082_v58  ;;  %v6066_v36 = vor.u32 %v6065_v46, %v6062_v35  ;;  %v4759_v29 = vadd.f32 %v9415_v56, %v9164_v59  ;;  %v5648_v33 = vadd.f32 %v5647_v60, %v9489_v31  ;;  %v9509_v59 = vpop.permute.xlu1 %5517  ;;  %v9517_v46 = vpop.permute.xlu0 %5522 }
 0x220   : > { %v6092_v5 = vrot.slane %v6090_v20, 6  ;;  %v6095_v6 = vrot.slane %v6093_v55, 7  ;;  %v6914_v2 = vpack.c.bf16 %v9489_v31, %v9489_v31  ;;  %v6919_v19 = vpack.c.bf16 %v9492_v30, %v9492_v30  ;;  %10064 = vst [vmem:[#allocation29_spill] sm:$0xff] %v9517_v46 }
 0x221   : > { %v6088_v43 = vrot.slane %v6086_v40, 4  ;;  %v6067_v37 = vsel %vm9295_vm11, %v6058_v8, %v6066_v36  ;;  %v6068_v7 = vrot.slane %v6066_v36, 4  ;;  %v5649_v51 = vadd.f32 %v5648_v33, %v9443_v17 }
 0x222   : > { %6353 = vst [vmem:[%s8324_s7 + $0x38] sm:$0xf] %v6067_v37  ;;  %v9512_v56 = vor.u32 %v6095_v6, %v6092_v5  ;;  %v6070_v60 = vshrl.u32 %v6914_v2, 16  ;;  %v6073_v10 = vshll.u32 %v6914_v2, 16  ;;  %v6120_v58 = vshrl.u32 %v6919_v19, 16 }
 0x223   : > { %v6123_v8 = vshll.u32 %v6919_v19, 16  ;;  %v5292_v50 = vadd.f32 %v9384_v38, %v4756_v41  ;;  %v5295_v35 = vadd.f32 %v9413_v24, %v4759_v29  ;;  %v5650_v38 = vadd.f32 %v5649_v51, %v9467_v13  ;;  %v9528_v24 = vpop.f32.mrf.mxu0  ;;  %v9530_v41 = vpop.f32.mrf.mxu1 }
 0x224   : > { %v6097_v20 = vsel %vm9295_vm11, %v6088_v43, %v9512_v56  ;;  %v6098_v55 = vrot.slane %v9512_v56, 4  ;;  %v6072_v36 = vrot.slane %v6070_v60, 6  ;;  %v6075_v5 = vrot.slane %v6073_v10, 7 }
 0x225   : > { %6356 = vst [vmem:[%s8324_s7 + $0x44] sm:$0xf] %v6097_v20  ;;  %v6122_v6 = vrot.slane %v6120_v58, 6  ;;  %v6125_v33 = vrot.slane %v6123_v8, 7  ;;  %v9525_v2 = vmul.f32 %v9435_v57, %v5292_v50  ;;  %v9533_v43 = vmul.f32 %v9509_v59, %v5295_v35  ;;  %v9546_v58 = vpop.permute.xlu1 %5527 }
 0x226   : > { %v6076_v29 = vor.u32 %v6075_v5, %v6072_v36  ;;  %v4757_v37 = vadd.f32 %v9423_v1, %v9167_v62  ;;  %v4762_v19 = vadd.f32 %v9431_v54, %v9170_v14  ;;  %v4760_v10 = vadd.f32 %v9462_v63, %v9173_v53  ;;  %10065 = vst [vmem:[#allocation30_spill] sm:$0xff] %v9546_v58  ;;  %v7629_v53 = vpop.f32.mrf.mxu0  ;;  %v9556_v63 = vpop.f32.mrf.mxu1 }
 0x227   : > { %v9539_v56 = vor.u32 %v6125_v33, %v6122_v6  ;;  %v5651_v60 = vadd.f32 %v5650_v38, %v9525_v2  ;;  %v6917_v51 = vpack.c.bf16 %v9525_v2, %v9525_v2  ;;  %v6920_v14 = vpack.c.bf16 %v9533_v43, %v9533_v43  ;;  %v9558_v36 = vpop.permute.xlu0 %5532 }
 0x228   : > { %v6077_v8 = vsel %vm9295_vm11, %v6068_v7, %v6076_v29  ;;  %v6078_v62 = vrot.slane %v6076_v29, 4  ;;  %v5293_v1 = vadd.f32 %v9429_v47, %v4757_v37  ;;  %v5298_v20 = vadd.f32 %v9460_v22, %v4762_v19  ;;  %10066 = vst [vmem:[#allocation31_spill] sm:$0xff] %v9558_v36 }
 0x229   : > { %6354 = vst [vmem:[%s8324_s7 + $0x3c] sm:$0xf] %v6077_v8  ;;  %v6128_v54 = vrot.slane %v9539_v56, 4  ;;  %v6100_v50 = vshrl.u32 %v6917_v51, 16  ;;  %v6103_v35 = vshll.u32 %v6917_v51, 16  ;;  %v6130_v5 = vshrl.u32 %v6920_v14, 16 }
 0x22a   : > { %v6087_v7 = vsel %vm9295_vm11, %v6078_v62, %v6086_v40  ;;  %v6133_v6 = vshll.u32 %v6920_v14, 16  ;;  %v9563_v33 = vmul.f32 %v9472_v26, %v5293_v1  ;;  %v9567_v29 = vmul.f32 %v9558_v36, %v5298_v20 }
 0x22b   : > { %6355 = vst [vmem:[%s8324_s7 + $0x40] sm:$0xf] %v6087_v7  ;;  %v6102_v47 = vrot.slane %v6100_v50, 6  ;;  %v6105_v38 = vrot.slane %v6103_v35, 7  ;;  %v5296_v22 = vadd.f32 %v9484_v15, %v4760_v10  ;;  %v6132_v37 = vrot.slane %v6130_v5, 6  ;;  %v5193_v50 = vpop.f32.mrf.mxu0  ;;  %v7578_v15 = vpop.f32.mrf.mxu1 }
 0x22c   : > { %v6135_v19 = vrot.slane %v6133_v6, 7  ;;  %v5652_v51 = vadd.f32 %v5651_v60, %v9563_v33  ;;  %v6918_v40 = vpack.c.bf16 %v9563_v33, %v9563_v33  ;;  %v6923_v62 = vpack.c.bf16 %v9567_v29, %v9567_v29  ;;  %v9580_v10 = vpop.permute.xlu1 %5537 }
 0x22d   : > { %v6106_v8 = vor.u32 %v6105_v38, %v6102_v47  ;;  %v9576_v14 = vmul.f32 %v9517_v46, %v5296_v22  ;;  %v4763_v1 = vadd.f32 %v9486_v52, %v9176_v11  ;;  %10067 = vst [vmem:[#allocation32_spill] sm:$0xff] %v9580_v10  ;;  %v9585_v22 = vpop.permute.xlu0 %5542 }
 0x22e   : > { %v6136_v60 = vor.u32 %v6135_v19, %v6132_v37  ;;  %v5653_v35 = vadd.f32 %v5652_v51, %v9492_v30  ;;  %v6110_v20 = vshrl.u32 %v6918_v40, 16  ;;  %v6113_v7 = vshll.u32 %v6918_v40, 16  ;;  %10068 = vst [vmem:[#allocation33_spill] sm:$0xff] %v9585_v22  ;;  %v7630_v40 = vpop.f32.mrf.mxu0 }
 0x22f   : > { %v6107_v5 = vsel %vm9295_vm11, %v6098_v55, %v6106_v8  ;;  %v6108_v6 = vrot.slane %v6106_v8, 4  ;;  %v6160_v47 = vshrl.u32 %v6923_v62, 16  ;;  %v6163_v38 = vshll.u32 %v6923_v62, 16  ;;  %v4660_v8 = vpop.f32.mrf.mxu1 }
 0x230   : > { %6357 = vst [vmem:[%s8324_s7 + $0x48] sm:$0xf] %v6107_v5  ;;  %v6137_v11 = vsel %vm9295_vm11, %v6128_v54, %v6136_v60  ;;  %v6138_v52 = vrot.slane %v6136_v60, 4  ;;  %v6112_v36 = vrot.slane %v6110_v20, 6  ;;  %v6115_v46 = vrot.slane %v6113_v7, 7 }
 0x231   : > { %6360 = vst [vmem:[%s8324_s7 + $0x54] sm:$0xf] %v6137_v11  ;;  %v6162_v37 = vrot.slane %v6160_v47, 6  ;;  %v6165_v19 = vrot.slane %v6163_v38, 7  ;;  %v5654_v51 = vadd.f32 %v5653_v35, %v9533_v43  ;;  %v6921_v55 = vpack.c.bf16 %v9576_v14, %v9576_v14  ;;  %v9602_v38 = vpop.permute.xlu1 %5547 }
 0x232   : > { %v6116_v62 = vor.u32 %v6115_v46, %v6112_v36  ;;  %v5299_v5 = vadd.f32 %v9505_v27, %v4763_v1  ;;  %v4761_v54 = vadd.f32 %v9507_v28, %v9179_v18  ;;  %v4766_v60 = vadd.f32 %v9530_v41, %v9182_v45  ;;  %10069 = vst [vmem:[#allocation34_spill] sm:$0xff] %v9602_v38  ;;  %v5196_v1 = vpop.f32.mrf.mxu0 }
 0x233   : > { %v9599_v20 = vor.u32 %v6165_v19, %v6162_v37  ;;  %v5655_v7 = vadd.f32 %v5654_v51, %v9576_v14  ;;  %v6140_v35 = vshrl.u32 %v6921_v55, 16  ;;  %v6143_v47 = vshll.u32 %v6921_v55, 16  ;;  %v7581_v37 = vpop.f32.mrf.mxu1  ;;  %v9612_v19 = vpop.permute.xlu0 %5552 }
 0x234   : > { %v6117_v11 = vsel %vm9295_vm11, %v6108_v6, %v6116_v62  ;;  %v6118_v46 = vrot.slane %v6116_v62, 4  ;;  %v9607_v27 = vmul.f32 %v9580_v10, %v5299_v5  ;;  %v5297_v18 = vadd.f32 %v9528_v24, %v4761_v54  ;;  %10070 = vst [vmem:[#allocation35_spill] sm:$0xff] %v9612_v19 }
 0x235   : > { %6358 = vst [vmem:[%s8324_s7 + $0x4c] sm:$0xf] %v6117_v11  ;;  %v6168_v45 = vrot.slane %v9599_v20, 4  ;;  %v6142_v28 = vrot.slane %v6140_v35, 6  ;;  %v6145_v41 = vrot.slane %v6143_v47, 7  ;;  %v5302_v36 = vadd.f32 %v7629_v53, %v4766_v60 }
 0x236   : > { %v6127_v6 = vsel %vm9295_vm11, %v6118_v46, %v9539_v56  ;;  %v6924_v51 = vpack.c.bf16 %v9607_v27, %v9607_v27  ;;  %v9620_v55 = vmul.f32 %v9546_v58, %v5297_v18  ;;  %v4764_v24 = vadd.f32 %v9556_v63, %v9185_v61  ;;  %v7633_v18 = vpop.f32.mrf.mxu0 }
 0x237   : > { %6359 = vst [vmem:[%s8324_s7 + $0x50] sm:$0xf] %v6127_v6  ;;  %v6146_v53 = vor.u32 %v6145_v41, %v6142_v28  ;;  %v9626_v62 = vmul.f32 %v9612_v19, %v5302_v36  ;;  %v4767_v5 = vadd.f32 %v7578_v15, %v9188_v21  ;;  %v4765_v54 = vadd.f32 %v4660_v8, %v9191_v9  ;;  %v4673_v28 = vpop.f32.mrf.mxu1  ;;  %v9637_v21 = vpop.permute.xlu1 %5557 }
 0x238   : > { %v6170_v56 = vshrl.u32 %v6924_v51, 16  ;;  %v6173_v60 = vshll.u32 %v6924_v51, 16  ;;  %v5656_v35 = vadd.f32 %v5655_v7, %v9620_v55  ;;  %v6922_v47 = vpack.c.bf16 %v9620_v55, %v9620_v55  ;;  %10071 = vst [vmem:[#allocation36_spill] sm:$0xff] %v9637_v21 }
 0x239   : > { %v6147_v61 = vsel %vm9295_vm11, %v6138_v52, %v6146_v53  ;;  %v6148_v63 = vrot.slane %v6146_v53, 4  ;;  %v6927_v11 = vpack.c.bf16 %v9626_v62, %v9626_v62  ;;  %v5300_v46 = vadd.f32 %v5193_v50, %v4764_v24 }
 0x23a   : > { %6361 = vst [vmem:[%s8324_s7 + $0x58] sm:$0xf] %v6147_v61  ;;  %v6172_v9 = vrot.slane %v6170_v56, 6  ;;  %v6175_v15 = vrot.slane %v6173_v60, 7  ;;  %v5657_v8 = vadd.f32 %v5656_v35, %v9567_v29  ;;  %v6150_v7 = vshrl.u32 %v6922_v47, 16  ;;  %v5209_v60 = vpop.f32.mrf.mxu0  ;;  %v7582_v35 = vpop.f32.mrf.mxu1 }
 0x23b   : > { %v6153_v41 = vshll.u32 %v6922_v47, 16  ;;  %v6200_v36 = vshrl.u32 %v6927_v11, 16  ;;  %v6203_v6 = vshll.u32 %v6927_v11, 16  ;;  %v9642_v52 = vmul.f32 %v9585_v22, %v5300_v46  ;;  %v9647_v47 = vpop.permute.xlu0 %5562 }
 0x23c   : > { %v6176_v51 = vor.u32 %v6175_v15, %v6172_v9  ;;  %v6152_v53 = vrot.slane %v6150_v7, 6  ;;  %v5658_v50 = vadd.f32 %v5657_v8, %v9607_v27  ;;  %v5303_v24 = vadd.f32 %v7630_v40, %v4767_v5  ;;  %10072 = vst [vmem:[#allocation37_spill] sm:$0xff] %v9647_v47 }
 0x23d   : > { %v6155_v19 = vrot.slane %v6153_v41, 7  ;;  %v6202_v10 = vrot.slane %v6200_v36, 6  ;;  %v6205_v61 = vrot.slane %v6203_v6, 7  ;;  %v6925_v56 = vpack.c.bf16 %v9642_v52, %v9642_v52  ;;  %v9658_v41 = vpop.permute.xlu1 %5567 }
 0x23e   : > { %v6177_v11 = vsel %vm9295_vm11, %v6168_v45, %v6176_v51  ;;  %v6178_v46 = vrot.slane %v6176_v51, 4  ;;  %v5659_v9 = vadd.f32 %v5658_v50, %v9642_v52  ;;  %v9653_v15 = vmul.f32 %v9637_v21, %v5303_v24 }
 0x23f   : > { %6364 = vst [vmem:[%s8324_s7 + $0x64] sm:$0xf] %v6177_v11  ;;  %v6156_v40 = vor.u32 %v6155_v19, %v6152_v53  ;;  %v9656_v5 = vor.u32 %v6205_v61, %v6202_v10  ;;  %v6180_v8 = vshrl.u32 %v6925_v56, 16  ;;  %v6183_v7 = vshll.u32 %v6925_v56, 16  ;;  %v7634_v53 = vpop.f32.mrf.mxu0  ;;  %v4676_v61 = vpop.f32.mrf.mxu1 }
 0x240   : > { %v6928_v36 = vpack.c.bf16 %v9653_v15, %v9653_v15  ;;  %v5301_v6 = vadd.f32 %v5196_v1, %v4765_v54  ;;  %v4770_v45 = vadd.f32 %v7581_v37, %v9194_v4  ;;  %v4768_v51 = vadd.f32 %v4673_v28, %v9197_v0 }
 0x241   : > { %v6157_v50 = vsel %vm9295_vm11, %v6148_v63, %v6156_v40  ;;  %v6158_v24 = vrot.slane %v6156_v40, 4  ;;  %v6208_v10 = vrot.slane %v9656_v5, 4  ;;  %v6182_v19 = vrot.slane %v6180_v8, 6  ;;  %v9675_v63 = vpop.permute.xlu0 %5572 }
 0x242   : > { %6362 = vst [vmem:[%s8324_s7 + $0x5c] sm:$0xf] %v6157_v50  ;;  %v6185_v56 = vrot.slane %v6183_v7, 7  ;;  %v6210_v11 = vshrl.u32 %v6928_v36, 16  ;;  %v6213_v21 = vshll.u32 %v6928_v36, 16  ;;  %v9669_v1 = vmul.f32 %v9602_v38, %v5301_v6  ;;  %10073 = vst [vmem:[#allocation38_spill] sm:$0xff] %v9675_v63 }
 0x243   : > { %v6167_v4 = vsel %vm9295_vm11, %v6158_v24, %v9599_v20  ;;  %v5306_v0 = vadd.f32 %v7633_v18, %v4770_v45  ;;  %v5304_v37 = vadd.f32 %v5209_v60, %v4768_v51  ;;  %v4771_v54 = vadd.f32 %v7582_v35, %v9200_v39  ;;  %v5212_v39 = vpop.f32.mrf.mxu0  ;;  %v7585_v60 = vpop.f32.mrf.mxu1 }
 0x244   : > { %6363 = vst [vmem:[%s8324_s7 + $0x60] sm:$0xf] %v6167_v4  ;;  %v6186_v28 = vor.u32 %v6185_v56, %v6182_v19  ;;  %v6212_v40 = vrot.slane %v6210_v11, 6  ;;  %v6215_v8 = vrot.slane %v6213_v21, 7  ;;  %v5660_v7 = vadd.f32 %v5659_v9, %v9669_v1  ;;  %v9690_v51 = vpop.permute.xlu1 %5577 }
 0x245   : > { %v6926_v36 = vpack.c.bf16 %v9669_v1, %v9669_v1  ;;  %v9682_v6 = vmul.f32 %v9675_v63, %v5306_v0  ;;  %v9685_v20 = vmul.f32 %v9647_v47, %v5304_v37  ;;  %v5307_v18 = vadd.f32 %v7634_v53, %v4771_v54  ;;  %10074 = vst [vmem:[#allocation39_spill] sm:$0xff] %v9690_v51 }
 0x246   : > { %v6187_v35 = vsel %vm9295_vm11, %v6178_v46, %v6186_v28  ;;  %v6188_v21 = vrot.slane %v6186_v28, 4  ;;  %v6216_v45 = vor.u32 %v6215_v8, %v6212_v40  ;;  %v5661_v9 = vadd.f32 %v5660_v7, %v9626_v62  ;;  %v7637_v40 = vpop.f32.mrf.mxu0  ;;  %v4689_v8 = vpop.f32.mrf.mxu1 }
 0x247   : > { %6365 = vst [vmem:[%s8324_s7 + $0x68] sm:$0xf] %v6187_v35  ;;  %v6190_v50 = vshrl.u32 %v6926_v36, 16  ;;  %v6193_v24 = vshll.u32 %v6926_v36, 16  ;;  %v6931_v19 = vpack.c.bf16 %v9682_v6, %v9682_v6  ;;  %v6929_v53 = vpack.c.bf16 %v9685_v20, %v9685_v20  ;;  %v9704_v7 = vpop.permute.xlu0 %5582 }
 0x248   : > { %v6217_v56 = vsel %vm9295_vm11, %v6208_v10, %v6216_v45  ;;  %v6218_v11 = vrot.slane %v6216_v45, 4  ;;  %v5662_v46 = vadd.f32 %v5661_v9, %v9653_v15  ;;  %v9701_v4 = vmul.f32 %v9690_v51, %v5307_v18  ;;  %v5225_v22 = vpop.f32.mrf.mxu0  ;;  %v7586_v58 = vpop.f32.mrf.mxu1 }
 0x249   : > { %6368 = vst [vmem:[%s8324_s7 + $0x74] sm:$0xf] %v6217_v56  ;;  %v6192_v0 = vrot.slane %v6190_v50, 6  ;;  %v6195_v37 = vrot.slane %v6193_v24, 7  ;;  %v6240_v54 = vshrl.u32 %v6931_v19, 16  ;;  %v6243_v28 = vshll.u32 %v6931_v19, 16 }
 0x24a   : > { %v5663_v36 = vadd.f32 %v5662_v46, %v9685_v20  ;;  %v6220_v35 = vshrl.u32 %v6929_v53, 16  ;;  %v6223_v63 = vshll.u32 %v6929_v53, 16  ;;  %v6932_v10 = vpack.c.bf16 %v9701_v4, %v9701_v4 }
 0x24b   : > { %v6196_v45 = vor.u32 %v6195_v37, %v6192_v0  ;;  %v6242_v18 = vrot.slane %v6240_v54, 6  ;;  %v6245_v9 = vrot.slane %v6243_v28, 7  ;;  %v4769_v50 = vadd.f32 %v4676_v61, %v9205_v32  ;;  %v10075_v61 = vld [vmem:[#allocation8_spill] sm:$0xff]  ;;  %v9716_v54 = vpop.permute.xlu1 %5587 }
 0x24c   : > { %v6222_v24 = vrot.slane %v6220_v35, 6  ;;  %v6225_v56 = vrot.slane %v6223_v63, 7  ;;  %v6250_v19 = vshrl.u32 %v6932_v10, 16  ;;  %v6253_v51 = vshll.u32 %v6932_v10, 16  ;;  %v10076_v35 = vld [vmem:[#allocation9_spill] sm:$0xff]  ;;  %v9732_v10 = vpop.permute.xlu0 %5592 }
 0x24d   : > { %v6197_v47 = vsel %vm9295_vm11, %v6188_v21, %v6196_v45  ;;  %v6198_v46 = vrot.slane %v6196_v45, 4  ;;  %v9712_v38 = vor.u32 %v6245_v9, %v6242_v18  ;;  %v5305_v53 = vadd.f32 %v5212_v39, %v4769_v50  ;;  %v7638_v50 = vpop.f32.mrf.mxu0 }
 0x24e   : > { %6366 = vst [vmem:[%s8324_s7 + $0x6c] sm:$0xf] %v6197_v47  ;;  %v6226_v0 = vor.u32 %v6225_v56, %v6222_v24  ;;  %v6252_v37 = vrot.slane %v6250_v19, 6  ;;  %v6255_v32 = vrot.slane %v6253_v51, 7  ;;  %v4774_v63 = vadd.f32 %v7585_v60, %v10075_v61  ;;  %v6384_v51 = vld [vmem:[%s8324_s7 + $0x8] sm:$0x3] }
 0x24f   : > { %v6207_v21 = vsel %vm9295_vm11, %v6198_v46, %v9656_v5  ;;  %v9722_v28 = vmul.f32 %v9658_v41, %v5305_v53  ;;  %v4772_v39 = vadd.f32 %v4689_v8, %v10076_v35  ;;  %v6248_v60 = vrot.slane %v9712_v38, 4  ;;  %v10079_v56 = vld [vmem:[#allocation5_spill] sm:$0xff]  ;;  %v4692_v46 = vpop.f32.mrf.mxu1 }
 0x250   : > { %6367 = vst [vmem:[%s8324_s7 + $0x70] sm:$0xf] %v6207_v21  ;;  %v6227_v5 = vsel %vm9295_vm11, %v6218_v11, %v6226_v0  ;;  %v6256_v45 = vor.u32 %v6255_v32, %v6252_v37  ;;  %v5310_v18 = vadd.f32 %v7637_v40, %v4774_v63  ;;  %v4775_v19 = vadd.f32 %v7586_v58, %v10079_v56  ;;  %v10080_v21 = vld [vmem:[#allocation6_spill] sm:$0xff] }
 0x251   : > { %6369 = vst [vmem:[%s8324_s7 + $0x78] sm:$0xf] %v6227_v5  ;;  %v5664_v8 = vadd.f32 %v5663_v36, %v9722_v28  ;;  %v6930_v9 = vpack.c.bf16 %v9722_v28, %v9722_v28  ;;  %v5308_v24 = vadd.f32 %v5225_v22, %v4772_v39  ;;  %v6385_v11 = vsel %vm9727_vm13, 0, %v6384_v51  ;;  %v9759_v39 = vpop.permute.xlu1 %5597 }
 0x252   : > { %v6257_v53 = vsel %vm9295_vm11, %v6248_v60, %v6256_v45  ;;  %v9746_v61 = vmul.f32 %v9732_v10, %v5310_v18  ;;  %6386 = vst [vmem:[%s8324_s7 + $0x8] sm:$0x3] %v6385_v11  ;;  %v6228_v58 = vrot.slane %v6226_v0, 4  ;;  %v5311_v63 = vadd.f32 %v7638_v50, %v4775_v19 }
 0x253   : > { %6372 = vst [vmem:[%s8324_s7 + $0x84] sm:$0xf] %v6257_v53  ;;  %v5665_v40 = vadd.f32 %v5664_v8, %v9682_v6  ;;  %v6230_v36 = vshrl.u32 %v6930_v9, 16  ;;  %v6233_v37 = vshll.u32 %v6930_v9, 16  ;;  %v9753_v32 = vmul.f32 %v9704_v7, %v5308_v24  ;;  %v5228_v8 = vpop.f32.mrf.mxu0 }
 0x254   : > { %v6935_v22 = vpack.c.bf16 %v9746_v61, %v9746_v61  ;;  %v4773_v35 = vadd.f32 %v4692_v46, %v10080_v21  ;;  %v9765_v0 = vmul.f32 %v9759_v39, %v5311_v63 }
 0x255   : > { %v6232_v60 = vrot.slane %v6230_v36, 6  ;;  %v6235_v51 = vrot.slane %v6233_v37, 7  ;;  %v5666_v5 = vadd.f32 %v5665_v40, %v9701_v4  ;;  %v6933_v18 = vpack.c.bf16 %v9753_v32, %v9753_v32 }
 0x256   : > { %v6280_v9 = vshrl.u32 %v6935_v22, 16  ;;  %v6283_v24 = vshll.u32 %v6935_v22, 16  ;;  %v5309_v56 = vadd.f32 %v5228_v8, %v4773_v35  ;;  %v6936_v40 = vpack.c.bf16 %v9765_v0, %v9765_v0 }
 0x257   : > { %v6236_v50 = vor.u32 %v6235_v51, %v6232_v60  ;;  %v5667_v19 = vadd.f32 %v5666_v5, %v9753_v32  ;;  %v6260_v46 = vshrl.u32 %v6933_v18, 16  ;;  %v6263_v53 = vshll.u32 %v6933_v18, 16 }
 0x258   : > { %v6282_v11 = vrot.slane %v6280_v9, 6  ;;  %v6285_v36 = vrot.slane %v6283_v24, 7  ;;  %v9771_v37 = vmul.f32 %v9716_v54, %v5309_v56  ;;  %v6290_v51 = vshrl.u32 %v6936_v40, 16 }
 0x259   : > { %v6237_v22 = vsel %vm9295_vm11, %v6228_v58, %v6236_v50  ;;  %v6238_v63 = vrot.slane %v6236_v50, 4  ;;  %v6262_v21 = vrot.slane %v6260_v46, 6  ;;  %v6265_v35 = vrot.slane %v6263_v53, 7 }
 0x25a   : > { %6370 = vst [vmem:[%s8324_s7 + $0x7c] sm:$0xf] %v6237_v22  ;;  %v6286_v60 = vor.u32 %v6285_v36, %v6282_v11  ;;  %v6293_v5 = vshll.u32 %v6936_v40, 16  ;;  %v5668_v18 = vadd.f32 %v5667_v19, %v9771_v37  ;;  %v6258_v8 = vrot.slane %v6256_v45, 4  ;;  %v6379_v40 = vld [vmem:[%s8324_s7 + $0x98] sm:$0x3] }
 0x25b   : > { %v6247_v9 = vsel %vm9295_vm11, %v6238_v63, %v9712_v38  ;;  %v6266_v24 = vor.u32 %v6265_v35, %v6262_v21  ;;  %v6934_v58 = vpack.c.bf16 %v9771_v37, %v9771_v37  ;;  %v6292_v56 = vrot.slane %v6290_v51, 6 }
 0x25c   : > { %6371 = vst [vmem:[%s8324_s7 + $0x80] sm:$0xf] %v6247_v9  ;;  %v6295_v50 = vrot.slane %v6293_v5, 7  ;;  %v5669_v46 = vadd.f32 %v5668_v18, %v9746_v61  ;;  %v6288_v45 = vrot.slane %v6286_v60, 4 }
 0x25d   : > { %v6267_v53 = vsel %vm9295_vm11, %v6258_v8, %v6266_v24  ;;  %v6270_v19 = vshrl.u32 %v6934_v58, 16  ;;  %v6273_v11 = vshll.u32 %v6934_v58, 16  ;;  %v6268_v5 = vrot.slane %v6266_v24, 4 }
 0x25e   : > { %6373 = vst [vmem:[%s8324_s7 + $0x88] sm:$0xf] %v6267_v53  ;;  %v6296_v36 = vor.u32 %v6295_v50, %v6292_v56  ;;  %v5670_v38 = vadd.f32 %v5669_v46, %v9765_v0 }
 0x25f   : > { %v6272_v22 = vrot.slane %v6270_v19, 6  ;;  %v6275_v63 = vrot.slane %v6273_v11, 7 }
 0x260   : > { %v6297_v21 = vsel %vm9295_vm11, %v6288_v45, %v6296_v36  ;;  %v6298_v35 = vrot.slane %v6296_v36, 4  ;;  %v5671_v51 = vrot.slane %v5670_v38, 4 }
 0x261   : > { %6376 = vst [vmem:[%s8324_s7 + $0x94] sm:$0xf] %v6297_v21  ;;  %v6276_v18 = vor.u32 %v6275_v63, %v6272_v22 }
 0x262   : > { %v6380_v8 = vsel %vm9727_vm13, %v6298_v35, %v6379_v40  ;;  %v5672_v9 = vadd.f32 %v5671_v51, %v5670_v38 }
 0x263   : > { %6381 = vst [vmem:[%s8324_s7 + $0x98] sm:$0x3] %v6380_v8  ;;  %v6277_v58 = vsel %vm9295_vm11, %v6268_v5, %v6276_v18  ;;  %v6278_v56 = vrot.slane %v6276_v18, 4  ;;  %v10086_v8 = vld [vmem:[#allocation4_spill] sm:$0xff] }
 0x264   : > { %v5673_v50 = vrot.slane %v5672_v9, 2  ;;  %6374 = vst [vmem:[%s8324_s7 + $0x8c] sm:$0xf] %v6277_v58 }
 0x265   : > { %v6287_v46 = vsel %vm9295_vm11, %v6278_v56, %v6286_v60  ;;  %v10082_v56 = vld [vmem:[#allocation13_spill] sm:$0xff] }
 0x266   : > { %v5674_v24 = vadd.f32 %v5673_v50, %v5672_v9  ;;  %6375 = vst [vmem:[%s8324_s7 + $0x90] sm:$0xf] %v6287_v46  ;;  %v10083_v46 = vld [vmem:[#allocation17_spill] sm:$0xff] }
 0x268   : > { %v5675_v53 = vrot.slane %v5674_v24, 1 }
 0x26a   : > { %v6387_v47 = vld [vmem:[%s8324_s7 + $0x98] sm:$0xe]  ;;  %v5676_v19 = vadd.f32 %v5675_v53, %v5674_v24 }
 0x26b   : > { %v6388_v45 = vsel %vm9269_vm10, 0, %v6387_v47 }
 0x26c   : > { %6389 = vst [vmem:[%s8324_s7 + $0x98] sm:$0xe] %v6388_v45  ;;  %5750 = vst [vmem:[%s9805_s23] sm:$0x1] %v5676_v19  ;;  %v9812_v36 = vmul.f32 0.00390625, %v5676_v19  ;;  %v10084_v19 = vld [vmem:[#allocation12_spill] sm:$0xff]  ;;  %v10085_v45 = vld [vmem:[#allocation7_spill] sm:$0xff] }
 0x26e   : > { %v5699_v16 = vsub.f32 %v9620_v55, %v9812_v36  ;;  %v5712_v9 = vsub.f32 %v9746_v61, %v9812_v36  ;;  %v5713_v58 = vsub.f32 %v9765_v0, %v9812_v36  ;;  %v5678_v50 = vsub.f32 %v10082_v56, %v9812_v36  ;;  %v10087_v0 = vld [vmem:[#allocation14_spill] sm:$0xff] }
 0x26f   : > { %v5679_v24 = vsub.f32 %v10083_v46, %v9812_v36  ;;  %v5680_v11 = vsub.f32 %v10084_v19, %v9812_v36  ;;  %v5681_v5 = vsub.f32 %v10087_v0, %v9812_v36  ;;  %v10088_v56 = vld [vmem:[#allocation22_spill] sm:$0xff]  ;;  %v10089_v46 = vld [vmem:[#allocation3_spill] sm:$0xff] }
 0x270   : > { %v9847_v53 = vmul.f32 %v5712_v9, %v9732_v10  ;;  %v9850_v47 = vmul.f32 %v5713_v58, %v9759_v39  ;;  %v5714_v61 = vmul.f32 %v5678_v50, %v10085_v45  ;;  %v5682_v51 = vsub.f32 %v10088_v56, %v9812_v36  ;;  %v10090_v58 = vld [vmem:[#allocation10_spill] sm:$0xff]  ;;  %v10091_v19 = vld [vmem:[#allocation19_spill] sm:$0xff] }
 0x271   : > { %v5715_v18 = vmul.f32 %v5679_v24, %v10086_v8  ;;  %v5716_v35 = vmul.f32 %v5680_v11, %v10089_v46  ;;  %v5683_v39 = vsub.f32 %v9343_v49, %v9812_v36  ;;  %v5717_v21 = vmul.f32 %v5681_v5, %v10090_v58  ;;  %v10092_v45 = vld [vmem:[#allocation11_spill] sm:$0xff]  ;;  %v10096_v49 = vld [vmem:[#allocation16_spill] sm:$0xff] }
 0x272   : > { %v5751_v10 = vmul.f32 %v5714_v61, %v5714_v61  ;;  %v5684_v50 = vsub.f32 %v10091_v19, %v9812_v36  ;;  %v5718_v8 = vmul.f32 %v5682_v51, %v10092_v45  ;;  %v10093_v0 = vld [vmem:[#allocation23_spill] sm:$0xff]  ;;  %v10097_v19 = vld [vmem:[#allocation28_spill] sm:$0xff]  ;;  %v5688_v45 = vsub.f32 %v9346_v34, %v9812_v36 }
 0x273   : > { %v5752_v9 = vmul.f32 %v5715_v18, %v5715_v18  ;;  %v5753_v24 = vmul.f32 %v5716_v35, %v5716_v35  ;;  %v5685_v22 = vsub.f32 %v10093_v0, %v9812_v36  ;;  %v10094_v56 = vld [vmem:[#allocation15_spill] sm:$0xff]  ;;  %v5754_v11 = vmul.f32 %v5717_v21, %v5717_v21  ;;  %v10098_v51 = vld [vmem:[#allocation20_spill] sm:$0xff] }
 0x274   : > { %v5719_v40 = vmul.f32 %v5683_v39, %v10094_v56  ;;  %v10095_v18 = vld [vmem:[#allocation27_spill] sm:$0xff]  ;;  %v5720_v38 = vmul.f32 %v5684_v50, %v10096_v49  ;;  %v5755_v5 = vmul.f32 %v5718_v8, %v5718_v8  ;;  %v5687_v60 = vsub.f32 %v10097_v19, %v9812_v36  ;;  %v10099_v39 = vld [vmem:[#allocation21_spill] sm:$0xff]  ;;  %v10100_v50 = vld [vmem:[#allocation24_spill] sm:$0xff] }
 0x275   : > { %v5787_v63 = vadd.f32 %v5752_v9, %v5751_v10  ;;  %v5686_v46 = vsub.f32 %v10095_v18, %v9812_v36  ;;  %v5721_v35 = vmul.f32 %v5685_v22, %v10098_v51  ;;  %v5689_v0 = vsub.f32 %v9389_v44, %v9812_v36  ;;  %v10101_v22 = vld [vmem:[#allocation25_spill] sm:$0xff] }
 0x276   : > { %v5756_v10 = vmul.f32 %v5719_v40, %v5719_v40  ;;  %v5723_v8 = vmul.f32 %v5687_v60, %v10100_v50  ;;  %v5724_v40 = vmul.f32 %v5688_v45, %v10101_v22  ;;  %v5691_v34 = vsub.f32 %v9489_v31, %v9812_v36 }
 0x277   : > { %v5788_v61 = vadd.f32 %v5787_v63, %v5753_v24  ;;  %v5722_v21 = vmul.f32 %v5686_v46, %v10099_v39  ;;  %v5757_v63 = vmul.f32 %v5720_v38, %v5720_v38  ;;  %v5758_v56 = vmul.f32 %v5721_v35, %v5721_v35  ;;  %v10102_v46 = vld [vmem:[#allocation26_spill] sm:$0xff] }
 0x278   : > { %v5725_v38 = vmul.f32 %v5689_v0, %v10102_v46  ;;  %v5692_v44 = vsub.f32 %v9443_v17, %v9812_v36  ;;  %v5761_v19 = vmul.f32 %v5724_v40, %v5724_v40  ;;  %v5727_v35 = vmul.f32 %v5691_v34, %v9400_v48  ;;  %v10104_v34 = vld [vmem:[#allocation30_spill] sm:$0xff] }
 0x279   : > { %v5789_v58 = vadd.f32 %v5788_v61, %v5754_v11  ;;  %v5690_v61 = vsub.f32 %v9446_v23, %v9812_v36  ;;  %v5759_v18 = vmul.f32 %v5722_v21, %v5722_v21  ;;  %v5693_v23 = vsub.f32 %v9467_v13, %v9812_v36 }
 0x27a   : > { %v5694_v31 = vsub.f32 %v9525_v2, %v9812_v36  ;;  %v5728_v45 = vmul.f32 %v5692_v44, %v9402_v3  ;;  %v5695_v17 = vsub.f32 %v9563_v33, %v9812_v36  ;;  %v5696_v13 = vsub.f32 %v9492_v30, %v9812_v36  ;;  %v10106_v44 = vld [vmem:[#allocation32_spill] sm:$0xff] }
 0x27b   : > { %v5790_v9 = vadd.f32 %v5789_v58, %v5755_v5  ;;  %v5760_v5 = vmul.f32 %v5723_v8, %v5723_v8  ;;  %v5726_v60 = vmul.f32 %v5690_v61, %v9362_v12  ;;  %v5729_v12 = vmul.f32 %v5693_v23, %v9433_v42  ;;  %v10108_v23 = vld [vmem:[#allocation33_spill] sm:$0xff] }
 0x27c   : > { %v5730_v48 = vmul.f32 %v5694_v31, %v9435_v57  ;;  %v5765_v0 = vmul.f32 %v5728_v45, %v5728_v45  ;;  %v5697_v2 = vsub.f32 %v9533_v43, %v9812_v36  ;;  %v5731_v3 = vmul.f32 %v5695_v17, %v9472_v26  ;;  %v10112_v17 = vld [vmem:[#allocation35_spill] sm:$0xff] }
 0x27d   : > { %v5791_v24 = vadd.f32 %v5790_v9, %v5756_v10  ;;  %v5762_v10 = vmul.f32 %v5725_v38, %v5725_v38  ;;  %v5763_v39 = vmul.f32 %v5726_v60, %v5726_v60  ;;  %v5766_v8 = vmul.f32 %v5729_v12, %v5729_v12  ;;  %v10105_v38 = vld [vmem:[#allocation31_spill] sm:$0xff] }
 0x27e   : > { %v5698_v33 = vsub.f32 %v9576_v14, %v9812_v36  ;;  %v5732_v42 = vmul.f32 %v5696_v13, %v9474_v25  ;;  %v5733_v30 = vmul.f32 %v5697_v2, %v9509_v59  ;;  %v5768_v22 = vmul.f32 %v5731_v3, %v5731_v3  ;;  %v10114_v13 = vld [vmem:[#allocation36_spill] sm:$0xff]  ;;  %v10116_v2 = vld [vmem:[#allocation37_spill] sm:$0xff] }
 0x27f   : > { %v5792_v11 = vadd.f32 %v5791_v24, %v5757_v63  ;;  %v5764_v63 = vmul.f32 %v5727_v35, %v5727_v35  ;;  %v5700_v40 = vsub.f32 %v9567_v29, %v9812_v36  ;;  %v5735_v14 = vmul.f32 %v5699_v16, %v10104_v34 }
 0x280   : > { %v5770_v46 = vmul.f32 %v5733_v30, %v5733_v30  ;;  %v10107_v60 = vsub.f32 %v9607_v27, %v9812_v36  ;;  %v10109_v35 = vsub.f32 %v9642_v52, %v9812_v36  ;;  %v10111_v31 = vsub.f32 %v9669_v1, %v9812_v36 }
 0x281   : > { %v5793_v49 = vadd.f32 %v5792_v11, %v5758_v56  ;;  %v5767_v11 = vmul.f32 %v5730_v48, %v5730_v48  ;;  %v10113_v27 = vsub.f32 %v9626_v62, %v9812_v36  ;;  %v10115_v52 = vsub.f32 %v9653_v15, %v9812_v36 }
 0x282   : > { %v5737_v29 = vmul.f32 %v10107_v60, %v10106_v44  ;;  %v10117_v1 = vsub.f32 %v9685_v20, %v9812_v36  ;;  %v10118_v62 = vsub.f32 %v9722_v28, %v9812_v36  ;;  %v10120_v15 = vsub.f32 %v9682_v6, %v9812_v36 }
 0x283   : > { %v5794_v58 = vadd.f32 %v5793_v49, %v5759_v18  ;;  %v10103_v18 = vld [vmem:[#allocation29_spill] sm:$0xff]  ;;  %v5769_v49 = vmul.f32 %v5732_v42, %v5732_v42  ;;  %v5740_v12 = vmul.f32 %v10113_v27, %v10112_v17  ;;  %v5741_v48 = vmul.f32 %v10115_v52, %v10114_v13 }
 0x284   : > { %v5734_v43 = vmul.f32 %v5698_v33, %v10103_v18  ;;  %v5742_v3 = vmul.f32 %v10117_v1, %v10116_v2  ;;  %v5743_v33 = vmul.f32 %v10118_v62, %v9658_v41  ;;  %v10122_v20 = vsub.f32 %v9701_v4, %v9812_v36 }
 0x285   : > { %v5795_v51 = vadd.f32 %v5794_v58, %v5760_v5  ;;  %v5736_v5 = vmul.f32 %v5700_v40, %v10105_v38  ;;  %v5778_v42 = vmul.f32 %v5741_v48, %v5741_v48  ;;  %v10121_v40 = vld [vmem:[#allocation39_spill] sm:$0xff]  ;;  %v10123_v41 = vsub.f32 %v9753_v32, %v9812_v36 }
 0x286   : > { %v5771_v58 = vmul.f32 %v5734_v43, %v5734_v43  ;;  %v5745_v18 = vmul.f32 %v10122_v20, %v10121_v40  ;;  %v5780_v43 = vmul.f32 %v5743_v33, %v5743_v33  ;;  %v10124_v6 = vsub.f32 %v9771_v37, %v9812_v36 }
 0x287   : > { %v5796_v9 = vadd.f32 %v5795_v51, %v5761_v19  ;;  %v5772_v19 = vmul.f32 %v5735_v14, %v5735_v14  ;;  %v5773_v55 = vmul.f32 %v5736_v5, %v5736_v5  ;;  %v5746_v28 = vmul.f32 %v10123_v41, %v9704_v7 }
 0x288   : > { %v5747_v14 = vmul.f32 %v10124_v6, %v9716_v54  ;;  %v5786_v7 = vmul.f32 %v9850_v47, %v9850_v47 }
 0x289   : > { %v5797_v21 = vadd.f32 %v5796_v9, %v5762_v10  ;;  %v5738_v10 = vmul.f32 %v10109_v35, %v10108_v23  ;;  %v10110_v9 = vld [vmem:[#allocation34_spill] sm:$0xff]  ;;  %v5783_v38 = vmul.f32 %v5746_v28, %v5746_v28 }
 0x28a   : > { %v5739_v45 = vmul.f32 %v10111_v31, %v10110_v9  ;;  %v5784_v5 = vmul.f32 %v5747_v14, %v5747_v14 }
 0x28b   : > { %v5798_v24 = vadd.f32 %v5797_v21, %v5763_v39  ;;  %v5774_v39 = vmul.f32 %v5737_v29, %v5737_v29 }
 0x28d   : > { %v5799_v50 = vadd.f32 %v5798_v24, %v5764_v63  ;;  %v5775_v63 = vmul.f32 %v5738_v10, %v5738_v10 }
 0x28f   : > { %v5800_v56 = vadd.f32 %v5799_v50, %v5765_v0  ;;  %v5776_v0 = vmul.f32 %v5739_v45, %v5739_v45 }
 0x291   : > { %v5801_v61 = vadd.f32 %v5800_v56, %v5766_v8  ;;  %v5777_v8 = vmul.f32 %v5740_v12, %v5740_v12 }
 0x293   : > { %v5802_v57 = vadd.f32 %v5801_v61, %v5767_v11  ;;  %v10119_v61 = vld [vmem:[#allocation38_spill] sm:$0xff] }
 0x294   : > { %v5744_v30 = vmul.f32 %v10120_v15, %v10119_v61 }
 0x295   : > { %v5803_v26 = vadd.f32 %v5802_v57, %v5768_v22  ;;  %v5779_v22 = vmul.f32 %v5742_v3, %v5742_v3 }
 0x297   : > { %v5804_v25 = vadd.f32 %v5803_v26, %v5769_v49  ;;  %v5781_v26 = vmul.f32 %v5744_v30, %v5744_v30 }
 0x299   : > { %v5805_v59 = vadd.f32 %v5804_v25, %v5770_v46  ;;  %v5782_v46 = vmul.f32 %v5745_v18, %v5745_v18 }
 0x29b   : > { %v5806_v51 = vadd.f32 %v5805_v59, %v5771_v58  ;;  %v5785_v59 = vmul.f32 %v9847_v53, %v9847_v53 }
 0x29d   : > { %v5807_v16 = vadd.f32 %v5806_v51, %v5772_v19 }
 0x29f   : > { %v5808_v21 = vadd.f32 %v5807_v16, %v5773_v55 }
 0x2a1   : > { %v5809_v24 = vadd.f32 %v5808_v21, %v5774_v39 }
 0x2a3   : > { %v5810_v50 = vadd.f32 %v5809_v24, %v5775_v63 }
 0x2a5   : > { %v5811_v56 = vadd.f32 %v5810_v50, %v5776_v0 }
 0x2a7   : > { %v5812_v11 = vadd.f32 %v5811_v56, %v5777_v8 }
 0x2a9   : > { %v5813_v57 = vadd.f32 %v5812_v11, %v5778_v42 }
 0x2ab   : > { %v5814_v49 = vadd.f32 %v5813_v57, %v5779_v22 }
 0x2ad   : > { %v5815_v34 = vadd.f32 %v5814_v49, %v5780_v43 }
 0x2af   : > { %v5816_v25 = vadd.f32 %v5815_v34, %v5781_v26 }
 0x2b1   : > { %v5817_v4 = vadd.f32 %v5816_v25, %v5782_v46 }
 0x2b3   : > { %v5818_v58 = vadd.f32 %v5817_v4, %v5783_v38 }
 0x2b5   : > { %v5819_v44 = vadd.f32 %v5818_v58, %v5784_v5 }
 0x2b7   : > { %v5820_v32 = vadd.f32 %v5819_v44, %v5785_v59 }
 0x2b9   : > { %v5821_v60 = vadd.f32 %v5820_v32, %v5786_v7 }
 0x2bb   : > { %v5822_v29 = vrot.slane %v5821_v60, 4 }
 0x2bd   : > { %v5823_v19 = vadd.f32 %v5822_v29, %v5821_v60 }
 0x2bf   : > { %v5824_v37 = vrot.slane %v5823_v19, 2 }
 0x2c1   : > { %v5825_v54 = vadd.f32 %v5824_v37, %v5823_v19 }
 0x2c3   : > { %v5826_v36 = vrot.slane %v5825_v54, 1 }
 0x2c5   : > { %v5827_v51 = vadd.f32 %v5826_v36, %v5825_v54 }
 0x2c7   : > { %5828 = vst [vmem:[%s9805_s23 + $0x1] sm:$0x1] %v5827_v51 }
 0x2c8 PF: > { %s17_s21 = sadd.s32 1, %s7915_s21  }
 0x2c9   : > { %p14_p4 = scmp.ge.s32.totalorder %s17_s21, 4  }
 0x2cb   :  { %16 = sbr.rel (!%p14_p4) target bundleno = 1 (0x1), region = 90 }

// kernel: basic_block_forward.4
= control target key start
LH: loop header
LB: loop body
LE: loop exit
PB: predicated region body
PF: predicated region fallthrough
CT: control target
= control target key end

     0   :  { %s8556_s21 = smov 0   ;;  %s10367_s0 = inlined_call_operand.vmem [shape: bf16[2,384,128], index: 0, kind: input, shape index: {}]   ;;  %s10368_s1 = inlined_call_operand.vmem [shape: bf16[9,128,128], index: 1, kind: input, shape index: {}]   ;;  %s10369_s2 = inlined_call_operand.vmem [shape: f32[1,128], index: 2, kind: input, shape index: {}]   ;;  %s10370_s3 = inlined_call_operand.vmem [shape: f32[1,128], index: 3, kind: input, shape index: {}]   ;;  %s10371_s4 = inlined_call_operand.vmem [shape: f32[384,1], index: 4, kind: input, shape index: {}]   ;;  %s10372_s5 = inlined_call_operand.vmem [shape: f32[2,384,128], index: 5, kind: output, shape index: {0}]   ;;  %s10373_s6 = inlined_call_operand.vmem [shape: f32[2,2,128], index: 6, kind: output, shape index: {1}]  }
   0x1 LB: > { %s6794_s22 = sadd.s32 4294967295, %s8517_s21   ;;  %p6798_p0 = scmp.ge.s32.totalorder %s8517_s21, 1  ;;  %s8517_s21 = sphi %s8556_s21, %s17_s21  }
   0x2   : > { %p215_p1 = scmp.lt.s32.totalorder %s8517_s21, 3 }
   0x4   : > { %p216_p2 = pnand %p6798_p0, %p215_p1 }
   0x6   : > { %219 = sbr.rel (%p216_p2) target bundleno = 817 (0x331), region = 40 }
   0xb   : > { %v536_v0 = vld [vmem:[%s10371_s4 + $0x90] sm:$0xff]  ;;  %v534_v1 = vld [vmem:[%s10371_s4 + $0x80] sm:$0xff]  ;;  %v8519_v2 = vmov 0   ;;  %v537_v3 = vld [vmem:[%s10371_s4 + $0x98] sm:$0xff]  ;;  %p249_p3 = scmp.lt.s32.totalorder %s6794_s22, 1  ;;  %vm2309_vm1 = vcmask 1046528  }
   0xc   : > { %8265 = vset.pattern.permute.xlu1 %v8519_v2  ;;  %8264 = vset.pattern.permute.xlu0 %v8519_v2  ;;  %v535_v4 = vld [vmem:[%s10371_s4 + $0x88] sm:$0xff]  ;;  %v538_v6 = vld [vmem:[%s10371_s4 + $0xa0] sm:$0xff]  ;;  %v541_v7 = vld [vmem:[%s10371_s4 + $0xb8] sm:$0xff]  ;;  %vm1662_vm0 = vsmask.f32 7424  ;;  %vm4049_vm3 = vcmask 1045504  }
   0xd   : > { %658 = vperm.xlu1 %8265, %v536_v0   ;;  %648 = vperm.xlu0 %8264, %v534_v1   ;;  %v539_v5 = vld [vmem:[%s10371_s4 + $0xa8] sm:$0xff]  ;;  %v540_v8 = vld [vmem:[%s10371_s4 + $0xb0] sm:$0xff]  ;;  %v518_v10 = vld [vmem:[%s10371_s4] sm:$0xff]  ;;  %s10533_s22 = smov (!%p249_p3, %s6794_s22), 1  ;;  %vm3380_vm2 = vsmask.f32 6400 }
   0xe   : > { %v519_v9 = vld [vmem:[%s10371_s4 + $0x8] sm:$0xff]  ;;  %v521_v11 = vld [vmem:[%s10371_s4 + $0x18] sm:$0xff]  ;;  %v520_v12 = vld [vmem:[%s10371_s4 + $0x10] sm:$0xff]  ;;  %s8252_s17 = smul.u32 192, %s10533_s22  ;;  %vm5120_vm4 = vsmask.f32 5376 }
   0xf   : > { %v8266_v13 = vld [vmem:[%s10368_s1 + $0x38] sm:$0xff]   ;;  %v8267_v14 = vld [vmem:[%s10368_s1 + $0x30] sm:$0xff]   ;;  %v543_v15 = vld [vmem:[%s10371_s4 + $0xc8] sm:$0xff]  ;;  %vm5789_vm5 = vcmask 1044480   ;;  %s8253_s16 = smul.u32 384, %s10533_s22  ;;  %s6801_s20 = sshll.u32 %s10533_s22, 1 }
  0x10   : > { %8236 = vmatprep.subr.bf16.mxu1 %v8266_v13  ;;  %7768 = vmatprep.subr.bf16.mxu0 %v8266_v13  ;;  %v542_v16 = vld [vmem:[%s10371_s4 + $0xc0] sm:$0xff]  ;;  %v8268_v17 = vld [vmem:[%s10368_s1 + $0x28] sm:$0xff]   ;;  %v545_v18 = vld [vmem:[%s10371_s4 + $0xd8] sm:$0xff]  ;;  %s8778_s26 = scalar_lea.vmem %s10367_s0, %s8252_s17  ;;  %s10187_s25 = scalar_lea.vmem %s10373_s6, %s6801_s20 }
  0x11   : > { %663 = vperm.xlu1 %8265, %v537_v3   ;;  %653 = vperm.xlu0 %8264, %v535_v4   ;;  %v544_v19 = vld [vmem:[%s10371_s4 + $0xd0] sm:$0xff]  ;;  %v8269_v20 = vld [vmem:[%s10368_s1 + $0x20] sm:$0xff]   ;;  %v523_v21 = vld [vmem:[%s10371_s4 + $0x28] sm:$0xff]  ;;  %s9918_s19 = scalar_lea.vmem %s10372_s5, %s8253_s16 }
  0x12   : > { %8244 = vmatpush3.bf16.msra.mxu1 %v8266_v13  ;;  %7769 = vmatpush3.bf16.msra.mxu0 %v8266_v13  ;;  %v522_v22 = vld [vmem:[%s10371_s4 + $0x20] sm:$0xff]  ;;  %v8270_v23 = vld [vmem:[%s10368_s1 + $0x18] sm:$0xff]   ;;  %v524_v25 = vld [vmem:[%s10371_s4 + $0x30] sm:$0xff] }
  0x13   : > { %8237 = vmatprep.subr.bf16.mxu1 %v8267_v14  ;;  %7770 = vmatprep.subr.bf16.mxu0 %v8267_v14  ;;  %v525_v24 = vld [vmem:[%s10371_s4 + $0x38] sm:$0xff]  ;;  %v8271_v26 = vld [vmem:[%s10368_s1 + $0x10] sm:$0xff]   ;;  %v547_v27 = vld [vmem:[%s10371_s4 + $0xe8] sm:$0xff] }
  0x14   : > { %v546_v28 = vld [vmem:[%s10371_s4 + $0xe0] sm:$0xff]  ;;  %v8272_v29 = vld [vmem:[%s10368_s1 + $0x8] sm:$0xff]   ;;  %v549_v30 = vld [vmem:[%s10371_s4 + $0xf8] sm:$0xff] }
  0x15   : > { %673 = vperm.xlu1 %8265, %v539_v5   ;;  %668 = vperm.xlu0 %8264, %v538_v6   ;;  %v548_v31 = vld [vmem:[%s10371_s4 + $0xf0] sm:$0xff]  ;;  %v8273_v32 = vld [vmem:[%s10368_s1] sm:$0xff]   ;;  %v527_v33 = vld [vmem:[%s10371_s4 + $0x48] sm:$0xff] }
  0x16   : > { %8245 = vmatpush3.bf16.msra.mxu1 %v8267_v14  ;;  %7771 = vmatpush3.bf16.msra.mxu0 %v8267_v14  ;;  %v526_v34 = vld [vmem:[%s10371_s4 + $0x40] sm:$0xff]  ;;  %v8669_v35 = vld [vmem:[%s10368_s1 + $0x78] sm:$0xff]   ;;  %v528_v37 = vld [vmem:[%s10371_s4 + $0x50] sm:$0xff] }
  0x17   : > { %8238 = vmatprep.subr.bf16.mxu1 %v8268_v17  ;;  %7772 = vmatprep.subr.bf16.mxu0 %v8268_v17  ;;  %v529_v36 = vld [vmem:[%s10371_s4 + $0x58] sm:$0xff]  ;;  %v551_v38 = vld [vmem:[%s10371_s4 + $0x108] sm:$0xff]  ;;  %v550_v40 = vld [vmem:[%s10371_s4 + $0x100] sm:$0xff] }
  0x18   : > { %v8684_v39 = vld [vmem:[%s10368_s1 + $0xb8] sm:$0xff]   ;;  %v552_v42 = vld [vmem:[%s10371_s4 + $0x110] sm:$0xff]  ;;  %v531_v43 = vld [vmem:[%s10371_s4 + $0x68] sm:$0xff] }
  0x19   : > { %683 = vperm.xlu1 %8265, %v541_v7   ;;  %678 = vperm.xlu0 %8264, %v540_v8   ;;  %v553_v41 = vld [vmem:[%s10371_s4 + $0x118] sm:$0xff]  ;;  %v530_v44 = vld [vmem:[%s10371_s4 + $0x60] sm:$0xff]  ;;  %v532_v46 = vld [vmem:[%s10371_s4 + $0x70] sm:$0xff] }
  0x1a   : > { %8246 = vmatpush3.bf16.msra.mxu1 %v8268_v17  ;;  %7773 = vmatpush3.bf16.msra.mxu0 %v8268_v17  ;;  %v533_v45 = vld [vmem:[%s10371_s4 + $0x78] sm:$0xff]  ;;  %v555_v47 = vld [vmem:[%s10371_s4 + $0x128] sm:$0xff]  ;;  %v554_v48 = vld [vmem:[%s10371_s4 + $0x120] sm:$0xff] }
  0x1b   : > { %8239 = vmatprep.subr.bf16.mxu1 %v8269_v20  ;;  %7774 = vmatprep.subr.bf16.mxu0 %v8269_v20  ;;  %v557_v49 = vld [vmem:[%s10371_s4 + $0x138] sm:$0xff]  ;;  %v556_v50 = vld [vmem:[%s10371_s4 + $0x130] sm:$0xff]  ;;  %v559_v51 = vld [vmem:[%s10371_s4 + $0x148] sm:$0xff] }
  0x1c   : > { %v558_v52 = vld [vmem:[%s10371_s4 + $0x140] sm:$0xff]  ;;  %v6178_v54 = vld [vmem:[%s10371_s4 + $0x13] sm:$0xff]  ;;  %v6181_v55 = vld [vmem:[%s10371_s4 + $0x2b] sm:$0xff] }
  0x1d   : > { %573 = vperm.xlu1 %8265, %v519_v9   ;;  %568 = vperm.xlu0 %8264, %v518_v10   ;;  %v6179_v53 = vld [vmem:[%s10371_s4 + $0x1b] sm:$0xff]  ;;  %v6180_v56 = vld [vmem:[%s10371_s4 + $0x23] sm:$0xff]  ;;  %v6182_v58 = vld [vmem:[%s10371_s4 + $0x33] sm:$0xff] }
  0x1e   : > { %8247 = vmatpush3.bf16.msra.mxu1 %v8269_v20  ;;  %7775 = vmatpush3.bf16.msra.mxu0 %v8269_v20  ;;  %v6183_v57 = vld [vmem:[%s10371_s4 + $0x3b] sm:$0xff]  ;;  %v6185_v59 = vld [vmem:[%s10371_s4 + $0x4b] sm:$0xff]  ;;  %v6184_v60 = vld [vmem:[%s10371_s4 + $0x43] sm:$0xff] }
  0x1f   : > { %8240 = vmatprep.subr.bf16.mxu1 %v8270_v23  ;;  %7776 = vmatprep.subr.bf16.mxu0 %v8270_v23  ;;  %v6187_v61 = vld [vmem:[%s10371_s4 + $0x5b] sm:$0xff]  ;;  %v6186_v62 = vld [vmem:[%s10371_s4 + $0x53] sm:$0xff]  ;;  %v6189_v63 = vld [vmem:[%s10371_s4 + $0x6b] sm:$0xff] }
  0x20   : > { %v6188_v0 = vld [vmem:[%s10371_s4 + $0x63] sm:$0xff]  ;;  %v6191_v1 = vld [vmem:[%s10371_s4 + $0x7b] sm:$0xff]  ;;  %v6190_v2 = vld [vmem:[%s10371_s4 + $0x73] sm:$0xff] }
  0x21   : > { %583 = vperm.xlu1 %8265, %v521_v11   ;;  %578 = vperm.xlu0 %8264, %v520_v12   ;;  %v7496_v3 = vld [vmem:[%s8778_s26 + $0x48] sm:$0xff]   ;;  %v7495_v6 = vld [vmem:[%s8778_s26 + $0x40] sm:$0xff]   ;;  %v7497_v9 = vld [vmem:[%s8778_s26 + $0x50] sm:$0xff]  }
  0x22   : > { %8248 = vmatpush3.bf16.msra.mxu1 %v8270_v23  ;;  %7777 = vmatpush3.bf16.msra.mxu0 %v8270_v23  ;;  %v6193_v4 = vld [vmem:[%s10371_s4 + $0x8b] sm:$0xff]  ;;  %v6192_v5 = vld [vmem:[%s10371_s4 + $0x83] sm:$0xff]  ;;  %v7310_v7 = vunpack.c.l.bf16 %v7496_v3  ;;  %v7311_v8 = vunpack.c.h.bf16 %v7496_v3  ;;  %v8792_v10 = vld [vmem:[%s10369_s2] ss:$0 sm:$0xff]  ;;  %v7306_v11 = vunpack.c.l.bf16 %v7495_v6  ;;  %v7307_v12 = vunpack.c.h.bf16 %v7495_v6 }
  0x23   : > { %8241 = vmatprep.subr.bf16.mxu1 %v8271_v26  ;;  %7778 = vmatprep.subr.bf16.mxu0 %v8271_v26  ;;  %v6195_v13 = vld [vmem:[%s10371_s4 + $0x9b] sm:$0xff]  ;;  %v6194_v14 = vld [vmem:[%s10371_s4 + $0x93] sm:$0xff]  ;;  %v6197_v23 = vld [vmem:[%s10371_s4 + $0xab] sm:$0xff] }
  0x24   : > { %v386_v17 = vmul.f32 %v7311_v8, %v8792_v10  ;;  %v384_v20 = vmul.f32 %v7307_v12, %v8792_v10 }
  0x25   : > { %693 = vperm.xlu1 %8265, %v543_v15   ;;  %688 = vperm.xlu0 %8264, %v542_v16   ;;  %v7315_v15 = vunpack.c.h.bf16 %v7497_v9  ;;  %v385_v16 = vmul.f32 %v7310_v7, %v8792_v10 }
  0x26   : > { %8249 = vmatpush3.bf16.msra.mxu1 %v8271_v26  ;;  %7779 = vmatpush3.bf16.msra.mxu0 %v8271_v26 }
  0x27   : > { %8242 = vmatprep.subr.bf16.mxu1 %v8272_v29  ;;  %7780 = vmatprep.subr.bf16.mxu0 %v8272_v29 }
  0x29   : > { %703 = vperm.xlu1 %8265, %v545_v18   ;;  %698 = vperm.xlu0 %8264, %v544_v19   ;;  %v8805_v18 = vld [vmem:[%s10370_s3] ss:$0 sm:$0xff]  ;;  %v383_v19 = vmul.f32 %v7306_v11, %v8792_v10 }
  0x2a   : > { %8250 = vmatpush3.bf16.msra.mxu1 %v8272_v29  ;;  %7781 = vmatpush3.bf16.msra.mxu0 %v8272_v29  ;;  %v440_v26 = vadd.f32 %v8805_v18, %v385_v16 }
  0x2b   : > { %8243 = vmatprep.subr.bf16.mxu1 %v8273_v32  ;;  %7782 = vmatprep.subr.bf16.mxu0 %v8273_v32 }
  0x2d   : > { %593 = vperm.xlu1 %8265, %v523_v21   ;;  %588 = vperm.xlu0 %8264, %v522_v22   ;;  %v7314_v21 = vunpack.c.l.bf16 %v7497_v9  ;;  %v7498_v22 = vld [vmem:[%s8778_s26 + $0x58] sm:$0xff]  }
  0x2e   : > { %8251 = vmatpush3.bf16.msra.mxu1 %v8273_v32  ;;  %7783 = vmatpush3.bf16.msra.mxu0 %v8273_v32  ;;  %v7318_v29 = vunpack.c.l.bf16 %v7498_v22  ;;  %v439_v32 = vadd.f32 %v8805_v18, %v384_v20 }
  0x2f   : > { %7820 = vmatprep.subr.bf16.mxu1 %v8669_v35  ;;  %7872 = vmatprep.subr.bf16.mxu0 %v8684_v39 }
  0x31   : > { %603 = vperm.xlu1 %8265, %v525_v24   ;;  %598 = vperm.xlu0 %8264, %v524_v25   ;;  %v6196_v24 = vld [vmem:[%s10371_s4 + $0xa3] sm:$0xff]  ;;  %v388_v25 = vmul.f32 %v7315_v15, %v8792_v10 }
  0x35   : > { %713 = vperm.xlu1 %8265, %v547_v27   ;;  %708 = vperm.xlu0 %8264, %v546_v28   ;;  %v441_v27 = vadd.f32 %v8805_v18, %v386_v17  ;;  %v7319_v28 = vunpack.c.h.bf16 %v7498_v22  ;;  %v7500_v22 = vld [vmem:[%s8778_s26 + $0x68] sm:$0xff]  }
  0x39   : > { %723 = vperm.xlu1 %8265, %v549_v30   ;;  %718 = vperm.xlu0 %8264, %v548_v31   ;;  %v7273_v30 = vld [vmem:[%s8778_s26] sm:$0xff]   ;;  %v438_v31 = vadd.f32 %v8805_v18, %v383_v19 }
  0x3d   : > { %613 = vperm.xlu1 %8265, %v527_v33   ;;  %608 = vperm.xlu0 %8264, %v526_v34   ;;  %v387_v33 = vmul.f32 %v7314_v21, %v8792_v10  ;;  %v6199_v34 = vld [vmem:[%s10371_s4 + $0xbb] sm:$0xff] }
  0x41   : > { %623 = vperm.xlu1 %8265, %v529_v36   ;;  %618 = vperm.xlu0 %8264, %v528_v37   ;;  %v6198_v36 = vld [vmem:[%s10371_s4 + $0xb3] sm:$0xff]  ;;  %v443_v37 = vadd.f32 %v8805_v18, %v388_v25 }
  0x45   : > { %733 = vperm.xlu1 %8265, %v551_v38   ;;  %728 = vperm.xlu0 %8264, %v550_v40   ;;  %v7275_v38 = vunpack.c.h.bf16 %v7273_v30 }
  0x49   : > { %743 = vperm.xlu1 %8265, %v553_v41   ;;  %738 = vperm.xlu0 %8264, %v552_v42   ;;  %v488_v41 = vmax.f32 %v440_v26, 0.0 }
  0x4d   : > { %633 = vperm.xlu1 %8265, %v531_v43   ;;  %628 = vperm.xlu0 %8264, %v530_v44   ;;  %v390_v43 = vmul.f32 %v7319_v28, %v8792_v10  ;;  %v389_v44 = vmul.f32 %v7318_v29, %v8792_v10 }
  0x51   : > { %643 = vperm.xlu1 %8265, %v533_v45   ;;  %638 = vperm.xlu0 %8264, %v532_v46   ;;  %v7274_v45 = vunpack.c.l.bf16 %v7273_v30  ;;  %v7488_v46 = vld [vmem:[%s8778_s26 + $0x8] sm:$0xff]  }
  0x55   : > { %753 = vperm.xlu1 %8265, %v555_v47   ;;  %748 = vperm.xlu0 %8264, %v554_v48   ;;  %v486_v47 = vmax.f32 %v438_v31, 0.0  ;;  %v489_v48 = vmax.f32 %v441_v27, 0.0 }
  0x59   : > { %763 = vperm.xlu1 %8265, %v557_v49   ;;  %758 = vperm.xlu0 %8264, %v556_v50   ;;  %v487_v49 = vmax.f32 %v439_v32, 0.0  ;;  %v442_v50 = vadd.f32 %v8805_v18, %v387_v33  ;;  %v7327_v33 = vunpack.c.h.bf16 %v7500_v22 }
  0x5b   : > { %v490_v3 = vmax.f32 %v442_v50, 0.0  ;;  %v6209_v50 = vld [vmem:[%s10371_s4 + $0x10b] sm:$0xff] }
  0x5d   : > { %773 = vperm.xlu1 %8265, %v559_v51   ;;  %768 = vperm.xlu0 %8264, %v558_v52   ;;  %v6201_v51 = vld [vmem:[%s10371_s4 + $0xcb] sm:$0xff]  ;;  %v6200_v52 = vld [vmem:[%s10371_s4 + $0xc3] sm:$0xff] }
  0x61   : > { %6257 = vperm.xlu1 %8265, %v6179_v53   ;;  %6252 = vperm.xlu0 %8264, %v6178_v54   ;;  %v491_v53 = vmax.f32 %v443_v37, 0.0  ;;  %v368_v54 = vmul.f32 %v7275_v38, %v8792_v10  ;;  %v7326_v38 = vunpack.c.l.bf16 %v7500_v22 }
  0x65   : > { %6267 = vperm.xlu1 %8265, %v6181_v55   ;;  %6262 = vperm.xlu0 %8264, %v6180_v56   ;;  %v7279_v55 = vunpack.c.h.bf16 %v7488_v46  ;;  %v7278_v56 = vunpack.c.l.bf16 %v7488_v46  ;;  %v7490_v46 = vld [vmem:[%s8778_s26 + $0x18] sm:$0xff]  }
  0x67   : > { %v370_v8 = vmul.f32 %v7279_v55, %v8792_v10  ;;  %v369_v15 = vmul.f32 %v7278_v56, %v8792_v10 }
  0x69   : > { %6277 = vperm.xlu1 %8265, %v6183_v57   ;;  %6272 = vperm.xlu0 %8264, %v6182_v58   ;;  %v425_v26 = vadd.f32 %v8805_v18, %v370_v8  ;;  %v424_v31 = vadd.f32 %v8805_v18, %v369_v15  ;;  %v6210_v15 = vld [vmem:[%s10371_s4 + $0x113] sm:$0xff] }
  0x6d   : > { %6287 = vperm.xlu1 %8265, %v6185_v59   ;;  %6282 = vperm.xlu0 %8264, %v6184_v60   ;;  %v445_v60 = vadd.f32 %v8805_v18, %v390_v43 }
  0x6f   : > { %v493_v20 = vmax.f32 %v445_v60, 0.0  ;;  %v393_v60 = vmul.f32 %v7326_v38, %v8792_v10 }
  0x71   : > { %6297 = vperm.xlu1 %8265, %v6187_v61   ;;  %6292 = vperm.xlu0 %8264, %v6186_v62   ;;  %v444_v61 = vadd.f32 %v8805_v18, %v389_v44  ;;  %v367_v62 = vmul.f32 %v7274_v45, %v8792_v10  ;;  %v473_v44 = vmax.f32 %v425_v26, 0.0 }
  0x73   : > { %v492_v21 = vmax.f32 %v444_v61, 0.0  ;;  %v8285_v61 = vld [vmem:[%s10368_s1 + $0x70] sm:$0xff]  }
  0x75   : > { %6307 = vperm.xlu1 %8265, %v6189_v63   ;;  %6302 = vperm.xlu0 %8264, %v6188_v0   ;;  %v7499_v63 = vld [vmem:[%s8778_s26 + $0x60] sm:$0xff]  }
  0x76   : > { %v7323_v9 = vunpack.c.h.bf16 %v7499_v63  ;;  %v7322_v16 = vunpack.c.l.bf16 %v7499_v63  ;;  %v7287_v63 = vunpack.c.h.bf16 %v7490_v46 }
  0x78   : > { %v392_v27 = vmul.f32 %v7323_v9, %v8792_v10  ;;  %v391_v32 = vmul.f32 %v7322_v16, %v8792_v10 }
  0x79   : > { %6317 = vperm.xlu1 %8265, %v6191_v1   ;;  %6312 = vperm.xlu0 %8264, %v6190_v2  }
  0x7a   : > { %v447_v45 = vadd.f32 %v8805_v18, %v392_v27 }
  0x7d   : > { %6327 = vperm.xlu1 %8265, %v6193_v4   ;;  %6322 = vperm.xlu0 %8264, %v6192_v5   ;;  %v6203_v4 = vld [vmem:[%s10371_s4 + $0xdb] sm:$0xff]  ;;  %v6202_v5 = vld [vmem:[%s10371_s4 + $0xd3] sm:$0xff] }
  0x81   : > { %6337 = vperm.xlu1 %8265, %v6195_v13   ;;  %6332 = vperm.xlu0 %8264, %v6194_v14   ;;  %v423_v13 = vadd.f32 %v8805_v18, %v368_v54  ;;  %v422_v14 = vadd.f32 %v8805_v18, %v367_v62 }
  0x83   : > { %v471_v30 = vmax.f32 %v423_v13, 0.0  ;;  %v470_v37 = vmax.f32 %v422_v14, 0.0  ;;  %v6211_v13 = vld [vmem:[%s10371_s4 + $0x11b] sm:$0xff]  ;;  %v448_v14 = vadd.f32 %v8805_v18, %v393_v60 }
  0x85   : > { %6347 = vperm.xlu1 %8265, %v6197_v23   ;;  %6342 = vperm.xlu0 %8264, %v6196_v24   ;;  %v6205_v23 = vld [vmem:[%s10371_s4 + $0xeb] sm:$0xff]  ;;  %v6204_v24 = vld [vmem:[%s10371_s4 + $0xe3] sm:$0xff] }
  0x88   : > { %v659_v40 = vpop.permute.xlu1 %658  ;;  %v649_v42 = vpop.permute.xlu0 %648 }
  0x89   : > { %6357 = vperm.xlu1 %8265, %v6199_v34   ;;  %6352 = vperm.xlu0 %8264, %v6198_v36   ;;  %v824_v57 = vmul.f32 %v659_v40, %v488_v41  ;;  %v822_v0 = vmul.f32 %v649_v42, %v486_v47  ;;  %v7489_v40 = vld [vmem:[%s8778_s26 + $0x10] sm:$0xff]   ;;  %v6207_v41 = vld [vmem:[%s10371_s4 + $0xfb] sm:$0xff] }
  0x8a   : > { %v6206_v42 = vld [vmem:[%s10371_s4 + $0xf3] sm:$0xff]  ;;  %v7283_v54 = vunpack.c.h.bf16 %v7489_v40  ;;  %v7282_v55 = vunpack.c.l.bf16 %v7489_v40 }
  0x8c   : > { %v664_v58 = vpop.permute.xlu1 %663  ;;  %v654_v59 = vpop.permute.xlu0 %653  ;;  %v371_v8 = vmul.f32 %v7282_v55, %v8792_v10  ;;  %v8295_v55 = vld [vmem:[%s10368_s1 + $0x58] sm:$0xff]  }
  0x8d   : > { %v825_v1 = vmul.f32 %v664_v58, %v489_v48  ;;  %v823_v2 = vmul.f32 %v654_v59, %v487_v49  ;;  %6367 = vperm.xlu1 %8265, %v6201_v51   ;;  %6362 = vperm.xlu0 %8264, %v6200_v52   ;;  %v6208_v51 = vld [vmem:[%s10371_s4 + $0x103] sm:$0xff]  ;;  %v446_v52 = vadd.f32 %v8805_v18, %v391_v32  ;;  %v472_v58 = vmax.f32 %v424_v31, 0.0 }
  0x8e   : > { %v426_v26 = vadd.f32 %v8805_v18, %v371_v8  ;;  %v496_v32 = vmax.f32 %v448_v14, 0.0  ;;  %v7503_v14 = vld [vmem:[%s8778_s26 + $0x80] sm:$0xff]  }
  0x8f   : > { %v7416_v6 = vpack.c.bf16 %v825_v1, %v824_v57  ;;  %v7411_v7 = vpack.c.bf16 %v823_v2, %v822_v0  ;;  %v7286_v0 = vunpack.c.l.bf16 %v7490_v46  ;;  %v7501_v1 = vld [vmem:[%s8778_s26 + $0x70] sm:$0xff]  }
  0x90   : > { %v674_v11 = vpop.permute.xlu1 %673  ;;  %v669_v12 = vpop.permute.xlu0 %668 }
  0x91   : > { %7519 = vst [vmem:[#allocation3 + $0x48] sm:$0xff] %v7416_v6   ;;  %7518 = vst [vmem:[#allocation3 + $0x40] sm:$0xff] %v7411_v7   ;;  %v827_v17 = vmul.f32 %v674_v11, %v491_v53  ;;  %v826_v19 = vmul.f32 %v669_v12, %v490_v3  ;;  %6377 = vperm.xlu1 %8265, %v6203_v4   ;;  %6372 = vperm.xlu0 %8264, %v6202_v5   ;;  %v495_v5 = vmax.f32 %v447_v45, 0.0  ;;  %v560_v45 = vld [vmem:[%s10371_s4 + $0x150] sm:$0xff] }
  0x92   : > { %v394_v53 = vmul.f32 %v7327_v33, %v8792_v10  ;;  %v372_v7 = vmul.f32 %v7283_v54, %v8792_v10  ;;  %v494_v12 = vmax.f32 %v446_v52, 0.0  ;;  %v373_v27 = vmul.f32 %v7286_v0, %v8792_v10  ;;  %v6212_v33 = vld [vmem:[%s10371_s4 + $0x123] sm:$0xff] }
  0x93   : > { %v7421_v25 = vpack.c.bf16 %v827_v17, %v826_v19  ;;  %v374_v17 = vmul.f32 %v7287_v63, %v8792_v10  ;;  %v7331_v19 = vunpack.c.h.bf16 %v7501_v1  ;;  %v8934_v54 = vld [vmem:[%s8778_s26 + $0x28] sm:$0xff]  }
  0x94   : > { %v684_v28 = vpop.permute.xlu1 %683  ;;  %v679_v29 = vpop.permute.xlu0 %678  ;;  %v449_v6 = vadd.f32 %v8805_v18, %v394_v53  ;;  %v428_v46 = vadd.f32 %v8805_v18, %v373_v27  ;;  %v7491_v53 = vld [vmem:[%s8778_s26 + $0x20] sm:$0xff]   ;;  %v563_v63 = vld [vmem:[%s10371_s4 + $0x168] sm:$0xff] }
  0x95   : > { %7520 = vst [vmem:[#allocation3 + $0x50] sm:$0xff] %v7421_v25   ;;  %v829_v34 = vmul.f32 %v684_v28, %v493_v20  ;;  %v828_v36 = vmul.f32 %v679_v29, %v492_v21  ;;  %6387 = vperm.xlu1 %8265, %v6205_v23   ;;  %6382 = vperm.xlu0 %8264, %v6204_v24   ;;  %v8904_v20 = vld [vmem:[%s8778_s26 + $0x78] sm:$0xff]   ;;  %v6213_v24 = vld [vmem:[%s10371_s4 + $0x12b] sm:$0xff]  ;;  %v7330_v28 = vunpack.c.l.bf16 %v7501_v1 }
  0x96   : > { %v427_v25 = vadd.f32 %v8805_v18, %v372_v7  ;;  %v497_v31 = vmax.f32 %v449_v6, 0.0  ;;  %v396_v38 = vmul.f32 %v7331_v19, %v8792_v10  ;;  %v7334_v52 = vunpack.c.l.bf16 %v8904_v20  ;;  %v562_v7 = vld [vmem:[%s10371_s4 + $0x160] sm:$0xff] }
  0x97   : > { %v7426_v43 = vpack.c.bf16 %v829_v34, %v828_v36  ;;  %v8292_v34 = vld [vmem:[%s10368_s1 + $0x60] sm:$0xff]   ;;  %v476_v6 = vmax.f32 %v428_v46, 0.0 }
  0x98   : > { %v574_v47 = vpop.permute.xlu1 %573  ;;  %v569_v48 = vpop.permute.xlu0 %568  ;;  %v8274_v49 = vld [vmem:[#allocation3 + $0x40] sm:$0xff]   ;;  %v8275_v59 = vld [vmem:[#allocation3 + $0x48] sm:$0xff]   ;;  %v397_v8 = vmul.f32 %v7334_v52, %v8792_v10  ;;  %v8996_v52 = vld [vmem:[%s8778_s26 + $0x38] sm:$0xff]  }
  0x99   : > { %7521 = vst [vmem:[#allocation3 + $0x58] sm:$0xff] %v7426_v43   ;;  %v807_v56 = vmul.f32 %v574_v47, %v471_v30  ;;  %v806_v57 = vmul.f32 %v569_v48, %v470_v37  ;;  %6397 = vperm.xlu1 %8265, %v6207_v41   ;;  %6392 = vperm.xlu0 %8264, %v6206_v42   ;;  %v475_v43 = vmax.f32 %v427_v25, 0.0  ;;  %v7335_v48 = vunpack.c.h.bf16 %v8904_v20  ;;  %v565_v20 = vld [vmem:[%s10371_s4 + $0x178] sm:$0xff] }
  0x9a   : > { %7800 = vmatprep.mubr.bf16.mxu1 %v8274_v49  ;;  %v8919_v37 = vadd.f32 %v8805_v18, %v374_v17  ;;  %v395_v47 = vmul.f32 %v7330_v28, %v8792_v10  ;;  %v452_v27 = vadd.f32 %v8805_v18, %v397_v8  ;;  %v8301_v28 = vld [vmem:[%s10368_s1 + $0x48] sm:$0xff]  }
  0x9b   : > { %v7371_v62 = vpack.c.bf16 %v807_v56, %v806_v57  ;;  %7801 = vmatmul.mubr.bf16.vlgmr.msra.gmra.mxu1 %v8275_v59  ;;  %v8290_v59 = vld [vmem:[%s10368_s1 + $0xb0] sm:$0xff]   ;;  %v398_v1 = vmul.f32 %v7335_v48, %v8792_v10 }
  0x9c   : > { %v584_v2 = vpop.permute.xlu1 %583  ;;  %v579_v3 = vpop.permute.xlu0 %578  ;;  %v8276_v4 = vld [vmem:[#allocation3 + $0x50] sm:$0xff]   ;;  %7821 = vmatpush3.bf16.msra.mxu1 %v8669_v35  ;;  %v8287_v35 = vld [vmem:[%s10368_s1 + $0x68] sm:$0xff]   ;;  %v477_v57 = vmax.f32 %v8919_v37, 0.0  ;;  %v450_v0 = vadd.f32 %v8805_v18, %v395_v47  ;;  %v8306_v47 = vld [vmem:[%s10368_s1 + $0x40] sm:$0xff]  }
  0x9d   : > { %7372 = vst [vmem:[#allocation3] sm:$0xff] %v7371_v62   ;;  %v809_v9 = vmul.f32 %v584_v2, %v473_v44  ;;  %v808_v11 = vmul.f32 %v579_v3, %v472_v58  ;;  %6407 = vperm.xlu1 %8265, %v6209_v50   ;;  %6402 = vperm.xlu0 %8264, %v6208_v51   ;;  %v561_v44 = vld [vmem:[%s10371_s4 + $0x158] sm:$0xff]  ;;  %v474_v51 = vmax.f32 %v426_v26, 0.0  ;;  %v7291_v2 = vunpack.c.h.bf16 %v7491_v53  ;;  %v564_v26 = vld [vmem:[%s10371_s4 + $0x170] sm:$0xff] }
  0x9e   : > { %7804 = vmatprep.mubr.bf16.mxu1 %v8276_v4  ;;  %7822 = vmatprep.subr.bf16.mxu1 %v8285_v61  ;;  %v8941_v58 = vadd.f32 %v8805_v18, %v396_v38  ;;  %v7290_v3 = vunpack.c.l.bf16 %v7491_v53  ;;  %v498_v25 = vmax.f32 %v450_v0, 0.0  ;;  %v7493_v48 = vld [vmem:[%s8778_s26 + $0x30] sm:$0xff]   ;;  %v8299_v53 = vld [vmem:[%s10368_s1 + $0x98] sm:$0xff]  }
  0x9f   : > { %v7376_v16 = vpack.c.bf16 %v809_v9, %v808_v11  ;;  %v8298_v9 = vld [vmem:[%s10368_s1 + $0x50] sm:$0xff]  }
  0xa0   : > { %v694_v21 = vpop.permute.xlu1 %693  ;;  %v689_v22 = vpop.permute.xlu0 %688  ;;  %v8277_v23 = vld [vmem:[#allocation3 + $0x58] sm:$0xff]   ;;  %7823 = vmatpush3.bf16.msra.mxu1 %v8285_v61  ;;  %v499_v19 = vmax.f32 %v8941_v58, 0.0 }
  0xa1   : > { %7511 = vst [vmem:[#allocation3 + $0x8] sm:$0xff] %v7376_v16   ;;  %v831_v29 = vmul.f32 %v694_v21, %v495_v5  ;;  %v830_v30 = vmul.f32 %v689_v22, %v494_v12  ;;  %6417 = vperm.xlu1 %8265, %v6211_v13   ;;  %6412 = vperm.xlu0 %8264, %v6210_v15   ;;  %v7295_v12 = vunpack.c.h.bf16 %v8934_v54  ;;  %v7294_v13 = vunpack.c.l.bf16 %v8934_v54  ;;  %v8293_v15 = vld [vmem:[%s10368_s1 + $0xa8] sm:$0xff]  }
  0xa2   : > { %7824 = vmatprep.subr.bf16.mxu1 %v8287_v35  ;;  %v453_v21 = vadd.f32 %v8805_v18, %v398_v1  ;;  %v376_v22 = vmul.f32 %v7291_v2, %v8792_v10  ;;  %v9008_v1 = vld [vmem:[%s10368_s1 + $0xf8] sm:$0xff]  }
  0xa3   : > { %v7431_v36 = vpack.c.bf16 %v831_v29, %v830_v30  ;;  %7805 = vmatmul.mubr.bf16.gmra.mxu1 %v8277_v23  ;;  %v375_v23 = vmul.f32 %v7290_v3, %v8792_v10  ;;  %v378_v30 = vmul.f32 %v7295_v12, %v8792_v10 }
  0xa4   : > { %v704_v40 = vpop.permute.xlu1 %703  ;;  %v699_v41 = vpop.permute.xlu0 %698  ;;  %v8278_v42 = vld [vmem:[#allocation3] sm:$0xff]   ;;  %7825 = vmatpush3.bf16.msra.mxu1 %v8287_v35  ;;  %v501_v38 = vmax.f32 %v453_v21, 0.0 }
  0xa5   : > { %7522 = vst [vmem:[#allocation3 + $0x60] sm:$0xff] %v7431_v36   ;;  %v833_v49 = vmul.f32 %v704_v40, %v497_v31  ;;  %v832_v50 = vmul.f32 %v699_v41, %v496_v32  ;;  %6427 = vperm.xlu1 %8265, %v6213_v24   ;;  %6422 = vperm.xlu0 %8264, %v6212_v33   ;;  %v7339_v31 = vunpack.c.h.bf16 %v7503_v14  ;;  %v8981_v32 = vld [vmem:[%s8778_s26 + $0x88] sm:$0xff]   ;;  %v8296_v33 = vld [vmem:[%s10368_s1 + $0xa0] sm:$0xff]  }
  0xa6   : > { %7784 = vmatprep.mubr.bf16.mxu0 %v8278_v42  ;;  %7826 = vmatprep.subr.bf16.mxu1 %v8292_v34  ;;  %v431_v40 = vadd.f32 %v8805_v18, %v376_v22  ;;  %v377_v41 = vmul.f32 %v7294_v13, %v8792_v10  ;;  %v7338_v42 = vunpack.c.l.bf16 %v7503_v14  ;;  %v430_v46 = vadd.f32 %v8805_v18, %v375_v23 }
  0xa7   : > { %v7436_v56 = vpack.c.bf16 %v833_v49, %v832_v50  ;;  %v433_v50 = vadd.f32 %v8805_v18, %v378_v30  ;;  %v7342_v0 = vunpack.c.l.bf16 %v8981_v32  ;;  %v7303_v14 = vunpack.c.h.bf16 %v8996_v52 }
  0xa8   : > { %v594_v60 = vpop.permute.xlu1 %593  ;;  %v589_v61 = vpop.permute.xlu0 %588  ;;  %v8279_v62 = vld [vmem:[#allocation3 + $0x8] sm:$0xff]   ;;  %7827 = vmatpush3.bf16.msra.mxu1 %v8292_v34  ;;  %v432_v58 = vadd.f32 %v8805_v18, %v377_v41 }
  0xa9   : > { %7523 = vst [vmem:[#allocation3 + $0x68] sm:$0xff] %v7436_v56   ;;  %v811_v4 = vmul.f32 %v594_v60, %v475_v43  ;;  %v810_v5 = vmul.f32 %v589_v61, %v474_v51  ;;  %783 = vperm.xlu1 %8265, %v561_v44   ;;  %778 = vperm.xlu0 %8264, %v560_v45   ;;  %v500_v45 = vmax.f32 %v452_v27, 0.0  ;;  %v7343_v60 = vunpack.c.h.bf16 %v8981_v32 }
  0xaa   : > { %7785 = vmatmul.mubr.bf16.vlgmr.msra.gmra.mxu0 %v8279_v62  ;;  %7828 = vmatprep.subr.bf16.mxu1 %v8295_v55  ;;  %v400_v51 = vmul.f32 %v7339_v31, %v8792_v10  ;;  %v382_v30 = vmul.f32 %v7303_v14, %v8792_v10 }
  0xab   : > { %v7381_v11 = vpack.c.bf16 %v811_v4, %v810_v5  ;;  %7873 = vmatpush3.bf16.msra.mxu0 %v8684_v39  ;;  %v7299_v4 = vunpack.c.h.bf16 %v7493_v48  ;;  %v7298_v5 = vunpack.c.l.bf16 %v7493_v48  ;;  %v402_v13 = vmul.f32 %v7343_v60, %v8792_v10  ;;  %v8302_v60 = vld [vmem:[#allocation3] sm:$0xff]  }
  0xac   : > { %v604_v35 = vpop.permute.xlu1 %603  ;;  %v599_v16 = vpop.permute.xlu0 %598  ;;  %v8280_v17 = vld [vmem:[#allocation3 + $0x60] sm:$0xff]   ;;  %7874 = vmatprep.subr.bf16.mxu0 %v8290_v59  ;;  %7829 = vmatpush3.bf16.msra.mxu1 %v8295_v55  ;;  %v455_v3 = vadd.f32 %v8805_v18, %v400_v51  ;;  %v437_v48 = vadd.f32 %v8805_v18, %v382_v30 }
  0xad   : > { %7512 = vst [vmem:[#allocation3 + $0x10] sm:$0xff] %v7381_v11   ;;  %v813_v39 = vmul.f32 %v604_v35, %v477_v57  ;;  %v812_v24 = vmul.f32 %v599_v16, %v476_v6  ;;  %793 = vperm.xlu1 %8265, %v563_v63   ;;  %788 = vperm.xlu0 %8264, %v562_v7   ;;  %v479_v57 = vmax.f32 %v431_v40, 0.0  ;;  %v478_v63 = vmax.f32 %v430_v46, 0.0  ;;  %v8304_v6 = vld [vmem:[%s10368_s1 + $0x90] sm:$0xff]  }
  0xae   : > { %7808 = vmatprep.mubr.bf16.mxu1 %v8280_v17  ;;  %7830 = vmatprep.subr.bf16.mxu1 %v8298_v9  ;;  %v481_v11 = vmax.f32 %v433_v50, 0.0  ;;  %v480_v16 = vmax.f32 %v432_v58, 0.0  ;;  %v401_v17 = vmul.f32 %v7342_v0, %v8792_v10  ;;  %v503_v22 = vmax.f32 %v455_v3, 0.0 }
  0xaf   : > { %v7386_v29 = vpack.c.bf16 %v813_v39, %v812_v24  ;;  %7875 = vmatpush3.bf16.msra.mxu0 %v8290_v59  ;;  %v399_v59 = vmul.f32 %v7338_v42, %v8792_v10  ;;  %v380_v23 = vmul.f32 %v7299_v4, %v8792_v10  ;;  %v379_v39 = vmul.f32 %v7298_v5, %v8792_v10  ;;  %v8307_v24 = vld [vmem:[%s10368_s1 + $0x88] sm:$0xff]   ;;  %v7506_v42 = vld [vmem:[%s8778_s26 + $0x98] sm:$0xff]  }
  0xb0   : > { %v714_v34 = vpop.permute.xlu1 %713  ;;  %v709_v36 = vpop.permute.xlu0 %708  ;;  %v8281_v37 = vld [vmem:[#allocation3 + $0x68] sm:$0xff]   ;;  %7876 = vmatprep.subr.bf16.mxu0 %v8293_v15  ;;  %7831 = vmatpush3.bf16.msra.mxu1 %v8298_v9 }
  0xb1   : > { %7513 = vst [vmem:[#allocation3 + $0x18] sm:$0xff] %v7386_v29   ;;  %v835_v43 = vmul.f32 %v714_v34, %v499_v19  ;;  %v834_v44 = vmul.f32 %v709_v36, %v498_v25  ;;  %803 = vperm.xlu1 %8265, %v565_v20   ;;  %798 = vperm.xlu0 %8264, %v564_v26   ;;  %v7302_v19 = vunpack.c.l.bf16 %v8996_v52  ;;  %v7505_v20 = vld [vmem:[%s8778_s26 + $0x90] sm:$0xff]  }
  0xb2   : > { %7809 = vmatmul.mubr.bf16.gmra.mxu1 %v8281_v37  ;;  %7832 = vmatprep.subr.bf16.mxu1 %v8301_v28  ;;  %v454_v12 = vadd.f32 %v8805_v18, %v399_v59  ;;  %v457_v29 = vadd.f32 %v8805_v18, %v402_v13  ;;  %v7347_v34 = vunpack.c.h.bf16 %v7505_v20  ;;  %v7346_v37 = vunpack.c.l.bf16 %v7505_v20 }
  0xb3   : > { %v7441_v49 = vpack.c.bf16 %v835_v43, %v834_v44  ;;  %7877 = vmatpush3.bf16.msra.mxu0 %v8293_v15  ;;  %v381_v36 = vmul.f32 %v7302_v19, %v8792_v10  ;;  %v435_v40 = vadd.f32 %v8805_v18, %v380_v23  ;;  %v434_v41 = vadd.f32 %v8805_v18, %v379_v39  ;;  %v8313_v43 = vld [vmem:[%s10368_s1 + $0x80] sm:$0xff]  }
  0xb4   : > { %v724_v54 = vpop.permute.xlu1 %723  ;;  %v719_v55 = vpop.permute.xlu0 %718  ;;  %v8282_v56 = vld [vmem:[#allocation3 + $0x10] sm:$0xff]   ;;  %7878 = vmatprep.subr.bf16.mxu0 %v8296_v33  ;;  %7833 = vmatpush3.bf16.msra.mxu1 %v8301_v28  ;;  %v502_v28 = vmax.f32 %v454_v12, 0.0  ;;  %v404_v52 = vmul.f32 %v7347_v34, %v8792_v10  ;;  %v7351_v59 = vunpack.c.h.bf16 %v7506_v42 }
  0xb5   : > { %7524 = vst [vmem:[#allocation3 + $0x70] sm:$0xff] %v7441_v49   ;;  %v837_v61 = vmul.f32 %v724_v54, %v501_v38  ;;  %v836_v62 = vmul.f32 %v719_v55, %v500_v45  ;;  %7834 = vmatprep.subr.bf16.mxu1 %v8306_v47  ;;  %7788 = vmatprep.mubr.bf16.mxu0 %v8282_v56  ;;  %v7507_v55 = vld [vmem:[%s8778_s26 + $0xa0] sm:$0xff]   ;;  %v482_v58 = vmax.f32 %v434_v41, 0.0 }
  0xb6   : > { %v403_v54 = vmul.f32 %v7346_v37, %v8792_v10  ;;  %v459_v5 = vadd.f32 %v8805_v18, %v404_v52  ;;  %v406_v12 = vmul.f32 %v7351_v59, %v8792_v10  ;;  %v7355_v13 = vunpack.c.h.bf16 %v7507_v55  ;;  %v9063_v52 = vld [vmem:[#allocation3 + $0x8] sm:$0xff]   ;;  %v8311_v59 = vld [vmem:[#allocation3] sm:$0xfe]  }
  0xb7   : > { %v7446_v2 = vpack.c.bf16 %v837_v61, %v836_v62  ;;  %7879 = vmatpush3.bf16.msra.mxu0 %v8296_v33  ;;  %v456_v33 = vadd.f32 %v8805_v18, %v401_v17  ;;  %v9044_v61 = vld [vmem:[%s10368_s1 + $0x138] sm:$0xff]   ;;  %v7354_v14 = vunpack.c.l.bf16 %v7507_v55  ;;  %v1666_v17 = vshll.u32 %v8302_v60, 16 }
  0xb8   : > { %v614_v7 = vpop.permute.xlu1 %613  ;;  %v609_v8 = vpop.permute.xlu0 %608  ;;  %v8284_v9 = vld [vmem:[#allocation3 + $0x18] sm:$0xff]   ;;  %7880 = vmatprep.subr.bf16.mxu0 %v8299_v53  ;;  %7835 = vmatpush3.bf16.msra.mxu1 %v8306_v47  ;;  %v505_v47 = vmax.f32 %v457_v29, 0.0  ;;  %v1664_v37 = vshrl.u32 %v8302_v60, 16 }
  0xb9   : > { %7525 = vst [vmem:[#allocation3 + $0x78] sm:$0xff] %v7446_v2   ;;  %v815_v15 = vmul.f32 %v614_v7, %v479_v57  ;;  %v814_v35 = vmul.f32 %v609_v8, %v478_v63  ;;  %7924 = vmatprep.subr.bf16.mxu1 %v9008_v1  ;;  %7789 = vmatmul.mubr.bf16.gmra.mxu0 %v8284_v9  ;;  %v504_v51 = vmax.f32 %v456_v33, 0.0  ;;  %v483_v57 = vmax.f32 %v435_v40, 0.0  ;;  %v9048_v9 = vld [vmem:[#allocation3 + $0x8] sm:$0xff]   ;;  %v9058_v40 = vld [vmem:[#allocation3 + $0x18] sm:$0xff]  }
  0xba   : > { %v485_v2 = vmax.f32 %v437_v48, 0.0  ;;  %v458_v8 = vadd.f32 %v8805_v18, %v403_v54  ;;  %v1671_v39 = vshll.u32 %v9048_v9, 16  ;;  %v1687_v54 = vshll.u32 %v9058_v40, 16 }
  0xbb   : > { %v7391_v21 = vpack.c.bf16 %v815_v15, %v814_v35  ;;  %7881 = vmatpush3.bf16.msra.mxu0 %v8299_v53  ;;  %v436_v53 = vadd.f32 %v8805_v18, %v381_v36 }
  0xbc   : > { %v624_v25 = vpop.permute.xlu1 %623  ;;  %v619_v26 = vpop.permute.xlu0 %618  ;;  %v8286_v27 = vld [vmem:[#allocation3 + $0x70] sm:$0xff]   ;;  %7882 = vmatprep.subr.bf16.mxu0 %v8304_v6  ;;  %v506_v23 = vmax.f32 %v458_v8, 0.0 }
  0xbd   : > { %7514 = vst [vmem:[#allocation3 + $0x20] sm:$0xff] %v7391_v21   ;;  %v817_v31 = vmul.f32 %v624_v25, %v481_v11  ;;  %v816_v32 = vmul.f32 %v619_v26, %v480_v16  ;;  %7812 = vmatprep.mubr.bf16.mxu1 %v8286_v27  ;;  %v484_v7 = vmax.f32 %v436_v53, 0.0  ;;  %v507_v21 = vmax.f32 %v459_v5, 0.0 }
  0xbe   : > { %v461_v25 = vadd.f32 %v8805_v18, %v406_v12  ;;  %v408_v26 = vmul.f32 %v7355_v13, %v8792_v10  ;;  %v407_v27 = vmul.f32 %v7354_v14, %v8792_v10  ;;  %v2310_v12 = vrot.slane %v8311_v59, 1  ;;  %v8320_v13 = vld [vmem:[%s10368_s1 + $0xf0] sm:$0xff]  }
  0xbf   : > { %v7396_v38 = vpack.c.bf16 %v817_v31, %v816_v32  ;;  %7883 = vmatpush3.bf16.msra.mxu0 %v8304_v6  ;;  %v7350_v6 = vunpack.c.l.bf16 %v7506_v42  ;;  %v1668_v32 = vrot.slane %v1666_v17, 1 }
  0xc0   : > { %v734_v44 = vpop.permute.xlu1 %733  ;;  %v729_v45 = vpop.permute.xlu0 %728  ;;  %v8289_v46 = vld [vmem:[#allocation3 + $0x78] sm:$0xff]   ;;  %7884 = vmatprep.subr.bf16.mxu0 %v8307_v24  ;;  %v509_v42 = vmax.f32 %v461_v25, 0.0 }
  0xc1   : > { %7515 = vst [vmem:[#allocation3 + $0x28] sm:$0xff] %v7396_v38   ;;  %v839_v49 = vmul.f32 %v734_v44, %v503_v22  ;;  %v838_v50 = vmul.f32 %v729_v45, %v502_v28  ;;  %7813 = vmatmul.mubr.bf16.gmra.mxu1 %v8289_v46  ;;  %v405_v22 = vmul.f32 %v7350_v6, %v8792_v10  ;;  %v8309_v28 = vld [vmem:[#allocation3 + $0x10] sm:$0xff]   ;;  %v1673_v38 = vrot.slane %v1671_v39, 1  ;;  %v8508_v10 = vld [vmem:[%s10370_s3] ss:$0 sm:$0xff] }
  0xc2   : > { %v462_v44 = vadd.f32 %v8508_v10, %v407_v27  ;;  %v1669_v48 = vor.u32 %v1668_v32, %v1664_v37  ;;  %v1683_v5 = vshrl.u32 %v8309_v28, 16  ;;  %v2311_v6 = vrot.slane %v9063_v52, 1 }
  0xc3   : > { %v7451_v56 = vpack.c.bf16 %v839_v49, %v838_v50  ;;  %7885 = vmatpush3.bf16.msra.mxu0 %v8307_v24  ;;  %v460_v36 = vadd.f32 %v8805_v18, %v405_v22  ;;  %v1679_v49 = vshll.u32 %v8309_v28, 16  ;;  %v8317_v22 = vld [vmem:[#allocation3 + $0x10] sm:$0xff]  }
  0xc4   : > { %v744_v62 = vpop.permute.xlu1 %743  ;;  %v739_v63 = vpop.permute.xlu0 %738  ;;  %v8291_v0 = vld [vmem:[#allocation3 + $0x20] sm:$0xff]   ;;  %7886 = vmatprep.subr.bf16.mxu0 %v8313_v43  ;;  %v1674_v53 = vsel %vm1662_vm0, %v1669_v48, %v1673_v38  ;;  %v2312_v39 = vsel %vm2309_vm1, %v2310_v12, %v2311_v6  ;;  %v2313_v32 = vrot.slane %v8317_v22, 1 }
  0xc5   : > { %7526 = vst [vmem:[#allocation3 + $0x80] sm:$0xff] %v7451_v56   ;;  %v841_v3 = vmul.f32 %v744_v62, %v505_v47  ;;  %v840_v4 = vmul.f32 %v739_v63, %v504_v51  ;;  %7792 = vmatprep.mubr.bf16.mxu0 %v8291_v0  ;;  %v508_v51 = vmax.f32 %v460_v36, 0.0  ;;  %v1675_v56 = vshrl.u32 %v9048_v9, 16  ;;  %v8316_v60 = vld [vmem:[#allocation3 + $0x20] sm:$0xff]  }
  0xc6   : > { %v1695_v17 = vshll.u32 %v8316_v60, 16 }
  0xc7   : > { %v7456_v11 = vpack.c.bf16 %v841_v3, %v840_v4  ;;  %7887 = vmatpush3.bf16.msra.mxu0 %v8313_v43  ;;  %v463_v43 = vadd.f32 %v8508_v10, %v408_v26  ;;  %v8319_v26 = vld [vmem:[#allocation3 + $0x18] sm:$0xff]  }
  0xc8   : > { %v634_v15 = vpop.permute.xlu1 %633  ;;  %v629_v35 = vpop.permute.xlu0 %628  ;;  %v8294_v16 = vld [vmem:[#allocation3 + $0x28] sm:$0xff]   ;;  %7976 = vmatprep.subr.bf16.mxu0 %v9044_v61 }
  0xc9   : > { %7527 = vst [vmem:[#allocation3 + $0x88] sm:$0xff] %v7456_v11   ;;  %v819_v19 = vmul.f32 %v634_v15, %v483_v57  ;;  %v818_v20 = vmul.f32 %v629_v35, %v482_v58  ;;  %7793 = vmatmul.mubr.bf16.gmra.mxu0 %v8294_v16  ;;  %v511_v57 = vmax.f32 %v463_v43, 0.0  ;;  %v510_v58 = vmax.f32 %v462_v44, 0.0  ;;  %v9069_v8 = vld [vmem:[#allocation3 + $0x28] sm:$0xff]   ;;  %v9096_v44 = vld [vmem:[#allocation3 + $0x40] sm:$0xff]  }
  0xca   : > { %v1677_v11 = vor.u32 %v1675_v56, %v1673_v38  ;;  %v9100_v48 = vld [vmem:[#allocation3 + $0x28] sm:$0xff]   ;;  %v1707_v56 = vshrl.u32 %v9069_v8, 16 }
  0xcb   : > { %v7401_v24 = vpack.c.bf16 %v819_v19, %v818_v20 }
  0xcc   : > { %v644_v29 = vpop.permute.xlu1 %643  ;;  %v639_v30 = vpop.permute.xlu0 %638  ;;  %v8297_v31 = vld [vmem:[#allocation3 + $0x80] sm:$0xff]  }
  0xcd   : > { %7516 = vst [vmem:[#allocation3 + $0x30] sm:$0xff] %v7401_v24   ;;  %v821_v33 = vmul.f32 %v644_v29, %v485_v2  ;;  %v820_v34 = vmul.f32 %v639_v30, %v484_v7  ;;  %7816 = vmatprep.mubr.bf16.mxu1 %v8297_v31  ;;  %v1681_v2 = vrot.slane %v1679_v49, 1  ;;  %v1689_v7 = vrot.slane %v1687_v54, 1 }
  0xce   : > { %v1703_v24 = vshll.u32 %v9069_v8, 16  ;;  %v1697_v29 = vrot.slane %v1695_v17, 1  ;;  %v1691_v31 = vshrl.u32 %v9058_v40, 16  ;;  %v8323_v40 = vld [vmem:[%s10368_s1 + $0x130] sm:$0xff]   ;;  %v8337_v8 = vld [vmem:[%s10368_s1 + $0x120] sm:$0xff]  }
  0xcf   : > { %v7406_v41 = vpack.c.bf16 %v821_v33, %v820_v34  ;;  %v1685_v16 = vor.u32 %v1683_v5, %v1681_v2  ;;  %v8326_v33 = vld [vmem:[%s10368_s1 + $0xe8] sm:$0xff]   ;;  %v1699_v34 = vshrl.u32 %v8316_v60, 16 }
  0xd0   : > { %v754_v45 = vpop.permute.xlu1 %753  ;;  %v749_v46 = vpop.permute.xlu0 %748  ;;  %v8300_v47 = vld [vmem:[#allocation3 + $0x88] sm:$0xff]   ;;  %v1705_v36 = vrot.slane %v1703_v24, 1  ;;  %v1693_v38 = vor.u32 %v1691_v31, %v1689_v7 }
  0xd1   : > { %7517 = vst [vmem:[#allocation3 + $0x38] sm:$0xff] %v7406_v41   ;;  %v843_v18 = vmul.f32 %v754_v45, %v507_v21  ;;  %v842_v50 = vmul.f32 %v749_v46, %v506_v23  ;;  %7817 = vmatmul.mubr.bf16.gmra.mxu1 %v8300_v47  ;;  %v1682_v21 = vsel %vm1662_vm0, %v1677_v11, %v1681_v2  ;;  %v2315_v41 = vrot.slane %v8319_v26, 1  ;;  %v8322_v47 = vld [vmem:[#allocation3 + $0x20] sm:$0xff]   ;;  %v8354_v26 = vld [vmem:[%s10368_s1 + $0xc8] sm:$0xff]  }
  0xd2   : > { %7836 = vmatprep.mubr.bf16.mxu1 %v1674_v53  ;;  %v1690_v23 = vsel %vm1662_vm0, %v1685_v16, %v1689_v7  ;;  %v1701_v10 = vor.u32 %v1699_v34, %v1697_v29  ;;  %v1698_v45 = vsel %vm1662_vm0, %v1693_v38, %v1697_v29  ;;  %v2314_v46 = vsel %vm2309_vm1, %v2311_v6, %v2313_v32 }
  0xd3   : > { %v7461_v55 = vpack.c.bf16 %v843_v18, %v842_v50  ;;  %v8334_v50 = vld [vmem:[%s10368_s1 + $0xe0] sm:$0xff]  }
  0xd4   : > { %v764_v62 = vpop.permute.xlu1 %763  ;;  %v759_v63 = vpop.permute.xlu0 %758  ;;  %v8305_v0 = vld [vmem:[#allocation3 + $0x30] sm:$0xff]   ;;  %v1706_v49 = vsel %vm1662_vm0, %v1701_v10, %v1705_v36 }
  0xd5   : > { %7528 = vst [vmem:[#allocation3 + $0x90] sm:$0xff] %v7461_v55   ;;  %v845_v3 = vmul.f32 %v764_v62, %v509_v42  ;;  %v844_v4 = vmul.f32 %v759_v63, %v508_v51  ;;  %7796 = vmatprep.mubr.bf16.mxu0 %v8305_v0  ;;  %v8321_v30 = vld [vmem:[#allocation3 + $0x30] sm:$0xff]   ;;  %v2316_v51 = vsel %vm2309_vm1, %v2313_v32, %v2315_v41  ;;  %v8331_v55 = vld [vmem:[%s10368_s1 + $0x128] sm:$0xff]  }
  0xd6   : > { %v1711_v43 = vshll.u32 %v8321_v30, 16  ;;  %v1715_v59 = vshrl.u32 %v8321_v30, 16  ;;  %v1709_v62 = vor.u32 %v1707_v56, %v1705_v36  ;;  %v8328_v7 = vld [vmem:[#allocation3 + $0x30] sm:$0xff]   ;;  %v8333_v36 = vld [vmem:[#allocation3 + $0x40] sm:$0xff]  }
  0xd7   : > { %v7466_v9 = vpack.c.bf16 %v845_v3, %v844_v4  ;;  %v9123_v3 = vld [vmem:[#allocation3 + $0x48] sm:$0xff]   ;;  %v8342_v4 = vld [vmem:[%s10368_s1 + $0xd8] sm:$0xff]   ;;  %v2321_v22 = vrot.slane %v8328_v7, 1 }
  0xd8   : > { %v774_v14 = vpop.permute.xlu1 %773  ;;  %v769_v15 = vpop.permute.xlu0 %768  ;;  %v8308_v35 = vld [vmem:[#allocation3 + $0x38] sm:$0xff]   ;;  %v1713_v54 = vrot.slane %v1711_v43, 1  ;;  %v9168_v43 = vld [vmem:[#allocation3 + $0x48] sm:$0xff]  }
  0xd9   : > { %7529 = vst [vmem:[#allocation3 + $0x98] sm:$0xff] %v7466_v9   ;;  %v847_v19 = vmul.f32 %v774_v14, %v511_v57  ;;  %v846_v20 = vmul.f32 %v769_v15, %v510_v58  ;;  %7797 = vmatmul.mubr.bf16.gmra.mxu0 %v8308_v35  ;;  %7837 = vmatmul.mubr.bf16.vlgmr.msra.gmra.mxu1 %v1682_v21  ;;  %v9087_v37 = vld [vmem:[#allocation3 + $0x38] sm:$0xff]   ;;  %v2317_v57 = vrot.slane %v8322_v47, 1  ;;  %v2319_v58 = vrot.slane %v9100_v48, 1  ;;  %v8348_v14 = vld [vmem:[%s10368_s1 + $0xd0] sm:$0xff]   ;;  %v8338_v48 = vld [vmem:[#allocation3 + $0x60] sm:$0xff]  }
  0xda   : > { %7840 = vmatprep.mubr.bf16.mxu1 %v1690_v23  ;;  %7888 = vmatprep.mubr.bf16.mxu0 %v2312_v39  ;;  %v1719_v18 = vshll.u32 %v9087_v37, 16  ;;  %v1717_v2 = vor.u32 %v1715_v59, %v1713_v54  ;;  %v1714_v5 = vsel %vm1662_vm0, %v1709_v62, %v1713_v54  ;;  %v1723_v15 = vshrl.u32 %v9087_v37, 16  ;;  %v8343_v23 = vld [vmem:[%s10368_s1 + $0x118] sm:$0xff]   ;;  %v8349_v37 = vld [vmem:[%s10368_s1 + $0x110] sm:$0xff]  }
  0xdb   : > { %v7471_v25 = vpack.c.bf16 %v847_v19, %v846_v20  ;;  %7925 = vmatpush3.bf16.msra.mxu1 %v9008_v1  ;;  %v2318_v6 = vsel %vm2309_vm1, %v2315_v41, %v2317_v57  ;;  %v2320_v11 = vsel %vm2309_vm1, %v2317_v57, %v2319_v58  ;;  %v1731_v35 = vshrl.u32 %v9096_v44, 16  ;;  %v8332_v20 = vld [vmem:[#allocation3 + $0x50] sm:$0xff]   ;;  %v9191_v62 = vld [vmem:[%s10368_s1 + $0x178] sm:$0xff]  }
  0xdc   : > { %v9078_v27 = vpop.permute.xlu1 %6257  ;;  %v9080_v28 = vpop.permute.xlu0 %6252  ;;  %7926 = vmatprep.subr.bf16.mxu1 %v8320_v13  ;;  %v1721_v60 = vrot.slane %v1719_v18, 1  ;;  %v1735_v19 = vshll.u32 %v9123_v3, 16  ;;  %v1743_v32 = vshll.u32 %v8332_v20, 16  ;;  %v2322_v34 = vsel %vm2309_vm1, %v2319_v58, %v2321_v22 }
  0xdd   : > { %10411 = vst [vmem:[#allocation4_spill] sm:$0xff] %v9078_v27  ;;  %10412 = vst [vmem:[#allocation5_spill] sm:$0xff] %v9080_v28  ;;  %v2325_v18 = vrot.slane %v8333_v36, 1  ;;  %v2327_v54 = vrot.slane %v9168_v43, 1  ;;  %v1759_v59 = vshll.u32 %v8338_v48, 16 }
  0xde   : > { %7530 = vst [vmem:[#allocation3 + $0xa0] sm:$0xff] %v7471_v25   ;;  %v1722_v9 = vsel %vm1662_vm0, %v1717_v2, %v1721_v60  ;;  %v1725_v21 = vor.u32 %v1723_v15, %v1721_v60  ;;  %v9151_v25 = vld [vmem:[#allocation3 + $0x58] sm:$0xff]   ;;  %v1737_v31 = vrot.slane %v1735_v19, 1  ;;  %v1745_v47 = vrot.slane %v1743_v32, 1  ;;  %v8339_v60 = vld [vmem:[#allocation3 + $0x50] sm:$0xff]  }
  0xdf   : > { %7927 = vmatpush3.bf16.msra.mxu1 %v8320_v13  ;;  %v9135_v13 = vld [vmem:[#allocation3 + $0x38] sm:$0xff]   ;;  %v1751_v10 = vshll.u32 %v9151_v25, 16  ;;  %v2328_v7 = vsel %vm2309_vm1, %v2325_v18, %v2327_v54  ;;  %v2329_v15 = vrot.slane %v8339_v60, 1 }
  0xe0   : > { %v9089_v42 = vpop.permute.xlu1 %6267  ;;  %v9091_v1 = vpop.permute.xlu0 %6262  ;;  %7928 = vmatprep.subr.bf16.mxu1 %v8326_v33  ;;  %v2323_v24 = vrot.slane %v9135_v13, 1  ;;  %v1761_v13 = vrot.slane %v1759_v59, 1 }
  0xe1   : > { %10413 = vst [vmem:[#allocation6_spill] sm:$0xff] %v9089_v42  ;;  %10414 = vst [vmem:[#allocation7_spill] sm:$0xff] %v9091_v1  ;;  %7841 = vmatmul.mubr.bf16.gmra.mxu1 %v1698_v45  ;;  %7889 = vmatmul.mubr.bf16.vlgmr.msra.gmra.mxu0 %v2314_v46  ;;  %v1739_v46 = vshrl.u32 %v9123_v3, 16  ;;  %v2330_v32 = vsel %vm2309_vm1, %v2327_v54, %v2329_v15 }
  0xe2   : > { %7977 = vmatpush3.bf16.msra.mxu0 %v9044_v61  ;;  %7844 = vmatprep.mubr.bf16.mxu1 %v1706_v49  ;;  %v1727_v61 = vshll.u32 %v9096_v44, 16  ;;  %v2324_v41 = vsel %vm2309_vm1, %v2321_v22, %v2323_v24  ;;  %v8355_v49 = vld [vmem:[%s10368_s1 + $0x108] sm:$0xff]   ;;  %v2326_v3 = vsel %vm2309_vm1, %v2323_v24, %v2325_v18  ;;  %v8346_v22 = vld [vmem:[#allocation3 + $0x78] sm:$0xff]  }
  0xe3   : > { %7892 = vmatprep.mubr.bf16.mxu0 %v2316_v51  ;;  %7978 = vmatprep.subr.bf16.mxu0 %v8323_v40  ;;  %v1753_v51 = vrot.slane %v1751_v10, 1  ;;  %v1741_v56 = vor.u32 %v1739_v46, %v1737_v31 }
  0xe4   : > { %v9109_v52 = vpop.permute.xlu1 %6277  ;;  %v9111_v53 = vpop.permute.xlu0 %6272  ;;  %7929 = vmatpush3.bf16.msra.mxu1 %v8326_v33  ;;  %v1729_v12 = vrot.slane %v1727_v61, 1 }
  0xe5   : > { %10415 = vst [vmem:[#allocation8_spill] sm:$0xff] %v9109_v52  ;;  %10416 = vst [vmem:[#allocation9_spill] sm:$0xff] %v9111_v53  ;;  %7930 = vmatprep.subr.bf16.mxu1 %v8334_v50  ;;  %v1746_v2 = vsel %vm1662_vm0, %v1741_v56, %v1745_v47  ;;  %v8465_v52 = vld [vmem:[#allocation3 + $0x90] sm:$0xff]  }
  0xe6   : > { %7979 = vmatpush3.bf16.msra.mxu0 %v8323_v40  ;;  %v1733_v39 = vor.u32 %v1731_v35, %v1729_v12  ;;  %v1730_v33 = vsel %vm1662_vm0, %v1725_v21, %v1729_v12  ;;  %v8361_v40 = vld [vmem:[%s10368_s1 + $0xc0] sm:$0xff]   ;;  %v1763_v35 = vshrl.u32 %v8338_v48, 16 }
  0xe7   : > { %7980 = vmatprep.subr.bf16.mxu0 %v8331_v55 }
  0xe8   : > { %v9119_v63 = vpop.permute.xlu1 %6287  ;;  %v9121_v0 = vpop.permute.xlu0 %6282  ;;  %7931 = vmatpush3.bf16.msra.mxu1 %v8334_v50  ;;  %v1738_v38 = vsel %vm1662_vm0, %v1733_v39, %v1737_v31  ;;  %v1747_v50 = vshrl.u32 %v8332_v20, 16  ;;  %v9210_v20 = vld [vmem:[%s10368_s1 + $0x1b8] sm:$0xff]  }
  0xe9   : > { %10417 = vst [vmem:[#allocation10_spill] sm:$0xff] %v9119_v63  ;;  %10418 = vst [vmem:[#allocation11_spill] sm:$0xff] %v9121_v0  ;;  %7845 = vmatmul.mubr.bf16.gmra.mxu1 %v1714_v5  ;;  %7893 = vmatmul.mubr.bf16.gmra.mxu0 %v2318_v6  ;;  %v8362_v5 = vld [vmem:[%s10368_s1 + $0x100] sm:$0xff]  }
  0xea   : > { %7848 = vmatprep.mubr.bf16.mxu1 %v1722_v9  ;;  %7896 = vmatprep.mubr.bf16.mxu0 %v2320_v11  ;;  %v1749_v61 = vor.u32 %v1747_v50, %v1745_v47  ;;  %v1755_v9 = vshrl.u32 %v9151_v25, 16  ;;  %v1765_v25 = vor.u32 %v1763_v35, %v1761_v13  ;;  %v8352_v50 = vld [vmem:[#allocation3 + $0x88] sm:$0xff]  }
  0xeb   : > { %7981 = vmatpush3.bf16.msra.mxu0 %v8331_v55  ;;  %7932 = vmatprep.subr.bf16.mxu1 %v8342_v4  ;;  %v9182_v55 = vld [vmem:[#allocation3 + $0x68] sm:$0xff]  }
  0xec   : > { %v9142_v16 = vpop.permute.xlu1 %6297  ;;  %v9144_v17 = vpop.permute.xlu0 %6292  ;;  %7982 = vmatprep.subr.bf16.mxu0 %v8337_v8  ;;  %7933 = vmatpush3.bf16.msra.mxu1 %v8342_v4  ;;  %v8341_v4 = vld [vmem:[#allocation3 + $0x58] sm:$0xff]   ;;  %v1754_v6 = vsel %vm1662_vm0, %v1749_v61, %v1753_v51  ;;  %v1771_v46 = vshrl.u32 %v9182_v55, 16 }
  0xed   : > { %10419 = vst [vmem:[#allocation12_spill] sm:$0xff] %v9142_v16  ;;  %10420 = vst [vmem:[#allocation13_spill] sm:$0xff] %v9144_v17  ;;  %7934 = vmatprep.subr.bf16.mxu1 %v8348_v14  ;;  %v2331_v19 = vrot.slane %v8341_v4, 1  ;;  %v8353_v4 = vld [vmem:[#allocation3 + $0x78] sm:$0xff]  }
  0xee   : > { %v2339_v35 = vrot.slane %v8353_v4, 1 }
  0xef   : > { %7983 = vmatpush3.bf16.msra.mxu0 %v8337_v8  ;;  %v1767_v8 = vshll.u32 %v9182_v55, 16  ;;  %v2332_v36 = vsel %vm2309_vm1, %v2329_v15, %v2331_v19 }
  0xf0   : > { %v9156_v29 = vpop.permute.xlu1 %6307  ;;  %v9158_v30 = vpop.permute.xlu0 %6302  ;;  %7984 = vmatprep.subr.bf16.mxu0 %v8343_v23  ;;  %7935 = vmatpush3.bf16.msra.mxu1 %v8348_v14  ;;  %v8344_v14 = vld [vmem:[#allocation3 + $0x70] sm:$0xff]  }
  0xf1   : > { %10421 = vst [vmem:[#allocation14_spill] sm:$0xff] %v9156_v29  ;;  %10422 = vst [vmem:[#allocation15_spill] sm:$0xff] %v9158_v30  ;;  %7849 = vmatmul.mubr.bf16.gmra.mxu1 %v1730_v33  ;;  %7897 = vmatmul.mubr.bf16.gmra.mxu0 %v2322_v34  ;;  %v1769_v21 = vrot.slane %v1767_v8, 1  ;;  %v8345_v33 = vld [vmem:[#allocation3 + $0x60] sm:$0xff]   ;;  %v1779_v48 = vshrl.u32 %v8344_v14, 16 }
  0xf2   : > { %7852 = vmatprep.mubr.bf16.mxu1 %v1738_v38  ;;  %7900 = vmatprep.mubr.bf16.mxu0 %v2324_v41  ;;  %v8347_v38 = vld [vmem:[#allocation3 + $0x68] sm:$0xff]   ;;  %v8350_v41 = vld [vmem:[#allocation3 + $0x80] sm:$0xff]   ;;  %v2333_v47 = vrot.slane %v8345_v33, 1  ;;  %v8356_v8 = vld [vmem:[#allocation3 + $0x90] ss:$0 sps:$4 sm:$0x11]  }
  0xf3   : > { %7985 = vmatpush3.bf16.msra.mxu0 %v8343_v23  ;;  %7936 = vmatprep.subr.bf16.mxu1 %v8354_v26  ;;  %v1757_v23 = vor.u32 %v1755_v9, %v1753_v51  ;;  %v1770_v34 = vsel %vm1662_vm0, %v1765_v25, %v1769_v21  ;;  %v2335_v18 = vrot.slane %v8347_v38, 1  ;;  %v1773_v51 = vor.u32 %v1771_v46, %v1769_v21  ;;  %v8359_v25 = vld [vmem:[#allocation3 + $0x8] sm:$0xfe]  }
  0xf4   : > { %v9173_v44 = vpop.permute.xlu1 %6317  ;;  %v9175_v45 = vpop.permute.xlu0 %6312  ;;  %7986 = vmatprep.subr.bf16.mxu0 %v8349_v37  ;;  %7937 = vmatpush3.bf16.msra.mxu1 %v8354_v26  ;;  %v1775_v26 = vshll.u32 %v8344_v14, 16  ;;  %v1791_v54 = vshll.u32 %v8350_v41, 16  ;;  %v1787_v14 = vshrl.u32 %v8346_v22, 16  ;;  %v8358_v46 = vld [vmem:[#allocation3 + $0x88] sm:$0xff]  }
  0xf5   : > { %10423 = vst [vmem:[#allocation16_spill] sm:$0xff] %v9173_v44  ;;  %10424 = vst [vmem:[#allocation17_spill] sm:$0xff] %v9175_v45  ;;  %7938 = vmatprep.subr.bf16.mxu1 %v8361_v40  ;;  %v1762_v31 = vsel %vm1662_vm0, %v1757_v23, %v1761_v13  ;;  %v8468_v44 = vld [vmem:[#allocation3 + $0x18] sm:$0xff]   ;;  %v8467_v45 = vld [vmem:[#allocation3 + $0x10] sm:$0xfc]  }
  0xf6   : > { %v5130_v17 = vshrl.u32 %v8468_v44, 16  ;;  %v5133_v30 = vshll.u32 %v8468_v44, 16  ;;  %v5122_v63 = vshrl.u32 %v8467_v45, 16 }
  0xf7   : > { %7987 = vmatpush3.bf16.msra.mxu0 %v8349_v37  ;;  %v1783_v37 = vshll.u32 %v8346_v22, 16 }
  0xf8   : > { %v9184_v57 = vpop.permute.xlu1 %6327  ;;  %v9186_v58 = vpop.permute.xlu0 %6322  ;;  %7988 = vmatprep.subr.bf16.mxu0 %v8355_v49  ;;  %7939 = vmatpush3.bf16.msra.mxu1 %v8361_v40  ;;  %v1777_v40 = vrot.slane %v1775_v26, 1  ;;  %v8366_v26 = vld [vmem:[#allocation3 + $0x8] sm:$0xfe]   ;;  %v5132_v0 = vrot.slane %v5130_v17, 2  ;;  %v5135_v27 = vrot.slane %v5133_v30, 3 }
  0xf9   : > { %10425 = vst [vmem:[#allocation18_spill] sm:$0xff] %v9184_v57  ;;  %10426 = vst [vmem:[#allocation19_spill] sm:$0xff] %v9186_v58  ;;  %7853 = vmatmul.mubr.bf16.gmra.mxu1 %v1746_v2  ;;  %7901 = vmatmul.mubr.bf16.gmra.mxu0 %v2326_v3  ;;  %v2334_v2 = vsel %vm2309_vm1, %v2331_v19, %v2333_v47  ;;  %v8351_v3 = vld [vmem:[#allocation3 + $0x70] sm:$0xff]   ;;  %v1795_v19 = vshrl.u32 %v8350_v41, 16 }
  0xfa   : > { %7856 = vmatprep.mubr.bf16.mxu1 %v1754_v6  ;;  %7904 = vmatprep.mubr.bf16.mxu0 %v2328_v7  ;;  %v1781_v59 = vor.u32 %v1779_v48, %v1777_v40  ;;  %v1778_v60 = vsel %vm1662_vm0, %v1773_v51, %v1777_v40  ;;  %v1799_v6 = vshll.u32 %v8352_v50, 16  ;;  %v1793_v7 = vrot.slane %v1791_v54, 1 }
  0xfb   : > { %7989 = vmatpush3.bf16.msra.mxu0 %v8355_v49  ;;  %8028 = vmatprep.subr.bf16.mxu1 %v9191_v62  ;;  %v1785_v49 = vrot.slane %v1783_v37, 1  ;;  %v2337_v15 = vrot.slane %v8351_v3, 1  ;;  %v9242_v37 = vld [vmem:[#allocation3 + $0x10] sm:$0xff]   ;;  %v1803_v51 = vshrl.u32 %v8352_v50, 16  ;;  %v2343_v3 = vrot.slane %v8358_v46, 1 }
  0xfc   : > { %v9202_v11 = vpop.permute.xlu1 %6337  ;;  %v9204_v12 = vpop.permute.xlu0 %6332  ;;  %7990 = vmatprep.subr.bf16.mxu0 %v8362_v5  ;;  %v1801_v21 = vrot.slane %v1799_v6, 1  ;;  %v1797_v33 = vor.u32 %v1795_v19, %v1793_v7  ;;  %v2846_v4 = vrot.slane %v9242_v37, 1 }
  0xfd   : > { %10427 = vst [vmem:[#allocation20_spill] sm:$0xff] %v9202_v11  ;;  %10428 = vst [vmem:[#allocation21_spill] sm:$0xff] %v9204_v12  ;;  %v1786_v55 = vsel %vm1662_vm0, %v1781_v59, %v1785_v49  ;;  %v1789_v23 = vor.u32 %v1787_v14, %v1785_v49  ;;  %v2338_v22 = vsel %vm2309_vm1, %v2335_v18, %v2337_v15  ;;  %v2845_v59 = vrot.slane %v8359_v25, 1  ;;  %v8371_v14 = vld [vmem:[#allocation3 + $0x18] sm:$0xff]  }
  0xfe   : > { %v1802_v41 = vsel %vm1662_vm0, %v1797_v33, %v1801_v21  ;;  %v2340_v40 = vsel %vm2309_vm1, %v2337_v15, %v2339_v35  ;;  %v1805_v6 = vor.u32 %v1803_v51, %v1801_v21  ;;  %v8365_v33 = vld [vmem:[#allocation3 + $0x20] sm:$0xff]   ;;  %v3402_v46 = vshll.u32 %v8371_v14, 16 }
  0xff   : > { %7991 = vmatpush3.bf16.msra.mxu0 %v8362_v5  ;;  %v2336_v5 = vsel %vm2309_vm1, %v2333_v47, %v2335_v18  ;;  %v1794_v38 = vsel %vm1662_vm0, %v1789_v23, %v1793_v7  ;;  %v8367_v47 = vld [vmem:[#allocation3 + $0x10] sm:$0xff]   ;;  %v3382_v18 = vshrl.u32 %v8366_v26, 16  ;;  %v2847_v21 = vsel %vm2309_vm1, %v2845_v59, %v2846_v4 }
 0x100   : > { %v9212_v39 = vpop.permute.xlu1 %6347  ;;  %v9214_v24 = vpop.permute.xlu0 %6342  ;;  %8080 = vmatprep.subr.bf16.mxu0 %v9210_v20  ;;  %v8363_v7 = vld [vmem:[#allocation3 + $0x90] ss:$0 sps:$4 sm:$0x11]   ;;  %v2850_v51 = vrot.slane %v8365_v33, 1 }
 0x101   : > { %10429 = vst [vmem:[#allocation22_spill] sm:$0xff] %v9212_v39  ;;  %10430 = vst [vmem:[#allocation23_spill] sm:$0xff] %v9214_v24  ;;  %7857 = vmatmul.mubr.bf16.gmra.mxu1 %v1762_v31  ;;  %7905 = vmatmul.mubr.bf16.gmra.mxu0 %v2330_v32  ;;  %v8374_v59 = vld [vmem:[%s10368_s1 + $0x170] sm:$0xff]  }
 0x102   : > { %7860 = vmatprep.mubr.bf16.mxu1 %v1770_v34  ;;  %7908 = vmatprep.mubr.bf16.mxu0 %v2332_v36  ;;  %v1807_v34 = vshll.u32 %v8356_v8, 16  ;;  %v8357_v36 = vld [vmem:[#allocation3 + $0x80] sm:$0xff]   ;;  %v3385_v8 = vshll.u32 %v8366_v26, 16  ;;  %v8379_v33 = vld [vmem:[#allocation3 + $0x30] sm:$0xff]  }
 0x103   : > { %v2341_v54 = vrot.slane %v8357_v36, 1 }
 0x104   : > { %v9221_v10 = vpop.permute.xlu1 %6357  ;;  %v9223_v43 = vpop.permute.xlu0 %6352 }
 0x105   : > { %10431 = vst [vmem:[#allocation24_spill] sm:$0xff] %v9221_v10  ;;  %10432 = vst [vmem:[#allocation25_spill] sm:$0xff] %v9223_v43  ;;  %v2342_v25 = vsel %vm2309_vm1, %v2339_v35, %v2341_v54  ;;  %v2344_v36 = vsel %vm2309_vm1, %v2341_v54, %v2343_v3  ;;  %v3399_v35 = vshrl.u32 %v8371_v14, 16 }
 0x108   : > { %v9226_v56 = vpop.permute.xlu1 %6367  ;;  %v9228_v61 = vpop.permute.xlu0 %6362 }
 0x109   : > { %10433 = vst [vmem:[#allocation26_spill] sm:$0xff] %v9226_v56  ;;  %10434 = vst [vmem:[#allocation27_spill] sm:$0xff] %v9228_v61  ;;  %7861 = vmatmul.mubr.bf16.gmra.mxu1 %v1778_v60  ;;  %7909 = vmatmul.mubr.bf16.gmra.mxu0 %v2334_v2  ;;  %v8364_v60 = vld [vmem:[#allocation3 + $0x18] sm:$0xff]   ;;  %v1809_v2 = vrot.slane %v1807_v34, 1  ;;  %v3384_v34 = vrot.slane %v3382_v18, 1  ;;  %v8376_v18 = vld [vmem:[#allocation3 + $0x28] sm:$0xff]  }
 0x10a   : > { %7864 = vmatprep.mubr.bf16.mxu1 %v1786_v55  ;;  %7912 = vmatprep.mubr.bf16.mxu0 %v2336_v5  ;;  %v3390_v55 = vshrl.u32 %v8367_v47, 16  ;;  %v3393_v5 = vshll.u32 %v8367_v47, 16  ;;  %v2848_v23 = vrot.slane %v8364_v60, 1  ;;  %v2345_v47 = vrot.slane %v8363_v7, 1 }
 0x10b   : > { %v1810_v50 = vsel %vm1662_vm0, %v1805_v6, %v1809_v2  ;;  %v8370_v2 = vld [vmem:[#allocation3 + $0x28] sm:$0xff]  }
 0x10c   : > { %v9234_v9 = vpop.permute.xlu1 %6377  ;;  %v9236_v13 = vpop.permute.xlu0 %6372  ;;  %v3392_v26 = vrot.slane %v3390_v55, 1  ;;  %v3395_v37 = vrot.slane %v3393_v5, 2  ;;  %v2346_v14 = vsel %vm2309_vm1, %v2343_v3, %v2345_v47  ;;  %v2849_v7 = vsel %vm2309_vm1, %v2846_v4, %v2848_v23 }
 0x10d   : > { %10435 = vst [vmem:[#allocation28_spill] sm:$0xff] %v9234_v9  ;;  %10436 = vst [vmem:[#allocation29_spill] sm:$0xff] %v9236_v13  ;;  %v2852_v3 = vrot.slane %v8370_v2, 1  ;;  %v3426_v47 = vshrl.u32 %v8379_v33, 16 }
 0x10e   : > { %v3396_v60 = vor.u32 %v3395_v37, %v3392_v26  ;;  %v9276_v26 = vld [vmem:[#allocation3 + $0x30] sm:$0xff]   ;;  %v3417_v37 = vshrl.u32 %v8376_v18, 16 }
 0x110   : > { %v9238_v31 = vpop.permute.xlu1 %6387  ;;  %v9240_v32 = vpop.permute.xlu0 %6382 }
 0x111   : > { %10437 = vst [vmem:[#allocation30_spill] sm:$0xff] %v9238_v31  ;;  %10438 = vst [vmem:[#allocation31_spill] sm:$0xff] %v9240_v32  ;;  %7865 = vmatmul.mubr.bf16.gmra.mxu1 %v1794_v38  ;;  %7913 = vmatmul.mubr.bf16.gmra.mxu0 %v2338_v22  ;;  %v3387_v38 = vrot.slane %v3385_v8, 2  ;;  %v8373_v22 = vld [vmem:[#allocation3 + $0x20] sm:$0xff]  }
 0x112   : > { %7868 = vmatprep.mubr.bf16.mxu1 %v1802_v41  ;;  %7916 = vmatprep.mubr.bf16.mxu0 %v2340_v40  ;;  %v3408_v54 = vshrl.u32 %v8373_v22, 16  ;;  %v3411_v6 = vshll.u32 %v8373_v22, 16 }
 0x113   : > { %v3388_v8 = vor.u32 %v3387_v38, %v3384_v34 }
 0x114   : > { %v9248_v48 = vpop.permute.xlu1 %6397  ;;  %v9250_v49 = vpop.permute.xlu0 %6392  ;;  %v3410_v22 = vrot.slane %v3408_v54, 1  ;;  %v3413_v34 = vrot.slane %v3411_v6, 2  ;;  %v8377_v54 = vld [vmem:[%s10368_s1 + $0x1b0] sm:$0xff]   ;;  %v3429_v6 = vshll.u32 %v8379_v33, 16  ;;  %v8388_v33 = vld [vmem:[%s10368_s1 + $0x160] sm:$0xff]  }
 0x115   : > { %10439 = vst [vmem:[#allocation32_spill] sm:$0xff] %v9248_v48  ;;  %10440 = vst [vmem:[#allocation33_spill] sm:$0xff] %v9250_v49 }
 0x118   : > { %v9253_v15 = vpop.permute.xlu1 %6407  ;;  %v9255_v19 = vpop.permute.xlu0 %6402 }
 0x119   : > { %10441 = vst [vmem:[#allocation34_spill] sm:$0xff] %v9253_v15  ;;  %10442 = vst [vmem:[#allocation35_spill] sm:$0xff] %v9255_v19  ;;  %7869 = vmatmul.mubr.bf16.gmra.mxu1 %v1810_v50  ;;  %7917 = vmatmul.mubr.bf16.gmra.mxu0 %v2342_v25  ;;  %v3401_v50 = vrot.slane %v3399_v35, 1  ;;  %v3404_v25 = vrot.slane %v3402_v46, 2  ;;  %v8380_v46 = vld [vmem:[%s10368_s1 + $0x168] sm:$0xff]   ;;  %v8443_v15 = vld [vmem:[#allocation3 + $0x60] sm:$0xff]  }
 0x11a   : > { %7920 = vmatprep.mubr.bf16.mxu0 %v2344_v36  ;;  %7940 = vmatprep.mubr.bf16.mxu1 %v2847_v21  ;;  %v2851_v36 = vsel %vm2309_vm1, %v2848_v23, %v2850_v51  ;;  %v3397_v21 = vsel %vm3380_vm2, %v3388_v8, %v3396_v60  ;;  %v3420_v23 = vshll.u32 %v8376_v18, 16  ;;  %v2854_v8 = vrot.slane %v9276_v26, 1 }
 0x11b   : > { %v3405_v4 = vor.u32 %v3404_v25, %v3401_v50  ;;  %v2853_v50 = vsel %vm2309_vm1, %v2850_v51, %v2852_v3 }
 0x11c   : > { %v9261_v41 = vpop.permute.xlu1 %6417  ;;  %v9263_v40 = vpop.permute.xlu0 %6412  ;;  %v3422_v18 = vrot.slane %v3420_v23, 2  ;;  %v2855_v26 = vsel %vm2309_vm1, %v2852_v3, %v2854_v8  ;;  %v8385_v3 = vld [vmem:[%s10368_s1 + $0x1a8] sm:$0xff]  }
 0x11d   : > { %10443 = vst [vmem:[#allocation36_spill] sm:$0xff] %v9261_v41  ;;  %10444 = vst [vmem:[#allocation37_spill] sm:$0xff] %v9263_v40  ;;  %v3406_v25 = vsel %vm3380_vm2, %v3396_v60, %v3405_v4  ;;  %v8438_v40 = vld [vmem:[#allocation3 + $0x48] sm:$0xff]  }
 0x11e   : > { %v4598_v48 = vrot.slane %v8438_v40, 2 }
 0x120   : > { %v9268_v55 = vpop.permute.xlu1 %6427  ;;  %v9270_v5 = vpop.permute.xlu0 %6422 }
 0x121   : > { %10445 = vst [vmem:[#allocation38_spill] sm:$0xff] %v9268_v55  ;;  %10446 = vst [vmem:[#allocation39_spill] sm:$0xff] %v9270_v5  ;;  %7921 = vmatmul.mubr.bf16.gmra.mxu0 %v2346_v14  ;;  %7941 = vmatmul.mubr.bf16.vlgmr.msra.gmra.mxu1 %v2849_v7  ;;  %v8375_v14 = vld [vmem:[#allocation3 + $0x38] sm:$0xff]   ;;  %v3414_v7 = vor.u32 %v3413_v34, %v3410_v22  ;;  %v8406_v55 = vld [vmem:[#allocation3 + $0x90] sm:$0xff]  }
 0x122   : > { %7944 = vmatprep.mubr.bf16.mxu1 %v2851_v36  ;;  %7992 = vmatprep.mubr.bf16.mxu0 %v3397_v21  ;;  %v3419_v36 = vrot.slane %v3417_v37, 1  ;;  %v8382_v21 = vld [vmem:[#allocation3 + $0x38] sm:$0xff]   ;;  %v2856_v60 = vrot.slane %v8375_v14, 1  ;;  %v8384_v37 = vld [vmem:[#allocation3 + $0x40] sm:$0xff]  }
 0x123   : > { %8029 = vmatpush3.bf16.msra.mxu1 %v9191_v62  ;;  %v3415_v51 = vsel %vm3380_vm2, %v3405_v4, %v3414_v7  ;;  %v3435_v23 = vshrl.u32 %v8382_v21, 16  ;;  %v8381_v4 = vld [vmem:[#allocation3 + $0x48] sm:$0xff]   ;;  %v3444_v14 = vshrl.u32 %v8384_v37, 16 }
 0x124   : > { %v784_v38 = vpop.permute.xlu1 %783  ;;  %v779_v35 = vpop.permute.xlu0 %778  ;;  %8030 = vmatprep.subr.bf16.mxu1 %v8374_v59 }
 0x125   : > { %v3428_v38 = vrot.slane %v3426_v47, 1  ;;  %v3431_v35 = vrot.slane %v3429_v6, 2  ;;  %v3423_v47 = vor.u32 %v3422_v18, %v3419_v36  ;;  %v3438_v6 = vshll.u32 %v8382_v21, 16  ;;  %v8390_v18 = vld [vmem:[#allocation3 + $0x50] sm:$0xff]  }
 0x127   : > { %8031 = vmatpush3.bf16.msra.mxu1 %v8374_v59  ;;  %v8378_v59 = vld [vmem:[#allocation3 + $0x40] sm:$0xff]   ;;  %v3424_v36 = vsel %vm3380_vm2, %v3414_v7, %v3423_v47  ;;  %v3440_v21 = vrot.slane %v3438_v6, 2  ;;  %v3446_v7 = vrot.slane %v3444_v14, 1  ;;  %v3465_v6 = vshll.u32 %v8390_v18, 16  ;;  %v8393_v14 = vld [vmem:[#allocation3 + $0x58] sm:$0xff]  }
 0x128   : > { %v794_v62 = vpop.permute.xlu1 %793  ;;  %v789_v2 = vpop.permute.xlu0 %788  ;;  %8032 = vmatprep.subr.bf16.mxu1 %v8380_v46 }
 0x129   : > { %7945 = vmatmul.mubr.bf16.gmra.mxu1 %v2853_v50  ;;  %7993 = vmatmul.mubr.bf16.vlgmr.msra.gmra.mxu0 %v3406_v25  ;;  %v3432_v62 = vor.u32 %v3431_v35, %v3428_v38  ;;  %v8387_v2 = vld [vmem:[#allocation3 + $0x48] sm:$0xff]   ;;  %v9297_v50 = vld [vmem:[#allocation3 + $0x50] sm:$0xff]   ;;  %v3447_v25 = vshll.u32 %v8384_v37, 16  ;;  %v2860_v37 = vrot.slane %v8381_v4, 1 }
 0x12a   : > { %8081 = vmatpush3.bf16.msra.mxu0 %v9210_v20  ;;  %7948 = vmatprep.mubr.bf16.mxu1 %v2855_v26  ;;  %v2858_v20 = vrot.slane %v8378_v59, 1  ;;  %v8396_v26 = vld [vmem:[%s10368_s1 + $0x158] sm:$0xff]   ;;  %v8408_v4 = vld [vmem:[%s10368_s1 + $0x148] sm:$0xff]  }
 0x12b   : > { %7996 = vmatprep.mubr.bf16.mxu0 %v3415_v51  ;;  %8082 = vmatprep.subr.bf16.mxu0 %v8377_v54  ;;  %v2857_v51 = vsel %vm2309_vm1, %v2854_v8, %v2856_v60  ;;  %v3433_v35 = vsel %vm3380_vm2, %v3423_v47, %v3432_v62  ;;  %v8402_v8 = vld [vmem:[%s10368_s1 + $0x150] sm:$0xff]   ;;  %v3449_v59 = vrot.slane %v3447_v25, 2  ;;  %v2862_v47 = vrot.slane %v9297_v50, 1  ;;  %v8395_v50 = vld [vmem:[#allocation3 + $0x60] sm:$0xff]  }
 0x12c   : > { %v804_v22 = vpop.permute.xlu1 %803  ;;  %v799_v34 = vpop.permute.xlu0 %798  ;;  %8033 = vmatpush3.bf16.msra.mxu1 %v8380_v46  ;;  %v3437_v46 = vrot.slane %v3435_v23, 1  ;;  %v2859_v38 = vsel %vm2309_vm1, %v2856_v60, %v2858_v20  ;;  %v3462_v23 = vshrl.u32 %v8390_v18, 16  ;;  %v8397_v60 = vld [vmem:[%s10368_s1 + $0x198] sm:$0xff]   ;;  %v8403_v18 = vld [vmem:[%s10368_s1 + $0x190] sm:$0xff]  }
 0x12d   : > { %8034 = vmatprep.subr.bf16.mxu1 %v8388_v33  ;;  %v3456_v34 = vshll.u32 %v8387_v2, 16  ;;  %v3450_v25 = vor.u32 %v3449_v59, %v3446_v7  ;;  %v3471_v7 = vshrl.u32 %v8393_v14, 16  ;;  %v3474_v59 = vshll.u32 %v8393_v14, 16 }
 0x12e   : > { %8083 = vmatpush3.bf16.msra.mxu0 %v8377_v54  ;;  %v8391_v54 = vld [vmem:[%s10368_s1 + $0x1a0] sm:$0xff]   ;;  %v3441_v22 = vor.u32 %v3440_v21, %v3437_v46  ;;  %v3464_v21 = vrot.slane %v3462_v23, 1  ;;  %v3480_v23 = vshrl.u32 %v8395_v50, 16 }
 0x12f   : > { %8084 = vmatprep.subr.bf16.mxu0 %v8385_v3  ;;  %v3458_v46 = vrot.slane %v3456_v34, 2  ;;  %v8392_v34 = vld [vmem:[#allocation3 + $0x68] sm:$0xff]  }
 0x130   : > { %8035 = vmatpush3.bf16.msra.mxu1 %v8388_v33  ;;  %v3453_v33 = vshrl.u32 %v8387_v2, 16  ;;  %v2861_v2 = vsel %vm2309_vm1, %v2858_v20, %v2860_v37 }
 0x131   : > { %7949 = vmatmul.mubr.bf16.gmra.mxu1 %v2857_v51  ;;  %7997 = vmatmul.mubr.bf16.gmra.mxu0 %v3424_v36  ;;  %v8386_v51 = vld [vmem:[#allocation3 + $0x58] sm:$0xff]   ;;  %v9316_v36 = vld [vmem:[#allocation3 + $0x60] sm:$0xff]  }
 0x132   : > { %7952 = vmatprep.mubr.bf16.mxu1 %v2859_v38  ;;  %8000 = vmatprep.mubr.bf16.mxu0 %v3433_v35  ;;  %v3451_v38 = vsel %vm3380_vm2, %v3441_v22, %v3450_v25  ;;  %v3467_v35 = vrot.slane %v3465_v6, 2  ;;  %v2864_v20 = vrot.slane %v8386_v51, 1  ;;  %v3483_v6 = vshll.u32 %v8395_v50, 16  ;;  %v8401_v51 = vld [vmem:[#allocation3 + $0x70] sm:$0xff]  }
 0x133   : > { %8085 = vmatpush3.bf16.msra.mxu0 %v8385_v3  ;;  %8036 = vmatprep.subr.bf16.mxu1 %v8396_v26  ;;  %v3455_v3 = vrot.slane %v3453_v33, 1  ;;  %v8409_v33 = vld [vmem:[%s10368_s1 + $0x188] sm:$0xff]  }
 0x134   : > { %8086 = vmatprep.subr.bf16.mxu0 %v8391_v54  ;;  %8037 = vmatpush3.bf16.msra.mxu1 %v8396_v26  ;;  %v3442_v26 = vsel %vm3380_vm2, %v3432_v62, %v3441_v22  ;;  %v8415_v62 = vld [vmem:[%s10368_s1 + $0x140] sm:$0xff]   ;;  %v3468_v22 = vor.u32 %v3467_v35, %v3464_v21  ;;  %v2865_v14 = vsel %vm2309_vm1, %v2862_v47, %v2864_v20  ;;  %v3498_v35 = vshrl.u32 %v8401_v51, 16 }
 0x135   : > { %8038 = vmatprep.subr.bf16.mxu1 %v8402_v8 }
 0x137   : > { %8087 = vmatpush3.bf16.msra.mxu0 %v8391_v54  ;;  %v2863_v54 = vsel %vm2309_vm1, %v2860_v37, %v2862_v47  ;;  %v2866_v37 = vrot.slane %v9316_v36, 1  ;;  %v8394_v36 = vld [vmem:[#allocation3 + $0x70] sm:$0xff]   ;;  %v2868_v47 = vrot.slane %v8392_v34, 1 }
 0x138   : > { %8088 = vmatprep.subr.bf16.mxu0 %v8397_v60  ;;  %8039 = vmatpush3.bf16.msra.mxu1 %v8402_v8  ;;  %v3459_v8 = vor.u32 %v3458_v46, %v3455_v3  ;;  %v8416_v46 = vld [vmem:[%s10368_s1 + $0x180] sm:$0xff]  }
 0x139   : > { %7953 = vmatmul.mubr.bf16.gmra.mxu1 %v2861_v2  ;;  %8001 = vmatmul.mubr.bf16.gmra.mxu0 %v3442_v26  ;;  %v8399_v2 = vld [vmem:[#allocation3 + $0x68] sm:$0xff]   ;;  %v3476_v26 = vrot.slane %v3474_v59, 2  ;;  %v2867_v21 = vsel %vm2309_vm1, %v2864_v20, %v2866_v37  ;;  %v9351_v20 = vld [vmem:[%s10368_s1 + $0x238] sm:$0xff]  }
 0x13a   : > { %7956 = vmatprep.mubr.bf16.mxu1 %v2863_v54  ;;  %8004 = vmatprep.mubr.bf16.mxu0 %v3451_v38  ;;  %v3460_v3 = vsel %vm3380_vm2, %v3450_v25, %v3459_v8  ;;  %v3469_v50 = vsel %vm3380_vm2, %v3459_v8, %v3468_v22  ;;  %v3485_v54 = vrot.slane %v3483_v6, 2  ;;  %v3489_v25 = vshrl.u32 %v8399_v2, 16 }
 0x13b   : > { %8089 = vmatpush3.bf16.msra.mxu0 %v8397_v60  ;;  %8040 = vmatprep.subr.bf16.mxu1 %v8408_v4  ;;  %v9338_v60 = vld [vmem:[%s10368_s1 + $0x1f8] sm:$0xff]   ;;  %v3492_v38 = vshll.u32 %v8399_v2, 16  ;;  %v2870_v8 = vrot.slane %v8394_v36, 1  ;;  %v2869_v6 = vsel %vm2309_vm1, %v2866_v37, %v2868_v47 }
 0x13c   : > { %8090 = vmatprep.subr.bf16.mxu0 %v8403_v18  ;;  %8041 = vmatpush3.bf16.msra.mxu1 %v8408_v4  ;;  %v3473_v4 = vrot.slane %v3471_v7, 1  ;;  %v3501_v7 = vshll.u32 %v8401_v51, 16  ;;  %v3491_v34 = vrot.slane %v3489_v25, 1  ;;  %v8405_v2 = vld [vmem:[#allocation3 + $0x78] sm:$0xff]  }
 0x13d   : > { %8042 = vmatprep.subr.bf16.mxu1 %v8415_v62  ;;  %v2871_v36 = vsel %vm2309_vm1, %v2868_v47, %v2870_v8  ;;  %v3507_v37 = vshrl.u32 %v8405_v2, 16 }
 0x13e   : > { %v3503_v51 = vrot.slane %v3501_v7, 2 }
 0x13f   : > { %8091 = vmatpush3.bf16.msra.mxu0 %v8403_v18  ;;  %v3482_v18 = vrot.slane %v3480_v23, 1  ;;  %v8398_v23 = vld [vmem:[#allocation3 + $0x78] sm:$0xff]   ;;  %v3509_v7 = vrot.slane %v3507_v37, 1 }
 0x140   : > { %8092 = vmatprep.subr.bf16.mxu0 %v8409_v33  ;;  %8043 = vmatpush3.bf16.msra.mxu1 %v8415_v62  ;;  %v3477_v62 = vor.u32 %v3476_v26, %v3473_v4  ;;  %v3500_v4 = vrot.slane %v3498_v35, 1  ;;  %v8407_v26 = vld [vmem:[#allocation3 + $0x80] sm:$0xff]   ;;  %v8404_v35 = vld [vmem:[#allocation3 + $0x88] sm:$0xff]   ;;  %v8410_v37 = vld [vmem:[#allocation3 + $0x98] ss:$0 sps:$4 sm:$0x11]  }
 0x141   : > { %7957 = vmatmul.mubr.bf16.gmra.mxu1 %v2865_v14  ;;  %8005 = vmatmul.mubr.bf16.gmra.mxu0 %v3460_v3  ;;  %v3486_v59 = vor.u32 %v3485_v54, %v3482_v18  ;;  %v8400_v14 = vld [vmem:[#allocation3 + $0x80] sm:$0xff]   ;;  %v3494_v3 = vrot.slane %v3492_v38, 2  ;;  %v2872_v18 = vrot.slane %v8398_v23, 1  ;;  %v3516_v54 = vshrl.u32 %v8407_v26, 16 }
 0x142   : > { %7960 = vmatprep.mubr.bf16.mxu1 %v2867_v21  ;;  %8008 = vmatprep.mubr.bf16.mxu0 %v3469_v50  ;;  %v3510_v50 = vshll.u32 %v8405_v2, 16  ;;  %v3504_v25 = vor.u32 %v3503_v51, %v3500_v4  ;;  %v3519_v38 = vshll.u32 %v8407_v26, 16  ;;  %v2878_v51 = vrot.slane %v8406_v55, 1 }
 0x143   : > { %8093 = vmatpush3.bf16.msra.mxu0 %v8409_v33  ;;  %8132 = vmatprep.subr.bf16.mxu1 %v9338_v60  ;;  %v3478_v33 = vsel %vm3380_vm2, %v3468_v22, %v3477_v62  ;;  %v3487_v21 = vsel %vm3380_vm2, %v3477_v62, %v3486_v59  ;;  %v2874_v22 = vrot.slane %v8400_v14, 1  ;;  %v8411_v62 = vld [vmem:[#allocation3 + $0x88] sm:$0xff]   ;;  %v8412_v14 = vld [vmem:[#allocation3 + $0x90] sm:$0xff]  }
 0x144   : > { %8094 = vmatprep.subr.bf16.mxu0 %v8416_v46  ;;  %v3512_v41 = vrot.slane %v3510_v50, 2  ;;  %v3525_v26 = vshrl.u32 %v8411_v62, 16  ;;  %v8417_v50 = vld [vmem:[#allocation3 + $0x98] ss:$0 sps:$4 sm:$0x33]  }
 0x145   : > { %v2875_v2 = vsel %vm2309_vm1, %v2872_v18, %v2874_v22 }
 0x146   : > { %v3513_v4 = vor.u32 %v3512_v41, %v3509_v7  ;;  %v8414_v7 = vld [vmem:[#allocation3 + $0x10] sm:$0xff]  }
 0x147   : > { %8095 = vmatpush3.bf16.msra.mxu0 %v8416_v46  ;;  %v3495_v46 = vor.u32 %v3494_v3, %v3491_v34  ;;  %v3521_v34 = vrot.slane %v3519_v38, 2  ;;  %v2876_v3 = vrot.slane %v8404_v35, 1 }
 0x148   : > { %8184 = vmatprep.subr.bf16.mxu0 %v9351_v20 }
 0x149   : > { %7961 = vmatmul.mubr.bf16.gmra.mxu1 %v2869_v6  ;;  %8009 = vmatmul.mubr.bf16.gmra.mxu0 %v3478_v33  ;;  %v2873_v6 = vsel %vm2309_vm1, %v2870_v8, %v2872_v18  ;;  %v3496_v47 = vsel %vm3380_vm2, %v3486_v59, %v3495_v46  ;;  %v3518_v33 = vrot.slane %v3516_v54, 1  ;;  %v3505_v23 = vsel %vm3380_vm2, %v3495_v46, %v3504_v25 }
 0x14a   : > { %7964 = vmatprep.mubr.bf16.mxu1 %v2871_v36  ;;  %8012 = vmatprep.mubr.bf16.mxu0 %v3487_v21  ;;  %v3528_v36 = vshll.u32 %v8411_v62, 16  ;;  %v3534_v21 = vshrl.u32 %v8412_v14, 16  ;;  %v3537_v59 = vshll.u32 %v8412_v14, 16  ;;  %v2877_v54 = vsel %vm2309_vm1, %v2874_v22, %v2876_v3 }
 0x14b   : > { %v3522_v8 = vor.u32 %v3521_v34, %v3518_v33  ;;  %v3514_v18 = vsel %vm3380_vm2, %v3504_v25, %v3513_v4  ;;  %v2879_v38 = vsel %vm2309_vm1, %v2876_v3, %v2878_v51  ;;  %v8413_v33 = vld [vmem:[#allocation3 + $0x8] sm:$0xfc]   ;;  %v2880_v22 = vrot.slane %v8410_v37, 1 }
 0x14c   : > { %v3530_v46 = vrot.slane %v3528_v36, 2  ;;  %v3536_v55 = vrot.slane %v3534_v21, 1  ;;  %v3539_v35 = vrot.slane %v3537_v59, 2  ;;  %v4051_v14 = vrot.slane %v8414_v7, 2 }
 0x14d   : > { %v3523_v41 = vsel %vm3380_vm2, %v3513_v4, %v3522_v8  ;;  %v4050_v3 = vrot.slane %v8413_v33, 2  ;;  %v2881_v4 = vsel %vm2309_vm1, %v2878_v51, %v2880_v22 }
 0x14e   : > { %v3540_v34 = vor.u32 %v3539_v35, %v3536_v55 }
 0x151   : > { %7965 = vmatmul.mubr.bf16.gmra.mxu1 %v2873_v6  ;;  %8013 = vmatmul.mubr.bf16.gmra.mxu0 %v3496_v47  ;;  %v3527_v6 = vrot.slane %v3525_v26, 1 }
 0x152   : > { %7968 = vmatprep.mubr.bf16.mxu1 %v2875_v2  ;;  %8016 = vmatprep.mubr.bf16.mxu0 %v3505_v23  ;;  %v3543_v2 = vshrl.u32 %v8417_v50, 16  ;;  %v3546_v23 = vshll.u32 %v8417_v50, 16  ;;  %v8419_v50 = vld [vmem:[#allocation3 + $0x20] sm:$0xff]  }
 0x153   : > { %v3531_v25 = vor.u32 %v3530_v46, %v3527_v6  ;;  %v8421_v6 = vld [vmem:[#allocation3 + $0x18] sm:$0xff]   ;;  %v4055_v55 = vrot.slane %v8419_v50, 2 }
 0x154   : > { %v3545_v21 = vrot.slane %v3543_v2, 1  ;;  %v3548_v59 = vrot.slane %v3546_v23, 2  ;;  %v8425_v2 = vld [vmem:[#allocation3 + $0x20] sm:$0xff]   ;;  %v8428_v23 = vld [vmem:[%s10368_s1 + $0x1f0] sm:$0xff]  }
 0x155   : > { %v3532_v36 = vsel %vm3380_vm2, %v3522_v8, %v3531_v25  ;;  %v3541_v37 = vsel %vm3380_vm2, %v3531_v25, %v3540_v34  ;;  %v4586_v8 = vrot.slane %v8421_v6, 2  ;;  %v8424_v25 = vld [vmem:[#allocation3 + $0x28] sm:$0xff]  }
 0x159   : > { %7969 = vmatmul.mubr.bf16.gmra.mxu1 %v2877_v54  ;;  %8017 = vmatmul.mubr.bf16.gmra.mxu0 %v3514_v18  ;;  %v8418_v54 = vld [vmem:[#allocation3 + $0x18] sm:$0xff]   ;;  %v4052_v18 = vsel %vm4049_vm3, %v4050_v3, %v4051_v14 }
 0x15a   : > { %7972 = vmatprep.mubr.bf16.mxu1 %v2879_v38  ;;  %8020 = vmatprep.mubr.bf16.mxu0 %v3523_v41  ;;  %v8420_v38 = vld [vmem:[#allocation3 + $0x10] sm:$0xfc]   ;;  %v3549_v41 = vor.u32 %v3548_v59, %v3545_v21  ;;  %v4053_v51 = vrot.slane %v8418_v54, 2  ;;  %v8427_v21 = vld [vmem:[#allocation3 + $0x28] sm:$0xff]  }
 0x15b   : > { %v9366_v47 = vpop.f32.mrf.mxu1  ;;  %v4585_v7 = vrot.slane %v8420_v38, 2  ;;  %v8434_v54 = vld [vmem:[%s10368_s1 + $0x1e8] sm:$0xff]   ;;  %v8431_v38 = vld [vmem:[%s10368_s1 + $0x230] sm:$0xff]  }
 0x15c   : > { %v3550_v33 = vsel %vm3380_vm2, %v3540_v34, %v3549_v41  ;;  %v4054_v22 = vsel %vm4049_vm3, %v4051_v14, %v4053_v51  ;;  %v4056_v3 = vsel %vm4049_vm3, %v4053_v51, %v4055_v55  ;;  %v4057_v34 = vrot.slane %v8424_v25, 2  ;;  %v8429_v51 = vld [vmem:[#allocation3 + $0x38] sm:$0xff]   ;;  %v8442_v25 = vld [vmem:[%s10368_s1 + $0x1e0] sm:$0xff]  }
 0x15d   : > { %v9368_v62 = vpop.f32.mrf.mxu1  ;;  %v4588_v14 = vrot.slane %v8425_v2, 2 }
 0x15f   : > { %v9370_v26 = vpop.f32.mrf.mxu1  ;;  %v4589_v41 = vsel %vm4049_vm3, %v4586_v8, %v4588_v14 }
 0x161   : > { %7973 = vmatmul.mubr.bf16.gmra.mxu1 %v2881_v4  ;;  %8021 = vmatmul.mubr.bf16.gmra.mxu0 %v3532_v36  ;;  %v9376_v46 = vpop.f32.mrf.mxu1  ;;  %v4587_v4 = vsel %vm4049_vm3, %v4585_v7, %v4586_v8  ;;  %v8426_v36 = vld [vmem:[#allocation3 + $0x30] sm:$0xff]  }
 0x162   : > { %8024 = vmatprep.mubr.bf16.mxu0 %v3541_v37  ;;  %8044 = vmatprep.mubr.bf16.mxu1 %v4052_v18  ;;  %v4059_v37 = vrot.slane %v8426_v36, 2  ;;  %v4590_v18 = vrot.slane %v8427_v21, 2  ;;  %v8430_v7 = vld [vmem:[#allocation3 + $0x30] sm:$0xff]  }
 0x163   : > { %v9378_v35 = vpop.f32.mrf.mxu1  ;;  %v4592_v36 = vrot.slane %v8430_v7, 2  ;;  %v8436_v7 = vld [vmem:[#allocation3 + $0x40] sm:$0xff]  }
 0x164   : > { %v4591_v2 = vsel %vm4049_vm3, %v4588_v14, %v4590_v18 }
 0x165   : > { %v9387_v59 = vpop.f32.mrf.mxu1 }
 0x167   : > { %v9393_v50 = vpop.f32.mrf.mxu1 }
 0x169   : > { %8025 = vmatmul.mubr.bf16.gmra.mxu0 %v3550_v33  ;;  %8045 = vmatmul.mubr.bf16.vlgmr.msra.gmra.mxu1 %v4054_v22  ;;  %v4060_v33 = vsel %vm4049_vm3, %v4057_v34, %v4059_v37  ;;  %v8433_v22 = vld [vmem:[#allocation3 + $0x38] sm:$0xff]  }
 0x16a   : > { %8048 = vmatprep.mubr.bf16.mxu1 %v4056_v3  ;;  %8096 = vmatprep.mubr.bf16.mxu0 %v4587_v4  ;;  %v9395_v6 = vpop.f32.mrf.mxu0  ;;  %v8439_v3 = vld [vmem:[%s10368_s1 + $0x228] sm:$0xff]   ;;  %v4061_v4 = vrot.slane %v8429_v51, 2 }
 0x16b   : > { %8133 = vmatpush3.bf16.msra.mxu1 %v9338_v60  ;;  %v4058_v60 = vsel %vm4049_vm3, %v4055_v55, %v4057_v34  ;;  %v9408_v55 = vpop.f32.mrf.mxu1  ;;  %v8435_v51 = vld [vmem:[#allocation3 + $0x48] sm:$0xff]  }
 0x16c   : > { %8134 = vmatprep.subr.bf16.mxu1 %v8428_v23  ;;  %v9410_v8 = vpop.f32.mrf.mxu0 }
 0x16e   : > { %v9417_v34 = vpop.f32.mrf.mxu0 }
 0x16f   : > { %8135 = vmatpush3.bf16.msra.mxu1 %v8428_v23  ;;  %v8432_v23 = vld [vmem:[#allocation3 + $0x40] sm:$0xff]  }
 0x170   : > { %8136 = vmatprep.subr.bf16.mxu1 %v8434_v54  ;;  %v4063_v14 = vrot.slane %v8432_v23, 2  ;;  %v8437_v23 = vld [vmem:[#allocation3 + $0x50] sm:$0xff]  }
 0x171   : > { %8049 = vmatmul.mubr.bf16.gmra.mxu1 %v4058_v60  ;;  %8097 = vmatmul.mubr.bf16.vlgmr.msra.gmra.mxu0 %v4589_v41  ;;  %v8450_v60 = vld [vmem:[%s10368_s1 + $0x1d8] sm:$0xff]   ;;  %v4062_v41 = vsel %vm4049_vm3, %v4059_v37, %v4061_v4  ;;  %v8456_v37 = vld [vmem:[%s10368_s1 + $0x1d0] sm:$0xff]   ;;  %v4067_v5 = vrot.slane %v8437_v23, 2 }
 0x172   : > { %8185 = vmatpush3.bf16.msra.mxu0 %v9351_v20  ;;  %8052 = vmatprep.mubr.bf16.mxu1 %v4060_v33  ;;  %v9415_v21 = vpop.f32.mrf.mxu1  ;;  %v4594_v20 = vrot.slane %v8433_v22, 2  ;;  %v4593_v33 = vsel %vm4049_vm3, %v4590_v18, %v4592_v36  ;;  %v4064_v22 = vsel %vm4049_vm3, %v4061_v4, %v4063_v14  ;;  %v9434_v18 = vpop.f32.mrf.mxu0  ;;  %v8451_v4 = vld [vmem:[%s10368_s1 + $0x218] sm:$0xff]  }
 0x173   : > { %8100 = vmatprep.mubr.bf16.mxu0 %v4591_v2  ;;  %8186 = vmatprep.subr.bf16.mxu0 %v8431_v38 }
 0x174   : > { %8137 = vmatpush3.bf16.msra.mxu1 %v8434_v54  ;;  %v8445_v54 = vld [vmem:[%s10368_s1 + $0x220] sm:$0xff]   ;;  %v4595_v2 = vsel %vm4049_vm3, %v4592_v36, %v4594_v20 }
 0x175   : > { %8138 = vmatprep.subr.bf16.mxu1 %v8442_v25 }
 0x176   : > { %8187 = vmatpush3.bf16.msra.mxu0 %v8431_v38  ;;  %v9427_v38 = vpop.f32.mrf.mxu1 }
 0x177   : > { %8188 = vmatprep.subr.bf16.mxu0 %v8439_v3 }
 0x178   : > { %8139 = vmatpush3.bf16.msra.mxu1 %v8442_v25  ;;  %v4065_v25 = vrot.slane %v8435_v51, 2  ;;  %v9439_v36 = vpop.f32.mrf.mxu1 }
 0x179   : > { %8053 = vmatmul.mubr.bf16.gmra.mxu1 %v4062_v41  ;;  %8101 = vmatmul.mubr.bf16.gmra.mxu0 %v4593_v33  ;;  %v9441_v41 = vpop.f32.mrf.mxu0  ;;  %v4596_v33 = vrot.slane %v8436_v7, 2  ;;  %v8457_v7 = vld [vmem:[%s10368_s1 + $0x210] sm:$0xff]  }
 0x17a   : > { %8056 = vmatprep.mubr.bf16.mxu1 %v4064_v22  ;;  %8104 = vmatprep.mubr.bf16.mxu0 %v4595_v2  ;;  %v4066_v51 = vsel %vm4049_vm3, %v4063_v14, %v4065_v25  ;;  %v8440_v22 = vld [vmem:[#allocation3 + $0x58] sm:$0xff]   ;;  %v8441_v2 = vld [vmem:[#allocation3 + $0x50] sm:$0xff]   ;;  %v9451_v23 = vpop.f32.mrf.mxu1 }
 0x17b   : > { %8189 = vmatpush3.bf16.msra.mxu0 %v8439_v3  ;;  %8140 = vmatprep.subr.bf16.mxu1 %v8450_v60  ;;  %v8462_v3 = vld [vmem:[%s10368_s1 + $0x1c8] sm:$0xff]   ;;  %v9453_v40 = vpop.f32.mrf.mxu0  ;;  %v4599_v14 = vsel %vm4049_vm3, %v4596_v33, %v4598_v48  ;;  %v4069_v19 = vrot.slane %v8440_v22, 2  ;;  %v4600_v9 = vrot.slane %v8441_v2, 2  ;;  %v8447_v2 = vld [vmem:[#allocation3 + $0x60] sm:$0xff]  }
 0x17c   : > { %8190 = vmatprep.subr.bf16.mxu0 %v8445_v54  ;;  %8141 = vmatpush3.bf16.msra.mxu1 %v8450_v60  ;;  %v4597_v60 = vsel %vm4049_vm3, %v4594_v20, %v4596_v33  ;;  %v8444_v20 = vld [vmem:[#allocation3 + $0x58] sm:$0xff]   ;;  %v8446_v22 = vld [vmem:[#allocation3 + $0x68] sm:$0xff]   ;;  %v4604_v32 = vrot.slane %v8447_v2, 2  ;;  %v8454_v2 = vld [vmem:[#allocation3 + $0x80] sm:$0xff]  }
 0x17d   : > { %8142 = vmatprep.subr.bf16.mxu1 %v8456_v37  ;;  %v9465_v33 = vpop.f32.mrf.mxu0  ;;  %v4079_v11 = vrot.slane %v8454_v2, 2  ;;  %v9508_v2 = vld [vmem:[#allocation3 + $0x90] sm:$0xff]  }
 0x17e   : > { %v4083_v16 = vrot.slane %v9508_v2, 2  ;;  %v8472_v2 = vld [vmem:[#allocation3 + $0x20] sm:$0xff]  }
 0x17f   : > { %8191 = vmatpush3.bf16.msra.mxu0 %v8445_v54  ;;  %v4068_v54 = vsel %vm4049_vm3, %v4065_v25, %v4067_v5  ;;  %v8463_v25 = vld [vmem:[%s10368_s1 + $0x208] sm:$0xff]   ;;  %v5139_v1 = vshrl.u32 %v8472_v2, 16  ;;  %v5142_v17 = vshll.u32 %v8472_v2, 16 }
 0x180   : > { %8192 = vmatprep.subr.bf16.mxu0 %v8451_v4  ;;  %8143 = vmatpush3.bf16.msra.mxu1 %v8456_v37  ;;  %v8469_v37 = vld [vmem:[%s10368_s1 + $0x1c0] sm:$0xff]  }
 0x181   : > { %8057 = vmatmul.mubr.bf16.gmra.mxu1 %v4066_v51  ;;  %8105 = vmatmul.mubr.bf16.gmra.mxu0 %v4597_v60  ;;  %v9460_v49 = vpop.f32.mrf.mxu1  ;;  %v4071_v51 = vrot.slane %v8443_v15, 2  ;;  %v4602_v60 = vrot.slane %v8444_v20, 2  ;;  %v8448_v20 = vld [vmem:[#allocation3 + $0x70] sm:$0xff]  }
 0x182   : > { %8060 = vmatprep.mubr.bf16.mxu1 %v4068_v54  ;;  %8108 = vmatprep.mubr.bf16.mxu0 %v4599_v14  ;;  %v4070_v54 = vsel %vm4049_vm3, %v4067_v5, %v4069_v19  ;;  %v9474_v14 = vpop.f32.mrf.mxu0  ;;  %v8449_v5 = vld [vmem:[#allocation3 + $0x68] sm:$0xff]   ;;  %v4075_v10 = vrot.slane %v8448_v20, 2  ;;  %v8455_v20 = vld [vmem:[#allocation3 + $0x78] sm:$0xff]  }
 0x183   : > { %8193 = vmatpush3.bf16.msra.mxu0 %v8451_v4  ;;  %8144 = vmatprep.subr.bf16.mxu1 %v8462_v3  ;;  %v9467_v31 = vpop.f32.mrf.mxu1  ;;  %v4601_v4 = vsel %vm4049_vm3, %v4598_v48, %v4600_v9  ;;  %v4072_v15 = vsel %vm4049_vm3, %v4069_v19, %v4071_v51  ;;  %v4606_v56 = vrot.slane %v8449_v5, 2  ;;  %v4605_v19 = vsel %vm4049_vm3, %v4602_v60, %v4604_v32 }
 0x184   : > { %8194 = vmatprep.subr.bf16.mxu0 %v8457_v7  ;;  %8145 = vmatpush3.bf16.msra.mxu1 %v8462_v3  ;;  %v8470_v3 = vld [vmem:[%s10368_s1 + $0x200] sm:$0xff]   ;;  %v4610_v39 = vrot.slane %v8455_v20, 2  ;;  %v9510_v20 = vld [vmem:[#allocation3 + $0x88] sm:$0xff]  }
 0x185   : > { %8146 = vmatprep.subr.bf16.mxu1 %v8469_v37  ;;  %v9478_v48 = vpop.f32.mrf.mxu1  ;;  %v4614_v29 = vrot.slane %v9510_v20, 2 }
 0x187   : > { %8195 = vmatpush3.bf16.msra.mxu0 %v8457_v7  ;;  %v4603_v7 = vsel %vm4049_vm3, %v4600_v9, %v4602_v60 }
 0x188   : > { %8196 = vmatprep.subr.bf16.mxu0 %v8463_v25  ;;  %8147 = vmatpush3.bf16.msra.mxu1 %v8469_v37  ;;  %v4073_v37 = vrot.slane %v8446_v22, 2  ;;  %v4607_v22 = vsel %vm4049_vm3, %v4604_v32, %v4606_v56 }
 0x189   : > { %8061 = vmatmul.mubr.bf16.gmra.mxu1 %v4070_v54  ;;  %8109 = vmatmul.mubr.bf16.gmra.mxu0 %v4601_v4  ;;  %v9480_v13 = vpop.f32.mrf.mxu0  ;;  %v9482_v54 = vpop.f32.mrf.mxu1 }
 0x18a   : > { %8064 = vmatprep.mubr.bf16.mxu1 %v4072_v15  ;;  %8112 = vmatprep.mubr.bf16.mxu0 %v4603_v7  ;;  %v4074_v9 = vsel %vm4049_vm3, %v4071_v51, %v4073_v37  ;;  %v8452_v15 = vld [vmem:[#allocation3 + $0x78] sm:$0xff]   ;;  %v8453_v7 = vld [vmem:[#allocation3 + $0x70] sm:$0xff]  }
 0x18b   : > { %8197 = vmatpush3.bf16.msra.mxu0 %v8463_v25  ;;  %v9484_v4 = vpop.f32.mrf.mxu0  ;;  %v4076_v25 = vsel %vm4049_vm3, %v4073_v37, %v4075_v10  ;;  %v4077_v51 = vrot.slane %v8452_v15, 2  ;;  %v4608_v60 = vrot.slane %v8453_v7, 2 }
 0x18c   : > { %8198 = vmatprep.subr.bf16.mxu0 %v8470_v3 }
 0x18d   : > { %v9492_v5 = vpop.f32.mrf.mxu0  ;;  %v4078_v32 = vsel %vm4049_vm3, %v4075_v10, %v4077_v51  ;;  %v4609_v37 = vsel %vm4049_vm3, %v4606_v56, %v4608_v60  ;;  %v4080_v15 = vsel %vm4049_vm3, %v4077_v51, %v4079_v11  ;;  %v4611_v7 = vsel %vm4049_vm3, %v4608_v60, %v4610_v39 }
 0x18f   : > { %8199 = vmatpush3.bf16.msra.mxu0 %v8470_v3 }
 0x191   : > { %v9488_v43 = vpop.f32.mrf.mxu1  ;;  %8065 = vmatmul.mubr.bf16.gmra.mxu1 %v4074_v9  ;;  %8113 = vmatmul.mubr.bf16.gmra.mxu0 %v4605_v19  ;;  %v9498_v9 = vpop.f32.mrf.mxu0 }
 0x192   : > { %8068 = vmatprep.mubr.bf16.mxu1 %v4076_v25  ;;  %8116 = vmatprep.mubr.bf16.mxu0 %v4607_v22  ;;  %v8458_v25 = vld [vmem:[#allocation3 + $0x88] sm:$0xff]   ;;  %v8459_v22 = vld [vmem:[#allocation3 + $0x80] sm:$0xff]  }
 0x193   : > { %v9494_v3 = vpop.f32.mrf.mxu1  ;;  %v4612_v58 = vrot.slane %v8459_v22, 2 }
 0x195   : > { %v9496_v61 = vpop.f32.mrf.mxu1  ;;  %v4613_v22 = vsel %vm4049_vm3, %v4610_v39, %v4612_v58 }
 0x197   : > { %v9500_v19 = vpop.f32.mrf.mxu1 }
 0x198   : > { %10447 = vst [vmem:[#allocation40_spill] sm:$0xff] %v9500_v19 }
 0x199   : > { %v9504_v12 = vpop.f32.mrf.mxu0  ;;  %v7838_v24 = vpop.f32.mrf.mxu1  ;;  %8069 = vmatmul.mubr.bf16.gmra.mxu1 %v4078_v32  ;;  %8117 = vmatmul.mubr.bf16.gmra.mxu0 %v4609_v37  ;;  %v4081_v37 = vrot.slane %v8458_v25, 2 }
 0x19a   : > { %v2092_v10 = vadd.f32 %v7838_v24, %v9395_v6  ;;  %8072 = vmatprep.mubr.bf16.mxu1 %v4080_v15  ;;  %8120 = vmatprep.mubr.bf16.mxu0 %v4611_v7  ;;  %v8464_v7 = vld [vmem:[#allocation3 + $0x98] ss:$0 sps:$4 sm:$0x33]  }
 0x19b   : > { %v9513_v56 = vpop.f32.mrf.mxu0  ;;  %v1911_v57 = vpop.f32.mrf.mxu1  ;;  %v4082_v25 = vsel %vm4049_vm3, %v4079_v11, %v4081_v37  ;;  %v4084_v44 = vsel %vm4049_vm3, %v4081_v37, %v4083_v16  ;;  %v4085_v42 = vrot.slane %v8464_v7, 2 }
 0x19c   : > { %v2090_v32 = vadd.f32 %v1911_v57, %v9410_v8  ;;  %v5125_v57 = vshll.u32 %v8467_v45, 16  ;;  %v8473_v45 = vld [vmem:[#allocation3 + $0x28] sm:$0xff]  }
 0x19d   : > { %v9516_v51 = vpop.f32.mrf.mxu0  ;;  %v7839_v60 = vpop.f32.mrf.mxu1  ;;  %v4086_v7 = vsel %vm4049_vm3, %v4083_v16, %v4085_v42 }
 0x19e   : > { %v2093_v24 = vadd.f32 %v7839_v60, %v9417_v34  ;;  %v4615_v34 = vsel %vm4049_vm3, %v4612_v58, %v4614_v29  ;;  %v9528_v60 = vld [vmem:[#allocation3 + $0x98] sm:$0xff]   ;;  %v5127_v28 = vrot.slane %v5125_v57, 3  ;;  %v8476_v57 = vld [vmem:[#allocation3 + $0x30] sm:$0xff]  }
 0x19f   : > { %v9521_v6 = vpop.f32.mrf.mxu0  ;;  %v1914_v15 = vpop.f32.mrf.mxu1 }
 0x1a0   : > { %v2091_v8 = vadd.f32 %v1914_v15, %v9434_v18 }
 0x1a1   : > { %v7842_v53 = vpop.f32.mrf.mxu1  ;;  %v7890_v20 = vpop.f32.mrf.mxu0  ;;  %8073 = vmatmul.mubr.bf16.gmra.mxu1 %v4082_v25  ;;  %8121 = vmatmul.mubr.bf16.gmra.mxu0 %v4613_v22  ;;  %v4616_v25 = vrot.slane %v8465_v52, 2  ;;  %v5124_v22 = vrot.slane %v5122_v63, 2 }
 0x1a2   : > { %v2096_v18 = vadd.f32 %v7842_v53, %v9441_v41  ;;  %v9531_v15 = vadd.f32 %v7890_v20, %v2092_v10  ;;  %8076 = vmatprep.mubr.bf16.mxu1 %v4084_v44  ;;  %8124 = vmatprep.mubr.bf16.mxu0 %v4615_v34  ;;  %v4618_v53 = vrot.slane %v9528_v60, 2  ;;  %v5136_v41 = vor.u32 %v5135_v27, %v5132_v0  ;;  %v8471_v27 = vld [vmem:[#allocation3 + $0xa0] ss:$0 sps:$4 sm:$0x33]  }
 0x1a3   : > { %v1927_v11 = vpop.f32.mrf.mxu1  ;;  %v2447_v39 = vpop.f32.mrf.mxu0  ;;  %v5148_v10 = vshrl.u32 %v8473_v45, 16  ;;  %v5151_v20 = vshll.u32 %v8473_v45, 16  ;;  %v5141_v0 = vrot.slane %v5139_v1, 2  ;;  %v5144_v60 = vrot.slane %v5142_v17, 3 }
 0x1a4   : > { %v2094_v37 = vadd.f32 %v1927_v11, %v9453_v40  ;;  %v9534_v58 = vadd.f32 %v2447_v39, %v2090_v32  ;;  %v4617_v40 = vsel %vm4049_vm3, %v4614_v29, %v4616_v25  ;;  %v5128_v32 = vor.u32 %v5127_v28, %v5124_v22  ;;  %v8478_v28 = vld [vmem:[#allocation3 + $0x38] sm:$0xff]   ;;  %v8474_v22 = vld [vmem:[#allocation3 + $0x10] sm:$0xf8]  }
 0x1a5   : > { %v7843_v30 = vpop.f32.mrf.mxu1  ;;  %v7891_v19 = vpop.f32.mrf.mxu0  ;;  %v5150_v16 = vrot.slane %v5148_v10, 2  ;;  %v5153_v29 = vrot.slane %v5151_v20, 3  ;;  %v5157_v17 = vshrl.u32 %v8476_v57, 16  ;;  %v4620_v10 = vrot.slane %v8471_v27, 2 }
 0x1a6   : > { %v2097_v44 = vadd.f32 %v7843_v30, %v9465_v33  ;;  %v9538_v34 = vadd.f32 %v7891_v19, %v2093_v24  ;;  %v4619_v19 = vsel %vm4049_vm3, %v4616_v25, %v4618_v53  ;;  %v5137_v42 = vsel %vm5120_vm4, %v5128_v32, %v5136_v41  ;;  %v9547_v24 = vld [vmem:[#allocation3 + $0x18] sm:$0xff]  }
 0x1a7   : > { %v1930_v52 = vpop.f32.mrf.mxu1  ;;  %v2450_v63 = vpop.f32.mrf.mxu0  ;;  %v5160_v30 = vshll.u32 %v8476_v57, 16  ;;  %v5145_v20 = vor.u32 %v5144_v60, %v5141_v0  ;;  %v5169_v32 = vshll.u32 %v8478_v28, 16  ;;  %v5790_v57 = vrot.slane %v8474_v22, 3 }
 0x1a8   : > { %v2095_v2 = vadd.f32 %v1930_v52, %v9474_v14  ;;  %v9543_v11 = vadd.f32 %v2450_v63, %v2091_v8  ;;  %v4621_v60 = vsel %vm4049_vm3, %v4618_v53, %v4620_v10 }
 0x1a9   : > { %v7846_v45 = vpop.f32.mrf.mxu1  ;;  %v7894_v33 = vpop.f32.mrf.mxu0  ;;  %8077 = vmatmul.mubr.bf16.gmra.mxu1 %v4086_v7  ;;  %8125 = vmatmul.mubr.bf16.gmra.mxu0 %v4617_v40  ;;  %v5154_v40 = vor.u32 %v5153_v29, %v5150_v16  ;;  %v5146_v16 = vsel %vm5120_vm4, %v5136_v41, %v5145_v20  ;;  %v8480_v29 = vld [vmem:[#allocation3 + $0x40] sm:$0xff]   ;;  %v5171_v22 = vrot.slane %v5169_v32, 3 }
 0x1aa   : > { %v2100_v14 = vadd.f32 %v7846_v45, %v9480_v13  ;;  %v9550_v8 = vadd.f32 %v7894_v33, %v2096_v18  ;;  %8128 = vmatprep.mubr.bf16.mxu0 %v4619_v19  ;;  %8148 = vmatprep.mubr.bf16.mxu1 %v5137_v42  ;;  %v5791_v13 = vrot.slane %v9547_v24, 3  ;;  %v5166_v18 = vshrl.u32 %v8478_v28, 16 }
 0x1ab   : > { %v1943_v1 = vpop.f32.mrf.mxu1  ;;  %v2463_v39 = vpop.f32.mrf.mxu0 }
 0x1ac   : > { %v2098_v25 = vadd.f32 %v1943_v1, %v9484_v4  ;;  %v9553_v52 = vadd.f32 %v2463_v39, %v2094_v37  ;;  %v5159_v4 = vrot.slane %v5157_v17, 2  ;;  %v5162_v37 = vrot.slane %v5160_v30, 3  ;;  %v8477_v1 = vld [vmem:[#allocation3 + $0x20] sm:$0xff]   ;;  %v9566_v17 = vld [vmem:[#allocation3 + $0x28] sm:$0xff]  }
 0x1ad   : > { %v7847_v63 = vpop.f32.mrf.mxu1  ;;  %v7895_v7 = vpop.f32.mrf.mxu0  ;;  %v5792_v28 = vsel %vm5789_vm5, %v5790_v57, %v5791_v13  ;;  %v5168_v39 = vrot.slane %v5166_v18, 2  ;;  %v5178_v18 = vshll.u32 %v8480_v29, 16 }
 0x1ae   : > { %v2101_v45 = vadd.f32 %v7847_v63, %v9492_v5  ;;  %v9557_v33 = vadd.f32 %v7895_v7, %v2097_v44  ;;  %v5155_v44 = vsel %vm5120_vm4, %v5145_v20, %v5154_v40  ;;  %v5163_v10 = vor.u32 %v5162_v37, %v5159_v4 }
 0x1af   : > { %v1946_v19 = vpop.f32.mrf.mxu1  ;;  %v2466_v42 = vpop.f32.mrf.mxu0  ;;  %v5793_v63 = vrot.slane %v8477_v1, 3  ;;  %v5172_v57 = vor.u32 %v5171_v22, %v5168_v39  ;;  %v8481_v39 = vld [vmem:[#allocation3 + $0x30] sm:$0xff]  }
 0x1b0   : > { %v2099_v27 = vadd.f32 %v1946_v19, %v9498_v9  ;;  %v9560_v0 = vadd.f32 %v2466_v42, %v2095_v2  ;;  %v8482_v9 = vld [vmem:[#allocation3 + $0x48] sm:$0xff]   ;;  %v5175_v19 = vshrl.u32 %v8480_v29, 16  ;;  %v5164_v37 = vsel %vm5120_vm4, %v5154_v40, %v5163_v10 }
 0x1b1   : > { %v7850_v24 = vpop.f32.mrf.mxu1  ;;  %v7898_v5 = vpop.f32.mrf.mxu0  ;;  %8129 = vmatmul.mubr.bf16.gmra.mxu0 %v4621_v60  ;;  %8149 = vmatmul.mubr.bf16.vlgmr.msra.gmra.mxu1 %v5146_v16  ;;  %v5795_v60 = vrot.slane %v9566_v17, 3 }
 0x1b2   : > { %v2104_v2 = vadd.f32 %v7850_v24, %v9504_v12  ;;  %v9569_v30 = vadd.f32 %v7898_v5, %v2100_v14  ;;  %8152 = vmatprep.mubr.bf16.mxu1 %v5155_v44  ;;  %8200 = vmatprep.mubr.bf16.mxu0 %v5792_v28  ;;  %v5184_v12 = vshrl.u32 %v8482_v9, 16  ;;  %v5187_v14 = vshll.u32 %v8482_v9, 16 }
 0x1b3   : > { %v1959_v53 = vpop.f32.mrf.mxu1  ;;  %v2479_v41 = vpop.f32.mrf.mxu0  ;;  %v5177_v44 = vrot.slane %v5175_v19, 2  ;;  %v5180_v28 = vrot.slane %v5178_v18, 3 }
 0x1b4   : > { %v2102_v7 = vadd.f32 %v1959_v53, %v9513_v56  ;;  %v9572_v20 = vadd.f32 %v2479_v41, %v2098_v25  ;;  %v5794_v56 = vsel %vm5789_vm5, %v5791_v13, %v5793_v63  ;;  %v8484_v25 = vld [vmem:[#allocation3 + $0x50] sm:$0xff]   ;;  %v5186_v9 = vrot.slane %v5184_v12, 2  ;;  %v9585_v53 = vld [vmem:[#allocation3 + $0x38] sm:$0xff]  }
 0x1b5   : > { %v7851_v32 = vpop.f32.mrf.mxu1  ;;  %v7899_v42 = vpop.f32.mrf.mxu0  ;;  %v5189_v40 = vrot.slane %v5187_v14, 3  ;;  %v8486_v13 = vld [vmem:[#allocation3 + $0x58] sm:$0xff]   ;;  %v5193_v19 = vshrl.u32 %v8484_v25, 16  ;;  %v5196_v18 = vshll.u32 %v8484_v25, 16  ;;  %v5799_v12 = vrot.slane %v9585_v53, 3 }
 0x1b6   : > { %v2105_v16 = vadd.f32 %v7851_v32, %v9516_v51  ;;  %v9576_v24 = vadd.f32 %v7899_v42, %v2101_v45  ;;  %v5173_v51 = vsel %vm5120_vm4, %v5163_v10, %v5172_v57  ;;  %v5796_v45 = vsel %vm5789_vm5, %v5793_v63, %v5795_v60 }
 0x1b7   : > { %v1962_v5 = vpop.f32.mrf.mxu1  ;;  %v2482_v4 = vpop.f32.mrf.mxu0  ;;  %v5181_v42 = vor.u32 %v5180_v28, %v5177_v44  ;;  %v5190_v63 = vor.u32 %v5189_v40, %v5186_v9  ;;  %v5202_v14 = vshrl.u32 %v8486_v13, 16 }
 0x1b8   : > { %v2103_v1 = vadd.f32 %v1962_v5, %v9521_v6  ;;  %v9581_v29 = vadd.f32 %v2482_v4, %v2099_v27  ;;  %v5797_v5 = vrot.slane %v8481_v39, 3  ;;  %v8488_v39 = vld [vmem:[#allocation3 + $0x60] sm:$0xff]  }
 0x1b9   : > { %v7854_v22 = vpop.f32.mrf.mxu1  ;;  %v7902_v17 = vpop.f32.mrf.mxu0  ;;  %8153 = vmatmul.mubr.bf16.gmra.mxu1 %v5164_v37  ;;  %8201 = vmatmul.mubr.bf16.vlgmr.msra.gmra.mxu0 %v5794_v56  ;;  %v5205_v37 = vshll.u32 %v8486_v13, 16  ;;  %v5182_v44 = vsel %vm5120_vm4, %v5172_v57, %v5181_v42  ;;  %v5204_v13 = vrot.slane %v5202_v14, 2  ;;  %v5214_v14 = vshll.u32 %v8488_v39, 16 }
 0x1ba   : > { %v9587_v41 = vadd.f32 %v7902_v17, %v2104_v2  ;;  %8156 = vmatprep.mubr.bf16.mxu1 %v5173_v51  ;;  %8204 = vmatprep.mubr.bf16.mxu0 %v5796_v45  ;;  %v5195_v51 = vrot.slane %v5193_v19, 2  ;;  %v5198_v45 = vrot.slane %v5196_v18, 3  ;;  %v2108_v25 = vadd.f32 %v7854_v22, %v9366_v47  ;;  %v9601_v19 = vld [vmem:[#allocation3 + $0x48] sm:$0xff]  }
 0x1bb   : > { %v1975_v6 = vpop.f32.mrf.mxu1  ;;  %v2495_v27 = vpop.f32.mrf.mxu0  ;;  %v5798_v28 = vsel %vm5789_vm5, %v5795_v60, %v5797_v5  ;;  %v5800_v53 = vsel %vm5789_vm5, %v5797_v5, %v5799_v12  ;;  %v8490_v47 = vld [vmem:[#allocation3 + $0x68] sm:$0xff]   ;;  %v5211_v5 = vshrl.u32 %v8488_v39, 16 }
 0x1bc   : > { %10448 = vst [vmem:[#allocation41_spill] sm:$0xff] %v9587_v41  ;;  %v9589_v32 = vadd.f32 %v2495_v27, %v2102_v7  ;;  %v8485_v41 = vld [vmem:[#allocation3 + $0x40] sm:$0xff]   ;;  %v5207_v27 = vrot.slane %v5205_v37, 3  ;;  %v5199_v18 = vor.u32 %v5198_v45, %v5195_v51 }
 0x1bd   : > { %v7855_v10 = vpop.f32.mrf.mxu1  ;;  %v7903_v4 = vpop.f32.mrf.mxu0 }
 0x1be   : > { %v9592_v56 = vadd.f32 %v7903_v4, %v2105_v16  ;;  %v5191_v16 = vsel %vm5120_vm4, %v5181_v42, %v5190_v63  ;;  %v5801_v4 = vrot.slane %v8485_v41, 3  ;;  %v5200_v41 = vsel %vm5120_vm4, %v5190_v63, %v5199_v18 }
 0x1bf   : > { %v1978_v2 = vpop.f32.mrf.mxu1  ;;  %v2498_v17 = vpop.f32.mrf.mxu0 }
 0x1c0   : > { %v9595_v7 = vadd.f32 %v2498_v17, %v2103_v1  ;;  %v2106_v1 = vadd.f32 %v1975_v6, %v9368_v62  ;;  %v2109_v17 = vadd.f32 %v7855_v10, %v9370_v26  ;;  %v5220_v62 = vshrl.u32 %v8490_v47, 16  ;;  %v8492_v10 = vld [vmem:[#allocation3 + $0x70] sm:$0xff]  }
 0x1c1   : > { %v7858_v9 = vpop.f32.mrf.mxu1  ;;  %v7906_v40 = vpop.f32.mrf.mxu0  ;;  %8157 = vmatmul.mubr.bf16.gmra.mxu1 %v5182_v44  ;;  %8205 = vmatmul.mubr.bf16.gmra.mxu0 %v5798_v28  ;;  %v5208_v28 = vor.u32 %v5207_v27, %v5204_v13  ;;  %v5223_v6 = vshll.u32 %v8490_v47, 16  ;;  %v5802_v26 = vsel %vm5789_vm5, %v5799_v12, %v5801_v4  ;;  %v5216_v13 = vrot.slane %v5214_v14, 3  ;;  %v8489_v27 = vld [vmem:[#allocation3 + $0x50] sm:$0xff]   ;;  %v8494_v12 = vld [vmem:[#allocation3 + $0x78] sm:$0xff]  }
 0x1c2   : > { %10449 = vst [vmem:[#allocation42_spill] sm:$0xff] %v9595_v7  ;;  %v9604_v22 = vadd.f32 %v7906_v40, %v2108_v25  ;;  %8160 = vmatprep.mubr.bf16.mxu1 %v5191_v16  ;;  %8208 = vmatprep.mubr.bf16.mxu0 %v5800_v53  ;;  %v5803_v7 = vrot.slane %v9601_v19, 3  ;;  %v2107_v25 = vadd.f32 %v1978_v2, %v9376_v46  ;;  %v5213_v53 = vrot.slane %v5211_v5, 2 }
 0x1c3   : > { %v1991_v57 = vpop.f32.mrf.mxu1  ;;  %v2511_v60 = vpop.f32.mrf.mxu0  ;;  %v2112_v45 = vadd.f32 %v7858_v9, %v9378_v35  ;;  %v5209_v46 = vsel %vm5120_vm4, %v5199_v18, %v5208_v28  ;;  %v5225_v63 = vrot.slane %v5223_v6, 3  ;;  %v5229_v14 = vshrl.u32 %v8492_v10, 16 }
 0x1c4   : > { %v9607_v42 = vadd.f32 %v2511_v60, %v2106_v1  ;;  %v5804_v2 = vsel %vm5789_vm5, %v5801_v4, %v5803_v7  ;;  %v5222_v1 = vrot.slane %v5220_v62, 2  ;;  %v9620_v60 = vld [vmem:[#allocation3 + $0x58] sm:$0xff]   ;;  %v2110_v35 = vadd.f32 %v1991_v57, %v9387_v59 }
 0x1c5   : > { %v7859_v37 = vpop.f32.mrf.mxu1  ;;  %v7907_v44 = vpop.f32.mrf.mxu0  ;;  %v5217_v4 = vor.u32 %v5216_v13, %v5213_v53  ;;  %v5805_v62 = vrot.slane %v8489_v27, 3  ;;  %v5238_v59 = vshrl.u32 %v8494_v12, 16  ;;  %v5241_v57 = vshll.u32 %v8494_v12, 16 }
 0x1c6   : > { %v9611_v40 = vadd.f32 %v7907_v44, %v2109_v17  ;;  %v5232_v44 = vshll.u32 %v8492_v10, 16  ;;  %v5231_v10 = vrot.slane %v5229_v14, 2 }
 0x1c7   : > { %v1994_v16 = vpop.f32.mrf.mxu1  ;;  %v2514_v51 = vpop.f32.mrf.mxu0  ;;  %v5218_v13 = vsel %vm5120_vm4, %v5208_v28, %v5217_v4  ;;  %v5806_v27 = vsel %vm5789_vm5, %v5803_v7, %v5805_v62  ;;  %v5240_v12 = vrot.slane %v5238_v59, 2 }
 0x1c8   : > { %v9616_v39 = vadd.f32 %v2514_v51, %v2107_v25  ;;  %v2113_v25 = vadd.f32 %v7859_v37, %v9393_v50  ;;  %v8493_v50 = vld [vmem:[#allocation3 + $0x60] sm:$0xff]  }
 0x1c9   : > { %v7862_v19 = vpop.f32.mrf.mxu1  ;;  %v7910_v47 = vpop.f32.mrf.mxu0  ;;  %8161 = vmatmul.mubr.bf16.gmra.mxu1 %v5200_v41  ;;  %8209 = vmatmul.mubr.bf16.gmra.mxu0 %v5802_v26  ;;  %v5226_v41 = vor.u32 %v5225_v63, %v5222_v1  ;;  %v5807_v26 = vrot.slane %v9620_v60, 3  ;;  %v8496_v1 = vld [vmem:[#allocation3 + $0x80] sm:$0xff]  }
 0x1ca   : > { %v9623_v9 = vadd.f32 %v7910_v47, %v2112_v45  ;;  %8164 = vmatprep.mubr.bf16.mxu1 %v5209_v46  ;;  %8212 = vmatprep.mubr.bf16.mxu0 %v5804_v2  ;;  %v2111_v45 = vadd.f32 %v1994_v16, %v9408_v55  ;;  %v2116_v37 = vadd.f32 %v7862_v19, %v9415_v21  ;;  %v8498_v21 = vld [vmem:[#allocation3 + $0x88] sm:$0xff]   ;;  %v5250_v59 = vshll.u32 %v8496_v1, 16 }
 0x1cb   : > { %v2007_v17 = vpop.f32.mrf.mxu1  ;;  %v2527_v5 = vpop.f32.mrf.mxu0  ;;  %v5227_v55 = vsel %vm5120_vm4, %v5217_v4, %v5226_v41  ;;  %v5808_v16 = vsel %vm5789_vm5, %v5805_v62, %v5807_v26  ;;  %v5247_v62 = vshrl.u32 %v8496_v1, 16 }
 0x1cc   : > { %10450 = vst [vmem:[#allocation43_spill] sm:$0xff] %v9623_v9  ;;  %v9626_v18 = vadd.f32 %v2527_v5, %v2110_v35  ;;  %v5234_v9 = vrot.slane %v5232_v44, 3  ;;  %v5243_v35 = vrot.slane %v5241_v57, 3  ;;  %v9639_v5 = vld [vmem:[#allocation3 + $0x68] sm:$0xff]   ;;  %v2114_v19 = vadd.f32 %v2007_v17, %v9427_v38 }
 0x1cd   : > { %v7863_v6 = vpop.f32.mrf.mxu1  ;;  %v7911_v51 = vpop.f32.mrf.mxu0  ;;  %v5256_v38 = vshrl.u32 %v8498_v21, 16  ;;  %v5259_v17 = vshll.u32 %v8498_v21, 16 }
 0x1ce   : > { %v9630_v47 = vadd.f32 %v7911_v51, %v2113_v25  ;;  %v5235_v44 = vor.u32 %v5234_v9, %v5231_v10  ;;  %v5809_v25 = vrot.slane %v8493_v50, 3  ;;  %v2117_v51 = vadd.f32 %v7863_v6, %v9439_v36  ;;  %v8500_v6 = vld [vmem:[#allocation3 + $0x90] sm:$0xff]  }
 0x1cf   : > { %v2010_v46 = vpop.f32.mrf.mxu1  ;;  %v2530_v2 = vpop.f32.mrf.mxu0  ;;  %v5258_v21 = vrot.slane %v5256_v38, 2 }
 0x1d0   : > { %v9633_v53 = vadd.f32 %v2530_v2, %v2111_v45  ;;  %v5244_v2 = vor.u32 %v5243_v35, %v5240_v12  ;;  %v5236_v10 = vsel %vm5120_vm4, %v5226_v41, %v5235_v44  ;;  %v5810_v36 = vsel %vm5789_vm5, %v5807_v26, %v5809_v25  ;;  %v8497_v12 = vld [vmem:[#allocation3 + $0x70] sm:$0xff]   ;;  %v8502_v26 = vld [vmem:[#allocation3 + $0x98] sm:$0xff]  }
 0x1d1   : > { %v7866_v63 = vpop.f32.mrf.mxu1  ;;  %v7914_v60 = vpop.f32.mrf.mxu0  ;;  %8165 = vmatmul.mubr.bf16.gmra.mxu1 %v5218_v13  ;;  %8213 = vmatmul.mubr.bf16.gmra.mxu0 %v5806_v27  ;;  %v5811_v13 = vrot.slane %v9639_v5, 3  ;;  %v5261_v41 = vrot.slane %v5259_v17, 3  ;;  %v5813_v38 = vrot.slane %v8497_v12, 3 }
 0x1d2   : > { %v9642_v14 = vadd.f32 %v7914_v60, %v2116_v37  ;;  %8168 = vmatprep.mubr.bf16.mxu1 %v5227_v55  ;;  %8216 = vmatprep.mubr.bf16.mxu0 %v5808_v16  ;;  %v2115_v37 = vadd.f32 %v2010_v46, %v9451_v23  ;;  %v2120_v50 = vadd.f32 %v7866_v63, %v9460_v49  ;;  %v5249_v55 = vrot.slane %v5247_v62, 2 }
 0x1d3   : > { %v2023_v7 = vpop.f32.mrf.mxu1  ;;  %v2543_v28 = vpop.f32.mrf.mxu0  ;;  %v5252_v16 = vrot.slane %v5250_v59, 3  ;;  %v5245_v23 = vsel %vm5120_vm4, %v5235_v44, %v5244_v2  ;;  %v5812_v46 = vsel %vm5789_vm5, %v5809_v25, %v5811_v13  ;;  %v5265_v62 = vshrl.u32 %v8500_v6, 16 }
 0x1d4   : > { %v9645_v4 = vadd.f32 %v2543_v28, %v2114_v19  ;;  %v9658_v19 = vld [vmem:[#allocation3 + $0x78] sm:$0xff]   ;;  %v2118_v49 = vadd.f32 %v2023_v7, %v9467_v31  ;;  %v5268_v59 = vshll.u32 %v8500_v6, 16  ;;  %v5274_v31 = vshrl.u32 %v8502_v26, 16 }
 0x1d5   : > { %v7867_v57 = vpop.f32.mrf.mxu1  ;;  %v7915_v45 = vpop.f32.mrf.mxu0  ;;  %v5253_v25 = vor.u32 %v5252_v16, %v5249_v55  ;;  %v5277_v7 = vshll.u32 %v8502_v26, 16  ;;  %v5267_v6 = vrot.slane %v5265_v62, 2 }
 0x1d6   : > { %v9649_v27 = vadd.f32 %v7915_v45, %v2117_v51  ;;  %v2121_v45 = vadd.f32 %v7867_v57, %v9478_v48  ;;  %v8501_v48 = vld [vmem:[#allocation3 + $0x80] sm:$0xff]   ;;  %v5276_v26 = vrot.slane %v5274_v31, 2 }
 0x1d7   : > { %v2026_v60 = vpop.f32.mrf.mxu1  ;;  %v2546_v9 = vpop.f32.mrf.mxu0  ;;  %v8504_v57 = vld [vmem:[#allocation3 + $0xa0] ss:$0 sps:$4 sm:$0x77]   ;;  %v5254_v12 = vsel %vm5120_vm4, %v5244_v2, %v5253_v25 }
 0x1d8   : > { %v9654_v1 = vadd.f32 %v2546_v9, %v2115_v37  ;;  %v5262_v9 = vor.u32 %v5261_v41, %v5258_v21  ;;  %v5814_v21 = vsel %vm5789_vm5, %v5811_v13, %v5813_v38  ;;  %v5286_v31 = vshll.u32 %v8504_v57, 16 }
 0x1d9   : > { %v7870_v35 = vpop.f32.mrf.mxu1  ;;  %v7918_v5 = vpop.f32.mrf.mxu0  ;;  %8169 = vmatmul.mubr.bf16.gmra.mxu1 %v5236_v10  ;;  %8217 = vmatmul.mubr.bf16.gmra.mxu0 %v5810_v36  ;;  %v5815_v10 = vrot.slane %v9658_v19, 3  ;;  %v2119_v36 = vadd.f32 %v2026_v60, %v9482_v54 }
 0x1da   : > { %v9661_v63 = vadd.f32 %v7918_v5, %v2120_v50  ;;  %8172 = vmatprep.mubr.bf16.mxu1 %v5245_v23  ;;  %8220 = vmatprep.mubr.bf16.mxu0 %v5812_v46  ;;  %v5270_v46 = vrot.slane %v5268_v59, 3  ;;  %v2124_v55 = vadd.f32 %v7870_v35, %v9488_v43  ;;  %v5263_v54 = vsel %vm5120_vm4, %v5253_v25, %v5262_v9 }
 0x1db   : > { %v2039_v28 = vpop.f32.mrf.mxu1  ;;  %v2559_v51 = vpop.f32.mrf.mxu0  ;;  %v5816_v60 = vsel %vm5789_vm5, %v5813_v38, %v5815_v10 }
 0x1dc   : > { %v9664_v44 = vadd.f32 %v2559_v51, %v2118_v49  ;;  %v5279_v49 = vrot.slane %v5277_v7, 3  ;;  %v8503_v51 = vld [vmem:[#allocation3 + $0x88] sm:$0xff]   ;;  %v2122_v62 = vadd.f32 %v2039_v28, %v9494_v3  ;;  %v5271_v59 = vor.u32 %v5270_v46, %v5267_v6 }
 0x1dd   : > { %v7871_v17 = vpop.f32.mrf.mxu1  ;;  %v7919_v37 = vpop.f32.mrf.mxu0 }
 0x1de   : > { %v9668_v50 = vadd.f32 %v7919_v37, %v2121_v45  ;;  %v5817_v45 = vrot.slane %v8501_v48, 3  ;;  %v5283_v37 = vshrl.u32 %v8504_v57, 16  ;;  %v2125_v25 = vadd.f32 %v7871_v17, %v9496_v61 }
 0x1df   : > { %v2042_v5 = vpop.f32.mrf.mxu1  ;;  %v2562_v23 = vpop.f32.mrf.mxu0  ;;  %v5280_v28 = vor.u32 %v5279_v49, %v5276_v26  ;;  %v5272_v48 = vsel %vm5120_vm4, %v5262_v9, %v5271_v59  ;;  %v8506_v26 = vld [vmem:[#allocation3 + $0x98] sm:$0xff]  }
 0x1e0   : > { %v9671_v16 = vadd.f32 %v2562_v23, %v2119_v36  ;;  %v5819_v23 = vrot.slane %v8503_v51, 3  ;;  %v5818_v61 = vsel %vm5789_vm5, %v5815_v10, %v5817_v45  ;;  %v5285_v57 = vrot.slane %v5283_v37, 2 }
 0x1e1   : > { %v7922_v41 = vpop.f32.mrf.mxu0  ;;  %v7942_v19 = vpop.f32.mrf.mxu1  ;;  %8173 = vmatmul.mubr.bf16.gmra.mxu1 %v5254_v12  ;;  %8221 = vmatmul.mubr.bf16.gmra.mxu0 %v5814_v21 }
 0x1e2   : > { %v9678_v43 = vadd.f32 %v7922_v41, %v2124_v55  ;;  %v3163_v35 = vadd.f32 %v7942_v19, %v9531_v15  ;;  %8176 = vmatprep.mubr.bf16.mxu1 %v5263_v54  ;;  %8224 = vmatprep.mubr.bf16.mxu0 %v5816_v60  ;;  %v10451_v55 = vld [vmem:[#allocation40_spill] sm:$0xff]  ;;  %v5288_v41 = vrot.slane %v5286_v31, 3  ;;  %v8505_v19 = vld [vmem:[#allocation3 + $0x90] sm:$0xff]  }
 0x1e3   : > { %v2575_v2 = vpop.f32.mrf.mxu0  ;;  %v2982_v13 = vpop.f32.mrf.mxu1  ;;  %v2123_v15 = vadd.f32 %v2042_v5, %v10451_v55  ;;  %v5281_v5 = vsel %vm5120_vm4, %v5271_v59, %v5280_v28  ;;  %v5823_v59 = vrot.slane %v8506_v26, 3 }
 0x1e4   : > { %v9682_v36 = vadd.f32 %v2575_v2, %v2122_v62  ;;  %v3161_v38 = vadd.f32 %v2982_v13, %v9534_v58  ;;  %v5289_v2 = vor.u32 %v5288_v41, %v5285_v57  ;;  %v5821_v13 = vrot.slane %v8505_v19, 3 }
 0x1e5   : > { %v7923_v7 = vpop.f32.mrf.mxu0  ;;  %v7943_v3 = vpop.f32.mrf.mxu1 }
 0x1e6   : > { %v9686_v12 = vadd.f32 %v7923_v7, %v2125_v25  ;;  %v3164_v21 = vadd.f32 %v7943_v3, %v9538_v34  ;;  %v5820_v34 = vsel %vm5789_vm5, %v5817_v45, %v5819_v23  ;;  %v5290_v55 = vsel %vm5120_vm4, %v5280_v28, %v5289_v2 }
 0x1e7   : > { %v2578_v6 = vpop.f32.mrf.mxu0  ;;  %v2985_v46 = vpop.f32.mrf.mxu1 }
 0x1e8   : > { %v9691_v17 = vadd.f32 %v2578_v6, %v2123_v15  ;;  %v3162_v58 = vadd.f32 %v2985_v46, %v9543_v11  ;;  %v5824_v46 = vsel %vm5789_vm5, %v5821_v13, %v5823_v59 }
 0x1e9   : > { %v7946_v54 = vpop.f32.mrf.mxu1  ;;  %v7994_v60 = vpop.f32.mrf.mxu0  ;;  %8177 = vmatmul.mubr.bf16.gmra.mxu1 %v5272_v48  ;;  %8225 = vmatmul.mubr.bf16.gmra.mxu0 %v5818_v61 }
 0x1ea   : > { %v3167_v9 = vadd.f32 %v7946_v54, %v9550_v8  ;;  %v9697_v49 = vadd.f32 %v7994_v60, %v3163_v35  ;;  %8180 = vmatprep.mubr.bf16.mxu1 %v5281_v5  ;;  %8228 = vmatprep.mubr.bf16.mxu0 %v5820_v34 }
 0x1eb   : > { %v2998_v10 = vpop.f32.mrf.mxu1  ;;  %v3651_v11 = vpop.f32.mrf.mxu0 }
 0x1ec   : > { %v3165_v51 = vadd.f32 %v2998_v10, %v9553_v52  ;;  %v9700_v62 = vadd.f32 %v3651_v11, %v3161_v38  ;;  %v5822_v52 = vsel %vm5789_vm5, %v5819_v23, %v5821_v13  ;;  %v8507_v38 = vld [vmem:[#allocation3 + $0xa0] ss:$0 sps:$4 sm:$0x77]  }
 0x1ed   : > { %v7947_v37 = vpop.f32.mrf.mxu1  ;;  %v7995_v25 = vpop.f32.mrf.mxu0  ;;  %v5825_v28 = vrot.slane %v8507_v38, 3 }
 0x1ee   : > { %v3168_v45 = vadd.f32 %v7947_v37, %v9557_v33  ;;  %v9703_v31 = vadd.f32 %v7995_v25, %v3164_v21 }
 0x1ef   : > { %v3001_v8 = vpop.f32.mrf.mxu1  ;;  %v3654_v35 = vpop.f32.mrf.mxu0  ;;  %v5826_v34 = vsel %vm5789_vm5, %v5823_v59, %v5825_v28 }
 0x1f0   : > { %v3166_v7 = vadd.f32 %v3001_v8, %v9560_v0  ;;  %v9706_v3 = vadd.f32 %v3654_v35, %v3162_v58  ;;  %v10453_v35 = vld [vmem:[#allocation42_spill] sm:$0xff] }
 0x1f1   : > { %v7950_v15 = vpop.f32.mrf.mxu1  ;;  %v7998_v6 = vpop.f32.mrf.mxu0  ;;  %8181 = vmatmul.mubr.bf16.gmra.mxu1 %v5290_v55  ;;  %8229 = vmatmul.mubr.bf16.gmra.mxu0 %v5822_v52 }
 0x1f2   : > { %v3171_v33 = vadd.f32 %v7950_v15, %v9569_v30  ;;  %v9712_v21 = vadd.f32 %v7998_v6, %v3167_v9  ;;  %8232 = vmatprep.mubr.bf16.mxu0 %v5824_v46 }
 0x1f3   : > { %v3014_v48 = vpop.f32.mrf.mxu1  ;;  %v3667_v0 = vpop.f32.mrf.mxu0 }
 0x1f4   : > { %v3169_v61 = vadd.f32 %v3014_v48, %v9572_v20  ;;  %v9715_v58 = vadd.f32 %v3667_v0, %v3165_v51  ;;  %v10452_v20 = vld [vmem:[#allocation41_spill] sm:$0xff] }
 0x1f5   : > { %v7951_v23 = vpop.f32.mrf.mxu1  ;;  %v7999_v57 = vpop.f32.mrf.mxu0 }
 0x1f6   : > { %v3172_v41 = vadd.f32 %v7951_v23, %v9576_v24  ;;  %v9718_v19 = vadd.f32 %v7999_v57, %v3168_v45 }
 0x1f7   : > { %v3017_v54 = vpop.f32.mrf.mxu1  ;;  %v3670_v60 = vpop.f32.mrf.mxu0 }
 0x1f8   : > { %v3170_v30 = vadd.f32 %v3017_v54, %v9581_v29  ;;  %v9721_v5 = vadd.f32 %v3670_v60, %v3166_v7 }
 0x1f9   : > { %v7954_v26 = vpop.f32.mrf.mxu1  ;;  %v8002_v9 = vpop.f32.mrf.mxu0  ;;  %8233 = vmatmul.mubr.bf16.gmra.mxu0 %v5826_v34 }
 0x1fa   : > { %v3175_v10 = vadd.f32 %v7954_v26, %v10452_v20  ;;  %v9725_v11 = vadd.f32 %v8002_v9, %v3171_v33 }
 0x1fb   : > { %v3030_v51 = vpop.f32.mrf.mxu1  ;;  %v3683_v2 = vpop.f32.mrf.mxu0 }
 0x1fc   : > { %v3173_v24 = vadd.f32 %v3030_v51, %v9589_v32  ;;  %v9728_v13 = vadd.f32 %v3683_v2, %v3169_v61 }
 0x1fd   : > { %v7955_v37 = vpop.f32.mrf.mxu1  ;;  %v8003_v25 = vpop.f32.mrf.mxu0 }
 0x1fe   : > { %v3176_v29 = vadd.f32 %v7955_v37, %v9592_v56  ;;  %v9731_v45 = vadd.f32 %v8003_v25, %v3172_v41 }
 0x1ff   : > { %v3033_v59 = vpop.f32.mrf.mxu1  ;;  %v3686_v8 = vpop.f32.mrf.mxu0 }
 0x200   : > { %v3174_v7 = vadd.f32 %v3033_v59, %v10453_v35  ;;  %v9734_v55 = vadd.f32 %v3686_v8, %v3170_v30  ;;  %v10454_v30 = vld [vmem:[#allocation43_spill] sm:$0xff] }
 0x201   : > { %v7958_v52 = vpop.f32.mrf.mxu1  ;;  %v8006_v38 = vpop.f32.mrf.mxu0 }
 0x202   : > { %v3179_v15 = vadd.f32 %v7958_v52, %v9604_v22  ;;  %v9737_v6 = vadd.f32 %v8006_v38, %v3175_v10 }
 0x203   : > { %v3046_v32 = vpop.f32.mrf.mxu1  ;;  %v3699_v46 = vpop.f32.mrf.mxu0 }
 0x204   : > { %v3177_v33 = vadd.f32 %v3046_v32, %v9607_v42  ;;  %v9740_v48 = vadd.f32 %v3699_v46, %v3173_v24 }
 0x205   : > { %v7959_v56 = vpop.f32.mrf.mxu1  ;;  %v8007_v0 = vpop.f32.mrf.mxu0 }
 0x206   : > { %v3180_v61 = vadd.f32 %v7959_v56, %v9611_v40  ;;  %v9743_v28 = vadd.f32 %v8007_v0, %v3176_v29 }
 0x207   : > { %v3049_v23 = vpop.f32.mrf.mxu1  ;;  %v3702_v57 = vpop.f32.mrf.mxu0 }
 0x208   : > { %v3178_v41 = vadd.f32 %v3049_v23, %v9616_v39  ;;  %v9746_v54 = vadd.f32 %v3702_v57, %v3174_v7 }
 0x209   : > { %v7962_v22 = vpop.f32.mrf.mxu1  ;;  %v8010_v60 = vpop.f32.mrf.mxu0 }
 0x20a   : > { %v3183_v34 = vadd.f32 %v7962_v22, %v10454_v30  ;;  %v9749_v26 = vadd.f32 %v8010_v60, %v3179_v15 }
 0x20b   : > { %v3062_v42 = vpop.f32.mrf.mxu1  ;;  %v3715_v9 = vpop.f32.mrf.mxu0 }
 0x20c   : > { %v3181_v20 = vadd.f32 %v3062_v42, %v9626_v18  ;;  %v9752_v10 = vadd.f32 %v3715_v9, %v3177_v33 }
 0x20d   : > { %v7963_v40 = vpop.f32.mrf.mxu1  ;;  %v8011_v51 = vpop.f32.mrf.mxu0 }
 0x20e   : > { %v3184_v2 = vadd.f32 %v7963_v40, %v9630_v47  ;;  %v9755_v24 = vadd.f32 %v8011_v51, %v3180_v61 }
 0x20f   : > { %v3065_v39 = vpop.f32.mrf.mxu1  ;;  %v3718_v37 = vpop.f32.mrf.mxu0 }
 0x210   : > { %v3182_v25 = vadd.f32 %v3065_v39, %v9633_v53  ;;  %v9758_v29 = vadd.f32 %v3718_v37, %v3178_v41 }
 0x211   : > { %v7966_v59 = vpop.f32.mrf.mxu1  ;;  %v8014_v8 = vpop.f32.mrf.mxu0 }
 0x212   : > { %v3187_v35 = vadd.f32 %v7966_v59, %v9642_v14  ;;  %v9761_v7 = vadd.f32 %v8014_v8, %v3183_v34 }
 0x213   : > { %v3078_v18 = vpop.f32.mrf.mxu1  ;;  %v3731_v52 = vpop.f32.mrf.mxu0 }
 0x214   : > { %v3185_v38 = vadd.f32 %v3078_v18, %v9645_v4  ;;  %v9764_v15 = vadd.f32 %v3731_v52, %v3181_v20 }
 0x215   : > { %v7967_v47 = vpop.f32.mrf.mxu1  ;;  %v8015_v32 = vpop.f32.mrf.mxu0 }
 0x216   : > { %v3188_v46 = vadd.f32 %v7967_v47, %v9649_v27  ;;  %v9767_v33 = vadd.f32 %v8015_v32, %v3184_v2 }
 0x217   : > { %v3081_v53 = vpop.f32.mrf.mxu1  ;;  %v3734_v56 = vpop.f32.mrf.mxu0 }
 0x218   : > { %v3186_v0 = vadd.f32 %v3081_v53, %v9654_v1  ;;  %v9770_v61 = vadd.f32 %v3734_v56, %v3182_v25 }
 0x219   : > { %v7970_v14 = vpop.f32.mrf.mxu1  ;;  %v8018_v23 = vpop.f32.mrf.mxu0 }
 0x21a   : > { %v3191_v57 = vadd.f32 %v7970_v14, %v9661_v63  ;;  %v9773_v41 = vadd.f32 %v8018_v23, %v3187_v35 }
 0x21b   : > { %v3094_v4 = vpop.f32.mrf.mxu1  ;;  %v3747_v22 = vpop.f32.mrf.mxu0 }
 0x21c   : > { %v3189_v60 = vadd.f32 %v3094_v4, %v9664_v44  ;;  %v9776_v30 = vadd.f32 %v3747_v22, %v3185_v38 }
 0x21d   : > { %v7971_v27 = vpop.f32.mrf.mxu1  ;;  %v8019_v34 = vpop.f32.mrf.mxu0 }
 0x21e   : > { %v3192_v42 = vadd.f32 %v7971_v27, %v9668_v50  ;;  %v9779_v9 = vadd.f32 %v8019_v34, %v3188_v46 }
 0x21f   : > { %v3097_v1 = vpop.f32.mrf.mxu1  ;;  %v3750_v20 = vpop.f32.mrf.mxu0 }
 0x220   : > { %v3190_v40 = vadd.f32 %v3097_v1, %v9671_v16  ;;  %v9782_v51 = vadd.f32 %v3750_v20, %v3186_v0 }
 0x221   : > { %v7974_v63 = vpop.f32.mrf.mxu1  ;;  %v8022_v2 = vpop.f32.mrf.mxu0 }
 0x222   : > { %v3195_v39 = vadd.f32 %v7974_v63, %v9678_v43  ;;  %v9785_v37 = vadd.f32 %v8022_v2, %v3191_v57 }
 0x223   : > { %v3110_v44 = vpop.f32.mrf.mxu1  ;;  %v3763_v25 = vpop.f32.mrf.mxu0 }
 0x224   : > { %v3193_v59 = vadd.f32 %v3110_v44, %v9682_v36  ;;  %v9788_v8 = vadd.f32 %v3763_v25, %v3189_v60 }
 0x225   : > { %v7975_v50 = vpop.f32.mrf.mxu1  ;;  %v8023_v35 = vpop.f32.mrf.mxu0 }
 0x226   : > { %v3196_v18 = vadd.f32 %v7975_v50, %v9686_v12  ;;  %v9791_v52 = vadd.f32 %v8023_v35, %v3192_v42 }
 0x227   : > { %v3113_v16 = vpop.f32.mrf.mxu1  ;;  %v3766_v38 = vpop.f32.mrf.mxu0 }
 0x228   : > { %v3194_v47 = vadd.f32 %v3113_v16, %v9691_v17  ;;  %v9794_v32 = vadd.f32 %v3766_v38, %v3190_v40 }
 0x229   : > { %v8026_v43 = vpop.f32.mrf.mxu0  ;;  %v8046_v46 = vpop.f32.mrf.mxu1 }
 0x22a   : > { %v9796_v53 = vadd.f32 %v8026_v43, %v3195_v39  ;;  %v4368_v36 = vadd.f32 %v8046_v46, %v9697_v49 }
 0x22b   : > { %v3779_v56 = vpop.f32.mrf.mxu0  ;;  %v4187_v0 = vpop.f32.mrf.mxu1 }
 0x22c   : > { %v9799_v14 = vadd.f32 %v3779_v56, %v3193_v59  ;;  %v4366_v12 = vadd.f32 %v4187_v0, %v9700_v62 }
 0x22d   : > { %v8027_v23 = vpop.f32.mrf.mxu0  ;;  %v8047_v57 = vpop.f32.mrf.mxu1 }
 0x22e   : > { %v9802_v4 = vadd.f32 %v8027_v23, %v3196_v18  ;;  %v4369_v17 = vadd.f32 %v8047_v57, %v9703_v31 }
 0x22f   : > { %v3782_v22 = vpop.f32.mrf.mxu0  ;;  %v4190_v60 = vpop.f32.mrf.mxu1 }
 0x230   : > { %v9805_v27 = vadd.f32 %v3782_v22, %v3194_v47  ;;  %v4367_v34 = vadd.f32 %v4190_v60, %v9706_v3 }
 0x231   : > { %v8050_v42 = vpop.f32.mrf.mxu1  ;;  %v8098_v49 = vpop.f32.mrf.mxu0 }
 0x232   : > { %v4372_v1 = vadd.f32 %v8050_v42, %v9712_v21  ;;  %v9809_v20 = vadd.f32 %v8098_v49, %v4368_v36 }
 0x233   : > { %v4203_v40 = vpop.f32.mrf.mxu1  ;;  %v4722_v62 = vpop.f32.mrf.mxu0 }
 0x234   : > { %v4370_v63 = vadd.f32 %v4203_v40, %v9715_v58  ;;  %v9812_v2 = vadd.f32 %v4722_v62, %v4366_v12 }
 0x235   : > { %v8051_v39 = vpop.f32.mrf.mxu1  ;;  %v8099_v31 = vpop.f32.mrf.mxu0 }
 0x236   : > { %v4373_v44 = vadd.f32 %v8051_v39, %v9718_v19  ;;  %v9815_v25 = vadd.f32 %v8099_v31, %v4369_v17 }
 0x237   : > { %v4206_v59 = vpop.f32.mrf.mxu1  ;;  %v4725_v3 = vpop.f32.mrf.mxu0 }
 0x238   : > { %v4371_v50 = vadd.f32 %v4206_v59, %v9721_v5  ;;  %v9818_v35 = vadd.f32 %v4725_v3, %v4367_v34 }
 0x239   : > { %v8054_v21 = vpop.f32.mrf.mxu1  ;;  %v8102_v18 = vpop.f32.mrf.mxu0 }
 0x23a   : > { %v4376_v16 = vadd.f32 %v8054_v21, %v9725_v11  ;;  %v9821_v38 = vadd.f32 %v8102_v18, %v4372_v1 }
 0x23b   : > { %v4219_v58 = vpop.f32.mrf.mxu1  ;;  %v4738_v47 = vpop.f32.mrf.mxu0 }
 0x23c   : > { %v4374_v43 = vadd.f32 %v4219_v58, %v9728_v13  ;;  %v9824_v46 = vadd.f32 %v4738_v47, %v4370_v63 }
 0x23d   : > { %v8055_v19 = vpop.f32.mrf.mxu1  ;;  %v8103_v36 = vpop.f32.mrf.mxu0 }
 0x23e   : > { %v4377_v56 = vadd.f32 %v8055_v19, %v9731_v45  ;;  %v9827_v0 = vadd.f32 %v8103_v36, %v4373_v44 }
 0x23f   : > { %v4222_v5 = vpop.f32.mrf.mxu1  ;;  %v4741_v12 = vpop.f32.mrf.mxu0 }
 0x240   : > { %v4375_v23 = vadd.f32 %v4222_v5, %v9734_v55  ;;  %v9830_v57 = vadd.f32 %v4741_v12, %v4371_v50 }
 0x241   : > { %v8058_v11 = vpop.f32.mrf.mxu1  ;;  %v8106_v17 = vpop.f32.mrf.mxu0 }
 0x242   : > { %v4380_v22 = vadd.f32 %v8058_v11, %v9737_v6  ;;  %v9833_v60 = vadd.f32 %v8106_v17, %v4376_v16 }
 0x243   : > { %v4235_v13 = vpop.f32.mrf.mxu1  ;;  %v4754_v34 = vpop.f32.mrf.mxu0 }
 0x244   : > { %v4378_v42 = vadd.f32 %v4235_v13, %v9740_v48  ;;  %v9836_v49 = vadd.f32 %v4754_v34, %v4374_v43 }
 0x245   : > { %v8059_v45 = vpop.f32.mrf.mxu1  ;;  %v8107_v1 = vpop.f32.mrf.mxu0 }
 0x246   : > { %v4381_v40 = vadd.f32 %v8059_v45, %v9743_v28  ;;  %v9839_v62 = vadd.f32 %v8107_v1, %v4377_v56 }
 0x247   : > { %v4238_v55 = vpop.f32.mrf.mxu1  ;;  %v4757_v63 = vpop.f32.mrf.mxu0 }
 0x248   : > { %v4379_v39 = vadd.f32 %v4238_v55, %v9746_v54  ;;  %v9842_v31 = vadd.f32 %v4757_v63, %v4375_v23 }
 0x249   : > { %v8062_v6 = vpop.f32.mrf.mxu1  ;;  %v8110_v44 = vpop.f32.mrf.mxu0 }
 0x24a   : > { %v4384_v59 = vadd.f32 %v8062_v6, %v9749_v26  ;;  %v9845_v3 = vadd.f32 %v8110_v44, %v4380_v22 }
 0x24b   : > { %v4251_v48 = vpop.f32.mrf.mxu1  ;;  %v4770_v50 = vpop.f32.mrf.mxu0 }
 0x24c   : > { %v4382_v21 = vadd.f32 %v4251_v48, %v9752_v10  ;;  %v9848_v18 = vadd.f32 %v4770_v50, %v4378_v42 }
 0x24d   : > { %v8063_v28 = vpop.f32.mrf.mxu1  ;;  %v8111_v16 = vpop.f32.mrf.mxu0 }
 0x24e   : > { %v4385_v58 = vadd.f32 %v8063_v28, %v9755_v24  ;;  %v9851_v47 = vadd.f32 %v8111_v16, %v4381_v40 }
 0x24f   : > { %v4254_v54 = vpop.f32.mrf.mxu1  ;;  %v4773_v43 = vpop.f32.mrf.mxu0 }
 0x250   : > { %v4383_v19 = vadd.f32 %v4254_v54, %v9758_v29  ;;  %v9854_v36 = vadd.f32 %v4773_v43, %v4379_v39 }
 0x251   : > { %v8066_v26 = vpop.f32.mrf.mxu1  ;;  %v8114_v56 = vpop.f32.mrf.mxu0 }
 0x252   : > { %v4388_v5 = vadd.f32 %v8066_v26, %v9761_v7  ;;  %v9857_v12 = vadd.f32 %v8114_v56, %v4384_v59 }
 0x253   : > { %v4267_v10 = vpop.f32.mrf.mxu1  ;;  %v4786_v23 = vpop.f32.mrf.mxu0 }
 0x254   : > { %v4386_v11 = vadd.f32 %v4267_v10, %v9764_v15  ;;  %v9860_v17 = vadd.f32 %v4786_v23, %v4382_v21 }
 0x255   : > { %v8067_v24 = vpop.f32.mrf.mxu1  ;;  %v8115_v22 = vpop.f32.mrf.mxu0 }
 0x256   : > { %v4389_v13 = vadd.f32 %v8067_v24, %v9767_v33  ;;  %v9863_v34 = vadd.f32 %v8115_v22, %v4385_v58 }
 0x257   : > { %v4270_v29 = vpop.f32.mrf.mxu1  ;;  %v4789_v42 = vpop.f32.mrf.mxu0 }
 0x258   : > { %v4387_v45 = vadd.f32 %v4270_v29, %v9770_v61  ;;  %v9866_v1 = vadd.f32 %v4789_v42, %v4383_v19 }
 0x259   : > { %v8070_v7 = vpop.f32.mrf.mxu1  ;;  %v8118_v40 = vpop.f32.mrf.mxu0 }
 0x25a   : > { %v4392_v55 = vadd.f32 %v8070_v7, %v9773_v41  ;;  %v9869_v63 = vadd.f32 %v8118_v40, %v4388_v5 }
 0x25b   : > { %v4283_v15 = vpop.f32.mrf.mxu1  ;;  %v4802_v39 = vpop.f32.mrf.mxu0 }
 0x25c   : > { %v4390_v6 = vadd.f32 %v4283_v15, %v9776_v30  ;;  %v9872_v44 = vadd.f32 %v4802_v39, %v4386_v11 }
 0x25d   : > { %v8071_v33 = vpop.f32.mrf.mxu1  ;;  %v8119_v59 = vpop.f32.mrf.mxu0 }
 0x25e   : > { %v4393_v48 = vadd.f32 %v8071_v33, %v9779_v9  ;;  %v9875_v50 = vadd.f32 %v8119_v59, %v4389_v13 }
 0x25f   : > { %v4286_v61 = vpop.f32.mrf.mxu1  ;;  %v4805_v21 = vpop.f32.mrf.mxu0 }
 0x260   : > { %v4391_v28 = vadd.f32 %v4286_v61, %v9782_v51  ;;  %v9878_v16 = vadd.f32 %v4805_v21, %v4387_v45 }
 0x261   : > { %v8074_v41 = vpop.f32.mrf.mxu1  ;;  %v8122_v58 = vpop.f32.mrf.mxu0 }
 0x262   : > { %v4396_v54 = vadd.f32 %v8074_v41, %v9785_v37  ;;  %v9881_v43 = vadd.f32 %v8122_v58, %v4392_v55 }
 0x263   : > { %v4299_v30 = vpop.f32.mrf.mxu1  ;;  %v4818_v19 = vpop.f32.mrf.mxu0 }
 0x264   : > { %v4394_v26 = vadd.f32 %v4299_v30, %v9788_v8  ;;  %v9884_v56 = vadd.f32 %v4818_v19, %v4390_v6 }
 0x265   : > { %v8075_v9 = vpop.f32.mrf.mxu1  ;;  %v8123_v5 = vpop.f32.mrf.mxu0 }
 0x266   : > { %v4397_v10 = vadd.f32 %v8075_v9, %v9791_v52  ;;  %v9887_v23 = vadd.f32 %v8123_v5, %v4393_v48 }
 0x267   : > { %v4302_v51 = vpop.f32.mrf.mxu1  ;;  %v4821_v11 = vpop.f32.mrf.mxu0 }
 0x268   : > { %v4395_v24 = vadd.f32 %v4302_v51, %v9794_v32  ;;  %v9890_v22 = vadd.f32 %v4821_v11, %v4391_v28 }
 0x269   : > { %v8078_v37 = vpop.f32.mrf.mxu1  ;;  %v8126_v13 = vpop.f32.mrf.mxu0 }
 0x26a   : > { %v4400_v29 = vadd.f32 %v8078_v37, %v9796_v53  ;;  %v9893_v42 = vadd.f32 %v8126_v13, %v4396_v54  ;;  %v10455_v37 = vld [vmem:[#allocation7_spill] sm:$0xff] }
 0x26b   : > { %v4315_v8 = vpop.f32.mrf.mxu1  ;;  %v4834_v45 = vpop.f32.mrf.mxu0 }
 0x26c   : > { %v4398_v7 = vadd.f32 %v4315_v8, %v9799_v14  ;;  %v9896_v40 = vadd.f32 %v4834_v45, %v4394_v26  ;;  %v10456_v45 = vld [vmem:[#allocation5_spill] sm:$0xff] }
 0x26d   : > { %v8079_v52 = vpop.f32.mrf.mxu1  ;;  %v8127_v55 = vpop.f32.mrf.mxu0 }
 0x26e   : > { %v4401_v15 = vadd.f32 %v8079_v52, %v9802_v4  ;;  %v9899_v32 = vadd.f32 %v8127_v55, %v4397_v10 }
 0x26f   : > { %v4318_v39 = vpop.f32.mrf.mxu1  ;;  %v4837_v6 = vpop.f32.mrf.mxu0 }
 0x270   : > { %v4399_v33 = vadd.f32 %v4318_v39, %v9805_v27  ;;  %v9902_v53 = vadd.f32 %v4837_v6, %v4395_v24  ;;  %v10457_v39 = vld [vmem:[#allocation6_spill] sm:$0xff] }
 0x271   : > { %v8130_v59 = vpop.f32.mrf.mxu0  ;;  %v8150_v48 = vpop.f32.mrf.mxu1 }
 0x272   : > { %v9904_v61 = vadd.f32 %v8130_v59, %v4400_v29  ;;  %v5572_v19 = vadd.f32 %v8150_v48, %v9809_v20 }
 0x273   : > { %v4850_v14 = vpop.f32.mrf.mxu0  ;;  %v5391_v21 = vpop.f32.mrf.mxu1 }
 0x274   : > { %v9906_v28 = vadd.f32 %v4850_v14, %v4398_v7  ;;  %v5570_v5 = vadd.f32 %v5391_v21, %v9812_v2  ;;  %v10458_v14 = vld [vmem:[#allocation4_spill] sm:$0xff] }
 0x275   : > { %v8131_v41 = vpop.f32.mrf.mxu0  ;;  %v8151_v58 = vpop.f32.mrf.mxu1 }
 0x276   : > { %v9908_v54 = vadd.f32 %v8131_v41, %v4401_v15  ;;  %v5573_v24 = vadd.f32 %v8151_v58, %v9815_v25 }
 0x277   : > { %v4853_v4 = vpop.f32.mrf.mxu0  ;;  %v5394_v30 = vpop.f32.mrf.mxu1 }
 0x278   : > { %v9912_v27 = vadd.f32 %v4853_v4, %v4399_v33  ;;  %v5571_v2 = vadd.f32 %v5394_v30, %v9818_v35 }
 0x279   : > { %v8154_v26 = vpop.f32.mrf.mxu1  ;;  %v8202_v9 = vpop.f32.mrf.mxu0 }
 0x27a   : > { %v6108_v10 = vadd.f32 %v8202_v9, %v5572_v19  ;;  %v5576_v25 = vadd.f32 %v8154_v26, %v9821_v38  ;;  %v10459_v19 = vld [vmem:[#allocation11_spill] sm:$0xff] }
 0x27b   : > { %v5407_v51 = vpop.f32.mrf.mxu1  ;;  %v5927_v11 = vpop.f32.mrf.mxu0 }
 0x27c   : > { %v9922_v20 = vmul.f32 %v10455_v37, %v6108_v10  ;;  %v6106_v13 = vadd.f32 %v5927_v11, %v5570_v5  ;;  %v5574_v35 = vadd.f32 %v5407_v51, %v9824_v46 }
 0x27d   : > { %v8155_v29 = vpop.f32.mrf.mxu1  ;;  %v8203_v8 = vpop.f32.mrf.mxu0 }
 0x27e   : > { %6661 = vst [vmem:[%s9918_s19 + $0x23] sm:$0xff] %v9922_v20  ;;  %v9928_v7 = vmul.f32 %v10456_v45, %v6106_v13  ;;  %v6109_v52 = vadd.f32 %v8203_v8, %v5573_v24  ;;  %v5577_v38 = vadd.f32 %v8155_v29, %v9827_v0  ;;  %v10460_v0 = vld [vmem:[#allocation9_spill] sm:$0xff] }
 0x27f   : > { %v5410_v55 = vpop.f32.mrf.mxu1  ;;  %v5930_v15 = vpop.f32.mrf.mxu0 }
 0x280   : > { %6659 = vst [vmem:[%s9918_s19 + $0x13] sm:$0xff] %v9928_v7  ;;  %v9934_v6 = vmul.f32 %v10457_v39, %v6109_v52  ;;  %v6107_v33 = vadd.f32 %v5930_v15, %v5571_v2  ;;  %v5575_v10 = vadd.f32 %v5410_v55, %v9830_v57  ;;  %v10461_v52 = vld [vmem:[#allocation10_spill] sm:$0xff] }
 0x281   : > { %v8158_v59 = vpop.f32.mrf.mxu1  ;;  %v8206_v48 = vpop.f32.mrf.mxu0 }
 0x282   : > { %6662 = vst [vmem:[%s9918_s19 + $0x2b] sm:$0xff] %v9934_v6  ;;  %v9940_v21 = vmul.f32 %v10458_v14, %v6107_v33  ;;  %v6112_v41 = vadd.f32 %v8206_v48, %v5576_v25  ;;  %v5580_v8 = vadd.f32 %v8158_v59, %v9833_v60 }
 0x283   : > { %v5423_v58 = vpop.f32.mrf.mxu1  ;;  %v5943_v4 = vpop.f32.mrf.mxu0 }
 0x284   : > { %v6466_v30 = vadd.f32 %v9940_v21, %v9928_v7  ;;  %6660 = vst [vmem:[%s9918_s19 + $0x1b] sm:$0xff] %v9940_v21  ;;  %v9948_v26 = vmul.f32 %v10459_v19, %v6112_v41  ;;  %v6110_v46 = vadd.f32 %v5943_v4, %v5574_v35  ;;  %v5578_v33 = vadd.f32 %v5423_v58, %v9836_v49  ;;  %v10462_v35 = vld [vmem:[#allocation8_spill] sm:$0xff] }
 0x285   : > { %v8159_v9 = vpop.f32.mrf.mxu1  ;;  %v8207_v5 = vpop.f32.mrf.mxu0 }
 0x286   : > { %v6467_v51 = vadd.f32 %v6466_v30, %v9922_v20  ;;  %6665 = vst [vmem:[%s9918_s19 + $0x43] sm:$0xff] %v9948_v26  ;;  %v9955_v11 = vmul.f32 %v10460_v0, %v6110_v46  ;;  %v6113_v24 = vadd.f32 %v8207_v5, %v5577_v38  ;;  %v5581_v38 = vadd.f32 %v8159_v9, %v9839_v62  ;;  %v10463_v46 = vld [vmem:[#allocation15_spill] sm:$0xff] }
 0x287   : > { %v5426_v13 = vpop.f32.mrf.mxu1  ;;  %v5946_v29 = vpop.f32.mrf.mxu0 }
 0x288   : > { %v6468_v2 = vadd.f32 %v6467_v51, %v9934_v6  ;;  %6663 = vst [vmem:[%s9918_s19 + $0x33] sm:$0xff] %v9955_v11  ;;  %v9962_v57 = vmul.f32 %v10461_v52, %v6113_v24  ;;  %v6111_v55 = vadd.f32 %v5946_v29, %v5575_v10  ;;  %v5579_v51 = vadd.f32 %v5426_v13, %v9842_v31  ;;  %v10464_v29 = vld [vmem:[#allocation13_spill] sm:$0xff] }
 0x289   : > { %v8162_v15 = vpop.f32.mrf.mxu1  ;;  %v8210_v25 = vpop.f32.mrf.mxu0 }
 0x28a   : > { %v6469_v48 = vadd.f32 %v6468_v2, %v9955_v11  ;;  %6666 = vst [vmem:[%s9918_s19 + $0x4b] sm:$0xff] %v9962_v57  ;;  %v9969_v60 = vmul.f32 %v10462_v35, %v6111_v55  ;;  %v6116_v59 = vadd.f32 %v8210_v25, %v5580_v8  ;;  %v5584_v55 = vadd.f32 %v8162_v15, %v9845_v3 }
 0x28b   : > { %v5439_v41 = vpop.f32.mrf.mxu1  ;;  %v5959_v4 = vpop.f32.mrf.mxu0 }
 0x28c   : > { %v6470_v30 = vadd.f32 %v6469_v48, %v9969_v60  ;;  %6664 = vst [vmem:[%s9918_s19 + $0x3b] sm:$0xff] %v9969_v60  ;;  %v9976_v49 = vmul.f32 %v10463_v46, %v6116_v59  ;;  %v6114_v58 = vadd.f32 %v5959_v4, %v5578_v33  ;;  %v10465_v33 = vld [vmem:[#allocation14_spill] sm:$0xff]  ;;  %v5582_v4 = vadd.f32 %v5439_v41, %v9848_v18 }
 0x28d   : > { %v8163_v5 = vpop.f32.mrf.mxu1  ;;  %v8211_v10 = vpop.f32.mrf.mxu0 }
 0x28e   : > { %v6471_v24 = vadd.f32 %v6470_v30, %v9948_v26  ;;  %6669 = vst [vmem:[%s9918_s19 + $0x63] sm:$0xff] %v9976_v49  ;;  %v9983_v62 = vmul.f32 %v10464_v29, %v6114_v58  ;;  %v6117_v9 = vadd.f32 %v8211_v10, %v5581_v38  ;;  %v10466_v30 = vld [vmem:[#allocation12_spill] sm:$0xff] }
 0x28f   : > { %v5442_v8 = vpop.f32.mrf.mxu1  ;;  %v5962_v2 = vpop.f32.mrf.mxu0 }
 0x290   : > { %v6472_v25 = vadd.f32 %v6471_v24, %v9962_v57  ;;  %6667 = vst [vmem:[%s9918_s19 + $0x53] sm:$0xff] %v9983_v62  ;;  %v9990_v31 = vmul.f32 %v10465_v33, %v6117_v9  ;;  %v6115_v13 = vadd.f32 %v5962_v2, %v5579_v51  ;;  %v5585_v24 = vadd.f32 %v8163_v5, %v9851_v47  ;;  %v10467_v9 = vld [vmem:[#allocation19_spill] sm:$0xff] }
 0x291   : > { %v8166_v48 = vpop.f32.mrf.mxu1  ;;  %v8214_v59 = vpop.f32.mrf.mxu0  ;;  %v5583_v33 = vadd.f32 %v5442_v8, %v9854_v36 }
 0x292   : > { %v6473_v38 = vadd.f32 %v6472_v25, %v9983_v62  ;;  %6670 = vst [vmem:[%s9918_s19 + $0x6b] sm:$0xff] %v9990_v31  ;;  %v9997_v3 = vmul.f32 %v10466_v30, %v6115_v13  ;;  %v6120_v15 = vadd.f32 %v8214_v59, %v5584_v55  ;;  %v10468_v13 = vld [vmem:[#allocation17_spill] sm:$0xff]  ;;  %v5588_v46 = vadd.f32 %v8166_v48, %v9857_v12 }
 0x293   : > { %v5455_v58 = vpop.f32.mrf.mxu1  ;;  %v5975_v10 = vpop.f32.mrf.mxu0 }
 0x294   : > { %v6474_v51 = vadd.f32 %v6473_v38, %v9997_v3  ;;  %6668 = vst [vmem:[%s9918_s19 + $0x5b] sm:$0xff] %v9997_v3  ;;  %v10004_v18 = vmul.f32 %v10467_v9, %v6120_v15  ;;  %v6118_v41 = vadd.f32 %v5975_v10, %v5582_v4  ;;  %v10469_v15 = vld [vmem:[#allocation18_spill] sm:$0xff]  ;;  %v5586_v9 = vadd.f32 %v5455_v58, %v9860_v17 }
 0x295   : > { %v8167_v2 = vpop.f32.mrf.mxu1  ;;  %v8215_v25 = vpop.f32.mrf.mxu0 }
 0x296   : > { %v6475_v55 = vadd.f32 %v6474_v51, %v9976_v49  ;;  %6673 = vst [vmem:[%s9918_s19 + $0x83] sm:$0xff] %v10004_v18  ;;  %v10011_v47 = vmul.f32 %v10468_v13, %v6118_v41  ;;  %v6121_v5 = vadd.f32 %v8215_v25, %v5585_v24  ;;  %v10470_v41 = vld [vmem:[#allocation16_spill] sm:$0xff]  ;;  %v5589_v13 = vadd.f32 %v8167_v2, %v9863_v34 }
 0x297   : > { %v5458_v59 = vpop.f32.mrf.mxu1  ;;  %v5978_v38 = vpop.f32.mrf.mxu0 }
 0x298   : > { %v6476_v4 = vadd.f32 %v6475_v55, %v9990_v31  ;;  %6671 = vst [vmem:[%s9918_s19 + $0x73] sm:$0xff] %v10011_v47  ;;  %v10018_v36 = vmul.f32 %v10469_v15, %v6121_v5  ;;  %v6119_v8 = vadd.f32 %v5978_v38, %v5583_v33  ;;  %v10471_v5 = vld [vmem:[#allocation23_spill] sm:$0xff]  ;;  %v5587_v15 = vadd.f32 %v5458_v59, %v9866_v1 }
 0x299   : > { %v8170_v10 = vpop.f32.mrf.mxu1  ;;  %v8218_v51 = vpop.f32.mrf.mxu0 }
 0x29a   : > { %v6477_v24 = vadd.f32 %v6476_v4, %v10011_v47  ;;  %6674 = vst [vmem:[%s9918_s19 + $0x8b] sm:$0xff] %v10018_v36  ;;  %v10025_v12 = vmul.f32 %v10470_v41, %v6119_v8  ;;  %v6124_v48 = vadd.f32 %v8218_v51, %v5588_v46  ;;  %v10472_v8 = vld [vmem:[#allocation21_spill] sm:$0xff]  ;;  %v5592_v41 = vadd.f32 %v8170_v10, %v9869_v63 }
 0x29b   : > { %v5471_v25 = vpop.f32.mrf.mxu1  ;;  %v5991_v55 = vpop.f32.mrf.mxu0 }
 0x29c   : > { %v6478_v33 = vadd.f32 %v6477_v24, %v10025_v12  ;;  %6672 = vst [vmem:[%s9918_s19 + $0x7b] sm:$0xff] %v10025_v12  ;;  %v10032_v17 = vmul.f32 %v10471_v5, %v6124_v48  ;;  %v6122_v58 = vadd.f32 %v5991_v55, %v5586_v9  ;;  %v10473_v48 = vld [vmem:[#allocation22_spill] sm:$0xff]  ;;  %v5590_v5 = vadd.f32 %v5471_v25, %v9872_v44 }
 0x29d   : > { %v8171_v38 = vpop.f32.mrf.mxu1  ;;  %v8219_v4 = vpop.f32.mrf.mxu0 }
 0x29e   : > { %v6479_v46 = vadd.f32 %v6478_v33, %v10004_v18  ;;  %6677 = vst [vmem:[%s9918_s19 + $0xa3] sm:$0xff] %v10032_v17  ;;  %v10039_v34 = vmul.f32 %v10472_v8, %v6122_v58  ;;  %v6125_v2 = vadd.f32 %v8219_v4, %v5589_v13  ;;  %v10474_v58 = vld [vmem:[#allocation20_spill] sm:$0xff]  ;;  %v5593_v8 = vadd.f32 %v8171_v38, %v9875_v50 }
 0x29f   : > { %v5474_v51 = vpop.f32.mrf.mxu1  ;;  %v5994_v24 = vpop.f32.mrf.mxu0 }
 0x2a0   : > { %v6480_v9 = vadd.f32 %v6479_v46, %v10018_v36  ;;  %6675 = vst [vmem:[%s9918_s19 + $0x93] sm:$0xff] %v10039_v34  ;;  %v10046_v1 = vmul.f32 %v10473_v48, %v6125_v2  ;;  %v6123_v59 = vadd.f32 %v5994_v24, %v5587_v15  ;;  %v10475_v2 = vld [vmem:[#allocation27_spill] sm:$0xff]  ;;  %v5591_v48 = vadd.f32 %v5474_v51, %v9878_v16 }
 0x2a1   : > { %v8174_v55 = vpop.f32.mrf.mxu1  ;;  %v8222_v33 = vpop.f32.mrf.mxu0 }
 0x2a2   : > { %v6481_v13 = vadd.f32 %v6480_v9, %v10039_v34  ;;  %6678 = vst [vmem:[%s9918_s19 + $0xab] sm:$0xff] %v10046_v1  ;;  %v10053_v63 = vmul.f32 %v10474_v58, %v6123_v59  ;;  %v6128_v10 = vadd.f32 %v8222_v33, %v5592_v41  ;;  %v10476_v59 = vld [vmem:[#allocation25_spill] sm:$0xff]  ;;  %v5596_v58 = vadd.f32 %v8174_v55, %v9881_v43 }
 0x2a3   : > { %v5487_v4 = vpop.f32.mrf.mxu1  ;;  %v6007_v46 = vpop.f32.mrf.mxu0 }
 0x2a4   : > { %v6482_v15 = vadd.f32 %v6481_v13, %v10053_v63  ;;  %6676 = vst [vmem:[%s9918_s19 + $0x9b] sm:$0xff] %v10053_v63  ;;  %v10060_v44 = vmul.f32 %v10475_v2, %v6128_v10  ;;  %v6126_v25 = vadd.f32 %v6007_v46, %v5590_v5  ;;  %v10477_v10 = vld [vmem:[#allocation26_spill] sm:$0xff]  ;;  %v5594_v2 = vadd.f32 %v5487_v4, %v9884_v56 }
 0x2a5   : > { %v8175_v24 = vpop.f32.mrf.mxu1  ;;  %v8223_v9 = vpop.f32.mrf.mxu0 }
 0x2a6   : > { %v6483_v41 = vadd.f32 %v6482_v15, %v10032_v17  ;;  %6681 = vst [vmem:[%s9918_s19 + $0xc3] sm:$0xff] %v10060_v44  ;;  %v10067_v50 = vmul.f32 %v10476_v59, %v6126_v25  ;;  %v6129_v38 = vadd.f32 %v8223_v9, %v5593_v8  ;;  %v10478_v25 = vld [vmem:[#allocation24_spill] sm:$0xff]  ;;  %v5597_v59 = vadd.f32 %v8175_v24, %v9887_v23 }
 0x2a7   : > { %v5490_v33 = vpop.f32.mrf.mxu1  ;;  %v6010_v13 = vpop.f32.mrf.mxu0 }
 0x2a8   : > { %v6484_v5 = vadd.f32 %v6483_v41, %v10046_v1  ;;  %6679 = vst [vmem:[%s9918_s19 + $0xb3] sm:$0xff] %v10067_v50  ;;  %v10074_v16 = vmul.f32 %v10477_v10, %v6129_v38  ;;  %v6127_v51 = vadd.f32 %v6010_v13, %v5591_v48  ;;  %v10479_v38 = vld [vmem:[#allocation31_spill] sm:$0xff]  ;;  %v5595_v10 = vadd.f32 %v5490_v33, %v9890_v22 }
 0x2a9   : > { %v8178_v46 = vpop.f32.mrf.mxu1  ;;  %v8226_v15 = vpop.f32.mrf.mxu0 }
 0x2aa   : > { %v6485_v8 = vadd.f32 %v6484_v5, %v10067_v50  ;;  %6682 = vst [vmem:[%s9918_s19 + $0xcb] sm:$0xff] %v10074_v16  ;;  %v10081_v43 = vmul.f32 %v10478_v25, %v6127_v51  ;;  %v6132_v55 = vadd.f32 %v8226_v15, %v5596_v58  ;;  %v10480_v51 = vld [vmem:[#allocation29_spill] sm:$0xff]  ;;  %v5600_v25 = vadd.f32 %v8178_v46, %v9893_v42 }
 0x2ab   : > { %v5503_v9 = vpop.f32.mrf.mxu1  ;;  %v6023_v41 = vpop.f32.mrf.mxu0 }
 0x2ac   : > { %v6486_v48 = vadd.f32 %v6485_v8, %v10081_v43  ;;  %6680 = vst [vmem:[%s9918_s19 + $0xbb] sm:$0xff] %v10081_v43  ;;  %v10088_v56 = vmul.f32 %v10479_v38, %v6132_v55  ;;  %v6130_v4 = vadd.f32 %v6023_v41, %v5594_v2  ;;  %v10481_v55 = vld [vmem:[#allocation30_spill] sm:$0xff] }
 0x2ad   : > { %v8179_v13 = vpop.f32.mrf.mxu1  ;;  %v8227_v5 = vpop.f32.mrf.mxu0 }
 0x2ae   : > { %v6487_v58 = vadd.f32 %v6486_v48, %v10060_v44  ;;  %6685 = vst [vmem:[%s9918_s19 + $0xe3] sm:$0xff] %v10088_v56  ;;  %v10095_v23 = vmul.f32 %v10480_v51, %v6130_v4  ;;  %v6133_v24 = vadd.f32 %v8227_v5, %v5597_v59  ;;  %v5598_v4 = vadd.f32 %v5503_v9, %v9896_v40  ;;  %v10482_v5 = vld [vmem:[#allocation28_spill] sm:$0xff] }
 0x2af   : > { %v5506_v15 = vpop.f32.mrf.mxu1  ;;  %v6026_v8 = vpop.f32.mrf.mxu0 }
 0x2b0   : > { %v6488_v2 = vadd.f32 %v6487_v58, %v10074_v16  ;;  %6683 = vst [vmem:[%s9918_s19 + $0xd3] sm:$0xff] %v10095_v23  ;;  %v10102_v22 = vmul.f32 %v10481_v55, %v6133_v24  ;;  %v6131_v33 = vadd.f32 %v6026_v8, %v5595_v10  ;;  %v5601_v24 = vadd.f32 %v8179_v13, %v9899_v32  ;;  %v10483_v8 = vld [vmem:[#allocation35_spill] sm:$0xff] }
 0x2b1   : > { %v8182_v41 = vpop.f32.mrf.mxu1  ;;  %v8230_v48 = vpop.f32.mrf.mxu0 }
 0x2b2   : > { %v6489_v59 = vadd.f32 %v6488_v2, %v10095_v23  ;;  %6686 = vst [vmem:[%s9918_s19 + $0xeb] sm:$0xff] %v10102_v22  ;;  %v10109_v42 = vmul.f32 %v10482_v5, %v6131_v33  ;;  %v6136_v46 = vadd.f32 %v8230_v48, %v5600_v25  ;;  %v5599_v2 = vadd.f32 %v5506_v15, %v9902_v53  ;;  %v10484_v25 = vld [vmem:[#allocation33_spill] sm:$0xff] }
 0x2b3   : > { %v5519_v58 = vpop.f32.mrf.mxu1  ;;  %v6039_v38 = vpop.f32.mrf.mxu0  ;;  %v5604_v5 = vadd.f32 %v8182_v41, %v9904_v61 }
 0x2b4   : > { %v6490_v10 = vadd.f32 %v6489_v59, %v10109_v42  ;;  %6684 = vst [vmem:[%s9918_s19 + $0xdb] sm:$0xff] %v10109_v42  ;;  %v10116_v55 = vmul.f32 %v10483_v8, %v6136_v46  ;;  %v6134_v40 = vadd.f32 %v6039_v38, %v5598_v4  ;;  %v10485_v38 = vld [vmem:[#allocation34_spill] sm:$0xff] }
 0x2b5   : > { %v8231_v9 = vpop.f32.mrf.mxu0  ;;  %v8183_v13 = vpop.f32.mrf.mxu1 }
 0x2b6   : > { %v6491_v33 = vadd.f32 %v6490_v10, %v10088_v56  ;;  %6689 = vst [vmem:[%s9918_s19 + $0x103] sm:$0xff] %v10116_v55  ;;  %v10123_v48 = vmul.f32 %v10484_v25, %v6134_v40  ;;  %v6137_v32 = vadd.f32 %v8231_v9, %v5601_v24  ;;  %v5602_v10 = vadd.f32 %v5519_v58, %v9906_v28  ;;  %v10486_v24 = vld [vmem:[#allocation32_spill] sm:$0xff] }
 0x2b7   : > { %v6042_v59 = vpop.f32.mrf.mxu0  ;;  %v5522_v41 = vpop.f32.mrf.mxu1  ;;  %v5605_v8 = vadd.f32 %v8183_v13, %v9908_v54 }
 0x2b8   : > { %v6492_v46 = vadd.f32 %v6491_v33, %v10102_v22  ;;  %6687 = vst [vmem:[%s9918_s19 + $0xf3] sm:$0xff] %v10123_v48  ;;  %v10130_v4 = vmul.f32 %v10485_v38, %v6137_v32  ;;  %v6135_v53 = vadd.f32 %v6042_v59, %v5599_v2  ;;  %v10487_v2 = vld [vmem:[#allocation39_spill] sm:$0xff] }
 0x2b9   : > { %v8234_v15 = vpop.f32.mrf.mxu0 }
 0x2ba   : > { %v6493_v40 = vadd.f32 %v6492_v46, %v10123_v48  ;;  %6690 = vst [vmem:[%s9918_s19 + $0x10b] sm:$0xff] %v10130_v4  ;;  %v10137_v9 = vmul.f32 %v10486_v24, %v6135_v53  ;;  %v6140_v61 = vadd.f32 %v8234_v15, %v5604_v5  ;;  %v5603_v46 = vadd.f32 %v5522_v41, %v9912_v27  ;;  %v10488_v53 = vld [vmem:[#allocation37_spill] sm:$0xff]  ;;  %v10489_v27 = vld [vmem:[#allocation38_spill] sm:$0xff] }
 0x2bb   : > { %v6055_v33 = vpop.f32.mrf.mxu0 }
 0x2bc   : > { %v6494_v32 = vadd.f32 %v6493_v40, %v10137_v9  ;;  %6688 = vst [vmem:[%s9918_s19 + $0xfb] sm:$0xff] %v10137_v9  ;;  %v10144_v28 = vmul.f32 %v10487_v2, %v6140_v61  ;;  %v6138_v58 = vadd.f32 %v6055_v33, %v5602_v10 }
 0x2bd   : > { %v8235_v59 = vpop.f32.mrf.mxu0 }
 0x2be   : > { %v6495_v5 = vadd.f32 %v6494_v32, %v10116_v55  ;;  %6693 = vst [vmem:[%s9918_s19 + $0x123] sm:$0xff] %v10144_v28  ;;  %v10151_v54 = vmul.f32 %v10488_v53, %v6138_v58  ;;  %v6141_v13 = vadd.f32 %v8235_v59, %v5605_v8  ;;  %v10491_v8 = vld [vmem:[#allocation36_spill] sm:$0xff]  ;;  %v8520_v59 = vmov 0.0  }
 0x2bf   : > { %v6058_v15 = vpop.f32.mrf.mxu0  ;;  %6695 = vst [vmem:[%s9918_s19] sm:$0xff] %v8520_v59  ;;  %6696 = vst [vmem:[%s9918_s19 + $0x8] sm:$0xff] %v8520_v59 }
 0x2c0   : > { %v6496_v10 = vadd.f32 %v6495_v5, %v10130_v4  ;;  %6691 = vst [vmem:[%s9918_s19 + $0x113] sm:$0xff] %v10151_v54  ;;  %v10157_v40 = vmul.f32 %v10489_v27, %v6141_v13  ;;  %v6139_v61 = vadd.f32 %v6058_v15, %v5603_v46  ;;  %6697 = vst [vmem:[%s9918_s19 + $0x10] sm:$0x7] %v8520_v59 }
 0x2c1   : > { %6698 = vst [vmem:[%s9918_s19 + $0x133] sm:$0xff] %v8520_v59  ;;  %6699 = vst [vmem:[%s9918_s19 + $0x13b] sm:$0xff] %v8520_v59 }
 0x2c2   : > { %10490 = vst [vmem:[#allocation40_spill] sm:$0xff] %v10157_v40  ;;  %v6497_v41 = vadd.f32 %v6496_v10, %v10151_v54  ;;  %6694 = vst [vmem:[%s9918_s19 + $0x12b] sm:$0xff] %v10157_v40  ;;  %v10163_v33 = vmul.f32 %v10491_v8, %v6139_v61 }
 0x2c3   : > { %6700 = vst [vmem:[%s9918_s19 + $0x143] sm:$0xff] %v8520_v59  ;;  %6701 = vst [vmem:[%s9918_s19 + $0x14b] sm:$0xff] %v8520_v59 }
 0x2c4   : > { %v6498_v32 = vadd.f32 %v6497_v41, %v10163_v33  ;;  %6692 = vst [vmem:[%s9918_s19 + $0x11b] sm:$0xff] %v10163_v33  ;;  %6702 = vst [vmem:[%s9918_s19 + $0x153] sm:$0xff] %v8520_v59 }
 0x2c5   : > { %6703 = vst [vmem:[%s9918_s19 + $0x15b] sm:$0xff] %v8520_v59  ;;  %6704 = vst [vmem:[%s9918_s19 + $0x163] sm:$0xff] %v8520_v59 }
 0x2c6   : > { %v6499_v58 = vadd.f32 %v6498_v32, %v10144_v28  ;;  %6705 = vst [vmem:[%s9918_s19 + $0x16b] sm:$0xff] %v8520_v59  ;;  %6706 = vst [vmem:[%s9918_s19 + $0x173] sm:$0xff] %v8520_v59 }
 0x2c7   : > { %6707 = vst [vmem:[%s9918_s19 + $0x17b] sm:$0x1f] %v8520_v59 }
 0x2c8   : > { %v6500_v46 = vadd.f32 %v6499_v58, %v10157_v40 }
 0x2ca   : > { %v6501_v5 = vrot.slane %v6500_v46, 4 }
 0x2cc   : > { %v6502_v13 = vadd.f32 %v6501_v5, %v6500_v46 }
 0x2ce   : > { %v6503_v15 = vrot.slane %v6502_v13, 2 }
 0x2d0   : > { %v6504_v10 = vadd.f32 %v6503_v15, %v6502_v13 }
 0x2d2   : > { %v6505_v61 = vrot.slane %v6504_v10, 1 }
 0x2d4   : > { %v6506_v41 = vadd.f32 %v6505_v61, %v6504_v10 }
 0x2d6   : > { %6580 = vst [vmem:[%s10187_s25] sm:$0x1] %v6506_v41  ;;  %v10190_v32 = vmul.f32 0.00390625, %v6506_v41 }
 0x2d8   : > { %v6508_v61 = vsub.f32 %v9928_v7, %v10190_v32  ;;  %v6509_v41 = vsub.f32 %v9940_v21, %v10190_v32  ;;  %v6510_v46 = vsub.f32 %v9922_v20, %v10190_v32  ;;  %v6511_v13 = vsub.f32 %v9934_v6, %v10190_v32 }
 0x2d9   : > { %v6512_v15 = vsub.f32 %v9955_v11, %v10190_v32  ;;  %v6513_v21 = vsub.f32 %v9969_v60, %v10190_v32  ;;  %v6514_v20 = vsub.f32 %v9948_v26, %v10190_v32  ;;  %v6515_v6 = vsub.f32 %v9962_v57, %v10190_v32 }
 0x2da   : > { %v6544_v5 = vmul.f32 %v6508_v61, %v10456_v45  ;;  %v6545_v58 = vmul.f32 %v6509_v41, %v10458_v14  ;;  %v6546_v10 = vmul.f32 %v6510_v46, %v10455_v37  ;;  %v6547_v40 = vmul.f32 %v6511_v13, %v10457_v39 }
 0x2db   : > { %v6548_v45 = vmul.f32 %v6512_v15, %v10460_v0  ;;  %v6549_v11 = vmul.f32 %v6513_v21, %v10462_v35  ;;  %v6550_v60 = vmul.f32 %v6514_v20, %v10459_v19  ;;  %v6517_v26 = vsub.f32 %v9997_v3, %v10190_v32 }
 0x2dc   : > { %v6581_v59 = vmul.f32 %v6544_v5, %v6544_v5  ;;  %v6582_v7 = vmul.f32 %v6545_v58, %v6545_v58  ;;  %v6583_v14 = vmul.f32 %v6546_v10, %v6546_v10  ;;  %v6584_v37 = vmul.f32 %v6547_v40, %v6547_v40 }
 0x2dd   : > { %v6516_v58 = vsub.f32 %v9983_v62, %v10190_v32  ;;  %v6585_v39 = vmul.f32 %v6548_v45, %v6548_v45  ;;  %v6551_v0 = vmul.f32 %v6515_v6, %v10461_v52  ;;  %v6518_v57 = vsub.f32 %v9976_v49, %v10190_v32  ;;  %v10492_v52 = vld [vmem:[#allocation15_spill] sm:$0xff]  ;;  %v10493_v45 = vld [vmem:[#allocation14_spill] sm:$0xff]  ;;  %v10494_v6 = vld [vmem:[#allocation17_spill] sm:$0xff] }
 0x2de   : > { %v6617_v61 = vadd.f32 %v6582_v7, %v6581_v59  ;;  %v6586_v59 = vmul.f32 %v6549_v11, %v6549_v11  ;;  %v6587_v40 = vmul.f32 %v6550_v60, %v6550_v60  ;;  %v6519_v62 = vsub.f32 %v9990_v31, %v10190_v32 }
 0x2df   : > { %v6552_v35 = vmul.f32 %v6516_v58, %v10464_v29  ;;  %v6553_v19 = vmul.f32 %v6517_v26, %v10466_v30  ;;  %v6588_v10 = vmul.f32 %v6551_v0, %v6551_v0  ;;  %v6520_v3 = vsub.f32 %v10011_v47, %v10190_v32 }
 0x2e0   : > { %v6618_v46 = vadd.f32 %v6617_v61, %v6583_v14  ;;  %v6554_v7 = vmul.f32 %v6518_v57, %v10492_v52  ;;  %v6555_v49 = vmul.f32 %v6519_v62, %v10493_v45  ;;  %v6522_v61 = vsub.f32 %v10004_v18, %v10190_v32 }
 0x2e1   : > { %v6589_v21 = vmul.f32 %v6552_v35, %v6552_v35  ;;  %v6590_v14 = vmul.f32 %v6553_v19, %v6553_v19  ;;  %v6556_v31 = vmul.f32 %v6520_v3, %v10494_v6  ;;  %v10496_v47 = vsub.f32 %v10025_v12, %v10190_v32 }
 0x2e2   : > { %v6619_v5 = vadd.f32 %v6618_v46, %v6584_v37  ;;  %v6591_v11 = vmul.f32 %v6554_v7, %v6554_v7  ;;  %v6523_v37 = vsub.f32 %v10018_v36, %v10190_v32  ;;  %v10495_v46 = vld [vmem:[#allocation16_spill] sm:$0xff]  ;;  %v6592_v60 = vmul.f32 %v6555_v49, %v6555_v49  ;;  %v10503_v7 = vld [vmem:[#allocation23_spill] sm:$0xff] }
 0x2e3   : > { %v6557_v58 = vmul.f32 %v10496_v47, %v10495_v46  ;;  %v6593_v0 = vmul.f32 %v6556_v31, %v6556_v31  ;;  %v10502_v12 = vsub.f32 %v10053_v63, %v10190_v32  ;;  %v10507_v31 = vld [vmem:[#allocation25_spill] sm:$0xff]  ;;  %v10508_v63 = vsub.f32 %v10067_v50, %v10190_v32  ;;  %v10509_v46 = vld [vmem:[#allocation24_spill] sm:$0xff] }
 0x2e4   : > { %v6620_v13 = vadd.f32 %v6619_v5, %v6585_v39  ;;  %v10497_v5 = vld [vmem:[#allocation19_spill] sm:$0xff]  ;;  %v10514_v50 = vsub.f32 %v10074_v16, %v10190_v32  ;;  %v10519_v16 = vsub.f32 %v10088_v56, %v10190_v32  ;;  %v10523_v56 = vsub.f32 %v10137_v9, %v10190_v32 }
 0x2e5   : > { %v6558_v26 = vmul.f32 %v6522_v61, %v10497_v5  ;;  %v6594_v57 = vmul.f32 %v6557_v58, %v6557_v58 }
 0x2e6   : > { %v6621_v15 = vadd.f32 %v6620_v13, %v6586_v59  ;;  %v10498_v13 = vld [vmem:[#allocation18_spill] sm:$0xff] }
 0x2e7   : > { %v6559_v18 = vmul.f32 %v6523_v37, %v10498_v13  ;;  %v6595_v62 = vmul.f32 %v6558_v26, %v6558_v26 }
 0x2e8   : > { %v6622_v41 = vadd.f32 %v6621_v15, %v6587_v40  ;;  %v10499_v40 = vld [vmem:[#allocation21_spill] sm:$0xff]  ;;  %v10500_v15 = vsub.f32 %v10039_v34, %v10190_v32  ;;  %v10506_v34 = vsub.f32 %v10046_v1, %v10190_v32  ;;  %v10512_v1 = vsub.f32 %v10060_v44, %v10190_v32 }
 0x2e9   : > { %v6596_v3 = vmul.f32 %v6559_v18, %v6559_v18  ;;  %v10517_v44 = vsub.f32 %v10109_v42, %v10190_v32  ;;  %v10522_v42 = vsub.f32 %v10123_v48, %v10190_v32 }
 0x2ea   : > { %v6623_v20 = vadd.f32 %v6622_v41, %v6588_v10  ;;  %v6560_v36 = vmul.f32 %v10500_v15, %v10499_v40  ;;  %v10501_v10 = vld [vmem:[#allocation20_spill] sm:$0xff] }
 0x2eb   : > { %v6561_v41 = vmul.f32 %v10502_v12, %v10501_v10  ;;  %v10518_v12 = vld [vmem:[#allocation31_spill] sm:$0xff] }
 0x2ec   : > { %v6624_v29 = vadd.f32 %v6623_v20, %v6589_v21  ;;  %v10504_v21 = vsub.f32 %v10032_v17, %v10190_v32  ;;  %v6597_v45 = vmul.f32 %v6560_v36, %v6560_v36  ;;  %v10510_v17 = vsub.f32 %v10081_v43, %v10190_v32  ;;  %v10516_v36 = vld [vmem:[#allocation28_spill] sm:$0xff] }
 0x2ed   : > { %v6598_v61 = vmul.f32 %v6561_v41, %v6561_v41  ;;  %v10515_v43 = vsub.f32 %v10095_v23, %v10190_v32  ;;  %v6570_v41 = vmul.f32 %v10519_v16, %v10518_v12 }
 0x2ee   : > { %v6625_v30 = vadd.f32 %v6624_v29, %v6590_v14  ;;  %v6562_v20 = vmul.f32 %v10504_v21, %v10503_v7  ;;  %v10505_v14 = vld [vmem:[#allocation22_spill] sm:$0xff]  ;;  %v6565_v47 = vmul.f32 %v10510_v17, %v10509_v46 }
 0x2ef   : > { %v6563_v29 = vmul.f32 %v10506_v34, %v10505_v14  ;;  %v10520_v7 = vld [vmem:[#allocation30_spill] sm:$0xff]  ;;  %v6573_v34 = vmul.f32 %v10523_v56, %v10486_v24  ;;  %v10527_v24 = vsub.f32 %v10151_v54, %v10190_v32  ;;  %v10530_v54 = vld [vmem:[#allocation40_spill] sm:$0xff] }
 0x2f0   : > { %v6626_v39 = vadd.f32 %v6625_v30, %v6591_v11  ;;  %v6564_v11 = vmul.f32 %v10508_v63, %v10507_v31  ;;  %v6599_v30 = vmul.f32 %v6562_v20, %v6562_v20  ;;  %v6602_v18 = vmul.f32 %v6565_v47, %v6565_v47 }
 0x2f1   : > { %v6600_v58 = vmul.f32 %v6563_v29, %v6563_v29  ;;  %v6576_v9 = vmul.f32 %v10527_v24, %v10488_v53  ;;  %v10531_v53 = vsub.f32 %v10530_v54, %v10190_v32 }
 0x2f2   : > { %v6627_v59 = vadd.f32 %v6626_v39, %v6592_v60  ;;  %v10511_v39 = vld [vmem:[#allocation27_spill] sm:$0xff]  ;;  %v6601_v26 = vmul.f32 %v6564_v11, %v6564_v11 }
 0x2f3   : > { %v6566_v5 = vmul.f32 %v10512_v1, %v10511_v39  ;;  %v6613_v39 = vmul.f32 %v6576_v9, %v6576_v9 }
 0x2f4   : > { %v6628_v35 = vadd.f32 %v6627_v59, %v6593_v0  ;;  %v10513_v59 = vld [vmem:[#allocation26_spill] sm:$0xff] }
 0x2f5   : > { %v6567_v13 = vmul.f32 %v10514_v50, %v10513_v59  ;;  %v6603_v40 = vmul.f32 %v6566_v5, %v6566_v5  ;;  %v6579_v5 = vmul.f32 %v10531_v53, %v10489_v27 }
 0x2f6   : > { %v6629_v19 = vadd.f32 %v6628_v35, %v6594_v57  ;;  %v6568_v35 = vmul.f32 %v10515_v43, %v10480_v51  ;;  %v10521_v51 = vsub.f32 %v10102_v22, %v10190_v32  ;;  %v10525_v22 = vsub.f32 %v10116_v55, %v10190_v32 }
 0x2f7   : > { %v10528_v55 = vsub.f32 %v10163_v33, %v10190_v32 }
 0x2f8   : > { %v6630_v52 = vadd.f32 %v6629_v19, %v6595_v62  ;;  %v6569_v62 = vmul.f32 %v10517_v44, %v10516_v36  ;;  %v6604_v19 = vmul.f32 %v6567_v13, %v6567_v13  ;;  %v6571_v23 = vmul.f32 %v10521_v51, %v10520_v7 }
 0x2f9   : > { %v6577_v47 = vmul.f32 %v10528_v55, %v10491_v8  ;;  %v6616_v8 = vmul.f32 %v6579_v5, %v6579_v5 }
 0x2fa   : > { %v6631_v49 = vadd.f32 %v6630_v52, %v6596_v3  ;;  %v6605_v3 = vmul.f32 %v6568_v35, %v6568_v35  ;;  %v6606_v21 = vmul.f32 %v6569_v62, %v6569_v62  ;;  %v6608_v29 = vmul.f32 %v6571_v23, %v6571_v23 }
 0x2fc   : > { %v6632_v6 = vadd.f32 %v6631_v49, %v6597_v45  ;;  %v6572_v45 = vmul.f32 %v10522_v42, %v10484_v25  ;;  %v6607_v49 = vmul.f32 %v6570_v41, %v6570_v41  ;;  %v10526_v25 = vsub.f32 %v10130_v4, %v10190_v32 }
 0x2fe   : > { %v6633_v37 = vadd.f32 %v6632_v6, %v6598_v61  ;;  %v10524_v6 = vld [vmem:[#allocation35_spill] sm:$0xff]  ;;  %v6609_v63 = vmul.f32 %v6572_v45, %v6572_v45  ;;  %v6575_v48 = vmul.f32 %v10526_v25, %v10485_v38  ;;  %v10529_v38 = vsub.f32 %v10144_v28, %v10190_v32 }
 0x2ff   : > { %v6574_v31 = vmul.f32 %v10525_v22, %v10524_v6 }
 0x300   : > { %v6634_v60 = vadd.f32 %v6633_v37, %v6599_v30  ;;  %v6610_v30 = vmul.f32 %v6573_v34, %v6573_v34  ;;  %v6578_v4 = vmul.f32 %v10529_v38, %v10487_v2 }
 0x301   : > { %v6611_v46 = vmul.f32 %v6574_v31, %v6574_v31 }
 0x302   : > { %v6635_v0 = vadd.f32 %v6634_v60, %v6600_v58  ;;  %v6612_v58 = vmul.f32 %v6575_v48, %v6575_v48  ;;  %v6615_v59 = vmul.f32 %v6578_v4, %v6578_v4 }
 0x304   : > { %v6636_v57 = vadd.f32 %v6635_v0, %v6601_v26  ;;  %v6614_v26 = vmul.f32 %v6577_v47, %v6577_v47 }
 0x306   : > { %v6637_v15 = vadd.f32 %v6636_v57, %v6602_v18 }
 0x308   : > { %v6638_v10 = vadd.f32 %v6637_v15, %v6603_v40 }
 0x30a   : > { %v6639_v52 = vadd.f32 %v6638_v10, %v6604_v19 }
 0x30c   : > { %v6640_v20 = vadd.f32 %v6639_v52, %v6605_v3 }
 0x30e   : > { %v6641_v14 = vadd.f32 %v6640_v20, %v6606_v21 }
 0x310   : > { %v6642_v61 = vadd.f32 %v6641_v14, %v6607_v49 }
 0x312   : > { %v6643_v11 = vadd.f32 %v6642_v61, %v6608_v29 }
 0x314   : > { %v6644_v37 = vadd.f32 %v6643_v11, %v6609_v63 }
 0x316   : > { %v6645_v17 = vadd.f32 %v6644_v37, %v6610_v30 }
 0x318   : > { %v6646_v60 = vadd.f32 %v6645_v17, %v6611_v46 }
 0x31a   : > { %v6647_v1 = vadd.f32 %v6646_v60, %v6612_v58 }
 0x31c   : > { %v6648_v0 = vadd.f32 %v6647_v1, %v6613_v39 }
 0x31e   : > { %v6649_v33 = vadd.f32 %v6648_v0, %v6614_v26 }
 0x320   : > { %v6650_v50 = vadd.f32 %v6649_v33, %v6615_v59 }
 0x322   : > { %v6651_v13 = vadd.f32 %v6650_v50, %v6616_v8 }
 0x324   : > { %v6652_v18 = vrot.slane %v6651_v13, 4 }
 0x326   : > { %v6653_v57 = vadd.f32 %v6652_v18, %v6651_v13 }
 0x328   : > { %v6654_v43 = vrot.slane %v6653_v57, 2 }
 0x32a   : > { %v6655_v28 = vadd.f32 %v6654_v43, %v6653_v57 }
 0x32c   : > { %v6656_v2 = vrot.slane %v6655_v28, 1 }
 0x32e   : > { %v6657_v35 = vadd.f32 %v6656_v2, %v6655_v28 }
 0x330   : > { %6658 = vst [vmem:[%s10187_s25 + $0x1] sm:$0x1] %v6657_v35 }
 0x331 PF: > { %s17_s21 = sadd.s32 1, %s8517_s21  }
 0x332   : > { %p14_p4 = scmp.ge.s32.totalorder %s17_s21, 4  }
 0x334   :  { %16 = sbr.rel (!%p14_p4) target bundleno = 1 (0x1), region = 90 }

</bundles_post_ra>
